<compile_context>
chip_gen: v5e
topology: v5e:2x2
jax: 0.10.0
libtpu: 0.0.40
codegen_flags: <defaults>
</compile_context>

<pallas_src>
import functools
import jax
import jax.numpy as jnp
from jax.experimental import pallas as pl
from jax.experimental.pallas import tpu as pltpu

HIDDEN = 384                 # `dimension` in the PyTorch module
NUM_LAYERS = 12              # MiniLM-L12
NUM_HEADS = 12
HEAD_DIM = HIDDEN // NUM_HEADS
INTERMEDIATE = 1536
VOCAB = 64                   # synthetic small vocab
MAX_POS = 32
TYPE_VOCAB = 2
BERT_EPS = 1e-12             # BERT LayerNorm eps
HEAD_EPS = 1e-5              # nn.LayerNorm default eps (head layer_norm)


# ----------------------------- kernel helpers -----------------------------

def _layernorm(x, g, b, eps):
    """f32 LayerNorm over the last (lane) axis; g/b broadcast from (1, H)."""
    mu = jnp.mean(x, axis=-1, keepdims=True)
    var = jnp.mean(jnp.square(x - mu), axis=-1, keepdims=True)
    return (x - mu) * jax.lax.rsqrt(var + eps) * g + b


# -------------------------- fused encoder kernel --------------------------

def _encoder_layer_kernel(h0_ref, embg_ref, embb_ref, mask_ref,
                          wqkv_ref, bqkv_ref, wo_ref, bo_ref,
                          ln1g_ref, ln1b_ref, wi_ref, bi_ref,
                          wf_ref, bf_ref, ln2g_ref, ln2b_ref,
                          h_ref, ctx_sc):
    """One BERT layer per grid step; h_ref is VMEM-resident across the grid."""
    layer = pl.program_id(0)

    # Step 0: embeddings LayerNorm seeds the resident hidden state.
    @pl.when(layer == 0)
    def _():
        h_ref[...] = _layernorm(h0_ref[...].astype(jnp.float32),
                                embg_ref[...], embb_ref[...], BERT_EPS)

    h = h_ref[...]                                   # (M, H) f32
    hb = h.astype(jnp.bfloat16)

    # ---- fused QKV projection (bf16 x bf16 -> f32 accumulate) ----
    qkv = jnp.dot(hb, wqkv_ref[0],
                  preferred_element_type=jnp.float32) + bqkv_ref[0]
    q = qkv[:, :HIDDEN]
    k = qkv[:, HIDDEN:2 * HIDDEN]
    v = qkv[:, 2 * HIDDEN:]

    # ---- multi-head self-attention, heads split/merged in VMEM ----
    scale = HEAD_DIM ** -0.5
    mask = mask_ref[...]                             # (M, M) block-diag additive
    for hh in range(NUM_HEADS):
        lo = hh * HEAD_DIM
        qh = q[:, lo:lo + HEAD_DIM] * scale          # (M, Dh) f32
        kh = k[:, lo:lo + HEAD_DIM]
        vh = v[:, lo:lo + HEAD_DIM]
        s = jax.lax.dot_general(qh, kh, (((1,), (1,)), ((), ())),
                                preferred_element_type=jnp.float32)
        s = s + mask
        s = s - jnp.max(s, axis=-1, keepdims=True)
        p = jnp.exp(s)
        p = p * pl.reciprocal(jnp.sum(p, axis=-1, keepdims=True), approx=True)
        ctx_sc[:, lo:lo + HEAD_DIM] = jnp.dot(
            p, vh, preferred_element_type=jnp.float32)

    # ---- attention output projection + residual + LN ----
    ctx = ctx_sc[...].astype(jnp.bfloat16)           # (M, H), lane-dense
    attn = jnp.dot(ctx, wo_ref[0],
                   preferred_element_type=jnp.float32) + bo_ref[0]
    h1 = _layernorm(attn + h, ln1g_ref[0], ln1b_ref[0], BERT_EPS)

    # ---- feed-forward + residual + LN ----
    ff = jnp.dot(h1.astype(jnp.bfloat16), wi_ref[0],
                 preferred_element_type=jnp.float32) + bi_ref[0]
    # TODO(synk): HF BERT uses exact erf GELU; tanh approximation kept here for
    # guaranteed Mosaic lowering (weights are synthetic anyway).
    ff = jax.nn.gelu(ff, approximate=True)
    ff = jnp.dot(ff.astype(jnp.bfloat16), wf_ref[0],
                 preferred_element_type=jnp.float32) + bf_ref[0]
    h_ref[...] = _layernorm(ff + h1, ln2g_ref[0], ln2b_ref[0], BERT_EPS)


def encoder(params, h0, add_mask):
    M = h0.shape[0]
    H, F, L = HIDDEN, INTERMEDIATE, NUM_LAYERS

    def resident(shape):                 # same block every grid step
        return pl.BlockSpec(shape, lambda l: (0, 0))

    def per_layer(shape):                # streamed / double-buffered per layer
        return pl.BlockSpec(shape, lambda l: (l, 0, 0))

    grid_spec = pltpu.PrefetchScalarGridSpec(
        num_scalar_prefetch=0,
        grid=(L,),
        in_specs=[
            resident((M, H)),            # h0 (embedding sum)
            resident((1, H)),            # emb_ln_g
            resident((1, H)),            # emb_ln_b
            resident((M, M)),            # additive attention mask
            per_layer((1, H, 3 * H)),    # wqkv (bf16)
            per_layer((1, 1, 3 * H)),    # bqkv
            per_layer((1, H, H)),        # wo (bf16)
            per_layer((1, 1, H)),        # bo
            per_layer((1, 1, H)),        # ln1_g
            per_layer((1, 1, H)),        # ln1_b
            per_layer((1, H, F)),        # wi (bf16)
            per_layer((1, 1, F)),        # bi
            per_layer((1, F, H)),        # wf (bf16)
            per_layer((1, 1, H)),        # bf
            per_layer((1, 1, H)),        # ln2_g
            per_layer((1, 1, H)),        # ln2_b
        ],
        out_specs=pl.BlockSpec((M, H), lambda l: (0, 0)),   # VMEM-resident h
        scratch_shapes=[pltpu.VMEM((M, H), jnp.float32)],   # attention context
    )
    return pl.pallas_call(
        _encoder_layer_kernel,
        grid_spec=grid_spec,
        out_shape=jax.ShapeDtypeStruct((M, H), jnp.float32),
        compiler_params=pltpu.CompilerParams(
            dimension_semantics=("arbitrary",),      # sequential over layers
            vmem_limit_bytes=48 * 1024 * 1024),
    )(h0, params["emb_ln_g"], params["emb_ln_b"], add_mask,
      params["wqkv"], params["bqkv"], params["wo"], params["bo"],
      params["ln1_g"], params["ln1_b"], params["wi"], params["bi"],
      params["wf"], params["bf"], params["ln2_g"], params["ln2_b"])


# --------------------------- fused head kernel ----------------------------

def _head_kernel(cls_ref, pw_ref, pb_ref, lng_ref, lnb_ref,
                 lw_ref, lb_ref, rw_ref, rb_ref, o_ref):
    x = cls_ref[...].astype(jnp.float32)                     # (B, H)
    # BERT pooler: dense + tanh over the [CLS] token
    pooled = jnp.tanh(jnp.dot(x.astype(jnp.bfloat16), pw_ref[...],
                              preferred_element_type=jnp.float32) + pb_ref[...])
    # head: LayerNorm -> (Dropout=id) -> Linear -> ReLU -> (Dropout=id) -> Linear
    y = _layernorm(pooled, lng_ref[...], lnb_ref[...], HEAD_EPS)
    y = jnp.dot(y.astype(jnp.bfloat16), lw_ref[...],
                preferred_element_type=jnp.float32) + lb_ref[...]
    y = jnp.maximum(y, 0.0)
    out = jnp.sum(y * rw_ref[...], axis=-1, keepdims=True) + rb_ref[...]
    o_ref[...] = out.astype(o_ref.dtype)


def head(params, cls_tok):
    B = cls_tok.shape[0]
    return pl.pallas_call(
        _head_kernel,
        out_shape=jax.ShapeDtypeStruct((B, 1), jnp.float32),
    )(cls_tok, params["pool_w"], params["pool_b"],
      params["head_ln_g"], params["head_ln_b"],
      params["lin_w"], params["lin_b"],
      params["reg_w"], params["reg_b"])


# ------------------------------ parameters ------------------------------

def init_params(key):
    ks = jax.random.split(key, 12)
    L, H, F = NUM_LAYERS, HIDDEN, INTERMEDIATE

    def w(k, shape):
        return 0.02 * jax.random.normal(k, shape, jnp.float32)

    p = {
        "word_emb": w(ks[0], (VOCAB, H)),
        "pos_emb": w(ks[1], (MAX_POS, H)),
        "type_emb": w(ks[2], (TYPE_VOCAB, H)),
        "emb_ln_g": jnp.ones((1, H), jnp.float32),
        "emb_ln_b": jnp.zeros((1, H), jnp.float32),

        # stacked, bf16 encoder weights (fused QKV)
        "wqkv": w(ks[3], (L, H, 3 * H)).astype(jnp.bfloat16),
        "bqkv": jnp.zeros((L, 1, 3 * H), jnp.float32),
        "wo":   w(ks[4], (L, H, H)).astype(jnp.bfloat16),
        "bo":   jnp.zeros((L, 1, H), jnp.float32),
        "ln1_g": jnp.ones((L, 1, H), jnp.float32),
        "ln1_b": jnp.zeros((L, 1, H), jnp.float32),
        "wi":   w(ks[5], (L, H, F)).astype(jnp.bfloat16),
        "bi":   jnp.zeros((L, 1, F), jnp.float32),
        "wf":   w(ks[6], (L, F, H)).astype(jnp.bfloat16),
        "bf":   jnp.zeros((L, 1, H), jnp.float32),
        "ln2_g": jnp.ones((L, 1, H), jnp.float32),
        "ln2_b": jnp.zeros((L, 1, H), jnp.float32),

        # pooler + regression head
        "pool_w": w(ks[7], (H, H)).astype(jnp.bfloat16),
        "pool_b": jnp.zeros((1, H), jnp.float32),
        "head_ln_g": jnp.ones((1, H), jnp.float32),
        "head_ln_b": jnp.zeros((1, H), jnp.float32),
        "lin_w": w(ks[8], (H, H // 2)).astype(jnp.bfloat16),
        "lin_b": jnp.zeros((1, H // 2), jnp.float32),
        "reg_w": w(ks[9], (1, H // 2)),          # used elementwise (N=1 output)
        "reg_b": jnp.zeros((1, 1), jnp.float32),
    }
    return p


# ------------------------------- forward --------------------------------

def clit_forward(params, input_ids, attention_mask, token_type_ids):
    B, S = input_ids.shape
    M = B * S
    pos_ids = jnp.arange(S)

    # embedding gathers kept as JAX glue (tiny, not the hot path)
    emb = (jnp.take(params["word_emb"], input_ids, axis=0)
           + jnp.take(params["pos_emb"], pos_ids, axis=0)[None, :, :]
           + jnp.take(params["type_emb"], token_type_ids, axis=0))
    h0 = emb.reshape(M, HIDDEN).astype(jnp.float32)

    # block-diagonal additive mask over the flattened (B*S) token axis:
    # 0 where (same batch AND key token valid), else -10000 (== BERT convention;
    # cross-batch entries underflow to exactly 0 after softmax).
    valid = attention_mask.reshape(M).astype(jnp.float32)
    batch_of = jnp.arange(M) // S
    same_batch = batch_of[:, None] == batch_of[None, :]
    add_mask = jnp.where(same_batch & (valid[None, :] > 0.5),
                         0.0, -10000.0).astype(jnp.float32)

    h = encoder(params, h0, add_mask)                       # (M, H)

    # transformer_model(...)[1] == pooler output over [CLS]; pooler is fused
    # into the head kernel, so just pick the CLS rows here.
    cls_tok = h.reshape(B, S, HIDDEN)[:, 0, :]              # (B, H)
    return head(params, cls_tok)                            # (B, 1)


# --------------------------------- main ----------------------------------

if __name__ == "__main__":
    key = jax.random.PRNGKey(0)
    pkey, ikey = jax.random.split(key)
    params = init_params(pkey)

    B, S = 2, 8
    input_ids = jax.random.randint(ikey, (B, S), 0, VOCAB, dtype=jnp.int32)
    attention_mask = jnp.ones((B, S), jnp.int32).at[1, 6:].set(0)  # ragged mask
    token_type_ids = jnp.zeros((B, S), jnp.int32)

    fwd = jax.jit(functools.partial(clit_forward, params))
    out = jax.block_until_ready(fwd(input_ids, attention_mask, token_type_ids))
    assert out.shape == (B, 1) and out.dtype == jnp.float32
    print("KERNEL_OK")
</pallas_src>

<mosaic_0001>
module attributes {stable_mosaic.version = 11 : i64} {
  func.func @_head_kernel(%arg0: memref<2x384xf32, #tpu.memory_space<vmem>>, %arg1: memref<384x384xbf16, #tpu.memory_space<vmem>>, %arg2: memref<1x384xf32, #tpu.memory_space<vmem>>, %arg3: memref<1x384xf32, #tpu.memory_space<vmem>>, %arg4: memref<1x384xf32, #tpu.memory_space<vmem>>, %arg5: memref<384x192xbf16, #tpu.memory_space<vmem>>, %arg6: memref<1x192xf32, #tpu.memory_space<vmem>>, %arg7: memref<1x192xf32, #tpu.memory_space<vmem>>, %arg8: memref<1x1xf32, #tpu.memory_space<vmem>>, %arg9: memref<2x1xf32, #tpu.memory_space<vmem>>) attributes {dimension_semantics = [], scalar_prefetch = 0 : i64, scratch_operands = 0 : i64, tpu.core_type = #tpu.core_type<tc>} {
    %c0 = arith.constant 0 : index
    %c0_0 = arith.constant 0 : index
    %0 = vector.load %arg0[%c0, %c0_0] : memref<2x384xf32, #tpu.memory_space<vmem>>, vector<2x384xf32>
    %1 = arith.truncf %0 : vector<2x384xf32> to vector<2x384xbf16>
    %c0_1 = arith.constant 0 : index
    %c0_2 = arith.constant 0 : index
    %2 = vector.load %arg1[%c0_1, %c0_2] : memref<384x384xbf16, #tpu.memory_space<vmem>>, vector<384x384xbf16>
    %cst = arith.constant dense<0.000000e+00> : vector<2x384xf32>
    %3 = tpu.matmul %1, %2, %cst {dimension_numbers = #tpu.dot_dimension_numbers<[1], [0], [0], [1], [0, 0, 1, 1], [], []>} : vector<2x384xbf16>, vector<384x384xbf16>, vector<2x384xf32> -> vector<2x384xf32>
    %c0_3 = arith.constant 0 : index
    %c0_4 = arith.constant 0 : index
    %4 = vector.load %arg2[%c0_3, %c0_4] : memref<1x384xf32, #tpu.memory_space<vmem>>, vector<1x384xf32>
    %5 = vector.broadcast %4 : vector<1x384xf32> to vector<2x384xf32>
    %6 = arith.addf %3, %5 : vector<2x384xf32>
    %7 = math.tanh %6 : vector<2x384xf32>
    %c0_5 = arith.constant 0 : index
    %c0_6 = arith.constant 0 : index
    %8 = vector.load %arg3[%c0_5, %c0_6] : memref<1x384xf32, #tpu.memory_space<vmem>>, vector<1x384xf32>
    %c0_7 = arith.constant 0 : index
    %c0_8 = arith.constant 0 : index
    %9 = vector.load %arg4[%c0_7, %c0_8] : memref<1x384xf32, #tpu.memory_space<vmem>>, vector<1x384xf32>
    %cst_9 = arith.constant dense<0.000000e+00> : vector<2xf32>
    %10 = vector.multi_reduction <add>, %7, %cst_9 [1] : vector<2x384xf32> to vector<2xf32>
    %11 = vector.shape_cast %10 : vector<2xf32> to vector<2x1xf32>
    %cst_10 = arith.constant 3.840000e+02 : f32
    %12 = vector.broadcast %cst_10 : f32 to vector<2x1xf32>
    %13 = arith.divf %11, %12 : vector<2x1xf32>
    %14 = vector.broadcast %13 : vector<2x1xf32> to vector<2x384xf32>
    %15 = arith.subf %7, %14 : vector<2x384xf32>
    %16 = arith.mulf %15, %15 : vector<2x384xf32>
    %cst_11 = arith.constant dense<0.000000e+00> : vector<2xf32>
    %17 = vector.multi_reduction <add>, %16, %cst_11 [1] : vector<2x384xf32> to vector<2xf32>
    %18 = vector.shape_cast %17 : vector<2xf32> to vector<2x1xf32>
    %cst_12 = arith.constant 3.840000e+02 : f32
    %19 = vector.broadcast %cst_12 : f32 to vector<2x1xf32>
    %20 = arith.divf %18, %19 : vector<2x1xf32>
    %21 = vector.broadcast %13 : vector<2x1xf32> to vector<2x384xf32>
    %22 = arith.subf %7, %21 : vector<2x384xf32>
    %cst_13 = arith.constant 9.99999974E-6 : f32
    %23 = vector.broadcast %cst_13 : f32 to vector<2x1xf32>
    %24 = arith.addf %20, %23 : vector<2x1xf32>
    %25 = math.rsqrt %24 : vector<2x1xf32>
    %26 = vector.broadcast %25 : vector<2x1xf32> to vector<2x384xf32>
    %27 = arith.mulf %22, %26 : vector<2x384xf32>
    %28 = vector.broadcast %8 : vector<1x384xf32> to vector<2x384xf32>
    %29 = arith.mulf %27, %28 : vector<2x384xf32>
    %30 = vector.broadcast %9 : vector<1x384xf32> to vector<2x384xf32>
    %31 = arith.addf %29, %30 : vector<2x384xf32>
    %32 = arith.truncf %31 : vector<2x384xf32> to vector<2x384xbf16>
    %c0_14 = arith.constant 0 : index
    %c0_15 = arith.constant 0 : index
    %33 = vector.load %arg5[%c0_14, %c0_15] : memref<384x192xbf16, #tpu.memory_space<vmem>>, vector<384x192xbf16>
    %cst_16 = arith.constant dense<0.000000e+00> : vector<2x192xf32>
    %34 = tpu.matmul %32, %33, %cst_16 {dimension_numbers = #tpu.dot_dimension_numbers<[1], [0], [0], [1], [0, 0, 1, 1], [], []>} : vector<2x384xbf16>, vector<384x192xbf16>, vector<2x192xf32> -> vector<2x192xf32>
    %c0_17 = arith.constant 0 : index
    %c0_18 = arith.constant 0 : index
    %35 = vector.load %arg6[%c0_17, %c0_18] : memref<1x192xf32, #tpu.memory_space<vmem>>, vector<1x192xf32>
    %36 = vector.broadcast %35 : vector<1x192xf32> to vector<2x192xf32>
    %37 = arith.addf %34, %36 : vector<2x192xf32>
    %cst_19 = arith.constant 0.000000e+00 : f32
    %38 = vector.broadcast %cst_19 : f32 to vector<2x192xf32>
    %39 = arith.maximumf %37, %38 : vector<2x192xf32>
    %c0_20 = arith.constant 0 : index
    %c0_21 = arith.constant 0 : index
    %40 = vector.load %arg7[%c0_20, %c0_21] : memref<1x192xf32, #tpu.memory_space<vmem>>, vector<1x192xf32>
    %41 = vector.broadcast %40 : vector<1x192xf32> to vector<2x192xf32>
    %42 = arith.mulf %39, %41 : vector<2x192xf32>
    %cst_22 = arith.constant dense<0.000000e+00> : vector<2xf32>
    %43 = vector.multi_reduction <add>, %42, %cst_22 [1] : vector<2x192xf32> to vector<2xf32>
    %44 = vector.shape_cast %43 : vector<2xf32> to vector<2x1xf32>
    %c0_23 = arith.constant 0 : index
    %c0_24 = arith.constant 0 : index
    %45 = vector.load %arg8[%c0_23, %c0_24] : memref<1x1xf32, #tpu.memory_space<vmem>>, vector<1x1xf32>
    %46 = vector.broadcast %45 : vector<1x1xf32> to vector<2x1xf32>
    %47 = arith.addf %44, %46 : vector<2x1xf32>
    %c0_25 = arith.constant 0 : index
    %c0_26 = arith.constant 0 : index
    %48 = vector.load %arg9[%c0_25, %c0_26] : memref<2x1xf32, #tpu.memory_space<vmem>>, vector<2x1xf32>
    tpu.vector_store %arg9[%c0_25, %c0_26], %47 {strides = array<i32>} : memref<2x1xf32, #tpu.memory_space<vmem>>, vector<2x1xf32>,
    return
  }
}

module attributes {stable_mosaic.version = 11 : i64} {
  func.func @_encoder_layer_kernel(%arg0: i32, %arg1: memref<16x384xf32, #tpu.memory_space<vmem>>, %arg2: memref<1x384xf32, #tpu.memory_space<vmem>>, %arg3: memref<1x384xf32, #tpu.memory_space<vmem>>, %arg4: memref<16x16xf32, #tpu.memory_space<vmem>>, %arg5: memref<1x384x1152xbf16, #tpu.memory_space<vmem>>, %arg6: memref<1x1x1152xf32, #tpu.memory_space<vmem>>, %arg7: memref<1x384x384xbf16, #tpu.memory_space<vmem>>, %arg8: memref<1x1x384xf32, #tpu.memory_space<vmem>>, %arg9: memref<1x1x384xf32, #tpu.memory_space<vmem>>, %arg10: memref<1x1x384xf32, #tpu.memory_space<vmem>>, %arg11: memref<1x384x1536xbf16, #tpu.memory_space<vmem>>, %arg12: memref<1x1x1536xf32, #tpu.memory_space<vmem>>, %arg13: memref<1x1536x384xbf16, #tpu.memory_space<vmem>>, %arg14: memref<1x1x384xf32, #tpu.memory_space<vmem>>, %arg15: memref<1x1x384xf32, #tpu.memory_space<vmem>>, %arg16: memref<1x1x384xf32, #tpu.memory_space<vmem>>, %arg17: memref<16x384xf32, #tpu.memory_space<vmem>>, %arg18: memref<16x384xf32, #tpu.memory_space<vmem>>) attributes {dimension_semantics = [#tpu.dimension_semantics<arbitrary>], iteration_bounds = array<i64: 12>, scalar_prefetch = 0 : i64, scratch_operands = 1 : i64, tpu.core_type = #tpu.core_type<tc>, window_params = [{pipeline_mode = #tpu.pipeline_mode<synchronous>, transform_indices = @transform_0, window_bounds = array<i64: 16, 384>}, {pipeline_mode = #tpu.pipeline_mode<synchronous>, transform_indices = @transform_1, window_bounds = array<i64: 1, 384>}, {pipeline_mode = #tpu.pipeline_mode<synchronous>, transform_indices = @transform_2, window_bounds = array<i64: 1, 384>}, {pipeline_mode = #tpu.pipeline_mode<synchronous>, transform_indices = @transform_3, window_bounds = array<i64: 16, 16>}, {transform_indices = @transform_4, window_bounds = array<i64: 1, 384, 1152>}, {transform_indices = @transform_5, window_bounds = array<i64: 1, 1, 1152>}, {transform_indices = @transform_6, window_bounds = array<i64: 1, 384, 384>}, {transform_indices = @transform_7, window_bounds = array<i64: 1, 1, 384>}, {transform_indices = @transform_8, window_bounds = array<i64: 1, 1, 384>}, {transform_indices = @transform_9, window_bounds = array<i64: 1, 1, 384>}, {transform_indices = @transform_10, window_bounds = array<i64: 1, 384, 1536>}, {transform_indices = @transform_11, window_bounds = array<i64: 1, 1, 1536>}, {transform_indices = @transform_12, window_bounds = array<i64: 1, 1536, 384>}, {transform_indices = @transform_13, window_bounds = array<i64: 1, 1, 384>}, {transform_indices = @transform_14, window_bounds = array<i64: 1, 1, 384>}, {transform_indices = @transform_15, window_bounds = array<i64: 1, 1, 384>}, {pipeline_mode = #tpu.pipeline_mode<synchronous>, transform_indices = @transform_16, window_bounds = array<i64: 16, 384>}]} {
    %c0_i32 = arith.constant 0 : i32
    %0 = arith.cmpi eq, %arg0, %c0_i32 : i32
    %1 = arith.extui %0 : i1 to i32
    %c0_i32_0 = arith.constant 0 : i32
    %2 = arith.cmpi ne, %1, %c0_i32_0 : i32
    scf.if %2 {
      %c0_134 = arith.constant 0 : index
      %c0_135 = arith.constant 0 : index
      %337 = vector.load %arg1[%c0_134, %c0_135] : memref<16x384xf32, #tpu.memory_space<vmem>>, vector<16x384xf32>
      %c0_136 = arith.constant 0 : index
      %c0_137 = arith.constant 0 : index
      %338 = vector.load %arg2[%c0_136, %c0_137] : memref<1x384xf32, #tpu.memory_space<vmem>>, vector<1x384xf32>
      %c0_138 = arith.constant 0 : index
      %c0_139 = arith.constant 0 : index
      %339 = vector.load %arg3[%c0_138, %c0_139] : memref<1x384xf32, #tpu.memory_space<vmem>>, vector<1x384xf32>
      %cst_140 = arith.constant dense<0.000000e+00> : vector<16xf32>
      %340 = vector.multi_reduction <add>, %337, %cst_140 [1] : vector<16x384xf32> to vector<16xf32>
      %341 = vector.shape_cast %340 : vector<16xf32> to vector<16x1xf32>
      %cst_141 = arith.constant 3.840000e+02 : f32
      %342 = vector.broadcast %cst_141 : f32 to vector<16x1xf32>
      %343 = arith.divf %341, %342 : vector<16x1xf32>
      %344 = vector.broadcast %343 : vector<16x1xf32> to vector<16x384xf32>
      %345 = arith.subf %337, %344 : vector<16x384xf32>
      %346 = arith.mulf %345, %345 : vector<16x384xf32>
      %cst_142 = arith.constant dense<0.000000e+00> : vector<16xf32>
      %347 = vector.multi_reduction <add>, %346, %cst_142 [1] : vector<16x384xf32> to vector<16xf32>
      %348 = vector.shape_cast %347 : vector<16xf32> to vector<16x1xf32>
      %cst_143 = arith.constant 3.840000e+02 : f32
      %349 = vector.broadcast %cst_143 : f32 to vector<16x1xf32>
      %350 = arith.divf %348, %349 : vector<16x1xf32>
      %351 = vector.broadcast %343 : vector<16x1xf32> to vector<16x384xf32>
      %352 = arith.subf %337, %351 : vector<16x384xf32>
      %cst_144 = arith.constant 9.99999996E-13 : f32
      %353 = vector.broadcast %cst_144 : f32 to vector<16x1xf32>
      %354 = arith.addf %350, %353 : vector<16x1xf32>
      %355 = math.rsqrt %354 : vector<16x1xf32>
      %356 = vector.broadcast %355 : vector<16x1xf32> to vector<16x384xf32>
      %357 = arith.mulf %352, %356 : vector<16x384xf32>
      %358 = vector.broadcast %338 : vector<1x384xf32> to vector<16x384xf32>
      %359 = arith.mulf %357, %358 : vector<16x384xf32>
      %360 = vector.broadcast %339 : vector<1x384xf32> to vector<16x384xf32>
      %361 = arith.addf %359, %360 : vector<16x384xf32>
      %c0_145 = arith.constant 0 : index
      %c0_146 = arith.constant 0 : index
      %362 = vector.load %arg17[%c0_145, %c0_146] : memref<16x384xf32, #tpu.memory_space<vmem>>, vector<16x384xf32>
      tpu.vector_store %arg17[%c0_145, %c0_146], %361 {strides = array<i32>} : memref<16x384xf32, #tpu.memory_space<vmem>>, vector<16x384xf32>,
    } else {
    }
    %c0 = arith.constant 0 : index
    %c0_1 = arith.constant 0 : index
    %3 = vector.load %arg17[%c0, %c0_1] : memref<16x384xf32, #tpu.memory_space<vmem>>, vector<16x384xf32>
    %4 = arith.truncf %3 : vector<16x384xf32> to vector<16x384xbf16>
    %c0_2 = arith.constant 0 : index
    %c0_3 = arith.constant 0 : index
    %c0_4 = arith.constant 0 : index
    %5 = vector.load %arg5[%c0_2, %c0_3, %c0_4] : memref<1x384x1152xbf16, #tpu.memory_space<vmem>>, vector<1x384x1152xbf16>
    %6 = vector.shape_cast %5 : vector<1x384x1152xbf16> to vector<384x1152xbf16>
    %cst = arith.constant dense<0.000000e+00> : vector<16x1152xf32>
    %7 = tpu.matmul %4, %6, %cst {dimension_numbers = #tpu.dot_dimension_numbers<[1], [0], [0], [1], [0, 0, 1, 1], [], []>} : vector<16x384xbf16>, vector<384x1152xbf16>, vector<16x1152xf32> -> vector<16x1152xf32>
    %c0_5 = arith.constant 0 : index
    %c0_6 = arith.constant 0 : index
    %c0_7 = arith.constant 0 : index
    %8 = vector.load %arg6[%c0_5, %c0_6, %c0_7] : memref<1x1x1152xf32, #tpu.memory_space<vmem>>, vector<1x1x1152xf32>
    %9 = vector.shape_cast %8 : vector<1x1x1152xf32> to vector<1x1152xf32>
    %10 = vector.broadcast %9 : vector<1x1152xf32> to vector<16x1152xf32>
    %11 = arith.addf %7, %10 : vector<16x1152xf32>
    %12 = vector.extract_strided_slice %11 {offsets = [0, 0], sizes = [16, 384], strides = [1, 1]} : vector<16x1152xf32> to vector<16x384xf32>
    %13 = vector.extract_strided_slice %11 {offsets = [0, 384], sizes = [16, 384], strides = [1, 1]} : vector<16x1152xf32> to vector<16x384xf32>
    %14 = vector.extract_strided_slice %11 {offsets = [0, 768], sizes = [16, 384], strides = [1, 1]} : vector<16x1152xf32> to vector<16x384xf32>
    %c0_8 = arith.constant 0 : index
    %c0_9 = arith.constant 0 : index
    %15 = vector.load %arg4[%c0_8, %c0_9] : memref<16x16xf32, #tpu.memory_space<vmem>>, vector<16x16xf32>
    %16 = vector.extract_strided_slice %12 {offsets = [0, 0], sizes = [16, 32], strides = [1, 1]} : vector<16x384xf32> to vector<16x32xf32>
    %cst_10 = arith.constant 0.176776692 : f32
    %17 = vector.broadcast %cst_10 : f32 to vector<16x32xf32>
    %18 = arith.mulf %16, %17 : vector<16x32xf32>
    %19 = vector.extract_strided_slice %13 {offsets = [0, 0], sizes = [16, 32], strides = [1, 1]} : vector<16x384xf32> to vector<16x32xf32>
    %20 = vector.extract_strided_slice %14 {offsets = [0, 0], sizes = [16, 32], strides = [1, 1]} : vector<16x384xf32> to vector<16x32xf32>
    %cst_11 = arith.constant dense<0.000000e+00> : vector<16x16xf32>
    %21 = tpu.matmul %18, %19, %cst_11 {dimension_numbers = #tpu.dot_dimension_numbers<[1], [1], [0], [0], [0, 0, 1, 0], [], []>} : vector<16x32xf32>, vector<16x32xf32>, vector<16x16xf32> -> vector<16x16xf32>
    %22 = arith.addf %21, %15 : vector<16x16xf32>
    %cst_12 = arith.constant dense<0xFF800000> : vector<16xf32>
    %23 = vector.multi_reduction <maximumf>, %22, %cst_12 [1] : vector<16x16xf32> to vector<16xf32>
    %24 = vector.shape_cast %23 : vector<16xf32> to vector<16x1xf32>
    %25 = vector.broadcast %24 : vector<16x1xf32> to vector<16x16xf32>
    %26 = arith.subf %22, %25 : vector<16x16xf32>
    %27 = math.exp %26 : vector<16x16xf32>
    %cst_13 = arith.constant dense<0.000000e+00> : vector<16xf32>
    %28 = vector.multi_reduction <add>, %27, %cst_13 [1] : vector<16x16xf32> to vector<16xf32>
    %29 = vector.shape_cast %28 : vector<16xf32> to vector<16x1xf32>
    %30 = tpu.reciprocal %29 {approx = true} : vector<16x1xf32> -> vector<16x1xf32>
    %31 = vector.broadcast %30 : vector<16x1xf32> to vector<16x16xf32>
    %32 = arith.mulf %27, %31 : vector<16x16xf32>
    %cst_14 = arith.constant dense<0.000000e+00> : vector<16x32xf32>
    %33 = tpu.matmul %32, %20, %cst_14 {dimension_numbers = #tpu.dot_dimension_numbers<[1], [0], [0], [1], [0, 0, 1, 1], [], []>} : vector<16x16xf32>, vector<16x32xf32>, vector<16x32xf32> -> vector<16x32xf32>
    %c0_15 = arith.constant 0 : index
    %c0_16 = arith.constant 0 : index
    %34 = vector.load %arg18[%c0_15, %c0_16] : memref<16x384xf32, #tpu.memory_space<vmem>>, vector<16x32xf32>
    tpu.vector_store %arg18[%c0_15, %c0_16], %33 {strides = array<i32>} : memref<16x384xf32, #tpu.memory_space<vmem>>, vector<16x32xf32>,
    %35 = vector.extract_strided_slice %12 {offsets = [0, 32], sizes = [16, 32], strides = [1, 1]} : vector<16x384xf32> to vector<16x32xf32>
    %cst_17 = arith.constant 0.176776692 : f32
    %36 = vector.broadcast %cst_17 : f32 to vector<16x32xf32>
    %37 = arith.mulf %35, %36 : vector<16x32xf32>
    %38 = vector.extract_strided_slice %13 {offsets = [0, 32], sizes = [16, 32], strides = [1, 1]} : vector<16x384xf32> to vector<16x32xf32>
    %39 = vector.extract_strided_slice %14 {offsets = [0, 32], sizes = [16, 32], strides = [1, 1]} : vector<16x384xf32> to vector<16x32xf32>
    %cst_18 = arith.constant dense<0.000000e+00> : vector<16x16xf32>
    %40 = tpu.matmul %37, %38, %cst_18 {dimension_numbers = #tpu.dot_dimension_numbers<[1], [1], [0], [0], [0, 0, 1, 0], [], []>} : vector<16x32xf32>, vector<16x32xf32>, vector<16x16xf32> -> vector<16x16xf32>
    %41 = arith.addf %40, %15 : vector<16x16xf32>
    %cst_19 = arith.constant dense<0xFF800000> : vector<16xf32>
    %42 = vector.multi_reduction <maximumf>, %41, %cst_19 [1] : vector<16x16xf32> to vector<16xf32>
    %43 = vector.shape_cast %42 : vector<16xf32> to vector<16x1xf32>
    %44 = vector.broadcast %43 : vector<16x1xf32> to vector<16x16xf32>
    %45 = arith.subf %41, %44 : vector<16x16xf32>
    %46 = math.exp %45 : vector<16x16xf32>
    %cst_20 = arith.constant dense<0.000000e+00> : vector<16xf32>
    %47 = vector.multi_reduction <add>, %46, %cst_20 [1] : vector<16x16xf32> to vector<16xf32>
    %48 = vector.shape_cast %47 : vector<16xf32> to vector<16x1xf32>
    %49 = tpu.reciprocal %48 {approx = true} : vector<16x1xf32> -> vector<16x1xf32>
    %50 = vector.broadcast %49 : vector<16x1xf32> to vector<16x16xf32>
    %51 = arith.mulf %46, %50 : vector<16x16xf32>
    %cst_21 = arith.constant dense<0.000000e+00> : vector<16x32xf32>
    %52 = tpu.matmul %51, %39, %cst_21 {dimension_numbers = #tpu.dot_dimension_numbers<[1], [0], [0], [1], [0, 0, 1, 1], [], []>} : vector<16x16xf32>, vector<16x32xf32>, vector<16x32xf32> -> vector<16x32xf32>
    %c0_22 = arith.constant 0 : index
    %c32 = arith.constant 32 : index
    %53 = vector.load %arg18[%c0_22, %c32] : memref<16x384xf32, #tpu.memory_space<vmem>>, vector<16x32xf32>
    tpu.vector_store %arg18[%c0_22, %c32], %52 {strides = array<i32>} : memref<16x384xf32, #tpu.memory_space<vmem>>, vector<16x32xf32>,
    %54 = vector.extract_strided_slice %12 {offsets = [0, 64], sizes = [16, 32], strides = [1, 1]} : vector<16x384xf32> to vector<16x32xf32>
    %cst_23 = arith.constant 0.176776692 : f32
    %55 = vector.broadcast %cst_23 : f32 to vector<16x32xf32>
    %56 = arith.mulf %54, %55 : vector<16x32xf32>
    %57 = vector.extract_strided_slice %13 {offsets = [0, 64], sizes = [16, 32], strides = [1, 1]} : vector<16x384xf32> to vector<16x32xf32>
    %58 = vector.extract_strided_slice %14 {offsets = [0, 64], sizes = [16, 32], strides = [1, 1]} : vector<16x384xf32> to vector<16x32xf32>
    %cst_24 = arith.constant dense<0.000000e+00> : vector<16x16xf32>
    %59 = tpu.matmul %56, %57, %cst_24 {dimension_numbers = #tpu.dot_dimension_numbers<[1], [1], [0], [0], [0, 0, 1, 0], [], []>} : vector<16x32xf32>, vector<16x32xf32>, vector<16x16xf32> -> vector<16x16xf32>
    %60 = arith.addf %59, %15 : vector<16x16xf32>
    %cst_25 = arith.constant dense<0xFF800000> : vector<16xf32>
    %61 = vector.multi_reduction <maximumf>, %60, %cst_25 [1] : vector<16x16xf32> to vector<16xf32>
    %62 = vector.shape_cast %61 : vector<16xf32> to vector<16x1xf32>
    %63 = vector.broadcast %62 : vector<16x1xf32> to vector<16x16xf32>
    %64 = arith.subf %60, %63 : vector<16x16xf32>
    %65 = math.exp %64 : vector<16x16xf32>
    %cst_26 = arith.constant dense<0.000000e+00> : vector<16xf32>
    %66 = vector.multi_reduction <add>, %65, %cst_26 [1] : vector<16x16xf32> to vector<16xf32>
    %67 = vector.shape_cast %66 : vector<16xf32> to vector<16x1xf32>
    %68 = tpu.reciprocal %67 {approx = true} : vector<16x1xf32> -> vector<16x1xf32>
    %69 = vector.broadcast %68 : vector<16x1xf32> to vector<16x16xf32>
    %70 = arith.mulf %65, %69 : vector<16x16xf32>
    %cst_27 = arith.constant dense<0.000000e+00> : vector<16x32xf32>
    %71 = tpu.matmul %70, %58, %cst_27 {dimension_numbers = #tpu.dot_dimension_numbers<[1], [0], [0], [1], [0, 0, 1, 1], [], []>} : vector<16x16xf32>, vector<16x32xf32>, vector<16x32xf32> -> vector<16x32xf32>
    %c0_28 = arith.constant 0 : index
    %c64 = arith.constant 64 : index
    %72 = vector.load %arg18[%c0_28, %c64] : memref<16x384xf32, #tpu.memory_space<vmem>>, vector<16x32xf32>
    tpu.vector_store %arg18[%c0_28, %c64], %71 {strides = array<i32>} : memref<16x384xf32, #tpu.memory_space<vmem>>, vector<16x32xf32>,
    %73 = vector.extract_strided_slice %12 {offsets = [0, 96], sizes = [16, 32], strides = [1, 1]} : vector<16x384xf32> to vector<16x32xf32>
    %cst_29 = arith.constant 0.176776692 : f32
    %74 = vector.broadcast %cst_29 : f32 to vector<16x32xf32>
    %75 = arith.mulf %73, %74 : vector<16x32xf32>
    %76 = vector.extract_strided_slice %13 {offsets = [0, 96], sizes = [16, 32], strides = [1, 1]} : vector<16x384xf32> to vector<16x32xf32>
    %77 = vector.extract_strided_slice %14 {offsets = [0, 96], sizes = [16, 32], strides = [1, 1]} : vector<16x384xf32> to vector<16x32xf32>
    %cst_30 = arith.constant dense<0.000000e+00> : vector<16x16xf32>
    %78 = tpu.matmul %75, %76, %cst_30 {dimension_numbers = #tpu.dot_dimension_numbers<[1], [1], [0], [0], [0, 0, 1, 0], [], []>} : vector<16x32xf32>, vector<16x32xf32>, vector<16x16xf32> -> vector<16x16xf32>
    %79 = arith.addf %78, %15 : vector<16x16xf32>
    %cst_31 = arith.constant dense<0xFF800000> : vector<16xf32>
    %80 = vector.multi_reduction <maximumf>, %79, %cst_31 [1] : vector<16x16xf32> to vector<16xf32>
    %81 = vector.shape_cast %80 : vector<16xf32> to vector<16x1xf32>
    %82 = vector.broadcast %81 : vector<16x1xf32> to vector<16x16xf32>
    %83 = arith.subf %79, %82 : vector<16x16xf32>
    %84 = math.exp %83 : vector<16x16xf32>
    %cst_32 = arith.constant dense<0.000000e+00> : vector<16xf32>
    %85 = vector.multi_reduction <add>, %84, %cst_32 [1] : vector<16x16xf32> to vector<16xf32>
    %86 = vector.shape_cast %85 : vector<16xf32> to vector<16x1xf32>
    %87 = tpu.reciprocal %86 {approx = true} : vector<16x1xf32> -> vector<16x1xf32>
    %88 = vector.broadcast %87 : vector<16x1xf32> to vector<16x16xf32>
    %89 = arith.mulf %84, %88 : vector<16x16xf32>
    %cst_33 = arith.constant dense<0.000000e+00> : vector<16x32xf32>
    %90 = tpu.matmul %89, %77, %cst_33 {dimension_numbers = #tpu.dot_dimension_numbers<[1], [0], [0], [1], [0, 0, 1, 1], [], []>} : vector<16x16xf32>, vector<16x32xf32>, vector<16x32xf32> -> vector<16x32xf32>
    %c0_34 = arith.constant 0 : index
    %c96 = arith.constant 96 : index
    %91 = vector.load %arg18[%c0_34, %c96] : memref<16x384xf32, #tpu.memory_space<vmem>>, vector<16x32xf32>
    tpu.vector_store %arg18[%c0_34, %c96], %90 {strides = array<i32>} : memref<16x384xf32, #tpu.memory_space<vmem>>, vector<16x32xf32>,
    %92 = vector.extract_strided_slice %12 {offsets = [0, 128], sizes = [16, 32], strides = [1, 1]} : vector<16x384xf32> to vector<16x32xf32>
    %cst_35 = arith.constant 0.176776692 : f32
    %93 = vector.broadcast %cst_35 : f32 to vector<16x32xf32>
    %94 = arith.mulf %92, %93 : vector<16x32xf32>
    %95 = vector.extract_strided_slice %13 {offsets = [0, 128], sizes = [16, 32], strides = [1, 1]} : vector<16x384xf32> to vector<16x32xf32>
    %96 = vector.extract_strided_slice %14 {offsets = [0, 128], sizes = [16, 32], strides = [1, 1]} : vector<16x384xf32> to vector<16x32xf32>
    %cst_36 = arith.constant dense<0.000000e+00> : vector<16x16xf32>
    %97 = tpu.matmul %94, %95, %cst_36 {dimension_numbers = #tpu.dot_dimension_numbers<[1], [1], [0], [0], [0, 0, 1, 0], [], []>} : vector<16x32xf32>, vector<16x32xf32>, vector<16x16xf32> -> vector<16x16xf32>
    %98 = arith.addf %97, %15 : vector<16x16xf32>
    %cst_37 = arith.constant dense<0xFF800000> : vector<16xf32>
    %99 = vector.multi_reduction <maximumf>, %98, %cst_37 [1] : vector<16x16xf32> to vector<16xf32>
    %100 = vector.shape_cast %99 : vector<16xf32> to vector<16x1xf32>
    %101 = vector.broadcast %100 : vector<16x1xf32> to vector<16x16xf32>
    %102 = arith.subf %98, %101 : vector<16x16xf32>
    %103 = math.exp %102 : vector<16x16xf32>
    %cst_38 = arith.constant dense<0.000000e+00> : vector<16xf32>
    %104 = vector.multi_reduction <add>, %103, %cst_38 [1] : vector<16x16xf32> to vector<16xf32>
    %105 = vector.shape_cast %104 : vector<16xf32> to vector<16x1xf32>
    %106 = tpu.reciprocal %105 {approx = true} : vector<16x1xf32> -> vector<16x1xf32>
    %107 = vector.broadcast %106 : vector<16x1xf32> to vector<16x16xf32>
    %108 = arith.mulf %103, %107 : vector<16x16xf32>
    %cst_39 = arith.constant dense<0.000000e+00> : vector<16x32xf32>
    %109 = tpu.matmul %108, %96, %cst_39 {dimension_numbers = #tpu.dot_dimension_numbers<[1], [0], [0], [1], [0, 0, 1, 1], [], []>} : vector<16x16xf32>, vector<16x32xf32>, vector<16x32xf32> -> vector<16x32xf32>
    %c0_40 = arith.constant 0 : index
    %c128 = arith.constant 128 : index
    %110 = vector.load %arg18[%c0_40, %c128] : memref<16x384xf32, #tpu.memory_space<vmem>>, vector<16x32xf32>
    tpu.vector_store %arg18[%c0_40, %c128], %109 {strides = array<i32>} : memref<16x384xf32, #tpu.memory_space<vmem>>, vector<16x32xf32>,
    %111 = vector.extract_strided_slice %12 {offsets = [0, 160], sizes = [16, 32], strides = [1, 1]} : vector<16x384xf32> to vector<16x32xf32>
    %cst_41 = arith.constant 0.176776692 : f32
    %112 = vector.broadcast %cst_41 : f32 to vector<16x32xf32>
    %113 = arith.mulf %111, %112 : vector<16x32xf32>
    %114 = vector.extract_strided_slice %13 {offsets = [0, 160], sizes = [16, 32], strides = [1, 1]} : vector<16x384xf32> to vector<16x32xf32>
    %115 = vector.extract_strided_slice %14 {offsets = [0, 160], sizes = [16, 32], strides = [1, 1]} : vector<16x384xf32> to vector<16x32xf32>
    %cst_42 = arith.constant dense<0.000000e+00> : vector<16x16xf32>
    %116 = tpu.matmul %113, %114, %cst_42 {dimension_numbers = #tpu.dot_dimension_numbers<[1], [1], [0], [0], [0, 0, 1, 0], [], []>} : vector<16x32xf32>, vector<16x32xf32>, vector<16x16xf32> -> vector<16x16xf32>
    %117 = arith.addf %116, %15 : vector<16x16xf32>
    %cst_43 = arith.constant dense<0xFF800000> : vector<16xf32>
    %118 = vector.multi_reduction <maximumf>, %117, %cst_43 [1] : vector<16x16xf32> to vector<16xf32>
    %119 = vector.shape_cast %118 : vector<16xf32> to vector<16x1xf32>
    %120 = vector.broadcast %119 : vector<16x1xf32> to vector<16x16xf32>
    %121 = arith.subf %117, %120 : vector<16x16xf32>
    %122 = math.exp %121 : vector<16x16xf32>
    %cst_44 = arith.constant dense<0.000000e+00> : vector<16xf32>
    %123 = vector.multi_reduction <add>, %122, %cst_44 [1] : vector<16x16xf32> to vector<16xf32>
    %124 = vector.shape_cast %123 : vector<16xf32> to vector<16x1xf32>
    %125 = tpu.reciprocal %124 {approx = true} : vector<16x1xf32> -> vector<16x1xf32>
    %126 = vector.broadcast %125 : vector<16x1xf32> to vector<16x16xf32>
    %127 = arith.mulf %122, %126 : vector<16x16xf32>
    %cst_45 = arith.constant dense<0.000000e+00> : vector<16x32xf32>
    %128 = tpu.matmul %127, %115, %cst_45 {dimension_numbers = #tpu.dot_dimension_numbers<[1], [0], [0], [1], [0, 0, 1, 1], [], []>} : vector<16x16xf32>, vector<16x32xf32>, vector<16x32xf32> -> vector<16x32xf32>
    %c0_46 = arith.constant 0 : index
    %c160 = arith.constant 160 : index
    %129 = vector.load %arg18[%c0_46, %c160] : memref<16x384xf32, #tpu.memory_space<vmem>>, vector<16x32xf32>
    tpu.vector_store %arg18[%c0_46, %c160], %128 {strides = array<i32>} : memref<16x384xf32, #tpu.memory_space<vmem>>, vector<16x32xf32>,
    %130 = vector.extract_strided_slice %12 {offsets = [0, 192], sizes = [16, 32], strides = [1, 1]} : vector<16x384xf32> to vector<16x32xf32>
    %cst_47 = arith.constant 0.176776692 : f32
    %131 = vector.broadcast %cst_47 : f32 to vector<16x32xf32>
    %132 = arith.mulf %130, %131 : vector<16x32xf32>
    %133 = vector.extract_strided_slice %13 {offsets = [0, 192], sizes = [16, 32], strides = [1, 1]} : vector<16x384xf32> to vector<16x32xf32>
    %134 = vector.extract_strided_slice %14 {offsets = [0, 192], sizes = [16, 32], strides = [1, 1]} : vector<16x384xf32> to vector<16x32xf32>
    %cst_48 = arith.constant dense<0.000000e+00> : vector<16x16xf32>
    %135 = tpu.matmul %132, %133, %cst_48 {dimension_numbers = #tpu.dot_dimension_numbers<[1], [1], [0], [0], [0, 0, 1, 0], [], []>} : vector<16x32xf32>, vector<16x32xf32>, vector<16x16xf32> -> vector<16x16xf32>
    %136 = arith.addf %135, %15 : vector<16x16xf32>
    %cst_49 = arith.constant dense<0xFF800000> : vector<16xf32>
    %137 = vector.multi_reduction <maximumf>, %136, %cst_49 [1] : vector<16x16xf32> to vector<16xf32>
    %138 = vector.shape_cast %137 : vector<16xf32> to vector<16x1xf32>
    %139 = vector.broadcast %138 : vector<16x1xf32> to vector<16x16xf32>
    %140 = arith.subf %136, %139 : vector<16x16xf32>
    %141 = math.exp %140 : vector<16x16xf32>
    %cst_50 = arith.constant dense<0.000000e+00> : vector<16xf32>
    %142 = vector.multi_reduction <add>, %141, %cst_50 [1] : vector<16x16xf32> to vector<16xf32>
    %143 = vector.shape_cast %142 : vector<16xf32> to vector<16x1xf32>
    %144 = tpu.reciprocal %143 {approx = true} : vector<16x1xf32> -> vector<16x1xf32>
    %145 = vector.broadcast %144 : vector<16x1xf32> to vector<16x16xf32>
    %146 = arith.mulf %141, %145 : vector<16x16xf32>
    %cst_51 = arith.constant dense<0.000000e+00> : vector<16x32xf32>
    %147 = tpu.matmul %146, %134, %cst_51 {dimension_numbers = #tpu.dot_dimension_numbers<[1], [0], [0], [1], [0, 0, 1, 1], [], []>} : vector<16x16xf32>, vector<16x32xf32>, vector<16x32xf32> -> vector<16x32xf32>
    %c0_52 = arith.constant 0 : index
    %c192 = arith.constant 192 : index
    %148 = vector.load %arg18[%c0_52, %c192] : memref<16x384xf32, #tpu.memory_space<vmem>>, vector<16x32xf32>
    tpu.vector_store %arg18[%c0_52, %c192], %147 {strides = array<i32>} : memref<16x384xf32, #tpu.memory_space<vmem>>, vector<16x32xf32>,
    %149 = vector.extract_strided_slice %12 {offsets = [0, 224], sizes = [16, 32], strides = [1, 1]} : vector<16x384xf32> to vector<16x32xf32>
    %cst_53 = arith.constant 0.176776692 : f32
    %150 = vector.broadcast %cst_53 : f32 to vector<16x32xf32>
    %151 = arith.mulf %149, %150 : vector<16x32xf32>
    %152 = vector.extract_strided_slice %13 {offsets = [0, 224], sizes = [16, 32], strides = [1, 1]} : vector<16x384xf32> to vector<16x32xf32>
    %153 = vector.extract_strided_slice %14 {offsets = [0, 224], sizes = [16, 32], strides = [1, 1]} : vector<16x384xf32> to vector<16x32xf32>
    %cst_54 = arith.constant dense<0.000000e+00> : vector<16x16xf32>
    %154 = tpu.matmul %151, %152, %cst_54 {dimension_numbers = #tpu.dot_dimension_numbers<[1], [1], [0], [0], [0, 0, 1, 0], [], []>} : vector<16x32xf32>, vector<16x32xf32>, vector<16x16xf32> -> vector<16x16xf32>
    %155 = arith.addf %154, %15 : vector<16x16xf32>
    %cst_55 = arith.constant dense<0xFF800000> : vector<16xf32>
    %156 = vector.multi_reduction <maximumf>, %155, %cst_55 [1] : vector<16x16xf32> to vector<16xf32>
    %157 = vector.shape_cast %156 : vector<16xf32> to vector<16x1xf32>
    %158 = vector.broadcast %157 : vector<16x1xf32> to vector<16x16xf32>
    %159 = arith.subf %155, %158 : vector<16x16xf32>
    %160 = math.exp %159 : vector<16x16xf32>
    %cst_56 = arith.constant dense<0.000000e+00> : vector<16xf32>
    %161 = vector.multi_reduction <add>, %160, %cst_56 [1] : vector<16x16xf32> to vector<16xf32>
    %162 = vector.shape_cast %161 : vector<16xf32> to vector<16x1xf32>
    %163 = tpu.reciprocal %162 {approx = true} : vector<16x1xf32> -> vector<16x1xf32>
    %164 = vector.broadcast %163 : vector<16x1xf32> to vector<16x16xf32>
    %165 = arith.mulf %160, %164 : vector<16x16xf32>
    %cst_57 = arith.constant dense<0.000000e+00> : vector<16x32xf32>
    %166 = tpu.matmul %165, %153, %cst_57 {dimension_numbers = #tpu.dot_dimension_numbers<[1], [0], [0], [1], [0, 0, 1, 1], [], []>} : vector<16x16xf32>, vector<16x32xf32>, vector<16x32xf32> -> vector<16x32xf32>
    %c0_58 = arith.constant 0 : index
    %c224 = arith.constant 224 : index
    %167 = vector.load %arg18[%c0_58, %c224] : memref<16x384xf32, #tpu.memory_space<vmem>>, vector<16x32xf32>
    tpu.vector_store %arg18[%c0_58, %c224], %166 {strides = array<i32>} : memref<16x384xf32, #tpu.memory_space<vmem>>, vector<16x32xf32>,
    %168 = vector.extract_strided_slice %12 {offsets = [0, 256], sizes = [16, 32], strides = [1, 1]} : vector<16x384xf32> to vector<16x32xf32>
    %cst_59 = arith.constant 0.176776692 : f32
    %169 = vector.broadcast %cst_59 : f32 to vector<16x32xf32>
    %170 = arith.mulf %168, %169 : vector<16x32xf32>
    %171 = vector.extract_strided_slice %13 {offsets = [0, 256], sizes = [16, 32], strides = [1, 1]} : vector<16x384xf32> to vector<16x32xf32>
    %172 = vector.extract_strided_slice %14 {offsets = [0, 256], sizes = [16, 32], strides = [1, 1]} : vector<16x384xf32> to vector<16x32xf32>
    %cst_60 = arith.constant dense<0.000000e+00> : vector<16x16xf32>
    %173 = tpu.matmul %170, %171, %cst_60 {dimension_numbers = #tpu.dot_dimension_numbers<[1], [1], [0], [0], [0, 0, 1, 0], [], []>} : vector<16x32xf32>, vector<16x32xf32>, vector<16x16xf32> -> vector<16x16xf32>
    %174 = arith.addf %173, %15 : vector<16x16xf32>
    %cst_61 = arith.constant dense<0xFF800000> : vector<16xf32>
    %175 = vector.multi_reduction <maximumf>, %174, %cst_61 [1] : vector<16x16xf32> to vector<16xf32>
    %176 = vector.shape_cast %175 : vector<16xf32> to vector<16x1xf32>
    %177 = vector.broadcast %176 : vector<16x1xf32> to vector<16x16xf32>
    %178 = arith.subf %174, %177 : vector<16x16xf32>
    %179 = math.exp %178 : vector<16x16xf32>
    %cst_62 = arith.constant dense<0.000000e+00> : vector<16xf32>
    %180 = vector.multi_reduction <add>, %179, %cst_62 [1] : vector<16x16xf32> to vector<16xf32>
    %181 = vector.shape_cast %180 : vector<16xf32> to vector<16x1xf32>
    %182 = tpu.reciprocal %181 {approx = true} : vector<16x1xf32> -> vector<16x1xf32>
    %183 = vector.broadcast %182 : vector<16x1xf32> to vector<16x16xf32>
    %184 = arith.mulf %179, %183 : vector<16x16xf32>
    %cst_63 = arith.constant dense<0.000000e+00> : vector<16x32xf32>
    %185 = tpu.matmul %184, %172, %cst_63 {dimension_numbers = #tpu.dot_dimension_numbers<[1], [0], [0], [1], [0, 0, 1, 1], [], []>} : vector<16x16xf32>, vector<16x32xf32>, vector<16x32xf32> -> vector<16x32xf32>
    %c0_64 = arith.constant 0 : index
    %c256 = arith.constant 256 : index
    %186 = vector.load %arg18[%c0_64, %c256] : memref<16x384xf32, #tpu.memory_space<vmem>>, vector<16x32xf32>
    tpu.vector_store %arg18[%c0_64, %c256], %185 {strides = array<i32>} : memref<16x384xf32, #tpu.memory_space<vmem>>, vector<16x32xf32>,
    %187 = vector.extract_strided_slice %12 {offsets = [0, 288], sizes = [16, 32], strides = [1, 1]} : vector<16x384xf32> to vector<16x32xf32>
    %cst_65 = arith.constant 0.176776692 : f32
    %188 = vector.broadcast %cst_65 : f32 to vector<16x32xf32>
    %189 = arith.mulf %187, %188 : vector<16x32xf32>
    %190 = vector.extract_strided_slice %13 {offsets = [0, 288], sizes = [16, 32], strides = [1, 1]} : vector<16x384xf32> to vector<16x32xf32>
    %191 = vector.extract_strided_slice %14 {offsets = [0, 288], sizes = [16, 32], strides = [1, 1]} : vector<16x384xf32> to vector<16x32xf32>
    %cst_66 = arith.constant dense<0.000000e+00> : vector<16x16xf32>
    %192 = tpu.matmul %189, %190, %cst_66 {dimension_numbers = #tpu.dot_dimension_numbers<[1], [1], [0], [0], [0, 0, 1, 0], [], []>} : vector<16x32xf32>, vector<16x32xf32>, vector<16x16xf32> -> vector<16x16xf32>
    %193 = arith.addf %192, %15 : vector<16x16xf32>
    %cst_67 = arith.constant dense<0xFF800000> : vector<16xf32>
    %194 = vector.multi_reduction <maximumf>, %193, %cst_67 [1] : vector<16x16xf32> to vector<16xf32>
    %195 = vector.shape_cast %194 : vector<16xf32> to vector<16x1xf32>
    %196 = vector.broadcast %195 : vector<16x1xf32> to vector<16x16xf32>
    %197 = arith.subf %193, %196 : vector<16x16xf32>
    %198 = math.exp %197 : vector<16x16xf32>
    %cst_68 = arith.constant dense<0.000000e+00> : vector<16xf32>
    %199 = vector.multi_reduction <add>, %198, %cst_68 [1] : vector<16x16xf32> to vector<16xf32>
    %200 = vector.shape_cast %199 : vector<16xf32> to vector<16x1xf32>
    %201 = tpu.reciprocal %200 {approx = true} : vector<16x1xf32> -> vector<16x1xf32>
    %202 = vector.broadcast %201 : vector<16x1xf32> to vector<16x16xf32>
    %203 = arith.mulf %198, %202 : vector<16x16xf32>
    %cst_69 = arith.constant dense<0.000000e+00> : vector<16x32xf32>
    %204 = tpu.matmul %203, %191, %cst_69 {dimension_numbers = #tpu.dot_dimension_numbers<[1], [0], [0], [1], [0, 0, 1, 1], [], []>} : vector<16x16xf32>, vector<16x32xf32>, vector<16x32xf32> -> vector<16x32xf32>
    %c0_70 = arith.constant 0 : index
    %c288 = arith.constant 288 : index
    %205 = vector.load %arg18[%c0_70, %c288] : memref<16x384xf32, #tpu.memory_space<vmem>>, vector<16x32xf32>
    tpu.vector_store %arg18[%c0_70, %c288], %204 {strides = array<i32>} : memref<16x384xf32, #tpu.memory_space<vmem>>, vector<16x32xf32>,
    %206 = vector.extract_strided_slice %12 {offsets = [0, 320], sizes = [16, 32], strides = [1, 1]} : vector<16x384xf32> to vector<16x32xf32>
    %cst_71 = arith.constant 0.176776692 : f32
    %207 = vector.broadcast %cst_71 : f32 to vector<16x32xf32>
    %208 = arith.mulf %206, %207 : vector<16x32xf32>
    %209 = vector.extract_strided_slice %13 {offsets = [0, 320], sizes = [16, 32], strides = [1, 1]} : vector<16x384xf32> to vector<16x32xf32>
    %210 = vector.extract_strided_slice %14 {offsets = [0, 320], sizes = [16, 32], strides = [1, 1]} : vector<16x384xf32> to vector<16x32xf32>
    %cst_72 = arith.constant dense<0.000000e+00> : vector<16x16xf32>
    %211 = tpu.matmul %208, %209, %cst_72 {dimension_numbers = #tpu.dot_dimension_numbers<[1], [1], [0], [0], [0, 0, 1, 0], [], []>} : vector<16x32xf32>, vector<16x32xf32>, vector<16x16xf32> -> vector<16x16xf32>
    %212 = arith.addf %211, %15 : vector<16x16xf32>
    %cst_73 = arith.constant dense<0xFF800000> : vector<16xf32>
    %213 = vector.multi_reduction <maximumf>, %212, %cst_73 [1] : vector<16x16xf32> to vector<16xf32>
    %214 = vector.shape_cast %213 : vector<16xf32> to vector<16x1xf32>
    %215 = vector.broadcast %214 : vector<16x1xf32> to vector<16x16xf32>
    %216 = arith.subf %212, %215 : vector<16x16xf32>
    %217 = math.exp %216 : vector<16x16xf32>
    %cst_74 = arith.constant dense<0.000000e+00> : vector<16xf32>
    %218 = vector.multi_reduction <add>, %217, %cst_74 [1] : vector<16x16xf32> to vector<16xf32>
    %219 = vector.shape_cast %218 : vector<16xf32> to vector<16x1xf32>
    %220 = tpu.reciprocal %219 {approx = true} : vector<16x1xf32> -> vector<16x1xf32>
    %221 = vector.broadcast %220 : vector<16x1xf32> to vector<16x16xf32>
    %222 = arith.mulf %217, %221 : vector<16x16xf32>
    %cst_75 = arith.constant dense<0.000000e+00> : vector<16x32xf32>
    %223 = tpu.matmul %222, %210, %cst_75 {dimension_numbers = #tpu.dot_dimension_numbers<[1], [0], [0], [1], [0, 0, 1, 1], [], []>} : vector<16x16xf32>, vector<16x32xf32>, vector<16x32xf32> -> vector<16x32xf32>
    %c0_76 = arith.constant 0 : index
    %c320 = arith.constant 320 : index
    %224 = vector.load %arg18[%c0_76, %c320] : memref<16x384xf32, #tpu.memory_space<vmem>>, vector<16x32xf32>
    tpu.vector_store %arg18[%c0_76, %c320], %223 {strides = array<i32>} : memref<16x384xf32, #tpu.memory_space<vmem>>, vector<16x32xf32>,
    %225 = vector.extract_strided_slice %12 {offsets = [0, 352], sizes = [16, 32], strides = [1, 1]} : vector<16x384xf32> to vector<16x32xf32>
    %cst_77 = arith.constant 0.176776692 : f32
    %226 = vector.broadcast %cst_77 : f32 to vector<16x32xf32>
    %227 = arith.mulf %225, %226 : vector<16x32xf32>
    %228 = vector.extract_strided_slice %13 {offsets = [0, 352], sizes = [16, 32], strides = [1, 1]} : vector<16x384xf32> to vector<16x32xf32>
    %229 = vector.extract_strided_slice %14 {offsets = [0, 352], sizes = [16, 32], strides = [1, 1]} : vector<16x384xf32> to vector<16x32xf32>
    %cst_78 = arith.constant dense<0.000000e+00> : vector<16x16xf32>
    %230 = tpu.matmul %227, %228, %cst_78 {dimension_numbers = #tpu.dot_dimension_numbers<[1], [1], [0], [0], [0, 0, 1, 0], [], []>} : vector<16x32xf32>, vector<16x32xf32>, vector<16x16xf32> -> vector<16x16xf32>
    %231 = arith.addf %230, %15 : vector<16x16xf32>
    %cst_79 = arith.constant dense<0xFF800000> : vector<16xf32>
    %232 = vector.multi_reduction <maximumf>, %231, %cst_79 [1] : vector<16x16xf32> to vector<16xf32>
    %233 = vector.shape_cast %232 : vector<16xf32> to vector<16x1xf32>
    %234 = vector.broadcast %233 : vector<16x1xf32> to vector<16x16xf32>
    %235 = arith.subf %231, %234 : vector<16x16xf32>
    %236 = math.exp %235 : vector<16x16xf32>
    %cst_80 = arith.constant dense<0.000000e+00> : vector<16xf32>
    %237 = vector.multi_reduction <add>, %236, %cst_80 [1] : vector<16x16xf32> to vector<16xf32>
    %238 = vector.shape_cast %237 : vector<16xf32> to vector<16x1xf32>
    %239 = tpu.reciprocal %238 {approx = true} : vector<16x1xf32> -> vector<16x1xf32>
    %240 = vector.broadcast %239 : vector<16x1xf32> to vector<16x16xf32>
    %241 = arith.mulf %236, %240 : vector<16x16xf32>
    %cst_81 = arith.constant dense<0.000000e+00> : vector<16x32xf32>
    %242 = tpu.matmul %241, %229, %cst_81 {dimension_numbers = #tpu.dot_dimension_numbers<[1], [0], [0], [1], [0, 0, 1, 1], [], []>} : vector<16x16xf32>, vector<16x32xf32>, vector<16x32xf32> -> vector<16x32xf32>
    %c0_82 = arith.constant 0 : index
    %c352 = arith.constant 352 : index
    %243 = vector.load %arg18[%c0_82, %c352] : memref<16x384xf32, #tpu.memory_space<vmem>>, vector<16x32xf32>
    tpu.vector_store %arg18[%c0_82, %c352], %242 {strides = array<i32>} : memref<16x384xf32, #tpu.memory_space<vmem>>, vector<16x32xf32>,
    %c0_83 = arith.constant 0 : index
    %c0_84 = arith.constant 0 : index
    %244 = vector.load %arg18[%c0_83, %c0_84] : memref<16x384xf32, #tpu.memory_space<vmem>>, vector<16x384xf32>
    %245 = arith.truncf %244 : vector<16x384xf32> to vector<16x384xbf16>
    %c0_85 = arith.constant 0 : index
    %c0_86 = arith.constant 0 : index
    %c0_87 = arith.constant 0 : index
    %246 = vector.load %arg7[%c0_85, %c0_86, %c0_87] : memref<1x384x384xbf16, #tpu.memory_space<vmem>>, vector<1x384x384xbf16>
    %247 = vector.shape_cast %246 : vector<1x384x384xbf16> to vector<384x384xbf16>
    %cst_88 = arith.constant dense<0.000000e+00> : vector<16x384xf32>
    %248 = tpu.matmul %245, %247, %cst_88 {dimension_numbers = #tpu.dot_dimension_numbers<[1], [0], [0], [1], [0, 0, 1, 1], [], []>} : vector<16x384xbf16>, vector<384x384xbf16>, vector<16x384xf32> -> vector<16x384xf32>
    %c0_89 = arith.constant 0 : index
    %c0_90 = arith.constant 0 : index
    %c0_91 = arith.constant 0 : index
    %249 = vector.load %arg8[%c0_89, %c0_90, %c0_91] : memref<1x1x384xf32, #tpu.memory_space<vmem>>, vector<1x1x384xf32>
    %250 = vector.shape_cast %249 : vector<1x1x384xf32> to vector<1x384xf32>
    %251 = vector.broadcast %250 : vector<1x384xf32> to vector<16x384xf32>
    %252 = arith.addf %248, %251 : vector<16x384xf32>
    %253 = arith.addf %252, %3 : vector<16x384xf32>
    %c0_92 = arith.constant 0 : index
    %c0_93 = arith.constant 0 : index
    %c0_94 = arith.constant 0 : index
    %254 = vector.load %arg9[%c0_92, %c0_93, %c0_94] : memref<1x1x384xf32, #tpu.memory_space<vmem>>, vector<1x1x384xf32>
    %255 = vector.shape_cast %254 : vector<1x1x384xf32> to vector<1x384xf32>
    %c0_95 = arith.constant 0 : index
    %c0_96 = arith.constant 0 : index
    %c0_97 = arith.constant 0 : index
    %256 = vector.load %arg10[%c0_95, %c0_96, %c0_97] : memref<1x1x384xf32, #tpu.memory_space<vmem>>, vector<1x1x384xf32>
    %257 = vector.shape_cast %256 : vector<1x1x384xf32> to vector<1x384xf32>
    %cst_98 = arith.constant dense<0.000000e+00> : vector<16xf32>
    %258 = vector.multi_reduction <add>, %253, %cst_98 [1] : vector<16x384xf32> to vector<16xf32>
    %259 = vector.shape_cast %258 : vector<16xf32> to vector<16x1xf32>
    %cst_99 = arith.constant 3.840000e+02 : f32
    %260 = vector.broadcast %cst_99 : f32 to vector<16x1xf32>
    %261 = arith.divf %259, %260 : vector<16x1xf32>
    %262 = vector.broadcast %261 : vector<16x1xf32> to vector<16x384xf32>
    %263 = arith.subf %253, %262 : vector<16x384xf32>
    %264 = arith.mulf %263, %263 : vector<16x384xf32>
    %cst_100 = arith.constant dense<0.000000e+00> : vector<16xf32>
    %265 = vector.multi_reduction <add>, %264, %cst_100 [1] : vector<16x384xf32> to vector<16xf32>
    %266 = vector.shape_cast %265 : vector<16xf32> to vector<16x1xf32>
    %cst_101 = arith.constant 3.840000e+02 : f32
    %267 = vector.broadcast %cst_101 : f32 to vector<16x1xf32>
    %268 = arith.divf %266, %267 : vector<16x1xf32>
    %269 = vector.broadcast %261 : vector<16x1xf32> to vector<16x384xf32>
    %270 = arith.subf %253, %269 : vector<16x384xf32>
    %cst_102 = arith.constant 9.99999996E-13 : f32
    %271 = vector.broadcast %cst_102 : f32 to vector<16x1xf32>
    %272 = arith.addf %268, %271 : vector<16x1xf32>
    %273 = math.rsqrt %272 : vector<16x1xf32>
    %274 = vector.broadcast %273 : vector<16x1xf32> to vector<16x384xf32>
    %275 = arith.mulf %270, %274 : vector<16x384xf32>
    %276 = vector.broadcast %255 : vector<1x384xf32> to vector<16x384xf32>
    %277 = arith.mulf %275, %276 : vector<16x384xf32>
    %278 = vector.broadcast %257 : vector<1x384xf32> to vector<16x384xf32>
    %279 = arith.addf %277, %278 : vector<16x384xf32>
    %280 = arith.truncf %279 : vector<16x384xf32> to vector<16x384xbf16>
    %c0_103 = arith.constant 0 : index
    %c0_104 = arith.constant 0 : index
    %c0_105 = arith.constant 0 : index
    %281 = vector.load %arg11[%c0_103, %c0_104, %c0_105] : memref<1x384x1536xbf16, #tpu.memory_space<vmem>>, vector<1x384x1536xbf16>
    %282 = vector.shape_cast %281 : vector<1x384x1536xbf16> to vector<384x1536xbf16>
    %cst_106 = arith.constant dense<0.000000e+00> : vector<16x1536xf32>
    %283 = tpu.matmul %280, %282, %cst_106 {dimension_numbers = #tpu.dot_dimension_numbers<[1], [0], [0], [1], [0, 0, 1, 1], [], []>} : vector<16x384xbf16>, vector<384x1536xbf16>, vector<16x1536xf32> -> vector<16x1536xf32>
    %c0_107 = arith.constant 0 : index
    %c0_108 = arith.constant 0 : index
    %c0_109 = arith.constant 0 : index
    %284 = vector.load %arg12[%c0_107, %c0_108, %c0_109] : memref<1x1x1536xf32, #tpu.memory_space<vmem>>, vector<1x1x1536xf32>
    %285 = vector.shape_cast %284 : vector<1x1x1536xf32> to vector<1x1536xf32>
    %286 = vector.broadcast %285 : vector<1x1536xf32> to vector<16x1536xf32>
    %287 = arith.addf %283, %286 : vector<16x1536xf32>
    %288 = arith.mulf %287, %287 : vector<16x1536xf32>
    %289 = arith.mulf %287, %288 : vector<16x1536xf32>
    %cst_110 = arith.constant 4.471500e-02 : f32
    %290 = vector.broadcast %cst_110 : f32 to vector<16x1536xf32>
    %291 = arith.mulf %290, %289 : vector<16x1536xf32>
    %292 = arith.addf %287, %291 : vector<16x1536xf32>
    %cst_111 = arith.constant 0.797884583 : f32
    %293 = vector.broadcast %cst_111 : f32 to vector<16x1536xf32>
    %294 = arith.mulf %293, %292 : vector<16x1536xf32>
    %295 = math.tanh %294 : vector<16x1536xf32>
    %cst_112 = arith.constant 1.000000e+00 : f32
    %296 = vector.broadcast %cst_112 : f32 to vector<16x1536xf32>
    %297 = arith.addf %296, %295 : vector<16x1536xf32>
    %cst_113 = arith.constant 5.000000e-01 : f32
    %298 = vector.broadcast %cst_113 : f32 to vector<16x1536xf32>
    %299 = arith.mulf %298, %297 : vector<16x1536xf32>
    %300 = arith.mulf %287, %299 : vector<16x1536xf32>
    %301 = arith.truncf %300 : vector<16x1536xf32> to vector<16x1536xbf16>
    %c0_114 = arith.constant 0 : index
    %c0_115 = arith.constant 0 : index
    %c0_116 = arith.constant 0 : index
    %302 = vector.load %arg13[%c0_114, %c0_115, %c0_116] : memref<1x1536x384xbf16, #tpu.memory_space<vmem>>, vector<1x1536x384xbf16>
    %303 = vector.shape_cast %302 : vector<1x1536x384xbf16> to vector<1536x384xbf16>
    %cst_117 = arith.constant dense<0.000000e+00> : vector<16x384xf32>
    %304 = tpu.matmul %301, %303, %cst_117 {dimension_numbers = #tpu.dot_dimension_numbers<[1], [0], [0], [1], [0, 0, 1, 1], [], []>} : vector<16x1536xbf16>, vector<1536x384xbf16>, vector<16x384xf32> -> vector<16x384xf32>
    %c0_118 = arith.constant 0 : index
    %c0_119 = arith.constant 0 : index
    %c0_120 = arith.constant 0 : index
    %305 = vector.load %arg14[%c0_118, %c0_119, %c0_120] : memref<1x1x384xf32, #tpu.memory_space<vmem>>, vector<1x1x384xf32>
    %306 = vector.shape_cast %305 : vector<1x1x384xf32> to vector<1x384xf32>
    %307 = vector.broadcast %306 : vector<1x384xf32> to vector<16x384xf32>
    %308 = arith.addf %304, %307 : vector<16x384xf32>
    %309 = arith.addf %308, %279 : vector<16x384xf32>
    %c0_121 = arith.constant 0 : index
    %c0_122 = arith.constant 0 : index
    %c0_123 = arith.constant 0 : index
    %310 = vector.load %arg15[%c0_121, %c0_122, %c0_123] : memref<1x1x384xf32, #tpu.memory_space<vmem>>, vector<1x1x384xf32>
    %311 = vector.shape_cast %310 : vector<1x1x384xf32> to vector<1x384xf32>
    %c0_124 = arith.constant 0 : index
    %c0_125 = arith.constant 0 : index
    %c0_126 = arith.constant 0 : index
    %312 = vector.load %arg16[%c0_124, %c0_125, %c0_126] : memref<1x1x384xf32, #tpu.memory_space<vmem>>, vector<1x1x384xf32>
    %313 = vector.shape_cast %312 : vector<1x1x384xf32> to vector<1x384xf32>
    %cst_127 = arith.constant dense<0.000000e+00> : vector<16xf32>
    %314 = vector.multi_reduction <add>, %309, %cst_127 [1] : vector<16x384xf32> to vector<16xf32>
    %315 = vector.shape_cast %314 : vector<16xf32> to vector<16x1xf32>
    %cst_128 = arith.constant 3.840000e+02 : f32
    %316 = vector.broadcast %cst_128 : f32 to vector<16x1xf32>
    %317 = arith.divf %315, %316 : vector<16x1xf32>
    %318 = vector.broadcast %317 : vector<16x1xf32> to vector<16x384xf32>
    %319 = arith.subf %309, %318 : vector<16x384xf32>
    %320 = arith.mulf %319, %319 : vector<16x384xf32>
    %cst_129 = arith.constant dense<0.000000e+00> : vector<16xf32>
    %321 = vector.multi_reduction <add>, %320, %cst_129 [1] : vector<16x384xf32> to vector<16xf32>
    %322 = vector.shape_cast %321 : vector<16xf32> to vector<16x1xf32>
    %cst_130 = arith.constant 3.840000e+02 : f32
    %323 = vector.broadcast %cst_130 : f32 to vector<16x1xf32>
    %324 = arith.divf %322, %323 : vector<16x1xf32>
    %325 = vector.broadcast %317 : vector<16x1xf32> to vector<16x384xf32>
    %326 = arith.subf %309, %325 : vector<16x384xf32>
    %cst_131 = arith.constant 9.99999996E-13 : f32
    %327 = vector.broadcast %cst_131 : f32 to vector<16x1xf32>
    %328 = arith.addf %324, %327 : vector<16x1xf32>
    %329 = math.rsqrt %328 : vector<16x1xf32>
    %330 = vector.broadcast %329 : vector<16x1xf32> to vector<16x384xf32>
    %331 = arith.mulf %326, %330 : vector<16x384xf32>
    %332 = vector.broadcast %311 : vector<1x384xf32> to vector<16x384xf32>
    %333 = arith.mulf %331, %332 : vector<16x384xf32>
    %334 = vector.broadcast %313 : vector<1x384xf32> to vector<16x384xf32>
    %335 = arith.addf %333, %334 : vector<16x384xf32>
    %c0_132 = arith.constant 0 : index
    %c0_133 = arith.constant 0 : index
    %336 = vector.load %arg17[%c0_132, %c0_133] : memref<16x384xf32, #tpu.memory_space<vmem>>, vector<16x384xf32>
    tpu.vector_store %arg17[%c0_132, %c0_133], %335 {strides = array<i32>} : memref<16x384xf32, #tpu.memory_space<vmem>>, vector<16x384xf32>,
    return
  }
  func.func @transform_0(%arg0: i32) -> (i32, i32) {
    %c0_i32 = arith.constant 0 : i32
    %c0_i32_0 = arith.constant 0 : i32
    %c0_i32_1 = arith.constant 0 : i32
    return %c0_i32, %c0_i32_0 : i32, i32
  }
  func.func @transform_1(%arg0: i32) -> (i32, i32) {
    %c0_i32 = arith.constant 0 : i32
    %c0_i32_0 = arith.constant 0 : i32
    %c0_i32_1 = arith.constant 0 : i32
    return %c0_i32, %c0_i32_0 : i32, i32
  }
  func.func @transform_2(%arg0: i32) -> (i32, i32) {
    %c0_i32 = arith.constant 0 : i32
    %c0_i32_0 = arith.constant 0 : i32
    %c0_i32_1 = arith.constant 0 : i32
    return %c0_i32, %c0_i32_0 : i32, i32
  }
  func.func @transform_3(%arg0: i32) -> (i32, i32) {
    %c0_i32 = arith.constant 0 : i32
    %c0_i32_0 = arith.constant 0 : i32
    %c0_i32_1 = arith.constant 0 : i32
    return %c0_i32, %c0_i32_0 : i32, i32
  }
  func.func @transform_4(%arg0: i32) -> (i32, i32, i32) {
    %c0_i32 = arith.constant 0 : i32
    %c0_i32_0 = arith.constant 0 : i32
    %c0_i32_1 = arith.constant 0 : i32
    return %arg0, %c0_i32, %c0_i32_0 : i32, i32, i32
  }
  func.func @transform_5(%arg0: i32) -> (i32, i32, i32) {
    %c0_i32 = arith.constant 0 : i32
    %c0_i32_0 = arith.constant 0 : i32
    %c0_i32_1 = arith.constant 0 : i32
    return %arg0, %c0_i32, %c0_i32_0 : i32, i32, i32
  }
  func.func @transform_6(%arg0: i32) -> (i32, i32, i32) {
    %c0_i32 = arith.constant 0 : i32
    %c0_i32_0 = arith.constant 0 : i32
    %c0_i32_1 = arith.constant 0 : i32
    return %arg0, %c0_i32, %c0_i32_0 : i32, i32, i32
  }
  func.func @transform_7(%arg0: i32) -> (i32, i32, i32) {
    %c0_i32 = arith.constant 0 : i32
    %c0_i32_0 = arith.constant 0 : i32
    %c0_i32_1 = arith.constant 0 : i32
    return %arg0, %c0_i32, %c0_i32_0 : i32, i32, i32
  }
  func.func @transform_8(%arg0: i32) -> (i32, i32, i32) {
    %c0_i32 = arith.constant 0 : i32
    %c0_i32_0 = arith.constant 0 : i32
    %c0_i32_1 = arith.constant 0 : i32
    return %arg0, %c0_i32, %c0_i32_0 : i32, i32, i32
  }
  func.func @transform_9(%arg0: i32) -> (i32, i32, i32) {
    %c0_i32 = arith.constant 0 : i32
    %c0_i32_0 = arith.constant 0 : i32
    %c0_i32_1 = arith.constant 0 : i32
    return %arg0, %c0_i32, %c0_i32_0 : i32, i32, i32
  }
  func.func @transform_10(%arg0: i32) -> (i32, i32, i32) {
    %c0_i32 = arith.constant 0 : i32
    %c0_i32_0 = arith.constant 0 : i32
    %c0_i32_1 = arith.constant 0 : i32
    return %arg0, %c0_i32, %c0_i32_0 : i32, i32, i32
  }
  func.func @transform_11(%arg0: i32) -> (i32, i32, i32) {
    %c0_i32 = arith.constant 0 : i32
    %c0_i32_0 = arith.constant 0 : i32
    %c0_i32_1 = arith.constant 0 : i32
    return %arg0, %c0_i32, %c0_i32_0 : i32, i32, i32
  }
  func.func @transform_12(%arg0: i32) -> (i32, i32, i32) {
    %c0_i32 = arith.constant 0 : i32
    %c0_i32_0 = arith.constant 0 : i32
    %c0_i32_1 = arith.constant 0 : i32
    return %arg0, %c0_i32, %c0_i32_0 : i32, i32, i32
  }
  func.func @transform_13(%arg0: i32) -> (i32, i32, i32) {
    %c0_i32 = arith.constant 0 : i32
    %c0_i32_0 = arith.constant 0 : i32
    %c0_i32_1 = arith.constant 0 : i32
    return %arg0, %c0_i32, %c0_i32_0 : i32, i32, i32
  }
  func.func @transform_14(%arg0: i32) -> (i32, i32, i32) {
    %c0_i32 = arith.constant 0 : i32
    %c0_i32_0 = arith.constant 0 : i32
    %c0_i32_1 = arith.constant 0 : i32
    return %arg0, %c0_i32, %c0_i32_0 : i32, i32, i32
  }
  func.func @transform_15(%arg0: i32) -> (i32, i32, i32) {
    %c0_i32 = arith.constant 0 : i32
    %c0_i32_0 = arith.constant 0 : i32
    %c0_i32_1 = arith.constant 0 : i32
    return %arg0, %c0_i32, %c0_i32_0 : i32, i32, i32
  }
  func.func @transform_16(%arg0: i32) -> (i32, i32) {
    %c0_i32 = arith.constant 0 : i32
    %c0_i32_0 = arith.constant 0 : i32
    %c0_i32_1 = arith.constant 0 : i32
    return %c0_i32, %c0_i32_0 : i32, i32
  }
}

</mosaic_0001>

<bundles_post_ra>
// kernel: clit_forward.3
= control target key start
LH: loop header
LB: loop body
LE: loop exit
PB: predicated region body
PF: predicated region fallthrough
CT: control target
= control target key end

     0   :  { %s2001_s0 = inlined_call_operand.vmem [shape: f32[2,384], index: 0, kind: input, shape index: {}]   ;;  %s2002_s1 = inlined_call_operand.hbm [shape: bf16[384,384], index: 1, kind: input, shape index: {}]   ;;  %s2003_s2 = inlined_call_operand.vmem [shape: f32[1,384], index: 2, kind: input, shape index: {}, may-alias: {2,4}]   ;;  %s2004_s3 = inlined_call_operand.vmem [shape: f32[1,384], index: 3, kind: input, shape index: {}]   ;;  %s2005_s4 = inlined_call_operand.vmem [shape: f32[1,384], index: 4, kind: input, shape index: {}, may-alias: {2,4}]   ;;  %s2006_s5 = inlined_call_operand.hbm [shape: bf16[384,192], index: 5, kind: input, shape index: {}]   ;;  %s2007_s6 = inlined_call_operand.vmem [shape: f32[1,192], index: 6, kind: input, shape index: {}]   ;;  %s2008_s7 = inlined_call_operand.hbm [shape: f32[1,192], index: 7, kind: input, shape index: {}]   ;;  %s2009_s8 = inlined_call_operand.<no memory space> [shape: f32[1,1], index: 8, kind: input, shape index: {}]   ;;  %s2010_s9 = inlined_call_operand.vmem [shape: f32[2,1], index: 9, kind: output, shape index: {}]  }
   0x1   :  { %v14_v0 = vstv %s2009_s8 }
   0x2   :  { %15 = vst [vmem:[#allocation2] sm:$0x1] %v14_v0 }
   0x3   :  { %16 = vsyncpa [#allocation4], 0 }
   0x4   :  { %17 = vsyncpa [#allocation6], 0  ;;  %s43_s13 = sshll.u32 %s2006_s5, 4  ;;  %s1864_s14 = smov [#allocation5]   ;;  %s44_s13 = int_to_ptr.hbm [resolvable:$true] %s43_s13 }
   0x5   :  { %s45_s15 = sshll.u32 %s1864_s14, 4  ;;  %s24_s18 = sshll.u32 %s2002_s1, 4  ;;  %s46_s15 = int_to_ptr.vmem [resolvable:$true] %s45_s15  ;;  %s25_s18 = int_to_ptr.hbm [resolvable:$true] %s24_s18 }
   0x6   :  { %s1865_s19 = smov 128   ;;  %s1866_s20 = smov 8  }
   0x7   :  { %51 = dma.hbm_to_vmem [thread:$0]  %s44_s13, 6144, %s46_s15, [#allocation6], %s1865_s19, %s1865_s19, %s1866_s20  }
   0x8   :  { %s1867_s8 = smov [#allocation3]   ;;  %s1868_s22 = smov 192  }
   0x9   :  { %s26_s21 = sshll.u32 %s1867_s8, 4  ;;  %s1869_s23 = smov 12   ;;  %s27_s21 = int_to_ptr.vmem [resolvable:$true] %s26_s21 }
   0xa   :  { %32 = dma.hbm_to_vmem [thread:$0]  %s25_s18, 9216, %s27_s21, [#allocation4], %s1868_s22, %s1868_s22, %s1869_s23  }
   0xb   :  { %s59_s25 = sshll.u32 %s2008_s7, 4  ;;  %s1870_s26 = smov [#allocation7]   ;;  %s60_s25 = int_to_ptr.hbm [resolvable:$true] %s59_s25 }
   0xc   :  { %s61_s27 = sshll.u32 %s1870_s26, 4  ;;  %s62_s27 = int_to_ptr.vmem [resolvable:$true] %s61_s27 }
   0xd   :  { %64 = dma.hbm_to_vmem [thread:$0]  %s60_s25, 32, %s62_s27, [#allocation6]  }
   0xe   :  { %1860 = dma.done.wait [#allocation4], 9216  }
   0xf   :  { %1861 = vsyncadd [#allocation4], 4294958080 }
  0x10   :  { %1862 = dma.done.wait [#allocation6], 6176  }
  0x11   :  { %1863 = vsyncadd [#allocation6], 4294961120  ;;  %v1255_v1 = vld [vmem:[#allocation3 + $0xa8] sm:$0xf]  ;;  %v1671_v2 = vld [vmem:[#allocation3 + $0xb0] sm:$0xf0] }
  0x12   :  { %v1351_v3 = vld [vmem:[#allocation3 + $0x168] sm:$0xf]  ;;  %v1256_v4 = vor.u32 %v1671_v2, %v1255_v1  ;;  %v1695_v5 = vld [vmem:[#allocation3 + $0x170] sm:$0xf0]  ;;  %v1243_v6 = vld [vmem:[#allocation3 + $0x90] sm:$0xf] }
  0x13   :  { %v1668_v7 = vld [vmem:[#allocation3 + $0x98] sm:$0xf0]  ;;  %v1352_v8 = vor.u32 %v1695_v5, %v1351_v3  ;;  %v1339_v9 = vld [vmem:[#allocation3 + $0x150] sm:$0xf]  ;;  %v1231_v12 = vld [vmem:[#allocation3 + $0x78] sm:$0xf] }
  0x14   :  { %v1692_v10 = vld [vmem:[#allocation3 + $0x158] sm:$0xf0]  ;;  %579 = vmatpush.bf16.msra.mxu0 %v1256_v4  ;;  %v1244_v11 = vor.u32 %v1668_v7, %v1243_v6  ;;  %v1665_v13 = vld [vmem:[#allocation3 + $0x80] sm:$0xf0]  ;;  %v1327_v15 = vld [vmem:[#allocation3 + $0x138] sm:$0xf] }
  0x15   :  { %592 = vmatpush.bf16.msra.mxu1 %v1352_v8  ;;  %v1340_v14 = vor.u32 %v1692_v10, %v1339_v9  ;;  %v1447_v16 = vld [vmem:[#allocation3 + $0x228] sm:$0xf]  ;;  %v1719_v17 = vld [vmem:[#allocation3 + $0x230] sm:$0xf0]  ;;  %v1689_v18 = vld [vmem:[#allocation3 + $0x140] sm:$0xf0]  ;;  %v1232_v24 = vor.u32 %v1665_v13, %v1231_v12 }
  0x16   :  { %v1448_v19 = vor.u32 %v1719_v17, %v1447_v16  ;;  %v1670_v20 = vld [vmem:[#allocation3 + $0xac] sm:$0xf]  ;;  %v1257_v21 = vld [vmem:[#allocation3 + $0xb4] sm:$0xf0]  ;;  %v1435_v23 = vld [vmem:[#allocation3 + $0x210] sm:$0xf]  ;;  %v1328_v28 = vor.u32 %v1689_v18, %v1327_v15 }
  0x17   :  { %v1260_v22 = vor.u32 %v1670_v20, %v1257_v21  ;;  %v1219_v25 = vld [vmem:[#allocation3 + $0x60] sm:$0xf]  ;;  %v1662_v26 = vld [vmem:[#allocation3 + $0x68] sm:$0xf0]  ;;  %v1716_v27 = vld [vmem:[#allocation3 + $0x218] sm:$0xf0] }
  0x18   :  { %580 = vmatpush.bf16.msra.mxu0 %v1244_v11  ;;  %605 = vmatpush.bf16.msra.mxu2 %v1448_v19  ;;  %v1315_v29 = vld [vmem:[#allocation3 + $0x120] sm:$0xf]  ;;  %v1436_v30 = vor.u32 %v1716_v27, %v1435_v23  ;;  %v1667_v31 = vld [vmem:[#allocation3 + $0x94] sm:$0xf]  ;;  %v1686_v33 = vld [vmem:[#allocation3 + $0x128] sm:$0xf0]  ;;  %v1220_v38 = vor.u32 %v1662_v26, %v1219_v25 }
  0x19   :  { %593 = vmatpush.bf16.msra.mxu1 %v1340_v14  ;;  %618 = vmatpush.bf16.msra.mxu3 %v1260_v22  ;;  %v1245_v32 = vld [vmem:[#allocation3 + $0x9c] sm:$0xf0]  ;;  %v1423_v35 = vld [vmem:[#allocation3 + $0x1f8] sm:$0xf]  ;;  %v1713_v36 = vld [vmem:[#allocation3 + $0x200] sm:$0xf0]  ;;  %v1316_v43 = vor.u32 %v1686_v33, %v1315_v29 }
  0x1a   :  { %v1248_v34 = vor.u32 %v1667_v31, %v1245_v32  ;;  %v1664_v37 = vld [vmem:[#allocation3 + $0x7c] sm:$0xf]  ;;  %v1207_v39 = vld [vmem:[#allocation3 + $0x48] sm:$0xf]  ;;  %v1659_v40 = vld [vmem:[#allocation3 + $0x50] sm:$0xf0]  ;;  %v1424_v41 = vor.u32 %v1713_v36, %v1423_v35 }
  0x1b   :  { %v1233_v42 = vld [vmem:[#allocation3 + $0x84] sm:$0xf0]  ;;  %v1411_v46 = vld [vmem:[#allocation3 + $0x1e0] sm:$0xf]  ;;  %v1710_v47 = vld [vmem:[#allocation3 + $0x1e8] sm:$0xf0]  ;;  %v1208_v51 = vor.u32 %v1659_v40, %v1207_v39 }
  0x1c   :  { %581 = vmatpush.bf16.msra.mxu0 %v1232_v24  ;;  %606 = vmatpush.bf16.msra.mxu2 %v1436_v30  ;;  %v1303_v44 = vld [vmem:[#allocation3 + $0x108] sm:$0xf]  ;;  %v1236_v45 = vor.u32 %v1664_v37, %v1233_v42  ;;  %v1683_v48 = vld [vmem:[#allocation3 + $0x110] sm:$0xf0]  ;;  %v1661_v49 = vld [vmem:[#allocation3 + $0x64] sm:$0xf]  ;;  %v1412_v54 = vor.u32 %v1710_v47, %v1411_v46 }
  0x1d   :  { %594 = vmatpush.bf16.msra.mxu1 %v1328_v28  ;;  %619 = vmatpush.bf16.msra.mxu3 %v1248_v34  ;;  %v1221_v50 = vld [vmem:[#allocation3 + $0x6c] sm:$0xf0]  ;;  %v1656_v53 = vld [vmem:[#allocation3 + $0x38] sm:$0xf0]  ;;  %v1304_v55 = vor.u32 %v1683_v48, %v1303_v44  ;;  %v1399_v58 = vld [vmem:[#allocation3 + $0x1c8] sm:$0xf] }
  0x1e   :  { %v1195_v52 = vld [vmem:[#allocation3 + $0x30] sm:$0xf]  ;;  %v1224_v57 = vor.u32 %v1661_v49, %v1221_v50  ;;  %v1707_v59 = vld [vmem:[#allocation3 + $0x1d0] sm:$0xf0]  ;;  %v1680_v60 = vld [vmem:[#allocation3 + $0xf8] sm:$0xf0] }
  0x1f   :  { %v1291_v56 = vld [vmem:[#allocation3 + $0xf0] sm:$0xf]  ;;  %v1658_v61 = vld [vmem:[#allocation3 + $0x4c] sm:$0xf]  ;;  %v1209_v62 = vld [vmem:[#allocation3 + $0x54] sm:$0xf0]  ;;  %v1196_v63 = vor.u32 %v1656_v53, %v1195_v52  ;;  %v1400_v2 = vor.u32 %v1707_v59, %v1399_v58 }
  0x20   :  { %582 = vmatpush.bf16.msra.mxu0 %v1220_v38  ;;  %607 = vmatpush.bf16.msra.mxu2 %v1424_v41  ;;  %v1183_v0 = vld [vmem:[#allocation3 + $0x18] sm:$0xf]  ;;  %v1653_v1 = vld [vmem:[#allocation3 + $0x20] sm:$0xf0]  ;;  %v1292_v3 = vor.u32 %v1680_v60, %v1291_v56  ;;  %v1212_v5 = vor.u32 %v1658_v61, %v1209_v62  ;;  %v1387_v6 = vld [vmem:[#allocation3 + $0x1b0] sm:$0xf] }
  0x21   :  { %595 = vmatpush.bf16.msra.mxu1 %v1316_v43  ;;  %620 = vmatpush.bf16.msra.mxu3 %v1236_v45  ;;  %v1279_v4 = vld [vmem:[#allocation3 + $0xd8] sm:$0xf]  ;;  %v1704_v7 = vld [vmem:[#allocation3 + $0x1b8] sm:$0xf0]  ;;  %v1677_v8 = vld [vmem:[#allocation3 + $0xe0] sm:$0xf0]  ;;  %v1184_v11 = vor.u32 %v1653_v1, %v1183_v0 }
  0x22   :  { %v1655_v9 = vld [vmem:[#allocation3 + $0x34] sm:$0xf]  ;;  %v1197_v10 = vld [vmem:[#allocation3 + $0x3c] sm:$0xf0]  ;;  %v1650_v13 = vld [vmem:[#allocation3 + $0x8] sm:$0xf0]  ;;  %v1388_v15 = vor.u32 %v1704_v7, %v1387_v6  ;;  %v1280_v16 = vor.u32 %v1677_v8, %v1279_v4 }
  0x23   :  { %v1171_v12 = vld [vmem:[#allocation3] sm:$0xf]  ;;  %v1694_v14 = vld [vmem:[#allocation3 + $0x16c] sm:$0xf]  ;;  %v1353_v17 = vld [vmem:[#allocation3 + $0x174] sm:$0xf0]  ;;  %v1200_v18 = vor.u32 %v1655_v9, %v1197_v10 }
  0x24   :  { %583 = vmatpush.bf16.msra.mxu0 %v1208_v51  ;;  %608 = vmatpush.bf16.msra.mxu2 %v1412_v54  ;;  %v1375_v19 = vld [vmem:[#allocation3 + $0x198] sm:$0xf]  ;;  %v1701_v20 = vld [vmem:[#allocation3 + $0x1a0] sm:$0xf0]  ;;  %v1267_v21 = vld [vmem:[#allocation3 + $0xc0] sm:$0xf]  ;;  %v1172_v27 = vor.u32 %v1650_v13, %v1171_v12  ;;  %v1356_v31 = vor.u32 %v1694_v14, %v1353_v17 }
  0x25   :  { %596 = vmatpush.bf16.msra.mxu1 %v1304_v55  ;;  %621 = vmatpush.bf16.msra.mxu3 %v1224_v57  ;;  %v1674_v22 = vld [vmem:[#allocation3 + $0xc8] sm:$0xf0]  ;;  %v1449_v24 = vld [vmem:[#allocation3 + $0x234] sm:$0xf0]  ;;  %v1652_v25 = vld [vmem:[#allocation3 + $0x1c] sm:$0xf]  ;;  %v1376_v30 = vor.u32 %v1701_v20, %v1375_v19 }
  0x26   :  { %v1718_v23 = vld [vmem:[#allocation3 + $0x22c] sm:$0xf]  ;;  %v1185_v26 = vld [vmem:[#allocation3 + $0x24] sm:$0xf0]  ;;  %v1691_v28 = vld [vmem:[#allocation3 + $0x154] sm:$0xf]  ;;  %v1268_v32 = vor.u32 %v1674_v22, %v1267_v21 }
  0x27   :  { %v1341_v29 = vld [vmem:[#allocation3 + $0x15c] sm:$0xf0]  ;;  %v1715_v33 = vld [vmem:[#allocation3 + $0x214] sm:$0xf]  ;;  %v1698_v35 = vld [vmem:[#allocation3 + $0x188] sm:$0xf0]  ;;  %v1452_v37 = vor.u32 %v1718_v23, %v1449_v24  ;;  %v1188_v38 = vor.u32 %v1652_v25, %v1185_v26 }
  0x28   :  { %584 = vmatpush.bf16.msra.mxu0 %v1196_v63  ;;  %609 = vmatpush.bf16.msra.mxu2 %v1400_v2  ;;  %v1363_v34 = vld [vmem:[#allocation3 + $0x180] sm:$0xf]  ;;  %v79_v36 = vld [vmem:[%s2001_s0] sm:$0x3f]  ;;  %v1263_v39 = vld [vmem:[#allocation3 + $0xb0] sm:$0xf]  ;;  %v1344_v47 = vor.u32 %v1691_v28, %v1341_v29 }
  0x29   :  { %597 = vmatpush.bf16.msra.mxu1 %v1292_v3  ;;  %622 = vmatpush.bf16.msra.mxu3 %v1212_v5  ;;  %v1672_v40 = vld [vmem:[#allocation3 + $0xb8] sm:$0xf0]  ;;  %81 = vst [vmem:[#allocation1] ss:$4 sm:$0xff] %v79_v36  ;;  %v1437_v41 = vld [vmem:[#allocation3 + $0x21c] sm:$0xf0]  ;;  %v1364_v44 = vor.u32 %v1698_v35, %v1363_v34 }
  0x2a   :  { %v1649_v42 = vld [vmem:[#allocation3 + $0x4] sm:$0xf]  ;;  %v1173_v43 = vld [vmem:[#allocation3 + $0xc] sm:$0xf0]  ;;  %v1696_v46 = vld [vmem:[#allocation3 + $0x178] sm:$0xf0]  ;;  %v1264_v49 = vor.u32 %v1672_v40, %v1263_v39  ;;  %v1440_v50 = vor.u32 %v1715_v33, %v1437_v41 }
  0x2b   :  { %v1359_v45 = vld [vmem:[#allocation3 + $0x170] sm:$0xf]  ;;  %v1688_v48 = vld [vmem:[#allocation3 + $0x13c] sm:$0xf]  ;;  %v1329_v51 = vld [vmem:[#allocation3 + $0x144] sm:$0xf0]  ;;  %v1176_v52 = vor.u32 %v1649_v42, %v1173_v43 }
  0x2c   :  { %585 = vmatpush.bf16.msra.mxu0 %v1184_v11  ;;  %610 = vmatpush.bf16.msra.mxu2 %v1388_v15  ;;  %v1251_v53 = vld [vmem:[#allocation3 + $0x98] sm:$0xf]  ;;  %v1669_v54 = vld [vmem:[#allocation3 + $0xa0] sm:$0xf0]  ;;  %v1712_v55 = vld [vmem:[#allocation3 + $0x1fc] sm:$0xf]  ;;  %v1360_v57 = vor.u32 %v1696_v46, %v1359_v45  ;;  %v1332_v63 = vor.u32 %v1688_v48, %v1329_v51 }
  0x2d   :  { %598 = vmatpush.bf16.msra.mxu1 %v1280_v16  ;;  %623 = vmatpush.bf16.msra.mxu3 %v1200_v18  ;;  %v1425_v56 = vld [vmem:[#allocation3 + $0x204] sm:$0xf0]  ;;  %v1685_v58 = vld [vmem:[#allocation3 + $0x124] sm:$0xf]  ;;  %v1317_v59 = vld [vmem:[#allocation3 + $0x12c] sm:$0xf0]  ;;  %v1252_v1 = vor.u32 %v1669_v54, %v1251_v53 }
  0x2e   :  { %v1347_v60 = vld [vmem:[#allocation3 + $0x158] sm:$0xf]  ;;  %v1693_v61 = vld [vmem:[#allocation3 + $0x160] sm:$0xf0]  ;;  %v1239_v62 = vld [vmem:[#allocation3 + $0x80] sm:$0xf]  ;;  %v1428_v3 = vor.u32 %v1712_v55, %v1425_v56  ;;  %v1320_v14 = vor.u32 %v1685_v58, %v1317_v59 }
  0x2f   :  { %v1666_v6 = vld [vmem:[#allocation3 + $0x88] sm:$0xf0]  ;;  %v1709_v8 = vld [vmem:[#allocation3 + $0x1e4] sm:$0xf]  ;;  %v1413_v9 = vld [vmem:[#allocation3 + $0x1ec] sm:$0xf0]  ;;  %v1348_v10 = vor.u32 %v1693_v61, %v1347_v60 }
  0x30   :  { %586 = vmatpush.bf16.msra.mxu0 %v1172_v27  ;;  %611 = vmatpush.bf16.msra.mxu2 %v1376_v30  ;;  %v82_v0 = vld.sshfl [vmem:[#allocation1] sm:$0xff pattern:$0x73625140]  ;;  %v83_v2 = vld.sshfl [vmem:[#allocation1 + $0x8] sm:$0xff pattern:$0x73625140]  ;;  %v1240_v16 = vor.u32 %v1666_v6, %v1239_v62  ;;  %v1416_v17 = vor.u32 %v1709_v8, %v1413_v9 }
  0x31   :  { %599 = vmatpush.bf16.msra.mxu1 %v1268_v32  ;;  %624 = vmatpush.bf16.msra.mxu3 %v1188_v38  ;;  %v1937_v4 = vpack.c.bf16 %v82_v0, %v82_v0  ;;  %v1939_v5 = vpack.c.bf16 %v83_v2, %v83_v2  ;;  %v84_v7 = vld.sshfl [vmem:[#allocation1 + $0x10] sm:$0xff pattern:$0x73625140]  ;;  %v1335_v12 = vld [vmem:[#allocation3 + $0x140] sm:$0xf]  ;;  %vm701_vm0 = vcmask 1041408  }
  0x32   :  { %v1941_v11 = vpack.c.bf16 %v84_v7, %v84_v7  ;;  %v1690_v13 = vld [vmem:[#allocation3 + $0x148] sm:$0xf0]  ;;  %v1305_v18 = vld [vmem:[#allocation3 + $0x114] sm:$0xf0]  ;;  %v1227_v19 = vld [vmem:[#allocation3 + $0x68] sm:$0xf] }
  0x33   :  { %587 = vmatmul.bf16.vlgmr.msra.gmra.mxu0 %v1937_v4  ;;  %v1682_v15 = vld [vmem:[#allocation3 + $0x10c] sm:$0xf]  ;;  %v1663_v20 = vld [vmem:[#allocation3 + $0x70] sm:$0xf0]  ;;  %v1401_v22 = vld [vmem:[#allocation3 + $0x1d4] sm:$0xf0]  ;;  %v1336_v23 = vor.u32 %v1690_v13, %v1335_v12 }
  0x34   :  { %631 = vmatpush.bf16.msrb.mxu0 %v1356_v31  ;;  %612 = vmatpush.bf16.msra.mxu2 %v1364_v44  ;;  %v1706_v21 = vld [vmem:[#allocation3 + $0x1cc] sm:$0xf]  ;;  %v1323_v24 = vld [vmem:[#allocation3 + $0x128] sm:$0xf]  ;;  %v1687_v25 = vld [vmem:[#allocation3 + $0x130] sm:$0xf0]  ;;  %v1308_v26 = vor.u32 %v1682_v15, %v1305_v18  ;;  %v1228_v28 = vor.u32 %v1663_v20, %v1227_v19 }
  0x35   :  { %644 = vmatpush.bf16.msrb.mxu1 %v1452_v37  ;;  %625 = vmatpush.bf16.msra.mxu3 %v1176_v52  ;;  %v1679_v27 = vld [vmem:[#allocation3 + $0xf4] sm:$0xf]  ;;  %v1404_v29 = vor.u32 %v1706_v21, %v1401_v22  ;;  %v1293_v30 = vld [vmem:[#allocation3 + $0xfc] sm:$0xf0]  ;;  %v1215_v31 = vld [vmem:[#allocation3 + $0x50] sm:$0xf]  ;;  %v1324_v35 = vor.u32 %v1687_v25, %v1323_v24 }
  0x36   :  { %600 = vmatmul.bf16.vlgmr.msra.gmra.mxu1 %v1939_v5  ;;  %v1660_v32 = vld [vmem:[#allocation3 + $0x58] sm:$0xf0]  ;;  %v1703_v33 = vld [vmem:[#allocation3 + $0x1b4] sm:$0xf]  ;;  %v1389_v34 = vld [vmem:[#allocation3 + $0x1bc] sm:$0xf0]  ;;  %v1296_v38 = vor.u32 %v1679_v27, %v1293_v30 }
  0x37   :  { %613 = vmatmul.bf16.vlgmr.msra.gmra.mxu2 %v1941_v11  ;;  %v1311_v36 = vld [vmem:[#allocation3 + $0x110] sm:$0xf]  ;;  %v1684_v37 = vld [vmem:[#allocation3 + $0x118] sm:$0xf0]  ;;  %v1281_v40 = vld [vmem:[#allocation3 + $0xe4] sm:$0xf0]  ;;  %v1216_v41 = vor.u32 %v1660_v32, %v1215_v31  ;;  %v1392_v42 = vor.u32 %v1703_v33, %v1389_v34 }
  0x38   :  { %632 = vmatpush.bf16.msrb.mxu0 %v1344_v47  ;;  %657 = vmatpush.bf16.msrb.mxu2 %v1264_v49  ;;  %v1676_v39 = vld [vmem:[#allocation3 + $0xdc] sm:$0xf]  ;;  %v1203_v43 = vld [vmem:[#allocation3 + $0x38] sm:$0xf]  ;;  %v1657_v44 = vld [vmem:[#allocation3 + $0x40] sm:$0xf0]  ;;  %v1312_v47 = vor.u32 %v1684_v37, %v1311_v36 }
  0x39   :  { %645 = vmatpush.bf16.msrb.mxu1 %v1440_v50  ;;  %670 = vmatpush.bf16.msrb.mxu3 %v1360_v57  ;;  %v1700_v45 = vld [vmem:[#allocation3 + $0x19c] sm:$0xf]  ;;  %v1377_v46 = vld [vmem:[#allocation3 + $0x1a4] sm:$0xf0]  ;;  %v1299_v48 = vld [vmem:[#allocation3 + $0xf8] sm:$0xf]  ;;  %v1284_v50 = vor.u32 %v1676_v39, %v1281_v40  ;;  %v1204_v53 = vor.u32 %v1657_v44, %v1203_v43 }
  0x3a   :  { %626 = vmatmul.bf16.vlgmr.msra.gmra.mxu3 %v1937_v4  ;;  %v1681_v49 = vld [vmem:[#allocation3 + $0x100] sm:$0xf0]  ;;  %v1269_v52 = vld [vmem:[#allocation3 + $0xcc] sm:$0xf0]  ;;  %v1380_v54 = vor.u32 %v1700_v45, %v1377_v46  ;;  %v1191_v56 = vld [vmem:[#allocation3 + $0x20] sm:$0xf] }
  0x3b   :  { %v1673_v51 = vld [vmem:[#allocation3 + $0xc4] sm:$0xf]  ;;  %v1455_v55 = vld [vmem:[#allocation3 + $0x230] sm:$0xf]  ;;  %v1654_v57 = vld [vmem:[#allocation3 + $0x28] sm:$0xf0]  ;;  %v1300_v61 = vor.u32 %v1681_v49, %v1299_v48 }
  0x3c   :  { %633 = vmatpush.bf16.msrb.mxu0 %v1332_v63  ;;  %658 = vmatpush.bf16.msrb.mxu2 %v1252_v1  ;;  %v1720_v58 = vld [vmem:[#allocation3 + $0x238] sm:$0xf0]  ;;  %v1697_v59 = vld [vmem:[#allocation3 + $0x184] sm:$0xf]  ;;  %v1365_v60 = vld [vmem:[#allocation3 + $0x18c] sm:$0xf0]  ;;  %v1272_v0 = vor.u32 %v1673_v51, %v1269_v52  ;;  %v1192_v1 = vor.u32 %v1654_v57, %v1191_v56 }
  0x3d   :  { %646 = vmatpush.bf16.msrb.mxu1 %v1428_v3  ;;  %671 = vmatpush.bf16.msrb.mxu3 %v1348_v10  ;;  %v1287_v62 = vld [vmem:[#allocation3 + $0xe0] sm:$0xf]  ;;  %v1678_v63 = vld [vmem:[#allocation3 + $0xe8] sm:$0xf0]  ;;  %v1456_v2 = vor.u32 %v1720_v58, %v1455_v55  ;;  %v1368_v3 = vor.u32 %v1697_v59, %v1365_v60  ;;  %v1179_v6 = vld [vmem:[#allocation3 + $0x8] sm:$0xf] }
  0x3e   :  { %v1651_v7 = vld [vmem:[#allocation3 + $0x10] sm:$0xf0]  ;;  %v1443_v8 = vld [vmem:[#allocation3 + $0x218] sm:$0xf]  ;;  %v1717_v9 = vld [vmem:[#allocation3 + $0x220] sm:$0xf0]  ;;  %v1288_v10 = vor.u32 %v1678_v63, %v1287_v62 }
  0x3f   :  { %v1275_v12 = vld [vmem:[#allocation3 + $0xc8] sm:$0xf]  ;;  %v1675_v13 = vld [vmem:[#allocation3 + $0xd0] sm:$0xf0]  ;;  %v1444_v15 = vor.u32 %v1717_v9, %v1443_v8  ;;  %v1708_v24 = vld [vmem:[#allocation3 + $0x1d8] sm:$0xf0] }
  0x40   :  { %634 = vmatpush.bf16.msrb.mxu0 %v1320_v14  ;;  %659 = vmatpush.bf16.msrb.mxu2 %v1240_v16  ;;  %v1180_v14 = vor.u32 %v1651_v7, %v1179_v6  ;;  %v1431_v16 = vld [vmem:[#allocation3 + $0x200] sm:$0xf]  ;;  %v1276_v18 = vor.u32 %v1675_v13, %v1275_v12  ;;  %v1419_v20 = vld [vmem:[#allocation3 + $0x1e8] sm:$0xf]  ;;  %v1711_v21 = vld [vmem:[#allocation3 + $0x1f0] sm:$0xf0] }
  0x41   :  { %647 = vmatpush.bf16.msrb.mxu1 %v1416_v17  ;;  %672 = vmatpush.bf16.msrb.mxu3 %v1336_v23  ;;  %v1714_v17 = vld [vmem:[#allocation3 + $0x208] sm:$0xf0]  ;;  %v1420_v22 = vor.u32 %v1711_v21, %v1419_v20  ;;  %v1407_v23 = vld [vmem:[#allocation3 + $0x1d0] sm:$0xf]  ;;  %v1705_v27 = vld [vmem:[#allocation3 + $0x1c0] sm:$0xf0] }
  0x42   :  { %v1432_v19 = vor.u32 %v1714_v17, %v1431_v16  ;;  %v1408_v25 = vor.u32 %v1708_v24, %v1407_v23  ;;  %v1702_v30 = vld [vmem:[#allocation3 + $0x1a8] sm:$0xf0]  ;;  %v1371_v32 = vld [vmem:[#allocation3 + $0x188] sm:$0xf]  ;;  %v1699_v33 = vld [vmem:[#allocation3 + $0x190] sm:$0xf0] }
  0x43   :  { %v187_v43 = vld [vmem:[%s2003_s2] sm:$0x7]  ;;  %v1871_v9 = vmov 384.0   ;;  %v1515_v12 = vld [vmem:[#allocation5 + $0x70] sm:$0xf]  ;;  %vm1151_vm5 = vcmask 517120  }
  0x44   :  { %635 = vmatpush.bf16.msrb.mxu0 %v1308_v26  ;;  %660 = vmatpush.bf16.msrb.mxu2 %v1228_v28  ;;  %v1395_v26 = vld [vmem:[#allocation3 + $0x1b8] sm:$0xf]  ;;  %v189_v45 = vperm.slane %v187_v43, 0  ;;  %v1507_v17 = vld [vmem:[#allocation5 + $0x60] sm:$0xf]  ;;  %vm1161_vm6 = vcmask 1024  }
  0x45   :  { %648 = vmatpush.bf16.msrb.mxu1 %v1404_v29  ;;  %673 = vmatpush.bf16.msrb.mxu3 %v1324_v35  ;;  %v1396_v28 = vor.u32 %v1705_v27, %v1395_v26  ;;  %v1383_v29 = vld [vmem:[#allocation3 + $0x1a0] sm:$0xf]  ;;  %v1736_v13 = vld [vmem:[#allocation5 + $0x74] sm:$0xf0]  ;;  %v1563_v27 = vld [vmem:[#allocation5 + $0xd0] sm:$0xf] }
  0x46   :  { %v1384_v31 = vor.u32 %v1702_v30, %v1383_v29  ;;  %v1752_v16 = vld [vmem:[#allocation5 + $0xf4] sm:$0xf0]  ;;  %v1571_v21 = vld [vmem:[#allocation5 + $0xe0] sm:$0xf]  ;;  %v1643_v29 = vld [vmem:[#allocation5 + $0x170] sm:$0xf] }
  0x47   :  { %v1732_v26 = vld [vmem:[#allocation5 + $0x54] sm:$0xf0] }
  0x48   :  { %636 = vmatpush.bf16.msrb.mxu0 %v1296_v38  ;;  %661 = vmatpush.bf16.msrb.mxu2 %v1216_v41  ;;  %v1768_v30 = vld [vmem:[#allocation5 + $0x174] sm:$0xf0] }
  0x49   :  { %649 = vmatpush.bf16.msrb.mxu1 %v1392_v42  ;;  %674 = vmatpush.bf16.msrb.mxu3 %v1312_v47  ;;  %v190_v47 = vperm.slane %v187_v43, 1 }
  0x4c   :  { %637 = vmatpush.bf16.msrb.mxu0 %v1284_v50  ;;  %662 = vmatpush.bf16.msrb.mxu2 %v1204_v53  ;;  %v191_v53 = vperm.slane %v187_v43, 2 }
  0x4d   :  { %650 = vmatpush.bf16.msrb.mxu1 %v1380_v54  ;;  %675 = vmatpush.bf16.msrb.mxu3 %v1300_v61 }
  0x50   :  { %638 = vmatpush.bf16.msrb.mxu0 %v1272_v0  ;;  %663 = vmatpush.bf16.msrb.mxu2 %v1192_v1 }
  0x51   :  { %651 = vmatpush.bf16.msrb.mxu1 %v1368_v3  ;;  %676 = vmatpush.bf16.msrb.mxu3 %v1288_v10 }
  0x53   :  { %639 = vmatmul.bf16.vlgmr.msrb.gmra.mxu0 %v1939_v5 }
  0x54   :  { %683 = vmatpush.bf16.msra.mxu0 %v1456_v2  ;;  %652 = vmatmul.bf16.vlgmr.msrb.gmra.mxu1 %v1941_v11 }
  0x55   :  { %664 = vmatpush.bf16.msrb.mxu2 %v1180_v14  ;;  %677 = vmatpush.bf16.msrb.mxu3 %v1276_v18  ;;  %v1579_v14 = vld [vmem:[#allocation5 + $0xf0] sm:$0xf]  ;;  %v1734_v18 = vld [vmem:[#allocation5 + $0x64] sm:$0xf0] }
  0x56   :  { %v1580_v20 = vor.u32 %v1752_v16, %v1579_v14  ;;  %v1508_v23 = vor.u32 %v1734_v18, %v1507_v17  ;;  %v1764_v14 = vld [vmem:[#allocation5 + $0x154] sm:$0xf0]  ;;  %v1731_v17 = vld [vmem:[#allocation5 + $0x54] sm:$0xf]  ;;  %v1501_v18 = vld [vmem:[#allocation5 + $0x58] sm:$0xf0] }
  0x58   :  { %684 = vmatpush.bf16.msra.mxu0 %v1444_v15  ;;  %665 = vmatmul.bf16.vlgmr.msrb.gmra.mxu2 %v1937_v4  ;;  %v1372_v4 = vor.u32 %v1699_v33, %v1371_v32  ;;  %v1516_v15 = vor.u32 %v1736_v13, %v1515_v12  ;;  %v1644_v32 = vor.u32 %v1768_v30, %v1643_v29  ;;  %v1735_v33 = vld [vmem:[#allocation5 + $0x74] sm:$0xf]  ;;  %v1742_v12 = vld [vmem:[#allocation5 + $0xa4] sm:$0xf0]  ;;  %v1627_v13 = vld [vmem:[#allocation5 + $0x150] sm:$0xf] }
  0x59   :  { %678 = vmatmul.bf16.vlgmr.msrb.gmra.mxu3 %v1939_v5  ;;  %1075 = vmatpush.bf16.msra.mxu2 %v1580_v20  ;;  %v1628_v16 = vor.u32 %v1764_v14, %v1627_v13  ;;  %v1467_v20 = vld [vmem:[#allocation5 + $0x10] sm:$0xf]  ;;  %v1729_v29 = vld [vmem:[#allocation5 + $0x44] sm:$0xf]  ;;  %v1493_v30 = vld [vmem:[#allocation5 + $0x48] sm:$0xf0] }
  0x5a   :  { %1062 = vmatpush.bf16.msra.mxu1 %v1516_v15  ;;  %1088 = vmatpush.bf16.msra.mxu3 %v1644_v32  ;;  %v1459_v32 = vld [vmem:[#allocation5] sm:$0xf] }
  0x5b   :  { %v1587_v13 = vld [vmem:[#allocation5 + $0x100] sm:$0xf] }
  0x5c   :  { %685 = vmatpush.bf16.msra.mxu0 %v1432_v19 }
  0x5e   :  { %1063 = vmatpush.bf16.msra.mxu1 %v1508_v23 }
  0x60   :  { %686 = vmatpush.bf16.msra.mxu0 %v1420_v22  ;;  %v1750_v22 = vld [vmem:[#allocation5 + $0xe4] sm:$0xf0] }
  0x61   :  { %v1572_v24 = vor.u32 %v1750_v22, %v1571_v21  ;;  %v1724_v21 = vld [vmem:[#allocation5 + $0x14] sm:$0xf0]  ;;  %v1531_v22 = vld [vmem:[#allocation5 + $0x90] sm:$0xf] }
  0x62   :  { %v1468_v23 = vor.u32 %v1724_v21, %v1467_v20  ;;  %v1745_v20 = vld [vmem:[#allocation5 + $0xc4] sm:$0xf]  ;;  %v1557_v21 = vld [vmem:[#allocation5 + $0xc8] sm:$0xf0] }
  0x63   :  { %1076 = vmatpush.bf16.msra.mxu2 %v1572_v24  ;;  %v1740_v24 = vld [vmem:[#allocation5 + $0x94] sm:$0xf0] }
  0x64   :  { %687 = vmatpush.bf16.msra.mxu0 %v1408_v25  ;;  %v1499_v25 = vld [vmem:[#allocation5 + $0x50] sm:$0xf] }
  0x68   :  { %688 = vmatpush.bf16.msra.mxu0 %v1396_v28  ;;  %v1748_v28 = vld [vmem:[#allocation5 + $0xd4] sm:$0xf0] }
  0x6c   :  { %689 = vmatpush.bf16.msra.mxu0 %v1384_v31 }
  0x70   :  { %690 = vmatpush.bf16.msra.mxu0 %v1372_v4  ;;  %v1517_v4 = vld [vmem:[#allocation5 + $0x78] sm:$0xf0] }
  0x73   :  { %691 = vmatmul.bf16.vlgmr.msra.gmra.mxu0 %v1941_v11 }
  0xb0   :  { %v588_v5 = vpop.f32.mrf.mxu0 }
  0xb1   :  { %v589_v49 = vadd.f32 %v588_v5, %v189_v45  ;;  %v1500_v5 = vor.u32 %v1732_v26, %v1499_v25  ;;  %v1619_v25 = vld [vmem:[#allocation5 + $0x140] sm:$0xf]  ;;  %v1762_v26 = vld [vmem:[#allocation5 + $0x144] sm:$0xf0] }
  0xb3   :  { %v601_v34 = vpop.f32.mrf.mxu1  ;;  %1064 = vmatpush.bf16.msra.mxu1 %v1500_v5 }
  0xb4   :  { %v602_v51 = vadd.f32 %v601_v34, %v589_v49  ;;  %v1520_v34 = vor.u32 %v1735_v33, %v1517_v4  ;;  %v1722_v33 = vld [vmem:[#allocation5 + $0x4] sm:$0xf0]  ;;  %v1523_v4 = vld [vmem:[#allocation5 + $0x80] sm:$0xf] }
  0xb5   :  { %v1460_v5 = vor.u32 %v1722_v33, %v1459_v32  ;;  %v1741_v33 = vld [vmem:[#allocation5 + $0xa4] sm:$0xf] }
  0xb6   :  { %1101 = vmatpush.bf16.msrb.mxu0 %v1520_v34  ;;  %v1738_v34 = vld [vmem:[#allocation5 + $0x84] sm:$0xf0] }
  0xb8   :  { %v590_v35 = vpop.f32.mrf.mxu0 }
  0xb9   :  { %v1564_v35 = vor.u32 %v1748_v28, %v1563_v27  ;;  %v1532_v27 = vor.u32 %v1740_v24, %v1531_v22  ;;  %v1620_v28 = vor.u32 %v1762_v26, %v1619_v25  ;;  %v1761_v22 = vld [vmem:[#allocation5 + $0x144] sm:$0xf]  ;;  %v1621_v24 = vld [vmem:[#allocation5 + $0x148] sm:$0xf0]  ;;  %v1743_v26 = vld [vmem:[#allocation5 + $0xb4] sm:$0xf] }
  0xba   :  { %v614_v38 = vpop.f32.mrf.mxu2  ;;  %v1624_v25 = vor.u32 %v1761_v22, %v1621_v24 }
  0xbb   :  { %v603_v36 = vpop.f32.mrf.mxu1  ;;  %v615_v56 = vadd.f32 %v614_v38, %v602_v51  ;;  %v1555_v38 = vld [vmem:[#allocation5 + $0xc0] sm:$0xf]  ;;  %1077 = vmatpush.bf16.msra.mxu2 %v1564_v35  ;;  %v1611_v35 = vld [vmem:[#allocation5 + $0x130] sm:$0xf] }
  0xbc   :  { %v1491_v36 = vld [vmem:[#allocation5 + $0x40] sm:$0xf] }
  0xbd   :  { %v627_v37 = vpop.f32.mrf.mxu3  ;;  %1778 = vtanh.f32 %v615_v56 }
  0xbe   :  { %v628_v50 = vadd.f32 %v627_v37, %v190_v47  ;;  %v1730_v37 = vld [vmem:[#allocation5 + $0x44] sm:$0xf0] }
  0xc2   :  { %v616_v39 = vpop.f32.mrf.mxu2 }
  0xc3   :  { %v1955_v62 = vpop.eup %1778  ;;  %v1746_v39 = vld [vmem:[#allocation5 + $0xc4] sm:$0xf0] }
  0xc4   :  { %v702_v0 = vsel %vm701_vm0, %v1955_v62, 0.0 }
  0xc5   :  { %v629_v40 = vpop.f32.mrf.mxu3 }
  0xd0   :  { %v640_v41 = vpop.f32.mrf.mxu0 }
  0xd1   :  { %v653_v42 = vpop.f32.mrf.mxu1  ;;  %v641_v52 = vadd.f32 %v640_v41, %v628_v50  ;;  %v1492_v41 = vor.u32 %v1730_v37, %v1491_v36  ;;  %v1760_v36 = vld [vmem:[#allocation5 + $0x134] sm:$0xf0]  ;;  %v1524_v37 = vor.u32 %v1738_v34, %v1523_v4  ;;  %v1541_v4 = vld [vmem:[#allocation5 + $0xa8] sm:$0xf0] }
  0xd3   :  { %v654_v57 = vadd.f32 %v653_v42, %v641_v52  ;;  %v1556_v42 = vor.u32 %v1746_v39, %v1555_v38  ;;  %1065 = vmatpush.bf16.msra.mxu1 %v1492_v41  ;;  %v1612_v38 = vor.u32 %v1760_v36, %v1611_v35  ;;  %v1727_v39 = vld [vmem:[#allocation5 + $0x34] sm:$0xf]  ;;  %v1605_v35 = vld [vmem:[#allocation5 + $0x128] sm:$0xf0]  ;;  %v1544_v36 = vor.u32 %v1741_v33, %v1541_v4 }
  0xd4   :  { %v1751_v41 = vld [vmem:[#allocation5 + $0xf4] sm:$0xf] }
  0xd5   :  { %1780 = vtanh.f32 %v654_v57  ;;  %1078 = vmatpush.bf16.msra.mxu2 %v1556_v42  ;;  %v1483_v57 = vld [vmem:[#allocation5 + $0x30] sm:$0xf] }
  0xd8   :  { %v642_v44 = vpop.f32.mrf.mxu0 }
  0xd9   :  { %v655_v46 = vpop.f32.mrf.mxu1 }
  0xdb   :  { %v666_v48 = vpop.f32.mrf.mxu2  ;;  %v1957_v63 = vpop.eup %1780 }
  0xdc   :  { %v679_v11 = vpop.f32.mrf.mxu3  ;;  %v667_v58 = vadd.f32 %v666_v48, %v191_v53  ;;  %v703_v1 = vsel %vm701_vm0, %v1957_v63, 0.0 }
  0xdd   :  { %v704_v6 = vadd.f32 %v703_v1, %v702_v0 }
  0xde   :  { %v680_v59 = vadd.f32 %v679_v11, %v667_v58  ;;  %v1728_v58 = vld [vmem:[#allocation5 + $0x34] sm:$0xf0] }
  0xe3   :  { %v668_v54 = vpop.f32.mrf.mxu2 }
  0xe4   :  { %v681_v55 = vpop.f32.mrf.mxu3 }
  0xf0   :  { %v692_v60 = vpop.f32.mrf.mxu0 }
  0xf1   :  { %v693_v61 = vadd.f32 %v692_v60, %v680_v59  ;;  %v1547_v59 = vld [vmem:[#allocation5 + $0xb0] sm:$0xf]  ;;  %v1484_v60 = vor.u32 %v1728_v58, %v1483_v57  ;;  %v1573_v57 = vld [vmem:[#allocation5 + $0xe8] sm:$0xf0] }
  0xf3   :  { %1782 = vtanh.f32 %v693_v61  ;;  %v1744_v61 = vld [vmem:[#allocation5 + $0xb4] sm:$0xf0]  ;;  %1066 = vmatpush.bf16.msra.mxu1 %v1484_v60  ;;  %v1765_v60 = vld [vmem:[#allocation5 + $0x164] sm:$0xf] }
  0xf4   :  { %1784 = vrcp.f32 %v1871_v9  ;;  %v1548_v0 = vor.u32 %v1744_v61, %v1547_v59  ;;  %v1539_v9 = vld [vmem:[#allocation5 + $0xa0] sm:$0xf]  ;;  %v1637_v61 = vld [vmem:[#allocation5 + $0x168] sm:$0xf0] }
  0xf5   :  { %v1540_v15 = vor.u32 %v1742_v12, %v1539_v9  ;;  %v1629_v12 = vld [vmem:[#allocation5 + $0x158] sm:$0xf0] }
  0xf6   :  { %1079 = vmatpush.bf16.msra.mxu2 %v1548_v0  ;;  %v1756_v0 = vld [vmem:[#allocation5 + $0x114] sm:$0xf0] }
  0xf8   :  { %v694_v2 = vpop.f32.mrf.mxu0 }
  0xf9   :  { %v1783_v3 = vpop.eup %1782  ;;  %v1733_v2 = vld [vmem:[#allocation5 + $0x64] sm:$0xf] }
  0xfa   :  { %v705_v7 = vsel %vm701_vm0, %v1783_v3, 0.0  ;;  %v1785_v10 = vpop.eup %1784  ;;  %1080 = vmatpush.bf16.msra.mxu2 %v1540_v15  ;;  %v1754_v15 = vld [vmem:[#allocation5 + $0x104] sm:$0xf0] }
  0xfb   :  { %v706_v8 = vadd.f32 %v705_v7, %v704_v6  ;;  %v710_v19 = vmul.f32 384.0, %v1785_v10  ;;  %vm714_vm1 = vweird.f32 %v1785_v10  ;;  %v1475_v7 = vld [vmem:[#allocation5 + $0x20] sm:$0xf] }
  0xfd   :  { %707 = vadd.xlane.f32.xlu0 %v706_v8  ;;  %v711_v31 = vsub.f32 1.0, %v710_v19  ;;  %v1726_v8 = vld [vmem:[#allocation5 + $0x24] sm:$0xf0]  ;;  %v1504_v19 = vor.u32 %v1731_v17, %v1501_v18  ;;  %v1461_v17 = vld [vmem:[#allocation5 + $0x8] sm:$0xf0]  ;;  %v1588_v18 = vor.u32 %v1754_v15, %v1587_v13 }
  0xfe   :  { %1081 = vmatpush.bf16.msra.mxu2 %v1532_v27  ;;  %v1549_v27 = vld [vmem:[#allocation5 + $0xb8] sm:$0xf0] }
  0xff   :  { %v712_v40 = vmul.f32 %v1785_v10, %v711_v31  ;;  %v1496_v31 = vor.u32 %v1729_v29, %v1493_v30  ;;  %v1552_v29 = vor.u32 %v1743_v26, %v1549_v27  ;;  %v1613_v30 = vld [vmem:[#allocation5 + $0x138] sm:$0xf0] }
 0x101   :  { %v713_v43 = vadd.f32 %v1785_v10, %v712_v40  ;;  %v1485_v40 = vld [vmem:[#allocation5 + $0x38] sm:$0xf0] }
 0x102   :  { %v1488_v42 = vor.u32 %v1727_v39, %v1485_v40  ;;  %1082 = vmatpush.bf16.msra.mxu2 %v1524_v37  ;;  %v1533_v39 = vld [vmem:[#allocation5 + $0x98] sm:$0xf0] }
 0x103   :  { %v1964_v44 = vsel %vm714_vm1, %v1785_v10, %v713_v43  ;;  %v1476_v10 = vor.u32 %v1726_v8, %v1475_v7  ;;  %v1581_v43 = vld [vmem:[#allocation5 + $0xf8] sm:$0xf0] }
 0x104   :  { %v1565_v7 = vld [vmem:[#allocation5 + $0xd8] sm:$0xf0] }
 0x105   :  { %1067 = vmatpush.bf16.msra.mxu1 %v1476_v10  ;;  %v1763_v10 = vld [vmem:[#allocation5 + $0x154] sm:$0xf] }
 0x106   :  { %v1632_v14 = vor.u32 %v1763_v10, %v1629_v12 }
 0x109   :  { %1068 = vmatpush.bf16.msra.mxu1 %v1468_v23  ;;  %v1560_v23 = vor.u32 %v1745_v20, %v1557_v21 }
 0x10d   :  { %1069 = vmatpush.bf16.msra.mxu1 %v1460_v5  ;;  %v1757_v5 = vld [vmem:[#allocation5 + $0x124] sm:$0xf] }
 0x10e   :  { %v1608_v37 = vor.u32 %v1757_v5, %v1605_v35 }
 0x170   :  { %v708_v45 = vpop.xlane.xlu0 %707 }
 0x171   :  { %v716_v46 = vmul.f32 %v1964_v44, %v708_v45  ;;  %v1767_v45 = vld [vmem:[#allocation5 + $0x174] sm:$0xf] }
 0x173   :  { %v1968_v47 = vsub.f32 %v1955_v62, %v716_v46  ;;  %v1971_v48 = vsub.f32 %v1957_v63, %v716_v46  ;;  %v1973_v11 = vsub.f32 %v1783_v3, %v716_v46  ;;  %v1635_v62 = vld [vmem:[#allocation5 + $0x160] sm:$0xf]  ;;  %v1766_v63 = vld [vmem:[#allocation5 + $0x164] sm:$0xf0]  ;;  %v1509_v3 = vld [vmem:[#allocation5 + $0x68] sm:$0xf0] }
 0x174   :  { %v1636_v1 = vor.u32 %v1766_v63, %v1635_v62  ;;  %v1512_v6 = vor.u32 %v1733_v2, %v1509_v3  ;;  %v1645_v46 = vld [vmem:[#allocation5 + $0x178] sm:$0xf0]  ;;  %v1640_v62 = vor.u32 %v1765_v60, %v1637_v61  ;;  %v1595_v63 = vld [vmem:[#allocation5 + $0x110] sm:$0xf] }
 0x175   :  { %v720_v49 = vmul.f32 %v1968_v47, %v1968_v47  ;;  %v721_v50 = vmul.f32 %v1971_v48, %v1971_v48  ;;  %v722_v51 = vmul.f32 %v1973_v11, %v1973_v11  ;;  %v1596_v2 = vor.u32 %v1756_v0, %v1595_v63  ;;  %v1469_v3 = vld [vmem:[#allocation5 + $0x18] sm:$0xf0] }
 0x176   :  { %1089 = vmatpush.bf16.msra.mxu3 %v1636_v1  ;;  %1102 = vmatpush.bf16.msrb.mxu0 %v1512_v6  ;;  %v1723_v1 = vld [vmem:[#allocation5 + $0x14] sm:$0xf] }
 0x177   :  { %v723_v52 = vsel %vm701_vm0, %v720_v49, 0.0  ;;  %v724_v53 = vsel %vm701_vm0, %v721_v50, 0.0  ;;  %v726_v55 = vsel %vm701_vm0, %v722_v51, 0.0  ;;  %v1584_v49 = vor.u32 %v1751_v41, %v1581_v43  ;;  %v1603_v51 = vld [vmem:[#allocation5 + $0x120] sm:$0xf] }
 0x178   :  { %v725_v54 = vadd.f32 %v724_v53, %v723_v52  ;;  %v1648_v50 = vor.u32 %v1767_v45, %v1645_v46  ;;  %v1758_v52 = vld [vmem:[#allocation5 + $0x124] sm:$0xf0]  ;;  %v1725_v53 = vld [vmem:[#allocation5 + $0x24] sm:$0xf]  ;;  %v1747_v6 = vld [vmem:[#allocation5 + $0xd4] sm:$0xf]  ;;  %v1472_v8 = vor.u32 %v1723_v1, %v1469_v3 }
 0x179   :  { %1114 = vmatpush.bf16.msrb.mxu1 %v1584_v49  ;;  %v1568_v9 = vor.u32 %v1747_v6, %v1565_v7  ;;  %v1755_v41 = vld [vmem:[#allocation5 + $0x114] sm:$0xf]  ;;  %v1737_v46 = vld [vmem:[#allocation5 + $0x84] sm:$0xf]  ;;  %v1525_v49 = vld [vmem:[#allocation5 + $0x88] sm:$0xf0] }
 0x17a   :  { %v727_v56 = vadd.f32 %v726_v55, %v725_v54  ;;  %1090 = vmatpush.bf16.msra.mxu3 %v1628_v16  ;;  %1103 = vmatpush.bf16.msrb.mxu0 %v1504_v19  ;;  %v1604_v54 = vor.u32 %v1758_v52, %v1603_v51  ;;  %v1477_v55 = vld [vmem:[#allocation5 + $0x28] sm:$0xf0]  ;;  %v1721_v16 = vld [vmem:[#allocation5 + $0x4] sm:$0xf] }
 0x17b   :  { %1127 = vmatpush.bf16.msrb.mxu2 %v1648_v50  ;;  %v1480_v58 = vor.u32 %v1725_v53, %v1477_v55  ;;  %v1464_v19 = vor.u32 %v1721_v16, %v1461_v17  ;;  %v1753_v50 = vld [vmem:[#allocation5 + $0x104] sm:$0xf]  ;;  %v1589_v51 = vld [vmem:[#allocation5 + $0x108] sm:$0xf0] }
 0x17c   :  { %728 = vadd.xlane.f32.xlu0 %v727_v56  ;;  %v1749_v56 = vld [vmem:[#allocation5 + $0xe4] sm:$0xf]  ;;  %v1592_v52 = vor.u32 %v1753_v50, %v1589_v51 }
 0x17d   :  { %v1576_v59 = vor.u32 %v1749_v56, %v1573_v57 }
 0x17e   :  { %1091 = vmatpush.bf16.msra.mxu3 %v1620_v28  ;;  %1104 = vmatpush.bf16.msrb.mxu0 %v1496_v31  ;;  %v1759_v28 = vld [vmem:[#allocation5 + $0x134] sm:$0xf] }
 0x17f   :  { %1115 = vmatpush.bf16.msrb.mxu1 %v1576_v59  ;;  %1128 = vmatpush.bf16.msrb.mxu2 %v1640_v62  ;;  %v1616_v32 = vor.u32 %v1759_v28, %v1613_v30  ;;  %v700_v59 = vld [vmem:[%s2005_s4] sm:$0x7] }
 0x180   :  { %v756_v1 = vperm.slane %v700_v59, 0 }
 0x182   :  { %1092 = vmatpush.bf16.msra.mxu3 %v1612_v38  ;;  %1105 = vmatpush.bf16.msrb.mxu0 %v1488_v42  ;;  %v1739_v38 = vld [vmem:[#allocation5 + $0x94] sm:$0xf]  ;;  %v1597_v42 = vld [vmem:[#allocation5 + $0x118] sm:$0xf0] }
 0x183   :  { %1116 = vmatpush.bf16.msrb.mxu1 %v1568_v9  ;;  %1129 = vmatpush.bf16.msrb.mxu2 %v1632_v14  ;;  %v1536_v43 = vor.u32 %v1739_v38, %v1533_v39  ;;  %v1600_v45 = vor.u32 %v1755_v41, %v1597_v42 }
 0x186   :  { %1093 = vmatpush.bf16.msra.mxu3 %v1604_v54  ;;  %1106 = vmatpush.bf16.msrb.mxu0 %v1480_v58  ;;  %v699_v58 = vld [vmem:[%s2004_s3] sm:$0x7] }
 0x187   :  { %1117 = vmatpush.bf16.msrb.mxu1 %v1560_v23  ;;  %1130 = vmatpush.bf16.msrb.mxu2 %v1624_v25  ;;  %v746_v61 = vperm.slane %v699_v58, 0  ;;  %v747_v62 = vperm.slane %v699_v58, 1  ;;  %v748_v63 = vperm.slane %v699_v58, 2 }
 0x18a   :  { %1094 = vmatpush.bf16.msra.mxu3 %v1596_v2  ;;  %1107 = vmatpush.bf16.msrb.mxu0 %v1472_v8  ;;  %v757_v2 = vperm.slane %v700_v59, 1  ;;  %v758_v8 = vperm.slane %v700_v59, 2 }
 0x18b   :  { %1118 = vmatpush.bf16.msrb.mxu1 %v1552_v29  ;;  %1131 = vmatpush.bf16.msrb.mxu2 %v1616_v32 }
 0x18e   :  { %1095 = vmatpush.bf16.msra.mxu3 %v1588_v18  ;;  %1108 = vmatpush.bf16.msrb.mxu0 %v1464_v19 }
 0x18f   :  { %1119 = vmatpush.bf16.msrb.mxu1 %v1544_v36  ;;  %1132 = vmatpush.bf16.msrb.mxu2 %v1608_v37 }
 0x193   :  { %1120 = vmatpush.bf16.msrb.mxu1 %v1536_v43  ;;  %1133 = vmatpush.bf16.msrb.mxu2 %v1600_v45 }
 0x197   :  { %1134 = vmatpush.bf16.msrb.mxu2 %v1592_v52 }
 0x1ef   :  { %v729_v31 = vpop.xlane.xlu0 %728 }
 0x1f0   :  { %v730_v34 = vmul.f32 %v729_v31, %v1964_v44  ;;  %v1528_v44 = vor.u32 %v1737_v46, %v1525_v49  ;;  %v1142_v31 = vld [vmem:[#allocation7] sm:$0x3]  ;;  %v1777_v46 = vld [vmem:[#allocation2] ss:$0 sm:$0xff] }
 0x1f1   :  { %v1144_v5 = vperm.slane %v1142_v31, 0  ;;  %v1145_v36 = vperm.slane %v1142_v31, 1 }
 0x1f2   :  { %v731_v40 = vadd.f32 1e-05, %v730_v34  ;;  %1121 = vmatpush.bf16.msrb.mxu1 %v1528_v44 }
 0x1f4   :  { %1786 = vrsqrt.f32 %v731_v40  ;;  %vm738_vm3 = vweird.f32 %v731_v40 }
 0x1fa   :  { %v1787_v53 = vpop.eup %1786 }
 0x1fb   :  { %v733_v54 = vmul.f32 %v1787_v53, %v731_v40  ;;  %vm739_vm2 = vweird.f32 %v1787_v53 }
 0x1fc   :  { %vm740_vm4 = vmor %vm738_vm3, %vm739_vm2 }
 0x1fd   :  { %v734_v55 = vmul.f32 %v1787_v53, %v733_v54 }
 0x1ff   :  { %v735_v56 = vmul.f32 0.5, %v734_v55 }
 0x201   :  { %v736_v57 = vsub.f32 1.5, %v735_v56 }
 0x203   :  { %v737_v60 = vmul.f32 %v1787_v53, %v736_v57 }
 0x205   :  { %v741_v0 = vsel %vm740_vm4, %v1787_v53, %v737_v60 }
 0x206   :  { %v742_v3 = vmul.f32 %v741_v0, %v1968_v47  ;;  %v743_v6 = vmul.f32 %v741_v0, %v1971_v48  ;;  %v744_v7 = vmul.f32 %v741_v0, %v1973_v11  ;;  %v816_v11 = vld [vmem:[%s2007_s6] sm:$0x3] }
 0x207   :  { %v818_v20 = vperm.slane %v816_v11, 0  ;;  %v819_v27 = vperm.slane %v816_v11, 1 }
 0x208   :  { %v752_v9 = vmul.f32 %v746_v61, %v742_v3  ;;  %v753_v10 = vmul.f32 %v747_v62, %v743_v6  ;;  %v754_v12 = vmul.f32 %v748_v63, %v744_v7 }
 0x20a   :  { %v762_v13 = vadd.f32 %v756_v1, %v752_v9  ;;  %v763_v14 = vadd.f32 %v757_v2, %v753_v10  ;;  %v764_v15 = vadd.f32 %v758_v8, %v754_v12 }
 0x20c   :  { %v765_v16 = vpack.c.bf16 %v762_v13, %v762_v13  ;;  %v766_v17 = vpack.c.bf16 %v763_v14, %v763_v14  ;;  %v767_v18 = vpack.c.bf16 %v764_v15, %v764_v15 }
 0x20e   :  { %1070 = vmatmul.bf16.vlgmr.msra.gmra.mxu1 %v765_v16  ;;  %1083 = vmatmul.bf16.vlgmr.msra.gmra.mxu2 %v766_v17 }
 0x20f   :  { %1096 = vmatmul.bf16.vlgmr.msra.gmra.mxu3 %v767_v18  ;;  %1109 = vmatmul.bf16.vlgmr.msrb.gmra.mxu0 %v765_v16 }
 0x21e   :  { %1122 = vmatmul.bf16.vlgmr.msrb.gmra.mxu1 %v766_v17  ;;  %1135 = vmatmul.bf16.vlgmr.msrb.gmra.mxu2 %v767_v18 }
 0x28b   :  { %v1071_v47 = vpop.f32.mrf.mxu1 }
 0x28c   :  { %v1110_v48 = vpop.f32.mrf.mxu0  ;;  %v1072_v24 = vadd.f32 %v1071_v47, %v818_v20 }
 0x28d   :  { %v1111_v32 = vadd.f32 %v1110_v48, %v819_v27 }
 0x291   :  { %v1084_v19 = vpop.f32.mrf.mxu2 }
 0x292   :  { %v1097_v21 = vpop.f32.mrf.mxu3  ;;  %v1085_v25 = vadd.f32 %v1084_v19, %v1072_v24 }
 0x293   :  { %v1073_v22 = vpop.f32.mrf.mxu1 }
 0x294   :  { %v1112_v23 = vpop.f32.mrf.mxu0  ;;  %v1098_v30 = vadd.f32 %v1097_v21, %v1085_v25 }
 0x296   :  { %v1140_v33 = vmax.f32 %v1098_v30, 0.0 }
 0x298   :  { %v1148_v39 = vmul.f32 %v1144_v5, %v1140_v33 }
 0x299   :  { %v1086_v26 = vpop.f32.mrf.mxu2 }
 0x29a   :  { %v1099_v28 = vpop.f32.mrf.mxu3  ;;  %v1150_v41 = vsel %vm701_vm0, %v1148_v39, 0.0 }
 0x29b   :  { %v1123_v29 = vpop.f32.mrf.mxu1 }
 0x29c   :  { %v1124_v4 = vadd.f32 %v1123_v29, %v1111_v32 }
 0x2a1   :  { %v1136_v34 = vpop.f32.mrf.mxu2 }
 0x2a2   :  { %v1137_v35 = vadd.f32 %v1136_v34, %v1124_v4 }
 0x2a3   :  { %v1125_v37 = vpop.f32.mrf.mxu1 }
 0x2a4   :  { %v1141_v38 = vmax.f32 %v1137_v35, 0.0 }
 0x2a6   :  { %v1149_v40 = vmul.f32 %v1145_v36, %v1141_v38 }
 0x2a8   :  { %v1152_v42 = vsel %vm1151_vm5, %v1149_v40, 0.0 }
 0x2a9   :  { %v1138_v43 = vpop.f32.mrf.mxu2  ;;  %v1153_v45 = vadd.f32 %v1152_v42, %v1150_v41 }
 0x2ab   :  { %1154 = vadd.xlane.f32.xlu1 %v1153_v45 }
 0x31e   :  { %v1155_v49 = vpop.xlane.xlu1 %1154 }
 0x31f   :  { %v1160_v50 = vadd.f32 %v1777_v46, %v1155_v49 }
 0x321   :  { %1162 = vst.msk [vmem:[%s2010_s9] sm:$0x3] %vm1161_vm6, %v1160_v50 }
 0x322   :  { %1167 = vsyncpa [#allocation4], 1 }
 0x323   :  { %1168 = vsyncpa [#allocation6], 1 }

// kernel: clit_forward.2
= control target key start
LH: loop header
LB: loop body
LE: loop exit
PB: predicated region body
PF: predicated region fallthrough
CT: control target
= control target key end

     0   :  { %s18100_s0 = inlined_call_operand.vmem [shape: f32[16,384], index: 0, kind: input, shape index: {}]   ;;  %s18101_s1 = inlined_call_operand.vmem [shape: f32[1,384], index: 1, kind: input, shape index: {}]   ;;  %s18102_s2 = inlined_call_operand.vmem [shape: f32[1,384], index: 2, kind: input, shape index: {}]   ;;  %s18103_s3 = inlined_call_operand.vmem [shape: f32[16,16], index: 3, kind: input, shape index: {}]   ;;  %s18104_s4 = inlined_call_operand.hbm [shape: bf16[12,384,1152], index: 4, kind: input, shape index: {}]   ;;  %s18105_s5 = inlined_call_operand.vmem [shape: f32[12,1,1152], index: 5, kind: input, shape index: {}]   ;;  %s18106_s6 = inlined_call_operand.hbm [shape: bf16[12,384,384], index: 6, kind: input, shape index: {}]   ;;  %s18107_s7 = inlined_call_operand.vmem [shape: f32[12,1,384], index: 7, kind: input, shape index: {}, may-alias: {7,9,13,15}]   ;;  %s18108_s8 = inlined_call_operand.vmem [shape: f32[12,1,384], index: 8, kind: input, shape index: {}, may-alias: {8,14}]   ;;  %s18109_s9 = inlined_call_operand.vmem [shape: f32[12,1,384], index: 9, kind: input, shape index: {}, may-alias: {7,9,13,15}]   ;;  %s18110_s10 = inlined_call_operand.hbm [shape: bf16[12,384,1536], index: 10, kind: input, shape index: {}]   ;;  %s18111_s11 = inlined_call_operand.vmem [shape: f32[12,1,1536], index: 11, kind: input, shape index: {}]   ;;  %s18112_s12 = inlined_call_operand.hbm [shape: bf16[12,1536,384], index: 12, kind: input, shape index: {}]   ;;  %s18113_s13 = inlined_call_operand.vmem [shape: f32[12,1,384], index: 13, kind: input, shape index: {}, may-alias: {7,9,13,15}]   ;;  %s18114_s14 = inlined_call_operand.vmem [shape: f32[12,1,384], index: 14, kind: input, shape index: {}, may-alias: {8,14}]   ;;  %s18115_s15 = inlined_call_operand.vmem [shape: f32[12,1,384], index: 15, kind: input, shape index: {}, may-alias: {7,9,13,15}]   ;;  %s18116_s16 = inlined_call_operand.vmem [shape: f32[16,384], index: 16, kind: output, shape index: {}]  }
   0x1   :  { %18126 = sst [smem:[#allocation16_spill]] %s18100_s0 }
   0x2   :  { %18127 = sst [smem:[#allocation17_spill]] %s18101_s1 }
   0x3   :  { %18128 = sst [smem:[#allocation18_spill]] %s18102_s2 }
   0x4   :  { %18129 = sst [smem:[#allocation19_spill]] %s18103_s3 }
   0x5   :  { %18130 = sst [smem:[#allocation20_spill]] %s18104_s4 }
   0x6   :  { %18131 = sst [smem:[#allocation21_spill]] %s18105_s5 }
   0x7   :  { %18132 = sst [smem:[#allocation22_spill]] %s18106_s6 }
   0x8   :  { %18133 = sst [smem:[#allocation23_spill]] %s18110_s10 }
   0x9   :  { %18134 = sst [smem:[#allocation24_spill]] %s18112_s12 }
   0xa   :  { %18135 = sst [smem:[#allocation25_spill]] %s18113_s13 }
   0xb   :  { %18136 = sst [smem:[#allocation26_spill]] %s18114_s14 }
   0xc   :  { %18137 = sst [smem:[#allocation27_spill]] %s18115_s15 }
   0xd   :  { %18138 = sst [smem:[#allocation28_spill]] %s18116_s16 }
   0xe   :  { %21 = vsyncpa [#allocation4], 0 }
   0xf   :  { %23 = vsyncpa [#allocation4 + $0x1], 0 }
  0x10   :  { %24 = vsyncpa [#allocation6], 0 }
  0x11   :  { %26 = vsyncpa [#allocation6 + $0x1], 0 }
  0x12   :  { %27 = vsyncpa [#allocation9], 0 }
  0x13   :  { %29 = vsyncpa [#allocation9 + $0x1], 0  ;;  %s14793_s21 = smov 0   ;;  %s14795_s22 = smov 0  }
  0x14   :  { %s14797_s23 = smov 0   ;;  %s14799_s24 = smov 0  }
  0x15 LB: > { %18139 = sst [smem:[#allocation13_spill]] %s14691_s23  ;;  %s14812_s25 = sadd.s32 4294967295, %s14695_s24   ;;  %s14695_s24 = sphi %s14799_s24, %s18165_s24   ;;  %s14691_s23 = sphi %s14797_s23, %s18167_s23   ;;  %s14687_s22 = sphi %s14795_s22, %s18169_s22   ;;  %s14683_s21 = sphi %s14793_s21, %s18168_s21  }
  0x16   : > { %s14815_s26 = sadd.s32 1, %s14695_s24   ;;  %s126_s28 = sadd.s32 1, %s14691_s23 }
  0x17   : > { %18140 = sst [smem:[#allocation14_spill]] %s14815_s26  ;;  %s123_s27 = ssub.s32 %s14695_s24, %s14815_s26 }
  0x18   : > { %p124_p0 = scmp.eq.s32.totalorder %s123_s27, 0  ;;  %p133_p1 = scmp.ne.s32.totalorder %s14691_s23, %s14687_s22 }
  0x19   : > { %p134_p2 = scmp.eq.s32.totalorder %s14695_s24, 0  ;;  %p139_p3 = scmp.ne.s32.totalorder %s14687_s22, %s14683_s21 }
  0x1a   : > { %s14825_s29 = scalar_select %p124_p0, %s14691_s23, %s126_s28  }
  0x1b   : > { %p135_p4 = por %p134_p2, %p133_p1  ;;  %p140_p5 = scmp.eq.s32.totalorder %s14812_s25, 0 }
  0x1c   : > { %18141 = sst [smem:[#allocation15_spill]] %s14825_s29  ;;  %p14275_p6 = scmp.lt.s32.totalorder %s14695_s24, 12 }
  0x1d   : > { %p14829_p7 = por %p140_p5, %p139_p3  ;;  %s14834_s0 = sand.u32 1, %s14691_s23  }
  0x1e   : > { %p14836_p8 = pnand %p14275_p6, %p135_p4  ;;  %s511_s18 = sand.u32 1, %s14695_s24  }
  0x1f   : > { %s14242_s19 = smul.u32 576, %s14834_s0  ;;  %s18144_s6 = sld [smem:[#allocation22_spill]] }
  0x20   : > { %s14243_s20 = smul.u32 576, %s14695_s24  ;;  %s14846_s23 = scalar_lea.sflag [#allocation6], %s511_s18 }
  0x21   : > { %s515_s29 = scalar_lea.vmem [#allocation5], %s14242_s19  ;;  %p14537_p10 = pneg %p14836_p8 }
  0x22   : > { %s523_s26 = sshll.u32 %s515_s29, 4  ;;  %s524_s26 = int_to_ptr.vmem [resolvable:$true] %s523_s26 }
  0x25   : > { %s520_s28 = scalar_lea.hbm %s18144_s6, %s14243_s20  ;;  %s14540_s19 = scalar_lea.hbm %s18144_s6, 6912 }
  0x26   : > { %s521_s3 = sshll.u32 %s520_s28, 4  ;;  %s522_s3 = int_to_ptr.hbm [resolvable:$true] %s521_s3 }
  0x27   : > { %s14533_s16 = sshra.s32 %s522_s3, 4  ;;  %s14534_s16 = int_to_ptr.hbm [resolvable:$true] %s14533_s16 }
  0x28   : > { %s14535_s2 = scalar_lea.hbm %s14534_s16, 576  ;;  %p14541_p13 = scmp.lt.s32.totalorder %s14534_s16, %s18144_s6 }
  0x29   : > { %p14536_p9 = scmp.ne.s32.totalorder %s14534_s16, %s14535_s2  ;;  %p14542_p0 = scmp.lt.s32.totalorder %s14540_s19, %s14535_s2 }
  0x2b   : > { %p14538_p11 = pnand %p14537_p10, %p14536_p9  ;;  %p14543_p1 = por %p14542_p0, %p14541_p13 }
  0x2d   : > { %p14539_p12 = pneg %p14538_p11 }
  0x2f   : > { %p14544_p2 = pnand %p14543_p1, %p14539_p12 }
  0x31   : > { %14547 = shalt.err (!%p14544_p2)
}
  0x32   : > { %s18124_s18 = smov 192   ;;  %s18125_s27 = smov 12  }
  0x33   : > { %14268 = dma.hbm_to_vmem [thread:$0]  (!%p14836_p8), %s522_s3, 9216, %s524_s26, %s14846_s23, %s18124_s18, %s18124_s18, %s18125_s27  }
  0x34   : > { %p9844_p3 = scmp.ge.s32.totalorder %s14695_s24, 1  ;;  %p624_p4 = scmp.lt.s32.totalorder %s14695_s24, 13 }
  0x35   : > { %s14240_s1 = smul.u32 1728, %s14834_s0  ;;  %s18146_s4 = sld [smem:[#allocation20_spill]] }
  0x36   : > { %p14868_p5 = pnand %p9844_p3, %p624_p4  ;;  %s14241_s16 = smul.u32 1728, %s14695_s24 }
  0x37   : > { %s486_s29 = scalar_lea.vmem [#allocation3], %s14240_s1  ;;  %s483_s15 = scalar_lea.sflag [#allocation4], %s14834_s0 }
  0x38   : > { %s494_s20 = sshll.u32 %s486_s29, 4  ;;  %s495_s20 = int_to_ptr.vmem [resolvable:$true] %s494_s20 }
  0x3b   : > { %s491_s19 = scalar_lea.hbm %s18146_s4, %s14241_s16  ;;  %s14570_s14 = scalar_lea.hbm %s18146_s4, 20736 }
  0x3c   : > { %s492_s6 = sshll.u32 %s491_s19, 4  ;;  %s493_s6 = int_to_ptr.hbm [resolvable:$true] %s492_s6 }
  0x3d   : > { %s14563_s3 = sshra.s32 %s493_s6, 4  ;;  %s14564_s3 = int_to_ptr.hbm [resolvable:$true] %s14563_s3 }
  0x3e   : > { %s14565_s26 = scalar_lea.hbm %s14564_s3, 1728  ;;  %p14571_p12 = scmp.lt.s32.totalorder %s14564_s3, %s18146_s4 }
  0x3f   : > { %p14566_p6 = scmp.ne.s32.totalorder %s14564_s3, %s14565_s26  ;;  %p14572_p13 = scmp.lt.s32.totalorder %s14570_s14, %s14565_s26 }
  0x41   : > { %p14568_p9 = pnand %p14566_p6, %p14537_p10  ;;  %p14573_p0 = por %p14572_p13, %p14571_p12 }
  0x43   : > { %p14569_p11 = pneg %p14568_p9 }
  0x45   : > { %p14574_p1 = pnand %p14573_p0, %p14569_p11 }
  0x47   : > { %14577 = shalt.err (!%p14574_p1)
}
  0x48   : > { %s14699_s1 = smov 576   ;;  %s14700_s21 = smov 36  }
  0x49   : > { %14265 = dma.hbm_to_vmem [thread:$0]  (!%p14836_p8), %s493_s6, 27648, %s495_s20, %s483_s15, %s14699_s1, %s14699_s1, %s14700_s21  }
  0x4a   : > { %s14244_s19 = smul.u32 2304, %s14834_s0  ;;  %s18147_s10 = sld [smem:[#allocation23_spill]] }
  0x4b   : > { %s14245_s29 = smul.u32 2304, %s14695_s24 }
  0x4c   : > { %s558_s28 = scalar_lea.vmem [#allocation7], %s14244_s19 }
  0x4d   : > { %s566_s3 = sshll.u32 %s558_s28, 4  ;;  %s567_s3 = int_to_ptr.vmem [resolvable:$true] %s566_s3 }
  0x50   : > { %s563_s13 = scalar_lea.hbm %s18147_s10, %s14245_s29  ;;  %s14600_s24 = scalar_lea.hbm %s18147_s10, 27648 }
  0x51   : > { %s564_s14 = sshll.u32 %s563_s13, 4  ;;  %s565_s14 = int_to_ptr.hbm [resolvable:$true] %s564_s14 }
  0x52   : > { %s14593_s26 = sshra.s32 %s565_s14, 4  ;;  %s14594_s26 = int_to_ptr.hbm [resolvable:$true] %s14593_s26 }
  0x53   : > { %s14595_s16 = scalar_lea.hbm %s14594_s26, 2304  ;;  %p14601_p6 = scmp.lt.s32.totalorder %s14594_s26, %s18147_s10 }
  0x54   : > { %p14596_p2 = scmp.ne.s32.totalorder %s14594_s26, %s14595_s16  ;;  %p14602_p9 = scmp.lt.s32.totalorder %s14600_s24, %s14595_s16 }
  0x56   : > { %p14598_p3 = pnand %p14596_p2, %p14537_p10  ;;  %p14603_p11 = por %p14602_p9, %p14601_p6 }
  0x58   : > { %p14599_p4 = pneg %p14598_p3 }
  0x5a   : > { %p14604_p12 = pnand %p14603_p11, %p14599_p4 }
  0x5c   : > { %14607 = shalt.err (!%p14604_p12)
}
  0x5d   : > { %s14701_s13 = smov 768   ;;  %s14702_s21 = smov 48  }
  0x5e   : > { %14271 = dma.hbm_to_vmem [thread:$0]  (!%p14836_p8), %s565_s14, 36864, %s567_s3, %s14846_s23, %s14701_s13, %s14701_s13, %s14702_s21  }
  0x5f   : > { %s18148_s12 = sld [smem:[#allocation24_spill]]  ;;  %s587_s6 = scalar_lea.vmem [#allocation8], %s14244_s19 }
  0x60   : > { %s595_s15 = sshll.u32 %s587_s6, 4  ;;  %s584_s26 = scalar_lea.sflag [#allocation9], %s14834_s0  ;;  %s596_s15 = int_to_ptr.vmem [resolvable:$true] %s595_s15 }
  0x65   : > { %s592_s28 = scalar_lea.hbm %s18148_s12, %s14245_s29  ;;  %s14630_s3 = scalar_lea.hbm %s18148_s12, 27648 }
  0x66   : > { %s593_s20 = sshll.u32 %s592_s28, 4  ;;  %s594_s20 = int_to_ptr.hbm [resolvable:$true] %s593_s20 }
  0x67   : > { %s14623_s16 = sshra.s32 %s594_s20, 4  ;;  %s14624_s16 = int_to_ptr.hbm [resolvable:$true] %s14623_s16 }
  0x68   : > { %s14625_s24 = scalar_lea.hbm %s14624_s16, 2304  ;;  %p14631_p2 = scmp.lt.s32.totalorder %s14624_s16, %s18148_s12 }
  0x69   : > { %p14626_p13 = scmp.ne.s32.totalorder %s14624_s16, %s14625_s24  ;;  %p14632_p3 = scmp.lt.s32.totalorder %s14630_s3, %s14625_s24 }
  0x6b   : > { %p14628_p0 = pnand %p14626_p13, %p14537_p10  ;;  %p14633_p4 = por %p14632_p3, %p14631_p2 }
  0x6d   : > { %p14629_p1 = pneg %p14628_p0 }
  0x6f   : > { %p14634_p6 = pnand %p14633_p4, %p14629_p1 }
  0x71   : > { %14637 = shalt.err (!%p14634_p6)
}
  0x72   : > { %s18149_s0 = smov 12   ;;  %s18150_s19 = smov 192  }
  0x73   : > { %14274 = dma.hbm_to_vmem [thread:$0]  (!%p14836_p8), %s594_s20, 36864, %s596_s15, %s584_s26, %s18150_s19, %s18150_s19, %s18149_s0  }
  0x74   : > { %628 = sbr.rel (%p14868_p5) target bundleno = 3326 (0xcfe), region = 84  ;;  %s630_s13 = sand.u32 (!%p14868_p5), 1, %s14687_s22  }
  0x75   : > { %s14248_s21 = smul.u32 (!%p14868_p5), 1728, %s630_s13  ;;  %s631_s18 = scalar_lea.sflag (!%p14868_p5), [#allocation4], %s630_s13 }
  0x77   : > { %s14926_s27 = scalar_lea.vmem (!%p14868_p5), [#allocation3], %s14248_s21 }
  0x79   : > { %14670 = dma.done.wait (%p14829_p7), %s631_s18, 27648  }
  0x7a   : > { %14672 = vsyncadd (%p14829_p7), %s631_s18, 4294939648  ;;  %s640_s17 = sand.u32 1, %s14812_s25   ;;  %s14249_s28 = smul.u32 576, %s630_s13 }
  0x7b   : > { %s641_s6 = scalar_lea.sflag [#allocation6], %s640_s17 }
  0x7c   : > { %s14933_s15 = scalar_lea.vmem [#allocation5], %s14249_s28 }
  0x7d   : > { %14674 = dma.done.wait (%p14829_p7), %s641_s6, 46080  }
  0x7e   : > { %14676 = vsyncadd (%p14829_p7), %s641_s6, 4294921216  ;;  %s14250_s2 = smul.u32 2304, %s630_s13  ;;  %s661_s26 = scalar_lea.sflag [#allocation9], %s630_s13 }
  0x80   : > { %s14939_s20 = scalar_lea.vmem [#allocation7], %s14250_s2  ;;  %s14941_s16 = scalar_lea.vmem [#allocation8], %s14250_s2 }
  0x81   : > { %14678 = dma.done.wait (%p14829_p7), %s661_s26, 36864  }
  0x82   : > { %14680 = vsyncadd (%p14829_p7), %s661_s26, 4294930432  ;;  %p756_p8 = scmp.lt.s32.totalorder %s14812_s25, 11  ;;  %s18151_s5 = sld [smem:[#allocation21_spill]] }
  0x83   : > { %s18153_s13 = sld [smem:[#allocation26_spill]]  ;;  %p9845_p7 = scmp.ne.s32.totalorder %s14812_s25, 0 }
  0x84   : > { %s757_s24 = scalar_select %p756_p8, %s14812_s25, 11 }
  0x85   : > { %s18154_s17 = sld [smem:[#allocation27_spill]] }
  0x86   : > { %s14251_s1 = smul.u32 9, %s757_s24  ;;  %s18156_s28 = sld [smem:[#allocation17_spill]] (!%p9845_p7) }
  0x87   : > { %s14949_s23 = smul.u32 3, %s757_s24  ;;  %s18157_s3 = sld [smem:[#allocation18_spill]] (!%p9845_p7) }
  0x88   : > { %s14954_s29 = scalar_lea.vmem %s18151_s5, %s14251_s1  ;;  %s14253_s30 = smul.u32 12, %s757_s24 }
  0x89   : > { %s771_s2 = scalar_lea.vmem %s18109_s9, %s14949_s23  ;;  %s18152_s24 = sld [smem:[#allocation25_spill]] }
  0x8a   : > { %s14971_s14 = scalar_lea.vmem %s18111_s11, %s14253_s30  ;;  %s783_s10 = scalar_lea.vmem %s18153_s13, %s14949_s23 }
  0x8b   : > { %s787_s12 = scalar_lea.vmem %s18154_s17, %s14949_s23  ;;  %791 = sbr.rel (%p9845_p7) target bundleno = 432 (0x1b0), region = 104 }
  0x8c   : > { %s18155_s30 = sld [smem:[#allocation16_spill]] (!%p9845_p7) }
  0x8d   : > { %s18158_s13 = sld [smem:[#allocation28_spill]] (!%p9845_p7) }
  0x8f   : > { %s14977_s5 = scalar_lea.vmem %s18152_s24, %s14949_s23 }
  0x90   : > { %v14703_v10 = vmov 384.0   ;;  %v798_v47 = vld [vmem:[%s18156_s28] sm:$0x7] }
  0x91   : > { %14319 = vrcp.f32 %v14703_v10  ;;  %v799_v50 = vld [vmem:[%s18157_s3] sm:$0x7]  ;;  %v868_v53 = vperm.slane %v798_v47, 0  ;;  %v869_v54 = vperm.slane %v798_v47, 1  ;;  %v870_v55 = vperm.slane %v798_v47, 2 }
  0x92   : > { %v792_v0 = vld [vmem:[%s18155_s30] sm:$0xff]  ;;  %v793_v1 = vld [vmem:[%s18155_s30 + $0x8] sm:$0xff]  ;;  %v794_v2 = vld [vmem:[%s18155_s30 + $0x10] sm:$0xff]  ;;  %v881_v56 = vperm.slane %v799_v50, 0  ;;  %v882_v57 = vperm.slane %v799_v50, 1  ;;  %v883_v60 = vperm.slane %v799_v50, 2 }
  0x93   : > { %v800_v3 = vadd.f32 %v793_v1, %v792_v0  ;;  %v795_v4 = vld [vmem:[%s18155_s30 + $0x18] sm:$0xff]  ;;  %v796_v5 = vld [vmem:[%s18155_s30 + $0x20] sm:$0xff]  ;;  %v797_v8 = vld [vmem:[%s18155_s30 + $0x28] sm:$0xff] }
  0x94   : > { %v804_v7 = vadd.f32 %v796_v5, %v795_v4 }
  0x95   : > { %v801_v6 = vadd.f32 %v800_v3, %v794_v2 }
  0x96   : > { %v805_v9 = vadd.f32 %v804_v7, %v797_v8 }
  0x97   : > { %802 = vadd.xlane.f32.xlu0 %v801_v6  ;;  %v14320_v11 = vpop.eup %14319 }
  0x98   : > { %v809_v12 = vmul.f32 384.0, %v14320_v11  ;;  %vm813_vm0 = vweird.f32 %v14320_v11 }
  0x9a   : > { %v810_v13 = vsub.f32 1.0, %v809_v12 }
  0x9c   : > { %v811_v14 = vmul.f32 %v14320_v11, %v810_v13 }
  0x9e   : > { %v812_v15 = vadd.f32 %v14320_v11, %v811_v14 }
  0x9f   : > { %806 = vadd.xlane.f32.xlu0 %v805_v9 }
  0xa0   : > { %v814_v16 = vsel %vm813_vm0, %v14320_v11, %v812_v15 }
 0x10a   : > { %v803_v17 = vpop.xlane.xlu0 %802 }
 0x10b   : > { %v815_v18 = vmul.f32 %v814_v16, %v803_v17 }
 0x10d   : > { %v817_v19 = vsub.f32 %v792_v0, %v815_v18  ;;  %v818_v20 = vsub.f32 %v793_v1, %v815_v18  ;;  %v819_v21 = vsub.f32 %v794_v2, %v815_v18 }
 0x10f   : > { %v823_v22 = vmul.f32 %v817_v19, %v817_v19  ;;  %v824_v23 = vmul.f32 %v818_v20, %v818_v20  ;;  %v825_v24 = vmul.f32 %v819_v21, %v819_v21 }
 0x111   : > { %v829_v25 = vadd.f32 %v824_v23, %v823_v22 }
 0x112   : > { %v807_v26 = vpop.xlane.xlu0 %806 }
 0x113   : > { %v816_v27 = vmul.f32 %v814_v16, %v807_v26  ;;  %v830_v28 = vadd.f32 %v829_v25, %v825_v24 }
 0x115   : > { %v820_v29 = vsub.f32 %v795_v4, %v816_v27  ;;  %v821_v30 = vsub.f32 %v796_v5, %v816_v27  ;;  %v822_v31 = vsub.f32 %v797_v8, %v816_v27  ;;  %831 = vadd.xlane.f32.xlu1 %v830_v28 }
 0x117   : > { %v826_v32 = vmul.f32 %v820_v29, %v820_v29  ;;  %v827_v33 = vmul.f32 %v821_v30, %v821_v30  ;;  %v828_v34 = vmul.f32 %v822_v31, %v822_v31 }
 0x119   : > { %v833_v35 = vadd.f32 %v827_v33, %v826_v32 }
 0x11b   : > { %v834_v36 = vadd.f32 %v833_v35, %v828_v34 }
 0x11d   : > { %835 = vadd.xlane.f32.xlu1 %v834_v36 }
 0x188   : > { %v832_v37 = vpop.xlane.xlu1 %831 }
 0x189   : > { %v837_v38 = vmul.f32 %v832_v37, %v814_v16 }
 0x18b   : > { %v839_v39 = vadd.f32 1e-12, %v837_v38 }
 0x18d   : > { %14321 = vrsqrt.f32 %v839_v39  ;;  %vm847_vm2 = vweird.f32 %v839_v39 }
 0x190   : > { %v836_v40 = vpop.xlane.xlu1 %835 }
 0x191   : > { %v838_v41 = vmul.f32 %v836_v40, %v814_v16 }
 0x193   : > { %v14322_v42 = vpop.eup %14321  ;;  %v840_v43 = vadd.f32 1e-12, %v838_v41 }
 0x194   : > { %v842_v44 = vmul.f32 %v14322_v42, %v839_v39  ;;  %vm848_vm1 = vweird.f32 %v14322_v42 }
 0x195   : > { %14323 = vrsqrt.f32 %v840_v43  ;;  %vm849_vm3 = vmor %vm847_vm2, %vm848_vm1  ;;  %vm857_vm5 = vweird.f32 %v840_v43 }
 0x196   : > { %v843_v45 = vmul.f32 %v14322_v42, %v842_v44 }
 0x198   : > { %v844_v46 = vmul.f32 0.5, %v843_v45 }
 0x19a   : > { %v845_v48 = vsub.f32 1.5, %v844_v46 }
 0x19b   : > { %v14324_v49 = vpop.eup %14323 }
 0x19c   : > { %v846_v51 = vmul.f32 %v14322_v42, %v845_v48  ;;  %v852_v52 = vmul.f32 %v14324_v49, %v840_v43  ;;  %vm858_vm4 = vweird.f32 %v14324_v49 }
 0x19d   : > { %vm859_vm6 = vmor %vm857_vm5, %vm858_vm4 }
 0x19e   : > { %v850_v58 = vsel %vm849_vm3, %v14322_v42, %v846_v51  ;;  %v853_v59 = vmul.f32 %v14324_v49, %v852_v52 }
 0x19f   : > { %v861_v61 = vmul.f32 %v850_v58, %v817_v19  ;;  %v862_v62 = vmul.f32 %v850_v58, %v818_v20  ;;  %v863_v63 = vmul.f32 %v850_v58, %v819_v21 }
 0x1a0   : > { %v854_v0 = vmul.f32 0.5, %v853_v59 }
 0x1a1   : > { %v874_v1 = vmul.f32 %v868_v53, %v861_v61  ;;  %v875_v2 = vmul.f32 %v869_v54, %v862_v62  ;;  %v876_v3 = vmul.f32 %v870_v55, %v863_v63 }
 0x1a2   : > { %v855_v4 = vsub.f32 1.5, %v854_v0 }
 0x1a3   : > { %v887_v5 = vadd.f32 %v881_v56, %v874_v1  ;;  %v888_v6 = vadd.f32 %v882_v57, %v875_v2  ;;  %v889_v7 = vadd.f32 %v883_v60, %v876_v3 }
 0x1a4   : > { %v856_v8 = vmul.f32 %v14324_v49, %v855_v4 }
 0x1a5   : > { %893 = vst [vmem:[%s18158_s13] sm:$0xff] %v887_v5 }
 0x1a6   : > { %894 = vst [vmem:[%s18158_s13 + $0x8] sm:$0xff] %v888_v6  ;;  %v860_v9 = vsel %vm859_vm6, %v14324_v49, %v856_v8 }
 0x1a7   : > { %895 = vst [vmem:[%s18158_s13 + $0x10] sm:$0xff] %v889_v7  ;;  %v864_v10 = vmul.f32 %v860_v9, %v820_v29  ;;  %v865_v11 = vmul.f32 %v860_v9, %v821_v30  ;;  %v866_v12 = vmul.f32 %v860_v9, %v822_v31 }
 0x1a9   : > { %v877_v13 = vmul.f32 %v868_v53, %v864_v10  ;;  %v878_v14 = vmul.f32 %v869_v54, %v865_v11  ;;  %v879_v15 = vmul.f32 %v870_v55, %v866_v12 }
 0x1ab   : > { %v890_v16 = vadd.f32 %v881_v56, %v877_v13  ;;  %v891_v17 = vadd.f32 %v882_v57, %v878_v14  ;;  %v892_v18 = vadd.f32 %v883_v60, %v879_v15 }
 0x1ad   : > { %896 = vst [vmem:[%s18158_s13 + $0x18] sm:$0xff] %v890_v16 }
 0x1ae   : > { %897 = vst [vmem:[%s18158_s13 + $0x20] sm:$0xff] %v891_v17 }
 0x1af   : > { %898 = vst [vmem:[%s18158_s13 + $0x28] sm:$0xff] %v892_v18 }
 0x1b0 PF: > { %v10100_v19 = vld [vmem:[%s14926_s27 + $0x1f8] sm:$0xf]  ;;  %v13443_v20 = vld [vmem:[%s14926_s27 + $0x218] sm:$0xf0]  ;;  %v10102_v29 = vld [vmem:[%s14926_s27 + $0x21c] sm:$0xf0] }
 0x1b1   : > { %v10388_v21 = vld [vmem:[%s14926_s27 + $0x438] sm:$0xf]  ;;  %v10101_v22 = vor.u32 %v13443_v20, %v10100_v19  ;;  %v13515_v23 = vld [vmem:[%s14926_s27 + $0x458] sm:$0xf0]  ;;  %v10064_v30 = vld [vmem:[%s14926_s27 + $0x1b0] sm:$0xf] }
 0x1b2   : > { %v10676_v24 = vld [vmem:[%s14926_s27 + $0x678] sm:$0xf]  ;;  %v13587_v25 = vld [vmem:[%s14926_s27 + $0x698] sm:$0xf0]  ;;  %v10389_v26 = vor.u32 %v13515_v23, %v10388_v21  ;;  %v13434_v32 = vld [vmem:[%s14926_s27 + $0x1d0] sm:$0xf0] }
 0x1b3   : > { %v10677_v27 = vor.u32 %v13587_v25, %v10676_v24  ;;  %v13439_v28 = vld [vmem:[%s14926_s27 + $0x1fc] sm:$0xf]  ;;  %2274 = vmatpush.bf16.msra.mxu0 %v10101_v22  ;;  %v10352_v33 = vld [vmem:[%s14926_s27 + $0x3f0] sm:$0xf]  ;;  %v13506_v34 = vld [vmem:[%s14926_s27 + $0x410] sm:$0xf0]  ;;  %v10065_v35 = vor.u32 %v13434_v32, %v10064_v30 }
 0x1b4   : > { %v10105_v31 = vor.u32 %v13439_v28, %v10102_v29  ;;  %2288 = vmatpush.bf16.msra.mxu1 %v10389_v26  ;;  %v10353_v36 = vor.u32 %v13506_v34, %v10352_v33  ;;  %v10640_v37 = vld [vmem:[%s14926_s27 + $0x630] sm:$0xf]  ;;  %v13578_v38 = vld [vmem:[%s14926_s27 + $0x650] sm:$0xf0]  ;;  %v10066_v41 = vld [vmem:[%s14926_s27 + $0x1d4] sm:$0xf0] }
 0x1b5   : > { %2302 = vmatpush.bf16.msra.mxu2 %v10677_v27  ;;  %v13430_v39 = vld [vmem:[%s14926_s27 + $0x1b4] sm:$0xf]  ;;  %v10641_v40 = vor.u32 %v13578_v38, %v10640_v37  ;;  %v10028_v42 = vld [vmem:[%s14926_s27 + $0x168] sm:$0xf]  ;;  %v13425_v43 = vld [vmem:[%s14926_s27 + $0x188] sm:$0xf0] }
 0x1b6   : > { %2316 = vmatpush.bf16.msra.mxu3 %v10105_v31  ;;  %v10069_v44 = vor.u32 %v13430_v39, %v10066_v41  ;;  %v10316_v45 = vld [vmem:[%s14926_s27 + $0x3a8] sm:$0xf]  ;;  %v13497_v46 = vld [vmem:[%s14926_s27 + $0x3c8] sm:$0xf0]  ;;  %v10029_v48 = vor.u32 %v13425_v43, %v10028_v42  ;;  %v10030_v51 = vld [vmem:[%s14926_s27 + $0x18c] sm:$0xf0] }
 0x1b7   : > { %v10604_v47 = vld [vmem:[%s14926_s27 + $0x5e8] sm:$0xf]  ;;  %2275 = vmatpush.bf16.msra.mxu0 %v10065_v35  ;;  %v13569_v49 = vld [vmem:[%s14926_s27 + $0x608] sm:$0xf0]  ;;  %v10317_v52 = vor.u32 %v13497_v46, %v10316_v45  ;;  %v9992_v54 = vld [vmem:[%s14926_s27 + $0x120] sm:$0xf] }
 0x1b8   : > { %v13421_v50 = vld [vmem:[%s14926_s27 + $0x16c] sm:$0xf]  ;;  %2289 = vmatpush.bf16.msra.mxu1 %v10353_v36  ;;  %v10605_v53 = vor.u32 %v13569_v49, %v10604_v47  ;;  %v13416_v55 = vld [vmem:[%s14926_s27 + $0x140] sm:$0xf0]  ;;  %v10280_v56 = vld [vmem:[%s14926_s27 + $0x360] sm:$0xf] }
 0x1b9   : > { %2303 = vmatpush.bf16.msra.mxu2 %v10641_v40  ;;  %v10033_v57 = vor.u32 %v13421_v50, %v10030_v51  ;;  %v13488_v58 = vld [vmem:[%s14926_s27 + $0x380] sm:$0xf0]  ;;  %v10568_v59 = vld [vmem:[%s14926_s27 + $0x5a0] sm:$0xf]  ;;  %v9994_v62 = vld [vmem:[%s14926_s27 + $0x144] sm:$0xf0]  ;;  %v9993_v63 = vor.u32 %v13416_v55, %v9992_v54 }
 0x1ba   : > { %2317 = vmatpush.bf16.msra.mxu3 %v10069_v44  ;;  %v13560_v60 = vld [vmem:[%s14926_s27 + $0x5c0] sm:$0xf0]  ;;  %v10281_v0 = vor.u32 %v13488_v58, %v10280_v56  ;;  %v9956_v2 = vld [vmem:[%s14926_s27 + $0xd8] sm:$0xf]  ;;  %v13407_v3 = vld [vmem:[%s14926_s27 + $0xf8] sm:$0xf0] }
 0x1bb   : > { %v13412_v61 = vld [vmem:[%s14926_s27 + $0x124] sm:$0xf]  ;;  %2276 = vmatpush.bf16.msra.mxu0 %v10029_v48  ;;  %v10569_v1 = vor.u32 %v13560_v60, %v10568_v59  ;;  %v10244_v4 = vld [vmem:[%s14926_s27 + $0x318] sm:$0xf]  ;;  %v13479_v6 = vld [vmem:[%s14926_s27 + $0x338] sm:$0xf0]  ;;  %v9957_v11 = vor.u32 %v13407_v3, %v9956_v2 }
 0x1bc   : > { %2290 = vmatpush.bf16.msra.mxu1 %v10317_v52  ;;  %v9997_v5 = vor.u32 %v13412_v61, %v9994_v62  ;;  %v10532_v7 = vld [vmem:[%s14926_s27 + $0x558] sm:$0xf]  ;;  %v13551_v8 = vld [vmem:[%s14926_s27 + $0x578] sm:$0xf0]  ;;  %v9958_v10 = vld [vmem:[%s14926_s27 + $0xfc] sm:$0xf0]  ;;  %v10245_v12 = vor.u32 %v13479_v6, %v10244_v4 }
 0x1bd   : > { %2304 = vmatpush.bf16.msra.mxu2 %v10605_v53  ;;  %v13403_v9 = vld [vmem:[%s14926_s27 + $0xdc] sm:$0xf]  ;;  %v10533_v13 = vor.u32 %v13551_v8, %v10532_v7  ;;  %v9920_v14 = vld [vmem:[%s14926_s27 + $0x90] sm:$0xf]  ;;  %v13398_v15 = vld [vmem:[%s14926_s27 + $0xb0] sm:$0xf0] }
 0x1be   : > { %2318 = vmatpush.bf16.msra.mxu3 %v10033_v57  ;;  %v10208_v16 = vld [vmem:[%s14926_s27 + $0x2d0] sm:$0xf]  ;;  %v9961_v17 = vor.u32 %v13403_v9, %v9958_v10  ;;  %v13470_v18 = vld [vmem:[%s14926_s27 + $0x2f0] sm:$0xf0]  ;;  %v9922_v22 = vld [vmem:[%s14926_s27 + $0xb4] sm:$0xf0]  ;;  %v9921_v23 = vor.u32 %v13398_v15, %v9920_v14 }
 0x1bf   : > { %2277 = vmatpush.bf16.msra.mxu0 %v9993_v63  ;;  %v10496_v19 = vld [vmem:[%s14926_s27 + $0x510] sm:$0xf]  ;;  %v13542_v20 = vld [vmem:[%s14926_s27 + $0x530] sm:$0xf0]  ;;  %v10209_v24 = vor.u32 %v13470_v18, %v10208_v16  ;;  %v9884_v26 = vld [vmem:[%s14926_s27 + $0x48] sm:$0xf] }
 0x1c0   : > { %2291 = vmatpush.bf16.msra.mxu1 %v10281_v0  ;;  %v13394_v21 = vld [vmem:[%s14926_s27 + $0x94] sm:$0xf]  ;;  %v10497_v25 = vor.u32 %v13542_v20, %v10496_v19  ;;  %v13389_v27 = vld [vmem:[%s14926_s27 + $0x68] sm:$0xf0]  ;;  %v10172_v28 = vld [vmem:[%s14926_s27 + $0x288] sm:$0xf] }
 0x1c1   : > { %2305 = vmatpush.bf16.msra.mxu2 %v10569_v1  ;;  %v9925_v29 = vor.u32 %v13394_v21, %v9922_v22  ;;  %v13461_v30 = vld [vmem:[%s14926_s27 + $0x2a8] sm:$0xf0]  ;;  %v10460_v31 = vld [vmem:[%s14926_s27 + $0x4c8] sm:$0xf]  ;;  %v9886_v34 = vld [vmem:[%s14926_s27 + $0x6c] sm:$0xf0]  ;;  %v9885_v35 = vor.u32 %v13389_v27, %v9884_v26 }
 0x1c2   : > { %2319 = vmatpush.bf16.msra.mxu3 %v9997_v5  ;;  %v13533_v32 = vld [vmem:[%s14926_s27 + $0x4e8] sm:$0xf0]  ;;  %v9848_v36 = vld [vmem:[%s14926_s27] sm:$0xf]  ;;  %v13380_v37 = vld [vmem:[%s14926_s27 + $0x20] sm:$0xf0]  ;;  %v10173_v38 = vor.u32 %v13461_v30, %v10172_v28 }
 0x1c3   : > { %2278 = vmatpush.bf16.msra.mxu0 %v9957_v11  ;;  %v13385_v33 = vld [vmem:[%s14926_s27 + $0x4c] sm:$0xf]  ;;  %v10461_v39 = vor.u32 %v13533_v32, %v10460_v31  ;;  %v10136_v40 = vld [vmem:[%s14926_s27 + $0x240] sm:$0xf]  ;;  %v13452_v41 = vld [vmem:[%s14926_s27 + $0x260] sm:$0xf0]  ;;  %v9849_v50 = vor.u32 %v13380_v37, %v9848_v36 }
 0x1c4   : > { %2292 = vmatpush.bf16.msra.mxu1 %v10245_v12  ;;  %v10424_v42 = vld [vmem:[%s14926_s27 + $0x480] sm:$0xf]  ;;  %v9889_v43 = vor.u32 %v13385_v33, %v9886_v34  ;;  %v13524_v44 = vld [vmem:[%s14926_s27 + $0x4a0] sm:$0xf0]  ;;  %v9850_v46 = vld [vmem:[%s14926_s27 + $0x24] sm:$0xf0]  ;;  %v10137_v54 = vor.u32 %v13452_v41, %v10136_v40 }
 0x1c5   : > { %2306 = vmatpush.bf16.msra.mxu2 %v10533_v13  ;;  %v13376_v45 = vld [vmem:[%s14926_s27 + $0x4] sm:$0xf]  ;;  %v13511_v47 = vld [vmem:[%s14926_s27 + $0x43c] sm:$0xf]  ;;  %v10390_v48 = vld [vmem:[%s14926_s27 + $0x45c] sm:$0xf0]  ;;  %v10425_v55 = vor.u32 %v13524_v44, %v10424_v42 }
 0x1c6   : > { %2320 = vmatpush.bf16.msra.mxu3 %v9961_v17  ;;  %v13583_v49 = vld [vmem:[%s14926_s27 + $0x67c] sm:$0xf]  ;;  %v10678_v51 = vld [vmem:[%s14926_s27 + $0x69c] sm:$0xf0]  ;;  %v13444_v53 = vld [vmem:[%s14926_s27 + $0x220] sm:$0xf0]  ;;  %v9853_v58 = vor.u32 %v13376_v45, %v9850_v46  ;;  %v10393_v59 = vor.u32 %v13511_v47, %v10390_v48 }
 0x1c7   : > { %2279 = vmatpush.bf16.msra.mxu0 %v9921_v23  ;;  %v10108_v52 = vld [vmem:[%s14926_s27 + $0x200] sm:$0xf]  ;;  %v13516_v57 = vld [vmem:[%s14926_s27 + $0x460] sm:$0xf0]  ;;  %v13502_v60 = vld [vmem:[%s14926_s27 + $0x3f4] sm:$0xf]  ;;  %v10681_v61 = vor.u32 %v13583_v49, %v10678_v51 }
 0x1c8   : > { %2293 = vmatpush.bf16.msra.mxu1 %v10209_v24  ;;  %v10396_v56 = vld [vmem:[%s14926_s27 + $0x440] sm:$0xf]  ;;  %v10109_v62 = vor.u32 %v13444_v53, %v10108_v52  ;;  %v10354_v63 = vld [vmem:[%s14926_s27 + $0x414] sm:$0xf0]  ;;  %v13574_v0 = vld [vmem:[%s14926_s27 + $0x634] sm:$0xf] }
 0x1c9   : > { %2307 = vmatpush.bf16.msra.mxu2 %v10497_v25  ;;  %v10642_v1 = vld [vmem:[%s14926_s27 + $0x654] sm:$0xf0]  ;;  %v10397_v2 = vor.u32 %v13516_v57, %v10396_v56  ;;  %v13435_v4 = vld [vmem:[%s14926_s27 + $0x1d8] sm:$0xf0]  ;;  %s18159_s1 = sld [smem:[#allocation28_spill]]  ;;  %v10357_v9 = vor.u32 %v13502_v60, %v10354_v63  ;;  %s14704_s26 = smov 96  }
 0x1ca   : > { %2321 = vmatpush.bf16.msra.mxu3 %v9925_v29  ;;  %v10072_v3 = vld [vmem:[%s14926_s27 + $0x1b8] sm:$0xf]  ;;  %v13507_v6 = vld [vmem:[%s14926_s27 + $0x418] sm:$0xf0]  ;;  %v13493_v10 = vld [vmem:[%s14926_s27 + $0x3ac] sm:$0xf]  ;;  %v10645_v14 = vor.u32 %v13574_v0, %v10642_v1 }
 0x1cb   : > { %2280 = vmatpush.bf16.msra.mxu0 %v9885_v35  ;;  %v10360_v5 = vld [vmem:[%s14926_s27 + $0x3f8] sm:$0xf]  ;;  %v10318_v11 = vld [vmem:[%s14926_s27 + $0x3cc] sm:$0xf0]  ;;  %v13565_v12 = vld [vmem:[%s14926_s27 + $0x5ec] sm:$0xf]  ;;  %v10073_v15 = vor.u32 %v13435_v4, %v10072_v3 }
 0x1cc   : > { %2294 = vmatpush.bf16.msra.mxu1 %v10173_v38  ;;  %v10606_v16 = vld [vmem:[%s14926_s27 + $0x60c] sm:$0xf0]  ;;  %v13426_v18 = vld [vmem:[%s14926_s27 + $0x190] sm:$0xf0]  ;;  %v10361_v19 = vor.u32 %v13507_v6, %v10360_v5  ;;  %v10321_v27 = vor.u32 %v13493_v10, %v10318_v11  ;;  %v13484_v31 = vld [vmem:[%s14926_s27 + $0x364] sm:$0xf] }
 0x1cd   : > { %2308 = vmatpush.bf16.msra.mxu2 %v10461_v39  ;;  %v10036_v17 = vld [vmem:[%s14926_s27 + $0x170] sm:$0xf]  ;;  %v13498_v23 = vld [vmem:[%s14926_s27 + $0x3d0] sm:$0xf0]  ;;  %v10609_v29 = vor.u32 %v13565_v12, %v10606_v16  ;;  %v10282_v32 = vld [vmem:[%s14926_s27 + $0x384] sm:$0xf0] }
 0x1ce   : > { %2322 = vmatpush.bf16.msra.mxu3 %v9889_v43  ;;  %v10324_v20 = vld [vmem:[%s14926_s27 + $0x3b0] sm:$0xf]  ;;  %v10037_v30 = vor.u32 %v13426_v18, %v10036_v17  ;;  %v13556_v33 = vld [vmem:[%s14926_s27 + $0x5a4] sm:$0xf]  ;;  %v10570_v35 = vld [vmem:[%s14926_s27 + $0x5c4] sm:$0xf0]  ;;  %v10285_v40 = vor.u32 %v13484_v31, %v10282_v32 }
 0x1cf   : > { %2281 = vmatpush.bf16.msra.mxu0 %v9849_v50  ;;  %v899_v7 = vld [vmem:[%s18159_s1] sm:$0xff]  ;;  %v902_v8 = vld [vmem:[%s18159_s1 + $0x18] sm:$0xff]  ;;  %v900_v21 = vld [vmem:[%s18159_s1 + $0x8] sm:$0xff]  ;;  %v10325_v34 = vor.u32 %v13498_v23, %v10324_v20  ;;  %v10573_v41 = vor.u32 %v13556_v33, %v10570_v35  ;;  %s14705_s3 = smov 32   ;;  %vm2656_vm7 = vcmask 261120   ;;  %s14706_s4 = smov 64  }
 0x1d0   : > { %2295 = vmatpush.bf16.msra.mxu1 %v10137_v54  ;;  %v15119_v13 = vpack.c.bf16 %v902_v8, %v899_v7  ;;  %v903_v22 = vld [vmem:[%s18159_s1 + $0x20] sm:$0xff]  ;;  %v901_v25 = vld [vmem:[%s18159_s1 + $0x10] sm:$0xff]  ;;  %v904_v26 = vld [vmem:[%s18159_s1 + $0x28] sm:$0xff]  ;;  %s18160_s17 = sld [smem:[#allocation19_spill]]  ;;  %vm2692_vm8 = vcmask 130048   ;;  %vm2852_vm9 = vcmask 523520  }
 0x1d1   : > { %2309 = vmatpush.bf16.msra.mxu2 %v10425_v55  ;;  %v15133_v24 = vpack.c.bf16 %v903_v22, %v900_v21  ;;  %v15142_v28 = vpack.c.bf16 %v904_v26, %v901_v25  ;;  %v10000_v36 = vld [vmem:[%s14926_s27 + $0x128] sm:$0xf]  ;;  %v13417_v37 = vld [vmem:[%s14926_s27 + $0x148] sm:$0xf0]  ;;  %v13475_v43 = vld [vmem:[%s14926_s27 + $0x31c] sm:$0xf] }
 0x1d2   : > { %2323 = vmatpush.bf16.msra.mxu3 %v9853_v58  ;;  %2282 = vmatmul.bf16.vlgmr.msra.gmra.mxu0 %v15119_v13  ;;  %v10288_v38 = vld [vmem:[%s14926_s27 + $0x368] sm:$0xf]  ;;  %v13489_v39 = vld [vmem:[%s14926_s27 + $0x388] sm:$0xf0]  ;;  %v10001_v42 = vor.u32 %v13417_v37, %v10000_v36  ;;  %v10246_v44 = vld [vmem:[%s14926_s27 + $0x33c] sm:$0xf0] }
 0x1d3   : > { %2330 = vmatpush.bf16.msrb.mxu0 %v10393_v59  ;;  %2296 = vmatmul.bf16.vlgmr.msra.gmra.mxu1 %v15133_v24  ;;  %v13547_v45 = vld [vmem:[%s14926_s27 + $0x55c] sm:$0xf]  ;;  %v10289_v46 = vor.u32 %v13489_v39, %v10288_v38  ;;  %v10534_v47 = vld [vmem:[%s14926_s27 + $0x57c] sm:$0xf0]  ;;  %v13408_v49 = vld [vmem:[%s14926_s27 + $0x100] sm:$0xf0]  ;;  %v10249_v52 = vor.u32 %v13475_v43, %v10246_v44 }
 0x1d4   : > { %2344 = vmatpush.bf16.msrb.mxu1 %v10681_v61  ;;  %2310 = vmatmul.bf16.vlgmr.msra.gmra.mxu2 %v15142_v28  ;;  %v9964_v48 = vld [vmem:[%s14926_s27 + $0xe0] sm:$0xf]  ;;  %v13480_v51 = vld [vmem:[%s14926_s27 + $0x340] sm:$0xf0]  ;;  %v10537_v53 = vor.u32 %v13547_v45, %v10534_v47  ;;  %v13466_v55 = vld [vmem:[%s14926_s27 + $0x2d4] sm:$0xf] }
 0x1d5   : > { %2358 = vmatpush.bf16.msrb.mxu2 %v10109_v62  ;;  %2324 = vmatmul.bf16.vlgmr.msra.gmra.mxu3 %v15119_v13  ;;  %v10252_v50 = vld [vmem:[%s14926_s27 + $0x320] sm:$0xf]  ;;  %v9965_v54 = vor.u32 %v13408_v49, %v9964_v48  ;;  %v10210_v56 = vld [vmem:[%s14926_s27 + $0x2f4] sm:$0xf0]  ;;  %v13538_v57 = vld [vmem:[%s14926_s27 + $0x514] sm:$0xf] }
 0x1d6   : > { %2372 = vmatpush.bf16.msrb.mxu3 %v10397_v2  ;;  %v10253_v58 = vor.u32 %v13480_v51, %v10252_v50  ;;  %v10498_v59 = vld [vmem:[%s14926_s27 + $0x534] sm:$0xf0]  ;;  %v13399_v61 = vld [vmem:[%s14926_s27 + $0xb8] sm:$0xf0]  ;;  %v10213_v0 = vor.u32 %v13466_v55, %v10210_v56  ;;  %v13457_v3 = vld [vmem:[%s14926_s27 + $0x28c] sm:$0xf] }
 0x1d7   : > { %2331 = vmatpush.bf16.msrb.mxu0 %v10357_v9  ;;  %v9928_v60 = vld [vmem:[%s14926_s27 + $0x98] sm:$0xf]  ;;  %v13471_v63 = vld [vmem:[%s14926_s27 + $0x2f8] sm:$0xf0]  ;;  %v10501_v1 = vor.u32 %v13538_v57, %v10498_v59  ;;  %v10174_v4 = vld [vmem:[%s14926_s27 + $0x2ac] sm:$0xf0] }
 0x1d8   : > { %2345 = vmatpush.bf16.msrb.mxu1 %v10645_v14  ;;  %v10216_v62 = vld [vmem:[%s14926_s27 + $0x2d8] sm:$0xf]  ;;  %v9929_v2 = vor.u32 %v13399_v61, %v9928_v60  ;;  %v13529_v5 = vld [vmem:[%s14926_s27 + $0x4cc] sm:$0xf]  ;;  %v10462_v7 = vld [vmem:[%s14926_s27 + $0x4ec] sm:$0xf0]  ;;  %v10177_v12 = vor.u32 %v13457_v3, %v10174_v4 }
 0x1d9   : > { %2359 = vmatpush.bf16.msrb.mxu2 %v10073_v15  ;;  %v10217_v6 = vor.u32 %v13471_v63, %v10216_v62  ;;  %v9892_v8 = vld [vmem:[%s14926_s27 + $0x50] sm:$0xf]  ;;  %v13390_v9 = vld [vmem:[%s14926_s27 + $0x70] sm:$0xf0]  ;;  %v13448_v14 = vld [vmem:[%s14926_s27 + $0x244] sm:$0xf]  ;;  %v10465_v16 = vor.u32 %v13529_v5, %v10462_v7 }
 0x1da   : > { %2373 = vmatpush.bf16.msrb.mxu3 %v10361_v19  ;;  %v10180_v10 = vld [vmem:[%s14926_s27 + $0x290] sm:$0xf]  ;;  %v13462_v11 = vld [vmem:[%s14926_s27 + $0x2b0] sm:$0xf0]  ;;  %v10138_v15 = vld [vmem:[%s14926_s27 + $0x264] sm:$0xf0]  ;;  %v9893_v17 = vor.u32 %v13390_v9, %v9892_v8 }
 0x1db   : > { %2332 = vmatpush.bf16.msrb.mxu0 %v10321_v27  ;;  %v13520_v18 = vld [vmem:[%s14926_s27 + $0x484] sm:$0xf]  ;;  %v10426_v19 = vld [vmem:[%s14926_s27 + $0x4a4] sm:$0xf0]  ;;  %v10181_v21 = vor.u32 %v13462_v11, %v10180_v10  ;;  %v13381_v22 = vld [vmem:[%s14926_s27 + $0x28] sm:$0xf0] }
 0x1dc   : > { %2346 = vmatpush.bf16.msrb.mxu1 %v10609_v29  ;;  %v9856_v20 = vld [vmem:[%s14926_s27 + $0x8] sm:$0xf]  ;;  %v13453_v25 = vld [vmem:[%s14926_s27 + $0x268] sm:$0xf0]  ;;  %v10684_v26 = vld [vmem:[%s14926_s27 + $0x680] sm:$0xf] }
 0x1dd   : > { %2360 = vmatpush.bf16.msrb.mxu2 %v10037_v30  ;;  %v10144_v23 = vld [vmem:[%s14926_s27 + $0x248] sm:$0xf]  ;;  %v13588_v27 = vld [vmem:[%s14926_s27 + $0x6a0] sm:$0xf0]  ;;  %v10141_v30 = vor.u32 %v13448_v14, %v10138_v15  ;;  %v9857_v35 = vor.u32 %v13381_v22, %v9856_v20  ;;  %v13579_v43 = vld [vmem:[%s14926_s27 + $0x658] sm:$0xf0] }
 0x1de   : > { %2374 = vmatpush.bf16.msrb.mxu3 %v10325_v34  ;;  %v13440_v29 = vld [vmem:[%s14926_s27 + $0x204] sm:$0xf]  ;;  %v10110_v31 = vld [vmem:[%s14926_s27 + $0x224] sm:$0xf0]  ;;  %v10429_v34 = vor.u32 %v13520_v18, %v10426_v19  ;;  %v10145_v38 = vor.u32 %v13453_v25, %v10144_v23  ;;  %v10685_v39 = vor.u32 %v13588_v27, %v10684_v26  ;;  %v13431_v44 = vld [vmem:[%s14926_s27 + $0x1bc] sm:$0xf] }
 0x1df   : > { %2333 = vmatpush.bf16.msrb.mxu0 %v10285_v40  ;;  %v13512_v32 = vld [vmem:[%s14926_s27 + $0x444] sm:$0xf]  ;;  %v10398_v33 = vld [vmem:[%s14926_s27 + $0x464] sm:$0xf0]  ;;  %v10113_v40 = vor.u32 %v13440_v29, %v10110_v31  ;;  %v13503_v47 = vld [vmem:[%s14926_s27 + $0x3fc] sm:$0xf] }
 0x1e0   : > { %2347 = vmatpush.bf16.msrb.mxu1 %v10573_v41  ;;  %v13584_v36 = vld [vmem:[%s14926_s27 + $0x684] sm:$0xf]  ;;  %v10686_v37 = vld [vmem:[%s14926_s27 + $0x6a4] sm:$0xf0]  ;;  %v10401_v41 = vor.u32 %v13512_v32, %v10398_v33  ;;  %v10362_v48 = vld [vmem:[%s14926_s27 + $0x41c] sm:$0xf0] }
 0x1e1   : > { %2361 = vmatpush.bf16.msrb.mxu2 %v10001_v42  ;;  %v10648_v42 = vld [vmem:[%s14926_s27 + $0x638] sm:$0xf]  ;;  %v10689_v45 = vor.u32 %v13584_v36, %v10686_v37  ;;  %v13575_v49 = vld [vmem:[%s14926_s27 + $0x63c] sm:$0xf]  ;;  %v10650_v50 = vld [vmem:[%s14926_s27 + $0x65c] sm:$0xf0] }
 0x1e2   : > { %2375 = vmatpush.bf16.msrb.mxu3 %v10289_v46  ;;  %v10074_v46 = vld [vmem:[%s14926_s27 + $0x1dc] sm:$0xf0]  ;;  %v10649_v51 = vor.u32 %v13579_v43, %v10648_v42  ;;  %v13570_v55 = vld [vmem:[%s14926_s27 + $0x610] sm:$0xf0]  ;;  %v10653_v57 = vor.u32 %v13575_v49, %v10650_v50  ;;  %v10326_v60 = vld [vmem:[%s14926_s27 + $0x3d4] sm:$0xf0] }
 0x1e3   : > { %2334 = vmatpush.bf16.msrb.mxu0 %v10249_v52  ;;  %v10077_v52 = vor.u32 %v13431_v44, %v10074_v46  ;;  %v13422_v56 = vld [vmem:[%s14926_s27 + $0x174] sm:$0xf]  ;;  %v10614_v62 = vld [vmem:[%s14926_s27 + $0x614] sm:$0xf0]  ;;  %v13561_v3 = vld [vmem:[%s14926_s27 + $0x5c8] sm:$0xf0] }
 0x1e4   : > { %2348 = vmatpush.bf16.msrb.mxu1 %v10537_v53  ;;  %v10365_v53 = vor.u32 %v13503_v47, %v10362_v48  ;;  %v13494_v59 = vld [vmem:[%s14926_s27 + $0x3b4] sm:$0xf]  ;;  %v13413_v4 = vld [vmem:[%s14926_s27 + $0x12c] sm:$0xf]  ;;  %v10290_v8 = vld [vmem:[%s14926_s27 + $0x38c] sm:$0xf0] }
 0x1e5   : > { %2362 = vmatpush.bf16.msrb.mxu2 %v9965_v54  ;;  %v10612_v54 = vld [vmem:[%s14926_s27 + $0x5f0] sm:$0xf]  ;;  %v13566_v61 = vld [vmem:[%s14926_s27 + $0x5f4] sm:$0xf]  ;;  %v13485_v7 = vld [vmem:[%s14926_s27 + $0x36c] sm:$0xf] }
 0x1e6   : > { %2376 = vmatpush.bf16.msrb.mxu3 %v10253_v58  ;;  %v10038_v58 = vld [vmem:[%s14926_s27 + $0x194] sm:$0xf0]  ;;  %v10613_v63 = vor.u32 %v13570_v55, %v10612_v54  ;;  %v10617_v5 = vor.u32 %v13566_v61, %v10614_v62  ;;  %v13557_v9 = vld [vmem:[%s14926_s27 + $0x5ac] sm:$0xf]  ;;  %v10578_v10 = vld [vmem:[%s14926_s27 + $0x5cc] sm:$0xf0]  ;;  %v10293_v15 = vor.u32 %v13485_v7, %v10290_v8 }
 0x1e7   : > { %2335 = vmatpush.bf16.msrb.mxu0 %v10213_v0  ;;  %v10041_v0 = vor.u32 %v13422_v56, %v10038_v58  ;;  %v9966_v18 = vld [vmem:[%s14926_s27 + $0x104] sm:$0xf0]  ;;  %v10581_v19 = vor.u32 %v13557_v9, %v10578_v10  ;;  %v13476_v20 = vld [vmem:[%s14926_s27 + $0x324] sm:$0xf]  ;;  %v10504_v29 = vld [vmem:[%s14926_s27 + $0x518] sm:$0xf] }
 0x1e8   : > { %2349 = vmatpush.bf16.msrb.mxu1 %v10501_v1  ;;  %v10329_v1 = vor.u32 %v13494_v59, %v10326_v60  ;;  %v13548_v22 = vld [vmem:[%s14926_s27 + $0x564] sm:$0xf]  ;;  %v10542_v23 = vld [vmem:[%s14926_s27 + $0x584] sm:$0xf0]  ;;  %v13395_v31 = vld [vmem:[%s14926_s27 + $0x9c] sm:$0xf] }
 0x1e9   : > { %2363 = vmatpush.bf16.msrb.mxu2 %v9929_v2  ;;  %v10576_v2 = vld [vmem:[%s14926_s27 + $0x5a8] sm:$0xf]  ;;  %v10545_v32 = vor.u32 %v13548_v22, %v10542_v23  ;;  %v9930_v33 = vld [vmem:[%s14926_s27 + $0xbc] sm:$0xf0]  ;;  %v13539_v36 = vld [vmem:[%s14926_s27 + $0x51c] sm:$0xf] }
 0x1ea   : > { %2377 = vmatpush.bf16.msrb.mxu3 %v10217_v6  ;;  %v10002_v6 = vld [vmem:[%s14926_s27 + $0x14c] sm:$0xf0]  ;;  %v10577_v11 = vor.u32 %v13561_v3, %v10576_v2  ;;  %v10506_v37 = vld [vmem:[%s14926_s27 + $0x53c] sm:$0xf0]  ;;  %v13534_v42 = vld [vmem:[%s14926_s27 + $0x4f0] sm:$0xf0] }
 0x1eb   : > { %2336 = vmatpush.bf16.msrb.mxu0 %v10177_v12  ;;  %v10540_v12 = vld [vmem:[%s14926_s27 + $0x560] sm:$0xf]  ;;  %v10005_v14 = vor.u32 %v13413_v4, %v10002_v6  ;;  %v13386_v43 = vld [vmem:[%s14926_s27 + $0x54] sm:$0xf]  ;;  %v10509_v44 = vor.u32 %v13539_v36, %v10506_v37  ;;  %v10182_v47 = vld [vmem:[%s14926_s27 + $0x2b4] sm:$0xf0] }
 0x1ec   : > { %2350 = vmatpush.bf16.msrb.mxu1 %v10465_v16  ;;  %v13552_v16 = vld [vmem:[%s14926_s27 + $0x580] sm:$0xf0]  ;;  %v13458_v46 = vld [vmem:[%s14926_s27 + $0x294] sm:$0xf]  ;;  %v10470_v49 = vld [vmem:[%s14926_s27 + $0x4f4] sm:$0xf0] }
 0x1ed   : > { %2364 = vmatpush.bf16.msrb.mxu2 %v9893_v17  ;;  %v13404_v17 = vld [vmem:[%s14926_s27 + $0xe4] sm:$0xf]  ;;  %v10541_v25 = vor.u32 %v13552_v16, %v10540_v12  ;;  %v13530_v48 = vld [vmem:[%s14926_s27 + $0x4d4] sm:$0xf]  ;;  %v13525_v54 = vld [vmem:[%s14926_s27 + $0x4a8] sm:$0xf0] }
 0x1ee   : > { %2378 = vmatpush.bf16.msrb.mxu3 %v10181_v21  ;;  %v10254_v21 = vld [vmem:[%s14926_s27 + $0x344] sm:$0xf0]  ;;  %v9969_v26 = vor.u32 %v13404_v17, %v9966_v18  ;;  %v13377_v55 = vld [vmem:[%s14926_s27 + $0xc] sm:$0xf]  ;;  %v9858_v56 = vld [vmem:[%s14926_s27 + $0x2c] sm:$0xf0] }
 0x1ef   : > { %2337 = vmatpush.bf16.msrb.mxu0 %v10141_v30  ;;  %v10257_v27 = vor.u32 %v13476_v20, %v10254_v21  ;;  %v13543_v30 = vld [vmem:[%s14926_s27 + $0x538] sm:$0xf0]  ;;  %v13449_v58 = vld [vmem:[%s14926_s27 + $0x24c] sm:$0xf]  ;;  %v10146_v59 = vld [vmem:[%s14926_s27 + $0x26c] sm:$0xf0]  ;;  %v9861_v3 = vor.u32 %v13377_v55, %v9858_v56 }
 0x1f0   : > { %2351 = vmatpush.bf16.msrb.mxu1 %v10429_v34  ;;  %v13467_v34 = vld [vmem:[%s14926_s27 + $0x2dc] sm:$0xf]  ;;  %v13521_v60 = vld [vmem:[%s14926_s27 + $0x48c] sm:$0xf]  ;;  %v10434_v61 = vld [vmem:[%s14926_s27 + $0x4ac] sm:$0xf0]  ;;  %v10149_v4 = vor.u32 %v13449_v58, %v10146_v59 }
 0x1f1   : > { %2365 = vmatpush.bf16.msrb.mxu2 %v9857_v35  ;;  %v10218_v35 = vld [vmem:[%s14926_s27 + $0x2fc] sm:$0xf0]  ;;  %v10692_v62 = vld [vmem:[%s14926_s27 + $0x688] sm:$0xf]  ;;  %v13517_v2 = vld [vmem:[%s14926_s27 + $0x468] sm:$0xf0] }
 0x1f2   : > { %2379 = vmatpush.bf16.msrb.mxu3 %v10145_v38  ;;  %2338 = vmatmul.bf16.vlgmr.msrb.gmra.mxu0 %v15133_v24  ;;  %v10505_v38 = vor.u32 %v13543_v30, %v10504_v29  ;;  %v10116_v7 = vld [vmem:[%s14926_s27 + $0x208] sm:$0xf]  ;;  %v13445_v8 = vld [vmem:[%s14926_s27 + $0x228] sm:$0xf0]  ;;  %v10656_v9 = vld [vmem:[%s14926_s27 + $0x640] sm:$0xf] }
 0x1f3   : > { %2386 = vmatpush.bf16.msra.mxu0 %v10685_v39  ;;  %2352 = vmatmul.bf16.vlgmr.msrb.gmra.mxu1 %v15142_v28  ;;  %v9933_v39 = vor.u32 %v13395_v31, %v9930_v33  ;;  %v13441_v12 = vld [vmem:[%s14926_s27 + $0x20c] sm:$0xf]  ;;  %v13508_v16 = vld [vmem:[%s14926_s27 + $0x420] sm:$0xf0]  ;;  %v10117_v17 = vor.u32 %v13445_v8, %v10116_v7  ;;  %v10620_v21 = vld [vmem:[%s14926_s27 + $0x5f8] sm:$0xf] }
 0x1f4   : > { %2400 = vmatpush.bf16.msra.mxu1 %v10113_v40  ;;  %2366 = vmatmul.bf16.vlgmr.msrb.gmra.mxu2 %v15119_v13  ;;  %v10221_v40 = vor.u32 %v13467_v34, %v10218_v35  ;;  %v13436_v20 = vld [vmem:[%s14926_s27 + $0x1e0] sm:$0xf0]  ;;  %v10332_v29 = vld [vmem:[%s14926_s27 + $0x3b8] sm:$0xf]  ;;  %v13499_v30 = vld [vmem:[%s14926_s27 + $0x3d8] sm:$0xf0] }
 0x1f5   : > { %2414 = vmatpush.bf16.msra.mxu2 %v10401_v41  ;;  %2380 = vmatmul.bf16.vlgmr.msrb.gmra.mxu3 %v15133_v24  ;;  %v10468_v41 = vld [vmem:[%s14926_s27 + $0x4d0] sm:$0xf]  ;;  %v10044_v33 = vld [vmem:[%s14926_s27 + $0x178] sm:$0xf]  ;;  %v13427_v34 = vld [vmem:[%s14926_s27 + $0x198] sm:$0xf0]  ;;  %v10333_v37 = vor.u32 %v13499_v30, %v10332_v29 }
 0x1f6   : > { %2428 = vmatpush.bf16.msra.mxu3 %v10689_v45  ;;  %v9894_v45 = vld [vmem:[%s14926_s27 + $0x74] sm:$0xf0]  ;;  %v10469_v50 = vor.u32 %v13534_v42, %v10468_v41  ;;  %v10584_v35 = vld [vmem:[%s14926_s27 + $0x5b0] sm:$0xf]  ;;  %v13490_v42 = vld [vmem:[%s14926_s27 + $0x390] sm:$0xf0] }
 0x1f7   : > { %2387 = vmatpush.bf16.msra.mxu0 %v10649_v51  ;;  %v10432_v51 = vld [vmem:[%s14926_s27 + $0x488] sm:$0xf]  ;;  %v10296_v41 = vld [vmem:[%s14926_s27 + $0x370] sm:$0xf]  ;;  %v13409_v58 = vld [vmem:[%s14926_s27 + $0x108] sm:$0xf0] }
 0x1f8   : > { %2401 = vmatpush.bf16.msra.mxu1 %v10077_v52  ;;  %v9897_v52 = vor.u32 %v13386_v43, %v9894_v45  ;;  %v10045_v43 = vor.u32 %v13427_v34, %v10044_v33  ;;  %v10008_v45 = vld [vmem:[%s14926_s27 + $0x130] sm:$0xf]  ;;  %v10512_v59 = vld [vmem:[%s14926_s27 + $0x520] sm:$0xf]  ;;  %v10476_v7 = vld [vmem:[%s14926_s27 + $0x4d8] sm:$0xf] }
 0x1f9   : > { %2415 = vmatpush.bf16.msra.mxu2 %v10365_v53  ;;  %v10185_v53 = vor.u32 %v13458_v46, %v10182_v47  ;;  %v13418_v46 = vld [vmem:[%s14926_s27 + $0x150] sm:$0xf0]  ;;  %v10548_v47 = vld [vmem:[%s14926_s27 + $0x568] sm:$0xf]  ;;  %v9864_v34 = vld [vmem:[%s14926_s27 + $0x10] sm:$0xf] }
 0x1fa   : > { %2429 = vmatpush.bf16.msra.mxu3 %v10653_v57  ;;  %v10473_v57 = vor.u32 %v13530_v48, %v10470_v49  ;;  %v10297_v49 = vor.u32 %v13490_v42, %v10296_v41  ;;  %v10009_v55 = vor.u32 %v13418_v46, %v10008_v45  ;;  %v13454_v29 = vld [vmem:[%s14926_s27 + $0x270] sm:$0xf0]  ;;  %v9866_v42 = vld [vmem:[%s14926_s27 + $0x34] sm:$0xf0]  ;;  %v10658_v45 = vld [vmem:[%s14926_s27 + $0x664] sm:$0xf0] }
 0x1fb   : > { %2388 = vmatpush.bf16.msra.mxu0 %v10613_v63  ;;  %v13589_v63 = vld [vmem:[%s14926_s27 + $0x6a8] sm:$0xf0]  ;;  %v13378_v41 = vld [vmem:[%s14926_s27 + $0x14] sm:$0xf]  ;;  %vm2959_vm10 = vcmask 785920   ;;  %vm3066_vm11 = vcmask 1048320  }
 0x1fc   : > { %2402 = vmatpush.bf16.msra.mxu1 %v10041_v0  ;;  %v10433_v0 = vor.u32 %v13525_v54, %v10432_v51  ;;  %v10693_v6 = vor.u32 %v13589_v63, %v10692_v62  ;;  %v13414_v51 = vld [vmem:[%s14926_s27 + $0x134] sm:$0xf]  ;;  %v13481_v54 = vld [vmem:[%s14926_s27 + $0x348] sm:$0xf0]  ;;  %v13544_v62 = vld [vmem:[%s14926_s27 + $0x540] sm:$0xf0] }
 0x1fd   : > { %2416 = vmatpush.bf16.msra.mxu2 %v10329_v1  ;;  %v10404_v1 = vld [vmem:[%s14926_s27 + $0x448] sm:$0xf]  ;;  %v13405_v63 = vld [vmem:[%s14926_s27 + $0xec] sm:$0xf] }
 0x1fe   : > { %2430 = vmatpush.bf16.msra.mxu3 %v10617_v5  ;;  %v10437_v5 = vor.u32 %v13521_v60, %v10434_v61  ;;  %v10405_v10 = vor.u32 %v13517_v2, %v10404_v1  ;;  %v10224_v1 = vld [vmem:[%s14926_s27 + $0x2e0] sm:$0xf]  ;;  %v13472_v2 = vld [vmem:[%s14926_s27 + $0x300] sm:$0xf0] }
 0x1ff   : > { %2389 = vmatpush.bf16.msra.mxu0 %v10577_v11  ;;  %v13580_v11 = vld [vmem:[%s14926_s27 + $0x660] sm:$0xf0] }
 0x200   : > { %2403 = vmatpush.bf16.msra.mxu1 %v10005_v14  ;;  %v10118_v14 = vld [vmem:[%s14926_s27 + $0x22c] sm:$0xf0]  ;;  %v10657_v18 = vor.u32 %v13580_v11, %v10656_v9  ;;  %v10225_v9 = vor.u32 %v13472_v2, %v10224_v1  ;;  %v13396_v11 = vld [vmem:[%s14926_s27 + $0xa4] sm:$0xf]  ;;  %v10334_v1 = vld [vmem:[%s14926_s27 + $0x3dc] sm:$0xf0] }
 0x201   : > { %2417 = vmatpush.bf16.msra.mxu2 %v10293_v15  ;;  %v10368_v15 = vld [vmem:[%s14926_s27 + $0x400] sm:$0xf]  ;;  %v10121_v22 = vor.u32 %v13441_v12, %v10118_v14  ;;  %v9938_v12 = vld [vmem:[%s14926_s27 + $0xc4] sm:$0xf0]  ;;  %v10188_v14 = vld [vmem:[%s14926_s27 + $0x298] sm:$0xf] }
 0x202   : > { %2431 = vmatpush.bf16.msra.mxu3 %v10581_v19  ;;  %v10080_v19 = vld [vmem:[%s14926_s27 + $0x1c0] sm:$0xf]  ;;  %v10369_v23 = vor.u32 %v13508_v16, %v10368_v15  ;;  %v13463_v15 = vld [vmem:[%s14926_s27 + $0x2b8] sm:$0xf0] }
 0x203   : > { %2390 = vmatpush.bf16.msra.mxu0 %v10541_v25  ;;  %v13571_v25 = vld [vmem:[%s14926_s27 + $0x618] sm:$0xf0]  ;;  %v10081_v31 = vor.u32 %v13436_v20, %v10080_v19  ;;  %v10440_v20 = vld [vmem:[%s14926_s27 + $0x490] sm:$0xf] }
 0x204   : > { %2404 = vmatpush.bf16.msra.mxu1 %v9969_v26  ;;  %v13432_v26 = vld [vmem:[%s14926_s27 + $0x1c4] sm:$0xf]  ;;  %v13391_v19 = vld [vmem:[%s14926_s27 + $0x78] sm:$0xf0] }
 0x205   : > { %2418 = vmatpush.bf16.msra.mxu2 %v10257_v27  ;;  %v10082_v27 = vld [vmem:[%s14926_s27 + $0x1e4] sm:$0xf0] }
 0x206   : > { %2432 = vmatpush.bf16.msra.mxu3 %v10545_v32  ;;  %v10621_v32 = vor.u32 %v13571_v25, %v10620_v21  ;;  %v10085_v36 = vor.u32 %v13432_v26, %v10082_v27  ;;  %v9941_v21 = vor.u32 %v13396_v11, %v9938_v12  ;;  %v13387_v25 = vld [vmem:[%s14926_s27 + $0x5c] sm:$0xf]  ;;  %v9902_v26 = vld [vmem:[%s14926_s27 + $0x7c] sm:$0xf0]  ;;  %v10152_v27 = vld [vmem:[%s14926_s27 + $0x250] sm:$0xf] }
 0x207   : > { %2391 = vmatpush.bf16.msra.mxu0 %v10505_v38  ;;  %v13562_v38 = vld [vmem:[%s14926_s27 + $0x5d0] sm:$0xf0]  ;;  %v13500_v11 = vld [vmem:[%s14926_s27 + $0x3e0] sm:$0xf0] }
 0x208   : > { %2405 = vmatpush.bf16.msra.mxu1 %v9933_v39  ;;  %v13423_v39 = vld [vmem:[%s14926_s27 + $0x17c] sm:$0xf]  ;;  %v13486_v12 = vld [vmem:[%s14926_s27 + $0x374] sm:$0xf] }
 0x209   : > { %2419 = vmatpush.bf16.msra.mxu2 %v10221_v40  ;;  %v10046_v40 = vld [vmem:[%s14926_s27 + $0x19c] sm:$0xf0] }
 0x20a   : > { %2433 = vmatpush.bf16.msra.mxu3 %v10509_v44  ;;  %v10585_v44 = vor.u32 %v13562_v38, %v10584_v35  ;;  %v10049_v48 = vor.u32 %v13423_v39, %v10046_v40  ;;  %v13382_v35 = vld [vmem:[%s14926_s27 + $0x30] sm:$0xf0]  ;;  %v13513_v38 = vld [vmem:[%s14926_s27 + $0x44c] sm:$0xf]  ;;  %v10406_v39 = vld [vmem:[%s14926_s27 + $0x46c] sm:$0xf0] }
 0x20b   : > { %2392 = vmatpush.bf16.msra.mxu0 %v10469_v50  ;;  %v13553_v50 = vld [vmem:[%s14926_s27 + $0x588] sm:$0xf0]  ;;  %v10409_v46 = vor.u32 %v13513_v38, %v10406_v39  ;;  %v13482_v38 = vld [vmem:[%s14926_s27 + $0x350] sm:$0xf0]  ;;  %v13468_v39 = vld [vmem:[%s14926_s27 + $0x2e4] sm:$0xf] }
 0x20c   : > { %2406 = vmatpush.bf16.msra.mxu1 %v9897_v52  ;;  %v10010_v52 = vld [vmem:[%s14926_s27 + $0x154] sm:$0xf0]  ;;  %v10549_v56 = vor.u32 %v13553_v50, %v10548_v47  ;;  %v10124_v47 = vld [vmem:[%s14926_s27 + $0x210] sm:$0xf]  ;;  %v10370_v50 = vld [vmem:[%s14926_s27 + $0x424] sm:$0xf0] }
 0x20d   : > { %2420 = vmatpush.bf16.msra.mxu2 %v10185_v53  ;;  %v10260_v53 = vld [vmem:[%s14926_s27 + $0x328] sm:$0xf]  ;;  %v10013_v60 = vor.u32 %v13414_v51, %v10010_v52  ;;  %v9869_v51 = vor.u32 %v13378_v41, %v9866_v42 }
 0x20e   : > { %2434 = vmatpush.bf16.msra.mxu3 %v10473_v57  ;;  %v9972_v57 = vld [vmem:[%s14926_s27 + $0xe8] sm:$0xf]  ;;  %v10261_v61 = vor.u32 %v13481_v54, %v10260_v53  ;;  %v13567_v54 = vld [vmem:[%s14926_s27 + $0x5fc] sm:$0xf] }
 0x20f   : > { %2393 = vmatpush.bf16.msra.mxu0 %v10433_v0  ;;  %v9974_v0 = vld [vmem:[%s14926_s27 + $0x10c] sm:$0xf0] }
 0x210   : > { %2407 = vmatpush.bf16.msra.mxu1 %v9861_v3  ;;  %v9973_v3 = vor.u32 %v13409_v58, %v9972_v57  ;;  %v9977_v8 = vor.u32 %v13405_v63, %v9974_v0  ;;  %v13518_v57 = vld [vmem:[%s14926_s27 + $0x470] sm:$0xf0]  ;;  %v10088_v58 = vld [vmem:[%s14926_s27 + $0x1c8] sm:$0xf]  ;;  %v13509_v63 = vld [vmem:[%s14926_s27 + $0x428] sm:$0xf0] }
 0x211   : > { %2421 = vmatpush.bf16.msra.mxu2 %v10149_v4  ;;  %v10513_v4 = vor.u32 %v13544_v62, %v10512_v59  ;;  %v10376_v62 = vld [vmem:[%s14926_s27 + $0x408] sm:$0xf]  ;;  %v13495_v0 = vld [vmem:[%s14926_s27 + $0x3bc] sm:$0xf] }
 0x212   : > { %2435 = vmatpush.bf16.msra.mxu3 %v10437_v5  ;;  %2394 = vmatmul.bf16.vlgmr.msra.gmra.mxu0 %v15142_v28  ;;  %v9936_v5 = vld [vmem:[%s14926_s27 + $0xa0] sm:$0xf] }
 0x213   : > { %2408 = vmatmul.bf16.vlgmr.msra.gmra.mxu1 %v15119_v13  ;;  %2442 = vmatpush.bf16.msrb.mxu0 %v10117_v17 }
 0x214   : > { %2456 = vmatpush.bf16.msrb.mxu1 %v10405_v10  ;;  %2422 = vmatmul.bf16.vlgmr.msra.gmra.mxu2 %v15133_v24  ;;  %v13535_v10 = vld [vmem:[%s14926_s27 + $0x4f8] sm:$0xf0] }
 0x215   : > { %2470 = vmatpush.bf16.msrb.mxu2 %v10693_v6  ;;  %2436 = vmatmul.bf16.vlgmr.msra.gmra.mxu3 %v15142_v28  ;;  %v13400_v6 = vld [vmem:[%s14926_s27 + $0xc0] sm:$0xf0]  ;;  %v10477_v17 = vor.u32 %v13535_v10, %v10476_v7  ;;  %v10586_v7 = vld [vmem:[%s14926_s27 + $0x5d4] sm:$0xf0]  ;;  %v10340_v10 = vld [vmem:[%s14926_s27 + $0x3c0] sm:$0xf] }
 0x216   : > { %2484 = vmatpush.bf16.msrb.mxu3 %v10121_v22  ;;  %v9937_v16 = vor.u32 %v13400_v6, %v9936_v5  ;;  %v10189_v22 = vor.u32 %v13463_v15, %v10188_v14  ;;  %v13428_v5 = vld [vmem:[%s14926_s27 + $0x1a0] sm:$0xf0]  ;;  %v13558_v6 = vld [vmem:[%s14926_s27 + $0x5b4] sm:$0xf]  ;;  %v10298_v14 = vld [vmem:[%s14926_s27 + $0x394] sm:$0xf0] }
 0x217   : > { %2443 = vmatpush.bf16.msrb.mxu0 %v10081_v31  ;;  %v13585_v31 = vld [vmem:[%s14926_s27 + $0x68c] sm:$0xf] }
 0x218   : > { %2457 = vmatpush.bf16.msrb.mxu1 %v10369_v23  ;;  %v13526_v23 = vld [vmem:[%s14926_s27 + $0x4b0] sm:$0xf0] }
 0x219   : > { %2471 = vmatpush.bf16.msrb.mxu2 %v10657_v18  ;;  %v9900_v18 = vld [vmem:[%s14926_s27 + $0x58] sm:$0xf]  ;;  %v10441_v33 = vor.u32 %v13526_v23, %v10440_v20  ;;  %v10550_v20 = vld [vmem:[%s14926_s27 + $0x58c] sm:$0xf0] }
 0x21a   : > { %2485 = vmatpush.bf16.msrb.mxu3 %v10085_v36  ;;  %v9901_v30 = vor.u32 %v13391_v19, %v9900_v18  ;;  %v9905_v36 = vor.u32 %v13387_v25, %v9902_v26  ;;  %v13419_v18 = vld [vmem:[%s14926_s27 + $0x158] sm:$0xf0]  ;;  %v13549_v19 = vld [vmem:[%s14926_s27 + $0x56c] sm:$0xf]  ;;  %v10304_v23 = vld [vmem:[%s14926_s27 + $0x378] sm:$0xf] }
 0x21b   : > { %2444 = vmatpush.bf16.msrb.mxu0 %v10045_v43  ;;  %v9865_v43 = vor.u32 %v13382_v35, %v9864_v34  ;;  %v13491_v25 = vld [vmem:[%s14926_s27 + $0x398] sm:$0xf0]  ;;  %v13477_v26 = vld [vmem:[%s14926_s27 + $0x32c] sm:$0xf]  ;;  %v10514_v34 = vld [vmem:[%s14926_s27 + $0x544] sm:$0xf0] }
 0x21c   : > { %2458 = vmatpush.bf16.msrb.mxu1 %v10333_v37  ;;  %v10153_v37 = vor.u32 %v13454_v29, %v10152_v27  ;;  %v10262_v27 = vld [vmem:[%s14926_s27 + $0x34c] sm:$0xf0]  ;;  %v10305_v35 = vor.u32 %v13491_v25, %v10304_v23  ;;  %v13586_v25 = vld [vmem:[%s14926_s27 + $0x694] sm:$0xf] }
 0x21d   : > { %2472 = vmatpush.bf16.msrb.mxu2 %v10621_v32  ;;  %v10694_v32 = vld [vmem:[%s14926_s27 + $0x6ac] sm:$0xf0] }
 0x21e   : > { %2486 = vmatpush.bf16.msrb.mxu3 %v10049_v48  ;;  %v10697_v40 = vor.u32 %v13585_v31, %v10694_v32  ;;  %v13446_v48 = vld [vmem:[%s14926_s27 + $0x230] sm:$0xf0]  ;;  %v9980_v31 = vld [vmem:[%s14926_s27 + $0xf0] sm:$0xf] }
 0x21f   : > { %2445 = vmatpush.bf16.msrb.mxu0 %v10009_v55  ;;  %v10125_v52 = vor.u32 %v13446_v48, %v10124_v47  ;;  %v10622_v55 = vld [vmem:[%s14926_s27 + $0x61c] sm:$0xf0]  ;;  %v13410_v32 = vld [vmem:[%s14926_s27 + $0x110] sm:$0xf0] }
 0x220   : > { %2459 = vmatpush.bf16.msrb.mxu1 %v10297_v49  ;;  %v13504_v49 = vld [vmem:[%s14926_s27 + $0x404] sm:$0xf]  ;;  %v9981_v41 = vor.u32 %v13410_v32, %v9980_v31  ;;  %v15401_v23 = vld [vmem:[%s14954_s29] sm:$0xff] }
 0x221   : > { %2473 = vmatpush.bf16.msrb.mxu2 %v10585_v44  ;;  %v13576_v44 = vld [vmem:[%s14926_s27 + $0x644] sm:$0xf]  ;;  %v10373_v59 = vor.u32 %v13504_v49, %v10370_v50  ;;  %v10232_v49 = vld [vmem:[%s14926_s27 + $0x2e8] sm:$0xf]  ;;  %v13473_v50 = vld [vmem:[%s14926_s27 + $0x308] sm:$0xf0] }
 0x222   : > { %2487 = vmatpush.bf16.msrb.mxu3 %v10013_v60  ;;  %v10661_v53 = vor.u32 %v13576_v44, %v10658_v45  ;;  %v13401_v44 = vld [vmem:[%s14926_s27 + $0xc8] sm:$0xf0]  ;;  %v13531_v45 = vld [vmem:[%s14926_s27 + $0x4dc] sm:$0xf]  ;;  %v13442_v32 = vld [vmem:[%s14926_s27 + $0x214] sm:$0xf] }
 0x223   : > { %2446 = vmatpush.bf16.msrb.mxu0 %v9973_v3  ;;  %v10625_v3 = vor.u32 %v13567_v54, %v10622_v55  ;;  %v9908_v55 = vld [vmem:[%s14926_s27 + $0x60] sm:$0xf] }
 0x224   : > { %2460 = vmatpush.bf16.msrb.mxu1 %v10261_v61  ;;  %v13437_v61 = vld [vmem:[%s14926_s27 + $0x1e8] sm:$0xf0] }
 0x225   : > { %2474 = vmatpush.bf16.msrb.mxu2 %v10549_v56  ;;  %v10412_v56 = vld [vmem:[%s14926_s27 + $0x450] sm:$0xf]  ;;  %v10089_v2 = vor.u32 %v13437_v61, %v10088_v58  ;;  %v10442_v58 = vld [vmem:[%s14926_s27 + $0x4b4] sm:$0xf0]  ;;  %v10196_v61 = vld [vmem:[%s14926_s27 + $0x2a0] sm:$0xf] }
 0x226   : > { %2488 = vmatpush.bf16.msrb.mxu3 %v9977_v8  ;;  %v10413_v60 = vor.u32 %v13518_v57, %v10412_v56  ;;  %v10377_v8 = vor.u32 %v13509_v63, %v10376_v62  ;;  %v13392_v56 = vld [vmem:[%s14926_s27 + $0x80] sm:$0xf0]  ;;  %v13522_v57 = vld [vmem:[%s14926_s27 + $0x494] sm:$0xf] }
 0x227   : > { %2447 = vmatpush.bf16.msrb.mxu0 %v9937_v16  ;;  %v10589_v16 = vor.u32 %v13558_v6, %v10586_v7  ;;  %v13464_v62 = vld [vmem:[%s14926_s27 + $0x2c0] sm:$0xf0]  ;;  %v13450_v63 = vld [vmem:[%s14926_s27 + $0x254] sm:$0xf]  ;;  %v9872_v6 = vld [vmem:[%s14926_s27 + $0x18] sm:$0xf] }
 0x228   : > { %2461 = vmatpush.bf16.msrb.mxu1 %v10225_v9  ;;  %v10337_v9 = vor.u32 %v13495_v0, %v10334_v1  ;;  %v10154_v0 = vld [vmem:[%s14926_s27 + $0x274] sm:$0xf0]  ;;  %v9909_v1 = vor.u32 %v13392_v56, %v9908_v55  ;;  %v13383_v7 = vld [vmem:[%s14926_s27 + $0x38] sm:$0xf0]  ;;  %v10520_v56 = vld [vmem:[%s14926_s27 + $0x528] sm:$0xf] }
 0x229   : > { %2475 = vmatpush.bf16.msrb.mxu2 %v10513_v4  ;;  %v10052_v4 = vld [vmem:[%s14926_s27 + $0x180] sm:$0xf] }
 0x22a   : > { %2489 = vmatpush.bf16.msrb.mxu3 %v9941_v21  ;;  %v10053_v15 = vor.u32 %v13428_v5, %v10052_v4  ;;  %v10341_v21 = vor.u32 %v13500_v11, %v10340_v10  ;;  %v13590_v4 = vld [vmem:[%s14926_s27 + $0x6b0] sm:$0xf0]  ;;  %v10197_v5 = vor.u32 %v13464_v62, %v10196_v61  ;;  %v13455_v10 = vld [vmem:[%s14926_s27 + $0x278] sm:$0xf0]  ;;  %v10054_v61 = vld [vmem:[%s14926_s27 + $0x1a4] sm:$0xf0] }
 0x22b   : > { %2448 = vmatpush.bf16.msrb.mxu0 %v9901_v30  ;;  %v10553_v30 = vor.u32 %v13549_v19, %v10550_v20  ;;  %v13487_v62 = vld [vmem:[%s14926_s27 + $0x37c] sm:$0xf] }
 0x22c   : > { %2462 = vmatpush.bf16.msrb.mxu1 %v10189_v22  ;;  %v10301_v22 = vor.u32 %v13486_v12, %v10298_v14  ;;  %v13514_v12 = vld [vmem:[%s14926_s27 + $0x454] sm:$0xf]  ;;  %v10414_v14 = vld [vmem:[%s14926_s27 + $0x474] sm:$0xf0] }
 0x22d   : > { %2476 = vmatpush.bf16.msrb.mxu2 %v10477_v17  ;;  %v10016_v17 = vld [vmem:[%s14926_s27 + $0x138] sm:$0xf]  ;;  %v10417_v19 = vor.u32 %v13514_v12, %v10414_v14 }
 0x22e   : > { %2490 = vmatpush.bf16.msrb.mxu3 %v9905_v36  ;;  %v10017_v29 = vor.u32 %v13419_v18, %v10016_v17  ;;  %v10265_v36 = vor.u32 %v13477_v26, %v10262_v27  ;;  %v9873_v17 = vor.u32 %v13383_v7, %v9872_v6  ;;  %v10702_v26 = vld [vmem:[%s14926_s27 + $0x6b4] sm:$0xf0]  ;;  %v10484_v6 = vld [vmem:[%s14926_s27 + $0x4e0] sm:$0xf] }
 0x22f   : > { %2449 = vmatpush.bf16.msrb.mxu0 %v9865_v43  ;;  %v9944_v43 = vld [vmem:[%s14926_s27 + $0xa8] sm:$0xf]  ;;  %v10705_v31 = vor.u32 %v13586_v25, %v10702_v26 }
 0x230   : > { %2463 = vmatpush.bf16.msrb.mxu1 %v10153_v37  ;;  %v10268_v37 = vld [vmem:[%s14926_s27 + $0x330] sm:$0xf] }
 0x231   : > { %2477 = vmatpush.bf16.msrb.mxu2 %v10441_v33  ;;  %v13540_v33 = vld [vmem:[%s14926_s27 + $0x524] sm:$0xf]  ;;  %v10269_v47 = vor.u32 %v13482_v38, %v10268_v37  ;;  %v10378_v37 = vld [vmem:[%s14926_s27 + $0x42c] sm:$0xf0] }
 0x232   : > { %2491 = vmatpush.bf16.msrb.mxu3 %v9869_v51  ;;  %2450 = vmatmul.bf16.vlgmr.msrb.gmra.mxu0 %v15119_v13  ;;  %v10517_v42 = vor.u32 %v13540_v33, %v10514_v34  ;;  %v13459_v51 = vld [vmem:[%s14926_s27 + $0x29c] sm:$0xf]  ;;  %v10126_v33 = vld [vmem:[%s14926_s27 + $0x234] sm:$0xf0]  ;;  %v13505_v34 = vld [vmem:[%s14926_s27 + $0x40c] sm:$0xf] }
 0x233   : > { %2464 = vmatmul.bf16.vlgmr.msrb.gmra.mxu1 %v15133_v24  ;;  %2498 = vmatpush.bf16.msra.mxu0 %v10409_v46  ;;  %v10478_v46 = vld [vmem:[%s14926_s27 + $0x4fc] sm:$0xf0]  ;;  %v10381_v38 = vor.u32 %v13505_v34, %v10378_v37  ;;  %v13541_v34 = vld [vmem:[%s14926_s27 + $0x52c] sm:$0xf] }
 0x234   : > { %2512 = vmatpush.bf16.msra.mxu1 %v10697_v40  ;;  %2478 = vmatmul.bf16.vlgmr.msrb.gmra.mxu2 %v15142_v28  ;;  %v10226_v40 = vld [vmem:[%s14926_s27 + $0x304] sm:$0xf0]  ;;  %v10481_v54 = vor.u32 %v13531_v45, %v10478_v46  ;;  %v13433_v46 = vld [vmem:[%s14926_s27 + $0x1cc] sm:$0xf] }
 0x235   : > { %2526 = vmatpush.bf16.msra.mxu2 %v10125_v52  ;;  %2492 = vmatmul.bf16.vlgmr.msrb.gmra.mxu3 %v15119_v13  ;;  %v10229_v48 = vor.u32 %v13468_v39, %v10226_v40  ;;  %v10190_v52 = vld [vmem:[%s14926_s27 + $0x2bc] sm:$0xf0]  ;;  %v13577_v39 = vld [vmem:[%s14926_s27 + $0x64c] sm:$0xf]  ;;  %v10666_v40 = vld [vmem:[%s14926_s27 + $0x66c] sm:$0xf0] }
 0x236   : > { %2540 = vmatpush.bf16.msra.mxu3 %v10413_v60  ;;  %v10193_v60 = vor.u32 %v13459_v51, %v10190_v52  ;;  %v10342_v51 = vld [vmem:[%s14926_s27 + $0x3e4] sm:$0xf0] }
 0x237   : > { %2499 = vmatpush.bf16.msra.mxu0 %v10373_v59  ;;  %v10233_v59 = vor.u32 %v13473_v50, %v10232_v49 }
 0x238   : > { %2513 = vmatpush.bf16.msra.mxu1 %v10661_v53  ;;  %v9945_v53 = vor.u32 %v13401_v44, %v9944_v43  ;;  %v13554_v43 = vld [vmem:[%s14926_s27 + $0x590] sm:$0xf0]  ;;  %v10669_v44 = vor.u32 %v13577_v39, %v10666_v40  ;;  %v9946_v39 = vld [vmem:[%s14926_s27 + $0xcc] sm:$0xf0]  ;;  %v13460_v40 = vld [vmem:[%s14926_s27 + $0x2a4] sm:$0xf] }
 0x239   : > { %2527 = vmatpush.bf16.msra.mxu2 %v10089_v2  ;;  %v10445_v2 = vor.u32 %v13522_v57, %v10442_v58  ;;  %v13545_v57 = vld [vmem:[%s14926_s27 + $0x548] sm:$0xf0] }
 0x23a   : > { %2541 = vmatpush.bf16.msra.mxu3 %v10377_v8  ;;  %v10157_v8 = vor.u32 %v13450_v63, %v10154_v0 }
 0x23b   : > { %2500 = vmatpush.bf16.msra.mxu0 %v10337_v9  ;;  %v10160_v9 = vld [vmem:[%s14926_s27 + $0x258] sm:$0xf] }
 0x23c   : > { %2514 = vmatpush.bf16.msra.mxu1 %v10625_v3  ;;  %v10700_v3 = vld [vmem:[%s14926_s27 + $0x690] sm:$0xf]  ;;  %v10161_v18 = vor.u32 %v13455_v10, %v10160_v9  ;;  %v13536_v9 = vld [vmem:[%s14926_s27 + $0x500] sm:$0xf0]  ;;  %v13415_v10 = vld [vmem:[%s14926_s27 + $0x13c] sm:$0xf] }
 0x23d   : > { %2528 = vmatpush.bf16.msra.mxu2 %v10053_v15  ;;  %v10701_v11 = vor.u32 %v13590_v4, %v10700_v3  ;;  %v10664_v15 = vld [vmem:[%s14926_s27 + $0x648] sm:$0xf]  ;;  %v13559_v3 = vld [vmem:[%s14926_s27 + $0x5bc] sm:$0xf]  ;;  %v10594_v4 = vld [vmem:[%s14926_s27 + $0x5dc] sm:$0xf0]  ;;  %v10485_v26 = vor.u32 %v13536_v9, %v10484_v6 }
 0x23e   : > { %2542 = vmatpush.bf16.msra.mxu3 %v10341_v21  ;;  %v10628_v21 = vld [vmem:[%s14926_s27 + $0x600] sm:$0xf]  ;;  %v10597_v7 = vor.u32 %v13559_v3, %v10594_v4  ;;  %v13582_v3 = vld [vmem:[%s14926_s27 + $0x670] sm:$0xf0] }
 0x23f   : > { %2501 = vmatpush.bf16.msra.mxu0 %v10301_v22  ;;  %v13572_v22 = vld [vmem:[%s14926_s27 + $0x620] sm:$0xf0] }
 0x240   : > { %2515 = vmatpush.bf16.msra.mxu1 %v10589_v16  ;;  %v13581_v16 = vld [vmem:[%s14926_s27 + $0x668] sm:$0xf0]  ;;  %v10629_v27 = vor.u32 %v13572_v22, %v10628_v21  ;;  %v13406_v21 = vld [vmem:[%s14926_s27 + $0xf4] sm:$0xf]  ;;  %v9982_v22 = vld [vmem:[%s14926_s27 + $0x114] sm:$0xf0] }
 0x241   : > { %2529 = vmatpush.bf16.msra.mxu2 %v10017_v29  ;;  %v10665_v20 = vor.u32 %v13581_v16, %v10664_v15  ;;  %v10592_v29 = vld [vmem:[%s14926_s27 + $0x5b8] sm:$0xf]  ;;  %v13478_v15 = vld [vmem:[%s14926_s27 + $0x334] sm:$0xf] }
 0x242   : > { %2543 = vmatpush.bf16.msra.mxu3 %v10305_v35  ;;  %v1152_v35 = vperm.slane %v15401_v23, 0  ;;  %v10270_v16 = vld [vmem:[%s14926_s27 + $0x354] sm:$0xf0] }
 0x243   : > { %2502 = vmatpush.bf16.msra.mxu0 %v10265_v36  ;;  %v10129_v36 = vor.u32 %v13442_v32, %v10126_v33  ;;  %v13527_v32 = vld [vmem:[%s14926_s27 + $0x4b8] sm:$0xf0] }
 0x244   : > { %2516 = vmatpush.bf16.msra.mxu1 %v10553_v30  ;;  %v13563_v30 = vld [vmem:[%s14926_s27 + $0x5d8] sm:$0xf0] }
 0x245   : > { %2530 = vmatpush.bf16.msra.mxu2 %v9981_v41  ;;  %v10593_v41 = vor.u32 %v13563_v30, %v10592_v29  ;;  %v9985_v29 = vor.u32 %v13406_v21, %v9982_v22  ;;  %v13469_v30 = vld [vmem:[%s14926_s27 + $0x2ec] sm:$0xf]  ;;  %v1154_v21 = vperm.slane %v15401_v23, 2 }
 0x246   : > { %2544 = vmatpush.bf16.msra.mxu3 %v10269_v47  ;;  %v10090_v47 = vld [vmem:[%s14926_s27 + $0x1ec] sm:$0xf0] }
 0x247   : > { %2503 = vmatpush.bf16.msra.mxu0 %v10229_v48  ;;  %v13496_v48 = vld [vmem:[%s14926_s27 + $0x3c4] sm:$0xf]  ;;  %v10093_v50 = vor.u32 %v13433_v46, %v10090_v47 }
 0x248   : > { %2517 = vmatpush.bf16.msra.mxu1 %v10517_v42  ;;  %v10556_v42 = vld [vmem:[%s14926_s27 + $0x570] sm:$0xf]  ;;  %v10345_v52 = vor.u32 %v13496_v48, %v10342_v51  ;;  %v13388_v47 = vld [vmem:[%s14926_s27 + $0x64] sm:$0xf]  ;;  %v9910_v48 = vld [vmem:[%s14926_s27 + $0x84] sm:$0xf0] }
 0x249   : > { %2531 = vmatpush.bf16.msra.mxu2 %v9945_v53  ;;  %v13568_v53 = vld [vmem:[%s14926_s27 + $0x604] sm:$0xf]  ;;  %v10557_v55 = vor.u32 %v13554_v43, %v10556_v42  ;;  %v10486_v43 = vld [vmem:[%s14926_s27 + $0x504] sm:$0xf0]  ;;  %v10162_v51 = vld [vmem:[%s14926_s27 + $0x27c] sm:$0xf0] }
 0x24a   : > { %2545 = vmatpush.bf16.msra.mxu3 %v10233_v59  ;;  %v13532_v42 = vld [vmem:[%s14926_s27 + $0x4e4] sm:$0xf] }
 0x24b   : > { %2504 = vmatpush.bf16.msra.mxu0 %v10193_v60  ;;  %v13424_v60 = vld [vmem:[%s14926_s27 + $0x184] sm:$0xf] }
 0x24c   : > { %2518 = vmatpush.bf16.msra.mxu1 %v10481_v54  ;;  %v10630_v54 = vld [vmem:[%s14926_s27 + $0x624] sm:$0xf0]  ;;  %v10057_v0 = vor.u32 %v13424_v60, %v10054_v61 }
 0x24d   : > { %2532 = vmatpush.bf16.msra.mxu2 %v9909_v1  ;;  %v10633_v58 = vor.u32 %v13568_v53, %v10630_v54  ;;  %v10306_v1 = vld [vmem:[%s14926_s27 + $0x39c] sm:$0xf0]  ;;  %v9913_v54 = vor.u32 %v13388_v47, %v9910_v48 }
 0x24e   : > { %2546 = vmatpush.bf16.msra.mxu3 %v10197_v5  ;;  %v10521_v5 = vor.u32 %v13545_v57, %v10520_v56  ;;  %v10450_v53 = vld [vmem:[%s14926_s27 + $0x4bc] sm:$0xf0]  ;;  %v13379_v57 = vld [vmem:[%s14926_s27 + $0x1c] sm:$0xf] }
 0x24f   : > { %2505 = vmatpush.bf16.msra.mxu0 %v10157_v8  ;;  %v2283_v45 = vpop.f32.mrf.mxu0 }
 0x250   : > { %2519 = vmatpush.bf16.msra.mxu1 %v10445_v2  ;;  %v2284_v49 = vadd.f32 %v2283_v45, %v1152_v35  ;;  %v2297_v59 = vpop.f32.mrf.mxu1  ;;  %v10309_v2 = vor.u32 %v13487_v62, %v10306_v1 }
 0x251   : > { %2533 = vmatpush.bf16.msra.mxu2 %v9873_v17  ;;  %v13550_v17 = vld [vmem:[%s14926_s27 + $0x574] sm:$0xf] }
 0x252   : > { %2506 = vmatmul.bf16.vlgmr.msra.gmra.mxu0 %v15133_v24  ;;  %2547 = vmatpush.bf16.msra.mxu3 %v10161_v18  ;;  %v2298_v63 = vadd.f32 %v2297_v59, %v2284_v49  ;;  %v10448_v18 = vld [vmem:[%s14926_s27 + $0x498] sm:$0xf]  ;;  %v10489_v49 = vor.u32 %v13532_v42, %v10486_v43  ;;  %v10456_v43 = vld [vmem:[%s14926_s27 + $0x4a0] sm:$0xf] }
 0x253   : > { %2520 = vmatmul.bf16.vlgmr.msra.gmra.mxu1 %v15142_v28  ;;  %2554 = vmatpush.bf16.msrb.mxu0 %v10701_v11  ;;  %v10018_v11 = vld [vmem:[%s14926_s27 + $0x15c] sm:$0xf0] }
 0x254   : > { %2534 = vmatmul.bf16.vlgmr.msra.gmra.mxu2 %v15119_v13  ;;  %2568 = vmatpush.bf16.msrb.mxu1 %v10129_v36  ;;  %v10021_v14 = vor.u32 %v13415_v10, %v10018_v11  ;;  %v10522_v36 = vld [vmem:[%s14926_s27 + $0x54c] sm:$0xf0] }
 0x255   : > { %2582 = vmatpush.bf16.msrb.mxu2 %v10417_v19  ;;  %2548 = vmatmul.bf16.vlgmr.msra.gmra.mxu3 %v15133_v24  ;;  %v10273_v19 = vor.u32 %v13478_v15, %v10270_v16  ;;  %v10525_v37 = vor.u32 %v13541_v34, %v10522_v36  ;;  %v10564_v16 = vld [vmem:[%s14926_s27 + $0x578] sm:$0xf] }
 0x256   : > { %2596 = vmatpush.bf16.msrb.mxu3 %v10705_v31  ;;  %v10234_v31 = vld [vmem:[%s14926_s27 + $0x30c] sm:$0xf0] }
 0x257   : > { %2555 = vmatpush.bf16.msrb.mxu0 %v10665_v20  ;;  %v2311_v8 = vpop.f32.mrf.mxu2  ;;  %v10558_v20 = vld [vmem:[%s14926_s27 + $0x594] sm:$0xf0]  ;;  %v10237_v33 = vor.u32 %v13469_v30, %v10234_v31  ;;  %v15472_v61 = vpop.f32.mrf.mxu0 }
 0x258   : > { %2569 = vmatpush.bf16.msrb.mxu1 %v10093_v50  ;;  %v2312_v12 = vadd.f32 %v2311_v8, %v2298_v63  ;;  %v13451_v50 = vld [vmem:[%s14926_s27 + $0x25c] sm:$0xf]  ;;  %v15469_v60 = vpop.f32.mrf.mxu3  ;;  %v15475_v62 = vpop.f32.mrf.mxu1  ;;  %v10708_v63 = vld [vmem:[%s14926_s27 + $0x698] sm:$0xf]  ;;  %v13573_v8 = vld [vmem:[%s14926_s27 + $0x628] sm:$0xf0] }
 0x259   : > { %2583 = vmatpush.bf16.msrb.mxu2 %v10381_v38  ;;  %v13397_v38 = vld [vmem:[%s14926_s27 + $0xac] sm:$0xf] }
 0x25a   : > { %2597 = vmatpush.bf16.msrb.mxu3 %v10669_v44  ;;  %v15445_v25 = vmul.f32 0.17677669, %v2312_v12  ;;  %v10449_v44 = vor.u32 %v13527_v32, %v10448_v18  ;;  %v9949_v45 = vor.u32 %v13397_v38, %v9946_v39  ;;  %v10600_v12 = vld [vmem:[%s14926_s27 + $0x5c0] sm:$0xf]  ;;  %v10492_v32 = vld [vmem:[%s14926_s27 + $0x4e8] sm:$0xf] }
 0x25b   : > { %2556 = vmatpush.bf16.msrb.mxu0 %v10629_v27  ;;  %v10561_v27 = vor.u32 %v13550_v17, %v10558_v20  ;;  %v13555_v17 = vld [vmem:[%s14926_s27 + $0x598] sm:$0xf0] }
 0x25c   : > { %2570 = vmatpush.bf16.msrb.mxu1 %v10057_v0  ;;  %2746 = vrot.lane.b32.xlu1 %v15445_v25, %s14704_s26  ;;  %v13591_v0 = vld [vmem:[%s14926_s27 + $0x6b8] sm:$0xf0] }
 0x25d   : > { %2584 = vmatpush.bf16.msrb.mxu2 %v10345_v52  ;;  %v13523_v52 = vld [vmem:[%s14926_s27 + $0x49c] sm:$0xf]  ;;  %v10709_v1 = vor.u32 %v13591_v0, %v10708_v63 }
 0x25e   : > { %2598 = vmatpush.bf16.msrb.mxu3 %v10633_v58  ;;  %v10453_v56 = vor.u32 %v13523_v52, %v10450_v53  ;;  %v9874_v58 = vld [vmem:[%s14926_s27 + $0x3c] sm:$0xf0] }
 0x25f   : > { %2557 = vmatpush.bf16.msrb.mxu0 %v10593_v41  ;;  %v10198_v41 = vld [vmem:[%s14926_s27 + $0x2c4] sm:$0xf0]  ;;  %v9877_v59 = vor.u32 %v13379_v57, %v9874_v58 }
 0x260   : > { %2571 = vmatpush.bf16.msrb.mxu1 %v10021_v14  ;;  %v10201_v46 = vor.u32 %v13460_v40, %v10198_v41  ;;  %v15484_v6 = vpop.f32.mrf.mxu3  ;;  %v13564_v14 = vld [vmem:[%s14926_s27 + $0x5e0] sm:$0xf0]  ;;  %v1155_v40 = vperm.slane %v15401_v23, 3 }
 0x261   : > { %2585 = vmatpush.bf16.msrb.mxu2 %v10309_v2  ;;  %v10672_v2 = vld [vmem:[%s14926_s27 + $0x650] sm:$0xf]  ;;  %v10601_v15 = vor.u32 %v13564_v14, %v10600_v12 }
 0x262   : > { %2599 = vmatpush.bf16.msrb.mxu3 %v10597_v7  ;;  %v10673_v4 = vor.u32 %v13582_v3, %v10672_v2  ;;  %v10636_v7 = vld [vmem:[%s14926_s27 + $0x608] sm:$0xf] }
 0x263   : > { %2558 = vmatpush.bf16.msrb.mxu0 %v10557_v55  ;;  %v10165_v55 = vor.u32 %v13451_v50, %v10162_v51  ;;  %v10637_v10 = vor.u32 %v13573_v8, %v10636_v7 }
 0x264   : > { %2572 = vmatpush.bf16.msrb.mxu1 %v9985_v29 }
 0x265   : > { %2586 = vmatpush.bf16.msrb.mxu2 %v10273_v19  ;;  %v10565_v19 = vor.u32 %v13555_v17, %v10564_v16  ;;  %v13447_v17 = vld [vmem:[%s14926_s27 + $0x238] sm:$0xf0] }
 0x266   : > { %2600 = vmatpush.bf16.msrb.mxu3 %v10561_v27  ;;  %v13546_v27 = vld [vmem:[%s14926_s27 + $0x550] sm:$0xf0] }
 0x267   : > { %2559 = vmatpush.bf16.msrb.mxu0 %v10521_v5  ;;  %v15482_v5 = vpop.f32.mrf.mxu2 }
 0x268   : > { %2573 = vmatpush.bf16.msrb.mxu1 %v9949_v45 }
 0x269   : > { %2587 = vmatpush.bf16.msrb.mxu2 %v10237_v33  ;;  %v13537_v33 = vld [vmem:[%s14926_s27 + $0x508] sm:$0xf0] }
 0x26a   : > { %2601 = vmatpush.bf16.msrb.mxu3 %v10525_v37  ;;  %v10493_v34 = vor.u32 %v13537_v33, %v10492_v32  ;;  %v13429_v32 = vld [vmem:[%s14926_s27 + $0x1a8] sm:$0xf0] }
 0x26b   : > { %2560 = vmatpush.bf16.msrb.mxu0 %v10485_v26  ;;  %v10528_v26 = vld [vmem:[%s14926_s27 + $0x530] sm:$0xf] }
 0x26c   : > { %2574 = vmatpush.bf16.msrb.mxu1 %v9913_v54  ;;  %v10529_v30 = vor.u32 %v13546_v27, %v10528_v26  ;;  %v13438_v26 = vld [vmem:[%s14926_s27 + $0x1f0] sm:$0xf0] }
 0x26d   : > { %2588 = vmatpush.bf16.msrb.mxu2 %v10201_v46 }
 0x26e   : > { %2602 = vmatpush.bf16.msrb.mxu3 %v10489_v49 }
 0x26f   : > { %2561 = vmatpush.bf16.msrb.mxu0 %v10449_v44  ;;  %v15488_v9 = vpop.f32.mrf.mxu0  ;;  %v13528_v44 = vld [vmem:[%s14926_s27 + $0x4c0] sm:$0xf0] }
 0x270   : > { %2575 = vmatpush.bf16.msrb.mxu1 %v9877_v59  ;;  %v15490_v11 = vpop.f32.mrf.mxu1  ;;  %v10457_v45 = vor.u32 %v13528_v44, %v10456_v43  ;;  %v13411_v43 = vld [vmem:[%s14926_s27 + $0x118] sm:$0xf0] }
 0x271   : > { %2589 = vmatpush.bf16.msrb.mxu2 %v10165_v55 }
 0x272   : > { %2562 = vmatmul.bf16.vlgmr.msrb.gmra.mxu0 %v15142_v28  ;;  %2603 = vmatpush.bf16.msrb.mxu3 %v10453_v56 }
 0x273   : > { %2576 = vmatmul.bf16.vlgmr.msrb.gmra.mxu1 %v15119_v13 }
 0x274   : > { %2590 = vmatmul.bf16.vlgmr.msrb.gmra.mxu2 %v15133_v24 }
 0x275   : > { %2604 = vmatmul.bf16.vlgmr.msrb.gmra.mxu3 %v15142_v28  ;;  %2638 = vmatpush.bf16.msra.mxu2 %v10709_v1 }
 0x277   : > { %v2367_v18 = vpop.f32.mrf.mxu2  ;;  %v15497_v22 = vpop.f32.mrf.mxu0 }
 0x278   : > { %v2381_v20 = vpop.f32.mrf.mxu3  ;;  %v15501_v29 = vpop.f32.mrf.mxu1  ;;  %v2368_v31 = vadd.f32 %v2367_v18, %v1154_v21 }
 0x279   : > { %2639 = vmatpush.bf16.msra.mxu2 %v10673_v4 }
 0x27a   : > { %v2382_v36 = vadd.f32 %v2381_v20, %v2368_v31  ;;  %v10060_v31 = vld [vmem:[%s14926_s27 + $0x188] sm:$0xf] }
 0x27d   : > { %2640 = vmatpush.bf16.msra.mxu2 %v10637_v10 }
 0x27f   : > { %v15507_v37 = vpop.f32.mrf.mxu2 }
 0x280   : > { %v15509_v38 = vpop.f32.mrf.mxu3 }
 0x281   : > { %2641 = vmatpush.bf16.msra.mxu2 %v10601_v15 }
 0x285   : > { %2642 = vmatpush.bf16.msra.mxu2 %v10565_v19 }
 0x289   : > { %2643 = vmatpush.bf16.msra.mxu2 %v10529_v30 }
 0x28d   : > { %2644 = vmatpush.bf16.msra.mxu2 %v10493_v34  ;;  %v10061_v34 = vor.u32 %v13429_v32, %v10060_v31 }
 0x28f   : > { %v2395_v39 = vpop.f32.mrf.mxu0 }
 0x290   : > { %v15512_v41 = vadd.f32 %v2395_v39, %v2382_v36  ;;  %v2409_v42 = vpop.f32.mrf.mxu1  ;;  %v10024_v36 = vld [vmem:[%s14926_s27 + $0x140] sm:$0xf]  ;;  %v9988_v39 = vld [vmem:[%s14926_s27 + $0xf8] sm:$0xf] }
 0x291   : > { %v2410_v46 = vadd.f32 %v2409_v42, %v1155_v40  ;;  %2645 = vmatpush.bf16.msra.mxu2 %v10457_v45 }
 0x294   : > { %2646 = vmatmul.bf16.vlgmr.msra.gmra.mxu2 %v15142_v28  ;;  %v2286_v28 = vadd.f32 %v15472_v61, %v1152_v35  ;;  %v1153_v61 = vperm.slane %v15401_v23, 1 }
 0x296   : > { %v2300_v57 = vadd.f32 %v15475_v62, %v2286_v28  ;;  %v1156_v62 = vperm.slane %v15401_v23, 4  ;;  %v2326_v3 = vadd.f32 %v15469_v60, %v1153_v61  ;;  %v10132_v60 = vld [vmem:[%s14926_s27 + $0x218] sm:$0xf]  ;;  %v2328_v19 = vadd.f32 %v15484_v6, %v1153_v61 }
 0x297   : > { %v2423_v47 = vpop.f32.mrf.mxu2  ;;  %v15533_v58 = vpop.f32.mrf.mxu0  ;;  %v10133_v20 = vor.u32 %v13447_v17, %v10132_v60  ;;  %v1159_v60 = vperm.slane %v15401_v23, 7 }
 0x298   : > { %v2424_v48 = vadd.f32 %v2423_v47, %v2410_v46  ;;  %v2437_v49 = vpop.f32.mrf.mxu3  ;;  %v2411_v51 = vpop.f32.mrf.mxu1  ;;  %v2314_v59 = vadd.f32 %v15482_v5, %v2300_v57  ;;  %v2340_v14 = vadd.f32 %v15488_v9, %v2326_v3  ;;  %v10096_v9 = vld [vmem:[%s14926_s27 + $0x1d0] sm:$0xf]  ;;  %v2342_v30 = vadd.f32 %v15497_v22, %v2328_v19  ;;  %v13420_v22 = vld [vmem:[%s14926_s27 + $0x160] sm:$0xf0] }
 0x299   : > { %v2412_v52 = vadd.f32 %v2411_v51, %v1155_v40  ;;  %2610 = vmatpush.bf16.msra.mxu0 %v10133_v20  ;;  %v10025_v42 = vor.u32 %v13420_v22, %v10024_v36  ;;  %v1157_v46 = vperm.slane %v15401_v23, 5  ;;  %v13402_v51 = vld [vmem:[%s14926_s27 + $0xd0] sm:$0xf0]  ;;  %v1158_v3 = vperm.slane %v15401_v23, 6 }
 0x29a   : > { %v15517_v50 = vadd.f32 %v2437_v49, %v2424_v48  ;;  %v2655_v0 = vmul.f32 0.17677669, %v2314_v59  ;;  %v2354_v18 = vadd.f32 %v15490_v11, %v2340_v14  ;;  %v10097_v11 = vor.u32 %v13438_v26, %v10096_v9  ;;  %v9952_v49 = vld [vmem:[%s14926_s27 + $0xb0] sm:$0xf] }
 0x29b   : > { %v2356_v33 = vadd.f32 %v15501_v29, %v2342_v30  ;;  %v9989_v29 = vor.u32 %v13411_v43, %v9988_v39 }
 0x29c   : > { %2966 = vrot.lane.b32.xlu1 %v15517_v50, %s14705_s3  ;;  %v15566_v27 = vmul.f32 0.17677669, %v2354_v18 }
 0x29d   : > { %2611 = vmatpush.bf16.msra.mxu0 %v10097_v11  ;;  %v3070_v40 = vmul.f32 0.17677669, %v2356_v33 }
 0x29f   : > { %v2425_v53 = vpop.f32.mrf.mxu2 }
 0x2a0   : > { %v2426_v54 = vadd.f32 %v2425_v53, %v2412_v52  ;;  %v2439_v55 = vpop.f32.mrf.mxu3  ;;  %v9953_v52 = vor.u32 %v13402_v51, %v9952_v49  ;;  %v9916_v53 = vld [vmem:[%s14926_s27 + $0x68] sm:$0xf]  ;;  %v10312_v51 = vld [vmem:[%s14926_s27 + $0x380] sm:$0xf] }
 0x2a1   : > { %2612 = vmatpush.bf16.msra.mxu0 %v10061_v34  ;;  %v2370_v34 = vadd.f32 %v15507_v37, %v1154_v21  ;;  %v15642_v37 = vld [vmem:[%s18160_s17] sm:$0xff] }
 0x2a2   : > { %v15521_v56 = vadd.f32 %v2439_v55, %v2426_v54  ;;  %v13393_v54 = vld [vmem:[%s14926_s27 + $0x88] sm:$0xf0] }
 0x2a3   : > { %v9917_v28 = vor.u32 %v13393_v54, %v9916_v53  ;;  %v2384_v36 = vadd.f32 %v15509_v38, %v2370_v34  ;;  %v10276_v54 = vld [vmem:[%s14926_s27 + $0x338] sm:$0xf] }
 0x2a4   : > { %2752 = vrot.lane.b32.xlu2 %v15521_v56, %s14704_s26  ;;  %10710 = vmatpush.xpose.msk.msra.mxu3 %vm2656_vm7, %v15521_v56 }
 0x2a5   : > { %2613 = vmatpush.bf16.msra.mxu0 %v10025_v42  ;;  %v2398_v22 = vadd.f32 %v15533_v58, %v2384_v36 }
 0x2a8   : > { %10711 = vmatpush.xpose.msk.msra.mxu3 %vm2656_vm7, %v15517_v50 }
 0x2a9   : > { %2614 = vmatpush.bf16.msra.mxu0 %v9989_v29 }
 0x2ab   : > { %10712 = vmatmul.msk.f32.vlgmr.msra.gmra.mxu3 %vm2656_vm7, %v15445_v25 }
 0x2ac   : > { %2861 = vrot.lane.b32.xlu2 %v15521_v56, %s14706_s4 }
 0x2ad   : > { %2615 = vmatpush.bf16.msra.mxu0 %v9953_v52  ;;  %v13492_v52 = vld [vmem:[%s14926_s27 + $0x3a0] sm:$0xf0] }
 0x2ae   : > { %v10313_v53 = vor.u32 %v13492_v52, %v10312_v51 }
 0x2af   : > { %v2451_v1 = vpop.f32.mrf.mxu0 }
 0x2b0   : > { %v2465_v63 = vpop.f32.mrf.mxu1  ;;  %v2452_v2 = vadd.f32 %v2451_v1, %v1156_v62  ;;  %v13384_v1 = vld [vmem:[%s14926_s27 + $0x40] sm:$0xf0] }
 0x2b1   : > { %2616 = vmatpush.bf16.msra.mxu0 %v9917_v28 }
 0x2b2   : > { %v2466_v8 = vadd.f32 %v2465_v63, %v2452_v2  ;;  %v15603_v2 = vmul.f32 0.17677669, %v15512_v41 }
 0x2b3   : > { %10713 = vmatmul.msk.f32.gmra.mxu3 %vm2656_vm7, %v2655_v0 }
 0x2b4   : > { %2859 = vrot.lane.b32.xlu2 %v15517_v50, %s14706_s4 }
 0x2b7   : > { %v2479_v35 = vpop.f32.mrf.mxu2  ;;  %v2453_v4 = vpop.f32.mrf.mxu0 }
 0x2b8   : > { %v2467_v5 = vpop.f32.mrf.mxu1  ;;  %v2454_v7 = vadd.f32 %v2453_v4, %v1156_v62  ;;  %v15551_v16 = vadd.f32 %v2479_v35, %v2466_v8  ;;  %v2493_v6 = vpop.f32.mrf.mxu3 }
 0x2ba   : > { %v2468_v10 = vadd.f32 %v2467_v5, %v2454_v7 }
 0x2bc   : > { %2855 = vrot.lane.b32.xlu2 %v15445_v25, %s14706_s4 }
 0x2bf   : > { %v2481_v12 = vpop.f32.mrf.mxu2 }
 0x2c0   : > { %v15549_v15 = vadd.f32 %v2481_v12, %v2468_v10  ;;  %v2495_v47 = vpop.f32.mrf.mxu3 }
 0x2c1   : > { %v2496_v48 = vadd.f32 %v2495_v47, %v1157_v46  ;;  %v10384_v47 = vld [vmem:[%s14926_s27 + $0x410] sm:$0xf] }
 0x2c2   : > { %10734 = vmatpush.xpose.msk.msrb.mxu2 %vm2656_vm7, %v15549_v15  ;;  %3165 = vrot.lane.b32.xlu1 %v15549_v15, %s14704_s26 }
 0x2c4   : > { %2748 = vrot.lane.b32.xlu2 %v2655_v0, %s14704_s26 }
 0x2c6   : > { %10735 = vmatpush.xpose.msk.msrb.mxu2 %vm2656_vm7, %v15551_v16 }
 0x2c9   : > { %10736 = vmatmul.msk.f32.vlgmr.msrb.gmra.mxu2 %vm2656_vm7, %v15566_v27 }
 0x2ca   : > { %3159 = vrot.lane.b32.xlu1 %v15566_v27, %s14704_s26 }
 0x2cc   : > { %2857 = vrot.lane.b32.xlu2 %v2655_v0, %s14706_s4 }
 0x2cf   : > { %v2507_v44 = vpop.f32.mrf.mxu0 }
 0x2d0   : > { %v2521_v45 = vpop.f32.mrf.mxu1 }
 0x2d1   : > { %10737 = vmatmul.msk.f32.gmra.mxu2 %vm2656_vm7, %v3070_v40 }
 0x2d2   : > { %3161 = vrot.lane.b32.xlu1 %v3070_v40, %s14704_s26 }
 0x2d4   : > { %2964 = vrot.lane.b32.xlu2 %v2655_v0, %s14705_s3  ;;  %v9880_v0 = vld [vmem:[%s14926_s27 + $0x20] sm:$0xf] }
 0x2d5   : > { %v9881_v35 = vor.u32 %v13384_v1, %v9880_v0  ;;  %v10204_v1 = vld [vmem:[%s14926_s27 + $0x2a8] sm:$0xf] }
 0x2d7   : > { %v2509_v55 = vpop.f32.mrf.mxu0  ;;  %v2535_v61 = vpop.f32.mrf.mxu2  ;;  %2617 = vmatpush.bf16.msra.mxu0 %v9881_v35  ;;  %v13465_v35 = vld [vmem:[%s14926_s27 + $0x2c8] sm:$0xf0] }
 0x2d8   : > { %v2510_v57 = vadd.f32 %v2509_v55, %v2496_v48  ;;  %v2523_v59 = vpop.f32.mrf.mxu1  ;;  %v2549_v62 = vpop.f32.mrf.mxu3  ;;  %v2536_v7 = vadd.f32 %v2535_v61, %v1158_v3  ;;  %v13483_v55 = vld [vmem:[%s14926_s27 + $0x358] sm:$0xf0]  ;;  %v10205_v61 = vor.u32 %v13465_v35, %v10204_v1 }
 0x2d9   : > { %v10277_v28 = vor.u32 %v13483_v55, %v10276_v54 }
 0x2da   : > { %3377 = vrot.lane.b32.xlu1 %v15551_v16, %s14705_s3  ;;  %v15591_v63 = vadd.f32 %v2523_v59, %v2510_v57  ;;  %2618 = vmatmul.bf16.vlgmr.msra.gmra.mxu0 %v15119_v13  ;;  %v2494_v13 = vadd.f32 %v2493_v6, %v1157_v46  ;;  %v2550_v12 = vadd.f32 %v2549_v62, %v2536_v7  ;;  %v10240_v57 = vld [vmem:[%s14926_s27 + $0x2f0] sm:$0xf]  ;;  %v13474_v59 = vld [vmem:[%s14926_s27 + $0x310] sm:$0xf0]  ;;  %v10168_v62 = vld [vmem:[%s14926_s27 + $0x260] sm:$0xf] }
 0x2db   : > { %v10241_v0 = vor.u32 %v13474_v59, %v10240_v57 }
 0x2dc   : > { %3163 = vrot.lane.b32.xlu2 %v15551_v16, %s14704_s26  ;;  %v2508_v18 = vadd.f32 %v2507_v44, %v2494_v13  ;;  %v15649_v44 = vld [vmem:[%s18160_s17 + $0x8] sm:$0xff] }
 0x2de   : > { %v15615_v6 = vadd.f32 %v2521_v45, %v2508_v18 }
 0x2df   : > { %v2537_v4 = vpop.f32.mrf.mxu2 }
 0x2e0   : > { %v2538_v8 = vadd.f32 %v2537_v4, %v1158_v3  ;;  %v2551_v10 = vpop.f32.mrf.mxu3  ;;  %v13456_v3 = vld [vmem:[%s14926_s27 + $0x280] sm:$0xf0] }
 0x2e1   : > { %v10169_v4 = vor.u32 %v13456_v3, %v10168_v62 }
 0x2e2   : > { %3575 = vrot.lane.b32.xlu1 %v15591_v63, %s14704_s26  ;;  %v2552_v14 = vadd.f32 %v2551_v10, %v2538_v8 }
 0x2e4   : > { %3267 = vrot.lane.b32.xlu2 %v15566_v27, %s14706_s4 }
 0x2ea   : > { %3569 = vrot.lane.b32.xlu1 %v15603_v2, %s14704_s26 }
 0x2ec   : > { %3269 = vrot.lane.b32.xlu2 %v3070_v40, %s14706_s4 }
 0x2ef   : > { %v2563_v5 = vpop.f32.mrf.mxu0 }
 0x2f0   : > { %v2577_v41 = vpop.f32.mrf.mxu1  ;;  %v2564_v19 = vadd.f32 %v2563_v5, %v2550_v12 }
 0x2f1   : > { %v2578_v9 = vadd.f32 %v2577_v41, %v1159_v60 }
 0x2f4   : > { %3375 = vrot.lane.b32.xlu2 %v3070_v40, %s14705_s3  ;;  %v15630_v40 = vmul.f32 0.17677669, %v2398_v22 }
 0x2f7   : > { %v2565_v17 = vpop.f32.mrf.mxu0  ;;  %v2591_v26 = vpop.f32.mrf.mxu2 }
 0x2f8   : > { %v2566_v20 = vadd.f32 %v2565_v17, %v2552_v14  ;;  %v2592_v11 = vadd.f32 %v2591_v26, %v2578_v9  ;;  %v2605_v31 = vpop.f32.mrf.mxu3 }
 0x2fa   : > { %2735 = vmatpush.msrb.mxu3 %v2566_v20  ;;  %v15613_v30 = vpack.i.bf16 %v2564_v19, %v2566_v20  ;;  %v15617_v32 = vadd.f32 %v2605_v31, %v2592_v11 }
 0x2fc   : > { %2736 = vmatpush.msrb.mxu3 %v2564_v19  ;;  %3573 = vrot.lane.b32.xlu2 %v15615_v6, %s14704_s26  ;;  %v2747_v19 = vpop.permute.xlu1 %2746 }
 0x2fe   : > { %v2753_v33 = vpop.permute.xlu2 %2752 }
 0x2ff   : > { %10716 = vmatpush.xpose.msk.msrb.mxu0 %vm2656_vm7, %v2753_v33  ;;  %v15748_v55 = vpop.f32.mrf.mxu2 }
 0x300   : > { %v15637_v21 = vpop.f32.mrf.mxu3 }
 0x304   : > { %3677 = vrot.lane.b32.xlu2 %v15603_v2, %s14706_s4 }
 0x306   : > { %v2862_v39 = vpop.permute.xlu2 %2861 }
 0x307   : > { %10722 = vmatpush.xpose.msk.msra.mxu3 %vm2656_vm7, %v2862_v39 }
 0x30c   : > { %3679 = vrot.lane.b32.xlu2 %v15630_v40, %s14706_s4 }
 0x30e   : > { %v2860_v42 = vpop.permute.xlu2 %2859  ;;  %v2967_v26 = vpop.permute.xlu1 %2966 }
 0x30f   : > { %10723 = vmatpush.xpose.msk.msra.mxu3 %vm2656_vm7, %v2860_v42 }
 0x314   : > { %3785 = vrot.lane.b32.xlu2 %v15630_v40, %s14705_s3 }
 0x316   : > { %v15691_v5 = vpop.permute.xlu2 %2855 }
 0x317   : > { %v15753_v57 = vpop.f32.mrf.mxu2 }
 0x31e   : > { %v2749_v13 = vpop.permute.xlu2 %2748 }
 0x326   : > { %v15698_v20 = vpop.permute.xlu2 %2857 }
 0x32e   : > { %v2686_v38 = vpop.f32.mrf.mxu3  ;;  %v2965_v11 = vpop.permute.xlu2 %2964 }
 0x32f   : > { %v2687_v58 = vadd.f32 %v2686_v38, %v15642_v37 }
 0x331   : > { %v2693_v43 = vsel %vm2692_vm8, %v2687_v58, -inf }
 0x332   : > { %2694 = vmax.xlane.f32.xlu0 %v2693_v43 }
 0x334   : > { %v3166_v33 = vpop.permute.xlu1 %3165 }
 0x336   : > { %v2689_v45 = vpop.f32.mrf.mxu3  ;;  %v3164_v36 = vpop.permute.xlu2 %3163 }
 0x337   : > { %v2690_v29 = vadd.f32 %v2689_v45, %v15649_v44 }
 0x339   : > { %v2696_v46 = vsel %vm2692_vm8, %v2690_v29, -inf }
 0x33a   : > { %2697 = vmax.xlane.f32.xlu0 %v2696_v46 }
 0x33c   : > { %v3160_v22 = vpop.permute.xlu1 %3159 }
 0x33e   : > { %v3268_v42 = vpop.permute.xlu2 %3267 }
 0x346   : > { %v3270_v43 = vpop.permute.xlu2 %3269 }
 0x34e   : > { %2750 = vrot.lane.b32.xlu0 %v15517_v50, %s14704_s26  ;;  %v10420_v50 = vld [vmem:[%s14926_s27 + $0x458] sm:$0xf]  ;;  %v3376_v46 = vpop.permute.xlu2 %3375 }
 0x356   : > { %2968 = vrot.lane.b32.xlu0 %v15521_v56, %s14705_s3  ;;  %v13519_v56 = vld [vmem:[%s14926_s27 + $0x478] sm:$0xf0] }
 0x357   : > { %v10421_v48 = vor.u32 %v13519_v56, %v10420_v50  ;;  %v15744_v52 = vpop.f32.mrf.mxu0 }
 0x359   : > { %2624 = vmatpush.bf16.msra.mxu1 %v10421_v48 }
 0x35e   : > { %2962 = vrot.lane.b32.xlu0 %v15445_v25, %s14705_s3  ;;  %v13510_v25 = vld [vmem:[%s14926_s27 + $0x430] sm:$0xf0] }
 0x35f   : > { %v10385_v49 = vor.u32 %v13510_v25, %v10384_v47  ;;  %v3574_v47 = vpop.permute.xlu2 %3573 }
 0x361   : > { %2625 = vmatpush.bf16.msra.mxu1 %v10385_v49 }
 0x366   : > { %3273 = vrot.lane.b32.xlu0 %v15549_v15, %s14706_s4 }
 0x367   : > { %v3678_v25 = vpop.permute.xlu2 %3677 }
 0x36e   : > { %3271 = vrot.lane.b32.xlu0 %v15551_v16, %s14706_s4  ;;  %v13501_v16 = vld [vmem:[%s14926_s27 + $0x3e8] sm:$0xf0] }
 0x376   : > { %3379 = vrot.lane.b32.xlu0 %v15549_v15, %s14705_s3  ;;  %v10348_v15 = vld [vmem:[%s14926_s27 + $0x3c8] sm:$0xf] }
 0x37e   : > { %3373 = vrot.lane.b32.xlu0 %v15566_v27, %s14705_s3  ;;  %v10349_v27 = vor.u32 %v13501_v16, %v10348_v15 }
 0x380   : > { %2626 = vmatpush.bf16.msra.mxu1 %v10349_v27 }
 0x384   : > { %2627 = vmatpush.bf16.msra.mxu1 %v10313_v53 }
 0x386   : > { %3683 = vrot.lane.b32.xlu0 %v15591_v63, %s14706_s4 }
 0x388   : > { %2628 = vmatpush.bf16.msra.mxu1 %v10277_v28  ;;  %v15751_v28 = vpop.f32.mrf.mxu0 }
 0x38c   : > { %2629 = vmatpush.bf16.msra.mxu1 %v10241_v0 }
 0x38e   : > { %3681 = vrot.lane.b32.xlu0 %v15615_v6, %s14706_s4 }
 0x390   : > { %2630 = vmatpush.bf16.msra.mxu1 %v10205_v61  ;;  %v15765_v61 = vpop.f32.mrf.mxu2 }
 0x394   : > { %2631 = vmatpush.bf16.msra.mxu1 %v10169_v4 }
 0x396   : > { %3789 = vrot.lane.b32.xlu0 %v15591_v63, %s14705_s3 }
 0x397   : > { %2632 = vmatmul.bf16.vlgmr.msra.gmra.mxu1 %v15133_v24 }
 0x39e   : > { %3783 = vrot.lane.b32.xlu0 %v15603_v2, %s14705_s3 }
 0x3a5   : > { %v2695_v7 = vpop.xlane.xlu0 %2694 }
 0x3a6   : > { %v2699_v8 = vsub.f32 %v2687_v58, %v2695_v7  ;;  %v3162_v58 = vpop.permute.xlu1 %3161 }
 0x3a8   : > { %v2701_v10 = vmul.f32 1.442695, %v2699_v8 }
 0x3aa   : > { %14371 = vpow2.f32 %v2701_v10 }
 0x3ad   : > { %v2698_v12 = vpop.xlane.xlu0 %2697 }
 0x3ae   : > { %v2700_v14 = vsub.f32 %v2690_v29, %v2698_v12  ;;  %v3378_v29 = vpop.permute.xlu1 %3377 }
 0x3b0   : > { %v15694_v17 = vpop.eup %14371  ;;  %v2703_v41 = vmul.f32 1.442695, %v2700_v14 }
 0x3b1   : > { %v2705_v18 = vsel %vm2692_vm8, %v15694_v17, 0.0 }
 0x3b2   : > { %14373 = vpow2.f32 %v2703_v41  ;;  %2706 = vadd.xlane.f32.xlu1 %v2705_v18 }
 0x3b6   : > { %v3576_v56 = vpop.permute.xlu1 %3575 }
 0x3b8   : > { %v15700_v9 = vpop.eup %14373 }
 0x3b9   : > { %v2708_v24 = vsel %vm2692_vm8, %v15700_v9, 0.0 }
 0x3ba   : > { %2709 = vadd.xlane.f32.xlu1 %v2708_v24 }
 0x3be   : > { %v3570_v49 = vpop.permute.xlu1 %3569 }
 0x3c0   : > { %v2751_v31 = vpop.permute.xlu0 %2750 }
 0x3c1   : > { %10717 = vmatpush.xpose.msk.msrb.mxu0 %vm2656_vm7, %v2751_v31 }
 0x3c4   : > { %10718 = vmatmul.msk.f32.vlgmr.msrb.gmra.mxu0 %vm2656_vm7, %v2747_v19 }
 0x3c8   : > { %v2969_v34 = vpop.permute.xlu0 %2968 }
 0x3c9   : > { %10728 = vmatpush.xpose.msk.msra.mxu0 %vm2656_vm7, %v2969_v34 }
 0x3cc   : > { %10719 = vmatmul.msk.f32.gmra.mxu0 %vm2656_vm7, %v2749_v13  ;;  %v3100_v13 = vpop.f32.mrf.mxu2 }
 0x3cd   : > { %10729 = vmatpush.xpose.msk.msra.mxu0 %vm2656_vm7, %v2967_v26  ;;  %v15780_v14 = vadd.f32 %v3100_v13, %v15642_v37 }
 0x3d0   : > { %v2963_v39 = vpop.permute.xlu0 %2962 }
 0x3d1   : > { %10740 = vmatpush.xpose.msk.msrb.mxu0 %vm2656_vm7, %v3166_v33 }
 0x3d3   : > { %3571 = vrot.lane.b32.xlu1 %v15630_v40, %s14704_s26 }
 0x3d4   : > { %10730 = vmatmul.msk.f32.vlgmr.msra.gmra.mxu0 %vm2656_vm7, %v2963_v39 }
 0x3d5   : > { %10741 = vmatpush.xpose.msk.msrb.mxu0 %vm2656_vm7, %v3164_v36 }
 0x3d8   : > { %v3274_v38 = vpop.permute.xlu0 %3273 }
 0x3d9   : > { %10746 = vmatpush.xpose.msk.msra.mxu2 %vm2656_vm7, %v3274_v38 }
 0x3db   : > { %3787 = vrot.lane.b32.xlu1 %v15615_v6, %s14705_s3 }
 0x3dc   : > { %10731 = vmatmul.msk.f32.gmra.mxu0 %vm2656_vm7, %v2965_v11 }
 0x3e0   : > { %v3272_v45 = vpop.permute.xlu0 %3271 }
 0x3e1   : > { %10747 = vmatpush.xpose.msk.msra.mxu2 %vm2656_vm7, %v3272_v45 }
 0x3e4   : > { %10742 = vmatmul.msk.f32.vlgmr.msrb.gmra.mxu0 %vm2656_vm7, %v3160_v22  ;;  %10748 = vmatmul.msk.f32.vlgmr.msra.gmra.mxu2 %vm2656_vm7, %v3268_v42 }
 0x3e5   : > { %10758 = vmatpush.xpose.msk.msrb.mxu2 %vm2656_vm7, %v15591_v63 }
 0x3e8   : > { %v3380_v50 = vpop.permute.xlu0 %3379 }
 0x3e9   : > { %10759 = vmatpush.xpose.msk.msrb.mxu2 %vm2656_vm7, %v15615_v6  ;;  %10752 = vmatpush.xpose.msk.msra.mxu0 %vm2656_vm7, %v3380_v50 }
 0x3ec   : > { %10743 = vmatmul.msk.f32.gmra.mxu0 %vm2656_vm7, %v3162_v58  ;;  %10749 = vmatmul.msk.f32.gmra.mxu2 %vm2656_vm7, %v3270_v43 }
 0x3ed   : > { %10753 = vmatpush.xpose.msk.msra.mxu0 %vm2656_vm7, %v3378_v29 }
 0x3f0   : > { %v3374_v63 = vpop.permute.xlu0 %3373 }
 0x3f1   : > { %10764 = vmatpush.xpose.msk.msrb.mxu0 %vm2656_vm7, %v3576_v56 }
 0x3f4   : > { %10754 = vmatmul.msk.f32.vlgmr.msra.gmra.mxu0 %vm2656_vm7, %v3374_v63  ;;  %10760 = vmatmul.msk.f32.vlgmr.msrb.gmra.mxu2 %vm2656_vm7, %v15603_v2  ;;  %v3680_v2 = vpop.permute.xlu2 %3679 }
 0x3f5   : > { %10765 = vmatpush.xpose.msk.msrb.mxu0 %vm2656_vm7, %v3574_v47 }
 0x3f8   : > { %v3684_v6 = vpop.permute.xlu0 %3683 }
 0x3f9   : > { %10770 = vmatpush.xpose.msk.msra.mxu2 %vm2656_vm7, %v3684_v6 }
 0x3fc   : > { %10755 = vmatmul.msk.f32.gmra.mxu0 %vm2656_vm7, %v3376_v46  ;;  %10761 = vmatmul.msk.f32.gmra.mxu2 %vm2656_vm7, %v15630_v40 }
 0x400   : > { %v3682_v48 = vpop.permute.xlu0 %3681 }
 0x401   : > { %10771 = vmatpush.xpose.msk.msra.mxu2 %vm2656_vm7, %v3682_v48 }
 0x404   : > { %10766 = vmatmul.msk.f32.vlgmr.msrb.gmra.mxu0 %vm2656_vm7, %v3570_v49  ;;  %10772 = vmatmul.msk.f32.vlgmr.msra.gmra.mxu2 %vm2656_vm7, %v3678_v25 }
 0x408   : > { %v3790_v15 = vpop.permute.xlu0 %3789 }
 0x409   : > { %10776 = vmatpush.xpose.msk.msra.mxu0 %vm2656_vm7, %v3790_v15 }
 0x40c   : > { %10773 = vmatmul.msk.f32.gmra.mxu2 %vm2656_vm7, %v3680_v2 }
 0x410   : > { %v3784_v7 = vpop.permute.xlu0 %3783 }
 0x425   : > { %v2707_v16 = vpop.xlane.xlu1 %2706 }
 0x426   : > { %14375 = vrcp.f32 %v2707_v16 }
 0x42c   : > { %v14376_v27 = vpop.eup %14375 }
 0x42d   : > { %v2713_v40 = vmul.f32 %v14376_v27, %v15694_v17  ;;  %v2710_v51 = vpop.xlane.xlu1 %2709  ;;  %v3786_v17 = vpop.permute.xlu2 %3785 }
 0x42e   : > { %14377 = vrcp.f32 %v2710_v51 }
 0x42f   : > { %10714 = vmatmul.msk.f32.vlgmr.msrb.gmra.mxu3 %vm2692_vm8, %v2713_v40 }
 0x434   : > { %v14378_v53 = vpop.eup %14377 }
 0x435   : > { %v2714_v54 = vmul.f32 %v14378_v53, %v15700_v9  ;;  %v3103_v9 = vpop.f32.mrf.mxu2 }
 0x436   : > { %v15791_v24 = vadd.f32 %v3103_v9, %v15649_v44 }
 0x437   : > { %10715 = vmatmul.msk.f32.gmra.mxu3 %vm2692_vm8, %v2714_v54 }
 0x438   : > { %v3109_v26 = vsel %vm2692_vm8, %v15791_v24, -inf }
 0x43f   : > { %10724 = vmatmul.msk.f32.vlgmr.msra.gmra.mxu3 %vm2656_vm7, %v15691_v5 }
 0x441   : > { %v2779_v59 = vpop.f32.mrf.mxu0 }
 0x442   : > { %v15758_v0 = vadd.f32 %v2779_v59, %v15642_v37 }
 0x444   : > { %v2785_v1 = vsel %vm2692_vm8, %v15758_v0, -inf }
 0x445   : > { %v3572_v35 = vpop.permute.xlu1 %3571  ;;  %2786 = vmax.xlane.f32.xlu1 %v2785_v1 }
 0x446   : > { %10767 = vmatmul.msk.f32.gmra.mxu0 %vm2656_vm7, %v3572_v35 }
 0x447   : > { %10725 = vmatmul.msk.f32.gmra.mxu3 %vm2656_vm7, %v15698_v20  ;;  %v3106_v20 = vsel %vm2692_vm8, %v15780_v14, -inf }
 0x449   : > { %v2782_v62 = vpop.f32.mrf.mxu0 }
 0x44a   : > { %v15768_v3 = vadd.f32 %v2782_v62, %v15649_v44 }
 0x44c   : > { %v2788_v4 = vsel %vm2692_vm8, %v15768_v3, -inf }
 0x44d   : > { %v3788_v5 = vpop.permute.xlu1 %3787  ;;  %2789 = vmax.xlane.f32.xlu0 %v2788_v4 }
 0x44e   : > { %10777 = vmatpush.xpose.msk.msra.mxu0 %vm2656_vm7, %v3788_v5 }
 0x451   : > { %v2995_v8 = vpop.f32.mrf.mxu0  ;;  %10778 = vmatmul.msk.f32.vlgmr.msra.gmra.mxu0 %vm2656_vm7, %v3784_v7 }
 0x452   : > { %v15775_v10 = vadd.f32 %v2995_v8, %v15642_v37 }
 0x454   : > { %v3001_v12 = vsel %vm2692_vm8, %v15775_v10, -inf }
 0x455   : > { %3002 = vmax.xlane.f32.xlu1 %v3001_v12 }
 0x459   : > { %v2998_v41 = vpop.f32.mrf.mxu0  ;;  %10779 = vmatmul.msk.f32.gmra.mxu0 %vm2656_vm7, %v3786_v17 }
 0x45a   : > { %v15784_v18 = vadd.f32 %v2998_v41, %v15649_v44 }
 0x45c   : > { %v3004_v19 = vsel %vm2692_vm8, %v15784_v18, -inf }
 0x45d   : > { %3005 = vmax.xlane.f32.xlu2 %v3004_v19  ;;  %3107 = vmax.xlane.f32.xlu1 %v3106_v20 }
 0x461   : > { %v3192_v22 = vpop.f32.mrf.mxu0 }
 0x462   : > { %v15832_v25 = vadd.f32 %v3192_v22, %v15642_v37 }
 0x465   : > { %3110 = vmax.xlane.f32.xlu2 %v3109_v26 }
 0x467   : > { %v3300_v11 = vpop.f32.mrf.mxu2 }
 0x468   : > { %v15796_v31 = vadd.f32 %v3300_v11, %v15642_v37 }
 0x469   : > { %v3195_v43 = vpop.f32.mrf.mxu0 }
 0x46a   : > { %v3306_v33 = vsel %vm2692_vm8, %v15796_v31, -inf  ;;  %v15813_v45 = vadd.f32 %v3195_v43, %v15649_v44 }
 0x46b   : > { %3307 = vmax.xlane.f32.xlu0 %v3306_v33 }
 0x46c   : > { %v3201_v46 = vsel %vm2692_vm8, %v15813_v45, -inf }
 0x46f   : > { %v3303_v34 = vpop.f32.mrf.mxu2 }
 0x470   : > { %v15801_v36 = vadd.f32 %v3303_v34, %v15649_v44 }
 0x471   : > { %v3406_v48 = vpop.f32.mrf.mxu0 }
 0x472   : > { %v3309_v39 = vsel %vm2692_vm8, %v15801_v36, -inf  ;;  %v15837_v49 = vadd.f32 %v3406_v48, %v15642_v37 }
 0x473   : > { %3310 = vmax.xlane.f32.xlu1 %v3309_v39 }
 0x474   : > { %v3412_v2 = vsel %vm2692_vm8, %v15837_v49, -inf }
 0x477   : > { %v3510_v42 = vpop.f32.mrf.mxu2 }
 0x478   : > { %v15806_v38 = vadd.f32 %v3510_v42, %v15642_v37 }
 0x479   : > { %v3409_v15 = vpop.f32.mrf.mxu0 }
 0x47a   : > { %v3516_v58 = vsel %vm2692_vm8, %v15806_v38, -inf  ;;  %v15842_v16 = vadd.f32 %v3409_v15, %v15649_v44 }
 0x47b   : > { %3517 = vmax.xlane.f32.xlu1 %v3516_v58 }
 0x47c   : > { %v3415_v40 = vsel %vm2692_vm8, %v15842_v16, -inf }
 0x47d   : > { %14331 = vrot.lane.b32.xlu2 %v15613_v30, %s14706_s4 }
 0x47f   : > { %14326 = vrot.lane.b32.xlu0 %v15613_v30, %s14704_s26  ;;  %v3513_v29 = vpop.f32.mrf.mxu2 }
 0x480   : > { %v15822_v50 = vadd.f32 %v3513_v29, %v15649_v44 }
 0x481   : > { %v3602_v51 = vpop.f32.mrf.mxu0 }
 0x482   : > { %v3519_v56 = vsel %vm2692_vm8, %v15822_v50, -inf  ;;  %v15848_v54 = vadd.f32 %v3602_v51, %v15642_v37 }
 0x483   : > { %3202 = vmax.xlane.f32.xlu1 %v3201_v46 }
 0x484   : > { %v3608_v62 = vsel %vm2692_vm8, %v15848_v54, -inf }
 0x485   : > { %14336 = vrot.lane.b32.xlu2 %v15613_v30, %s14705_s3  ;;  %v3198_v30 = vsel %vm2692_vm8, %v15832_v25, -inf }
 0x487   : > { %v3710_v63 = vpop.f32.mrf.mxu2 }
 0x488   : > { %v15827_v47 = vadd.f32 %v3710_v63, %v15642_v37 }
 0x48a   : > { %v3716_v6 = vsel %vm2692_vm8, %v15827_v47, -inf }
 0x48b   : > { %3520 = vmax.xlane.f32.xlu1 %v3519_v56  ;;  %v2579_v56 = vpop.f32.mrf.mxu1 }
 0x493   : > { %3717 = vmax.xlane.f32.xlu1 %v3716_v6 }
 0x4a9   : > { %3199 = vmax.xlane.f32.xlu0 %v3198_v30 }
 0x4ae   : > { %3413 = vmax.xlane.f32.xlu2 %v3412_v2 }
 0x4b2   : > { %v2738_v27 = vpop.f32.mrf.mxu3 }
 0x4b3   : > { %2744 = vst.msk [vmem:[#allocation2] sm:$0xff] %vm2656_vm7, %v2738_v27 }
 0x4b6   : > { %3416 = vmax.xlane.f32.xlu2 %v3415_v40 }
 0x4b8   : > { %v2787_v53 = vpop.xlane.xlu1 %2786 }
 0x4b9   : > { %v2791_v59 = vsub.f32 %v15758_v0, %v2787_v53 }
 0x4ba   : > { %v2741_v1 = vpop.f32.mrf.mxu3 }
 0x4bb   : > { %v2793_v35 = vmul.f32 1.442695, %v2791_v59  ;;  %2745 = vst.msk [vmem:[#allocation2 + $0x18] sm:$0xff] %vm2656_vm7, %v2741_v1  ;;  %v3713_v59 = vpop.f32.mrf.mxu2 }
 0x4bd   : > { %14379 = vpow2.f32 %v2793_v35 }
 0x4be   : > { %3609 = vmax.xlane.f32.xlu2 %v3608_v62 }
 0x4c0   : > { %v2790_v4 = vpop.xlane.xlu0 %2789 }
 0x4c1   : > { %v2792_v5 = vsub.f32 %v15768_v3, %v2790_v4 }
 0x4c2   : > { %v2888_v26 = vpop.f32.mrf.mxu3 }
 0x4c3   : > { %v15855_v7 = vpop.eup %14379  ;;  %v2795_v8 = vmul.f32 1.442695, %v2792_v5  ;;  %v3605_v13 = vpop.f32.mrf.mxu0  ;;  %v15870_v11 = vadd.f32 %v2888_v26, %v15642_v37 }
 0x4c4   : > { %v15858_v12 = vadd.f32 %v3605_v13, %v15649_v44  ;;  %v2797_v0 = vsel %vm2692_vm8, %v15855_v7, 0.0 }
 0x4c5   : > { %14381 = vpow2.f32 %v2795_v8  ;;  %2798 = vadd.xlane.f32.xlu0 %v2797_v0  ;;  %v2894_v29 = vsel %vm2692_vm8, %v15870_v11, -inf }
 0x4c6   : > { %v3611_v17 = vsel %vm2692_vm8, %v15858_v12, -inf }
 0x4c7   : > { %3612 = vmax.xlane.f32.xlu1 %v3611_v17 }
 0x4c8   : > { %v3003_v41 = vpop.xlane.xlu1 %3002 }
 0x4c9   : > { %v3007_v19 = vsub.f32 %v15775_v10, %v3003_v41 }
 0x4cb   : > { %v15865_v3 = vpop.eup %14381  ;;  %v3009_v20 = vmul.f32 1.442695, %v3007_v19 }
 0x4cc   : > { %v2800_v9 = vsel %vm2692_vm8, %v15865_v3, 0.0 }
 0x4cd   : > { %14383 = vpow2.f32 %v3009_v20  ;;  %2801 = vadd.xlane.f32.xlu2 %v2800_v9 }
 0x4ce   : > { %v3816_v48 = vpop.f32.mrf.mxu0 }
 0x4cf   : > { %v15892_v2 = vadd.f32 %v3816_v48, %v15642_v37 }
 0x4d0   : > { %v3006_v33 = vpop.xlane.xlu2 %3005  ;;  %v3108_v34 = vpop.xlane.xlu1 %3107 }
 0x4d1   : > { %v3008_v22 = vsub.f32 %v15784_v18, %v3006_v33  ;;  %v3112_v39 = vsub.f32 %v15780_v14, %v3108_v34  ;;  %v2580_v14 = vadd.f32 %v2579_v56, %v1159_v60  ;;  %v3822_v53 = vsel %vm2692_vm8, %v15892_v2, -inf }
 0x4d3   : > { %v15874_v42 = vpop.eup %14383  ;;  %v3011_v10 = vmul.f32 1.442695, %v3008_v22  ;;  %v3114_v58 = vmul.f32 1.442695, %v3112_v39  ;;  %v2594_v15 = vadd.f32 %v15748_v55, %v2580_v14  ;;  %v15899_v55 = vadd.f32 %v3713_v59, %v15649_v44 }
 0x4d4   : > { %v3013_v43 = vsel %vm2692_vm8, %v15874_v42, 0.0 }
 0x4d5   : > { %14385 = vpow2.f32 %v3011_v10  ;;  %3014 = vadd.xlane.f32.xlu0 %v3013_v43  ;;  %2895 = vmax.xlane.f32.xlu2 %v2894_v29  ;;  %v2608_v60 = vadd.f32 %v15637_v21, %v2594_v15  ;;  %v2891_v29 = vpop.f32.mrf.mxu3 }
 0x4d6   : > { %14387 = vpow2.f32 %v3114_v58  ;;  %v3819_v22 = vpop.f32.mrf.mxu0 }
 0x4d7   : > { %v14345_v13 = vpack.i.bf16 %v15617_v32, %v2608_v60  ;;  %v15924_v58 = vadd.f32 %v3819_v22, %v15649_v44 }
 0x4d8   : > { %v3111_v46 = vpop.xlane.xlu2 %3110 }
 0x4d9   : > { %v3113_v51 = vsub.f32 %v15791_v24, %v3111_v46  ;;  %v3719_v24 = vsel %vm2692_vm8, %v15899_v55, -inf  ;;  %v3825_v43 = vsel %vm2692_vm8, %v15924_v58, -inf }
 0x4db   : > { %v15880_v63 = vpop.eup %14385  ;;  %v3116_v1 = vmul.f32 1.442695, %v3113_v51 }
 0x4dc   : > { %v15882_v18 = vpop.eup %14387  ;;  %v3016_v6 = vsel %vm2692_vm8, %v15880_v63, 0.0 }
 0x4dd   : > { %3017 = vadd.xlane.f32.xlu1 %v3016_v6  ;;  %v3118_v30 = vsel %vm2692_vm8, %v15882_v18, 0.0  ;;  %14389 = vpow2.f32 %v3116_v1  ;;  %v15931_v6 = vadd.f32 %v2891_v29, %v15649_v44 }
 0x4de   : > { %3119 = vadd.xlane.f32.xlu2 %v3118_v30  ;;  %v3308_v37 = vpop.xlane.xlu0 %3307 }
 0x4df   : > { %v3312_v15 = vsub.f32 %v15796_v31, %v3308_v37 }
 0x4e0   : > { %v14332_v27 = vpop.permute.xlu2 %14331 }
 0x4e1   : > { %v14333_v40 = vunpack.i.l.bf16 %v14332_v27  ;;  %v14334_v23 = vunpack.i.h.bf16 %v14332_v27  ;;  %v2897_v27 = vsel %vm2692_vm8, %v15931_v6, -inf }
 0x4e3   : > { %2942 = vmatpush.msrb.mxu3 %v14333_v40  ;;  %v15904_v21 = vpop.eup %14389  ;;  %v3314_v40 = vmul.f32 1.442695, %v3312_v15 }
 0x4e4   : > { %v3121_v8 = vsel %vm2692_vm8, %v15904_v21, 0.0 }
 0x4e5   : > { %2943 = vmatpush.msrb.mxu3 %v14334_v23  ;;  %3823 = vmax.xlane.f32.xlu1 %v3822_v53 }
 0x4e6   : > { %v15912_v41 = vpop.xlane.xlu1 %3310 }
 0x4e7   : > { %3148 = vmatpush.msra.mxu3 %v2608_v60  ;;  %v2633_v60 = vpop.f32.mrf.mxu1 }
 0x4e8   : > { %v14337_v62 = vpop.permute.xlu2 %14336 }
 0x4e9   : > { %3149 = vmatpush.msra.mxu3 %v15617_v32  ;;  %v14338_v0 = vunpack.i.l.bf16 %v14337_v62  ;;  %v14339_v17 = vunpack.i.h.bf16 %v14337_v62 }
 0x4ed   : > { %3720 = vmax.xlane.f32.xlu1 %v3719_v24 }
 0x4ee   : > { %v15915_v26 = vpop.xlane.xlu1 %3517 }
 0x4f1   : > { %v14327_v35 = vpop.permute.xlu0 %14326 }
 0x4f2   : > { %v14328_v4 = vunpack.i.l.bf16 %v14327_v35  ;;  %v14329_v5 = vunpack.i.h.bf16 %v14327_v35  ;;  %v14370_v35 = vld [vmem:[%s14954_s29 + $0x8] ss:$0 sm:$0xff]  ;;  %s18161_s29 = scalar_lea.vmem %s18107_s7, %s14949_s23 }
 0x4f4   : > { %2835 = vmatpush.msrb.mxu1 %v14328_v4 }
 0x4f5   : > { %3122 = vadd.xlane.f32.xlu1 %v3121_v8  ;;  %v2622_v8 = vadd.f32 %v14370_v35, %v15751_v28 }
 0x4f6   : > { %14346 = vrot.lane.b32.xlu2 %v14345_v13, %s14706_s4  ;;  %2836 = vmatpush.msrb.mxu1 %v14329_v5  ;;  %v3203_v10 = vpop.xlane.xlu1 %3202  ;;  %v3313_v5 = vsub.f32 %v15801_v36, %v15912_v41 }
 0x4f8   : > { %3049 = vmatpush.msra.mxu1 %v14338_v0  ;;  %v3316_v36 = vmul.f32 1.442695, %v3313_v5 }
 0x4fa   : > { %3050 = vmatpush.msra.mxu1 %v14339_v17 }
 0x4fe   : > { %v15933_v30 = vpop.xlane.xlu1 %3520 }
 0x506   : > { %v15944_v31 = vpop.xlane.xlu1 %3717 }
 0x50e   : > { %14341 = vrot.lane.b32.xlu1 %v14345_v13, %s14704_s26 }
 0x516   : > { %14351 = vrot.lane.b32.xlu1 %v14345_v13, %s14705_s3 }
 0x51c   : > { %v3200_v19 = vpop.xlane.xlu0 %3199 }
 0x51d   : > { %v3204_v20 = vsub.f32 %v15832_v25, %v3200_v19  ;;  %v3205_v25 = vsub.f32 %v15813_v45, %v3203_v10 }
 0x51f   : > { %v3206_v9 = vmul.f32 1.442695, %v3204_v20  ;;  %v3208_v14 = vmul.f32 1.442695, %v3205_v25  ;;  %v2635_v20 = vpop.f32.mrf.mxu1 }
 0x521   : > { %14391 = vpow2.f32 %v3206_v9  ;;  %v3414_v32 = vpop.xlane.xlu2 %3413 }
 0x522   : > { %v3418_v53 = vsub.f32 %v15837_v49, %v3414_v32 }
 0x524   : > { %v3420_v24 = vmul.f32 1.442695, %v3418_v53 }
 0x527   : > { %v15917_v33 = vpop.eup %14391 }
 0x528   : > { %v3210_v34 = vsel %vm2692_vm8, %v15917_v33, 0.0 }
 0x529   : > { %v15921_v39 = vpop.xlane.xlu2 %3416  ;;  %3211 = vadd.xlane.f32.xlu0 %v3210_v34 }
 0x52a   : > { %v3419_v22 = vsub.f32 %v15842_v16, %v15921_v39  ;;  %v3523_v39 = vsub.f32 %v15822_v50, %v15933_v30 }
 0x531   : > { %v3610_v46 = vpop.xlane.xlu2 %3609  ;;  %3826 = vmax.xlane.f32.xlu0 %v3825_v43 }
 0x532   : > { %v3614_v56 = vsub.f32 %v15848_v54, %v3610_v46  ;;  %v3422_v46 = vmul.f32 1.442695, %v3419_v22 }
 0x534   : > { %v3616_v48 = vmul.f32 1.442695, %v3614_v56 }
 0x536   : > { %14393 = vpow2.f32 %v3616_v48  ;;  %v3526_v48 = vmul.f32 1.442695, %v3523_v39 }
 0x537   : > { %14395 = vpow2.f32 %v3208_v14 }
 0x538   : > { %v2799_v45 = vpop.xlane.xlu0 %2798 }
 0x539   : > { %14397 = vrcp.f32 %v2799_v45  ;;  %2898 = vmax.xlane.f32.xlu0 %v2897_v27 }
 0x53a   : > { %14399 = vpow2.f32 %v3314_v40  ;;  %v15956_v49 = vpop.xlane.xlu1 %3612 }
 0x53c   : > { %v15938_v51 = vpop.eup %14393 }
 0x53d   : > { %v15940_v54 = vpop.eup %14395  ;;  %v3620_v44 = vsel %vm2692_vm8, %v15938_v51, 0.0 }
 0x53e   : > { %3621 = vadd.xlane.f32.xlu2 %v3620_v44  ;;  %v3213_v37 = vsel %vm2692_vm8, %v15940_v54, 0.0 }
 0x53f   : > { %v14398_v23 = vpop.eup %14397 }
 0x540   : > { %v2805_v59 = vmul.f32 %v14398_v23, %v15855_v7  ;;  %v2802_v1 = vpop.xlane.xlu2 %2801  ;;  %v15952_v62 = vpop.eup %14399  ;;  %v2620_v7 = vadd.f32 %v14370_v35, %v15744_v52  ;;  %v2636_v52 = vadd.f32 %v2635_v20, %v2622_v8  ;;  %v3522_v20 = vsub.f32 %v15806_v38, %v15915_v26 }
 0x541   : > { %14401 = vrcp.f32 %v2802_v1  ;;  %3214 = vadd.xlane.f32.xlu0 %v3213_v37  ;;  %v3318_v17 = vsel %vm2692_vm8, %v15952_v62, 0.0  ;;  %v3615_v37 = vsub.f32 %v15858_v12, %v15956_v49 }
 0x542   : > { %10720 = vmatmul.msk.f32.vlgmr.msrb.gmra.mxu1 %vm2692_vm8, %v2805_v59  ;;  %14403 = vpow2.f32 %v3420_v24  ;;  %v2634_v32 = vadd.f32 %v2633_v60, %v2620_v7 }
 0x543   : > { %v3618_v24 = vmul.f32 1.442695, %v3615_v37 }
 0x547   : > { %v14402_v4 = vpop.eup %14401 }
 0x548   : > { %v2896_v13 = vpop.xlane.xlu2 %2895  ;;  %v3015_v0 = vpop.xlane.xlu0 %3014  ;;  %v2806_v19 = vmul.f32 %v14402_v4, %v15865_v3  ;;  %v15970_v3 = vadd.f32 %v15753_v57, %v2634_v32 }
 0x549   : > { %v2900_v9 = vsub.f32 %v15870_v11, %v2896_v13  ;;  %14405 = vrcp.f32 %v3015_v0  ;;  %3319 = vadd.xlane.f32.xlu0 %v3318_v17  ;;  %v15965_v34 = vpop.eup %14403  ;;  %v15973_v11 = vadd.f32 %v15765_v61, %v2636_v52 }
 0x54a   : > { %10721 = vmatmul.msk.f32.gmra.mxu1 %vm2692_vm8, %v2806_v19  ;;  %v3424_v43 = vsel %vm2692_vm8, %v15965_v34, 0.0 }
 0x54b   : > { %v2902_v41 = vmul.f32 1.442695, %v2900_v9  ;;  %v15985_v61 = vpack.i.bf16 %v15970_v3, %v15973_v11  ;;  %v3524_v9 = vmul.f32 1.442695, %v3522_v20 }
 0x54d   : > { %14407 = vpow2.f32 %v2902_v41 }
 0x54e   : > { %14409 = vpow2.f32 %v3316_v36 }
 0x54f   : > { %v14406_v28 = vpop.eup %14405 }
 0x550   : > { %v3021_v10 = vmul.f32 %v14406_v28, %v15874_v42  ;;  %v3018_v25 = vpop.xlane.xlu1 %3017 }
 0x551   : > { %14411 = vrcp.f32 %v3018_v25  ;;  %3425 = vadd.xlane.f32.xlu0 %v3424_v43  ;;  %v16043_v43 = vpop.xlane.xlu2 %3119 }
 0x552   : > { %10732 = vmatmul.msk.f32.vlgmr.msra.gmra.mxu1 %vm2692_vm8, %v3021_v10  ;;  %14413 = vpow2.f32 %v3422_v46 }
 0x553   : > { %v15979_v29 = vpop.eup %14407  ;;  %14415 = vpow2.f32 %v3526_v48 }
 0x554   : > { %v2906_v57 = vsel %vm2692_vm8, %v15979_v29, 0.0  ;;  %v15987_v16 = vpop.eup %14409  ;;  %14417 = vpow2.f32 %v3618_v24 }
 0x555   : > { %2907 = vadd.xlane.f32.xlu1 %v2906_v57  ;;  %v3321_v56 = vsel %vm2692_vm8, %v15987_v16, 0.0 }
 0x556   : > { %14361 = vrot.lane.b32.xlu2 %v15985_v61, %s14706_s4 }
 0x557   : > { %v14412_v42 = vpop.eup %14411 }
 0x558   : > { %v3022_v14 = vmul.f32 %v14412_v42, %v15880_v63  ;;  %v15997_v15 = vpop.eup %14413  ;;  %v3824_v27 = vpop.xlane.xlu1 %3823 }
 0x559   : > { %3322 = vadd.xlane.f32.xlu0 %v3321_v56  ;;  %v3427_v45 = vsel %vm2692_vm8, %v15997_v15, 0.0  ;;  %v16001_v40 = vpop.eup %14415  ;;  %v3828_v10 = vsub.f32 %v15892_v2, %v3824_v27 }
 0x55a   : > { %10733 = vmatmul.msk.f32.gmra.mxu1 %vm2692_vm8, %v3022_v14  ;;  %v3531_v50 = vsel %vm2692_vm8, %v16001_v40, 0.0  ;;  %v16013_v4 = vpop.eup %14417 }
 0x55b   : > { %v3623_v0 = vsel %vm2692_vm8, %v16013_v4, 0.0 }
 0x560   : > { %v16005_v30 = vpop.xlane.xlu1 %3720 }
 0x561   : > { %3428 = vadd.xlane.f32.xlu0 %v3427_v45 }
 0x568   : > { %v16007_v63 = vpop.xlane.xlu1 %3122 }
 0x569   : > { %3532 = vadd.xlane.f32.xlu0 %v3531_v50  ;;  %v14347_v50 = vpop.permute.xlu2 %14346 }
 0x57d   : > { %14356 = vrot.lane.b32.xlu0 %v15985_v61, %s14704_s26 }
 0x580   : > { %v14342_v44 = vpop.permute.xlu1 %14341 }
 0x581   : > { %v14343_v23 = vunpack.i.l.bf16 %v14342_v44  ;;  %v14344_v60 = vunpack.i.h.bf16 %v14342_v44 }
 0x583   : > { %3248 = vmatpush.msrb.mxu1 %v14343_v23 }
 0x585   : > { %3249 = vmatpush.msrb.mxu1 %v14344_v60  ;;  %v14348_v60 = vunpack.i.l.bf16 %v14347_v50 }
 0x588   : > { %v14352_v53 = vpop.permute.xlu1 %14351 }
 0x589   : > { %v14353_v59 = vunpack.i.l.bf16 %v14352_v53  ;;  %v14354_v1 = vunpack.i.h.bf16 %v14352_v53 }
 0x58b   : > { %3460 = vmatpush.msra.mxu1 %v14353_v59 }
 0x58d   : > { %3461 = vmatpush.msra.mxu1 %v14354_v1 }
 0x59c   : > { %v3212_v35 = vpop.xlane.xlu0 %3211 }
 0x59d   : > { %14419 = vrcp.f32 %v3212_v35 }
 0x5a3   : > { %v14420_v5 = vpop.eup %14419 }
 0x5a4   : > { %v3218_v7 = vmul.f32 %v14420_v5, %v15917_v33  ;;  %v3827_v8 = vpop.xlane.xlu0 %3826 }
 0x5a5   : > { %v3829_v13 = vsub.f32 %v15924_v58, %v3827_v8 }
 0x5a6   : > { %10744 = vmatmul.msk.f32.vlgmr.msrb.gmra.mxu1 %vm2692_vm8, %v3218_v7 }
 0x5a7   : > { %v3832_v17 = vmul.f32 1.442695, %v3829_v13  ;;  %3624 = vadd.xlane.f32.xlu0 %v3623_v0 }
 0x5a9   : > { %14421 = vpow2.f32 %v3832_v17 }
 0x5ac   : > { %v2899_v12 = vpop.xlane.xlu0 %2898 }
 0x5ad   : > { %v2901_v49 = vsub.f32 %v15931_v6, %v2899_v12  ;;  %v3722_v6 = vsub.f32 %v15827_v47, %v15944_v31  ;;  %v3830_v31 = vmul.f32 1.442695, %v3828_v10 }
 0x5af   : > { %v16021_v19 = vpop.eup %14421  ;;  %v2904_v33 = vmul.f32 1.442695, %v2901_v49  ;;  %v3724_v26 = vmul.f32 1.442695, %v3722_v6 }
 0x5b0   : > { %v3837_v58 = vsel %vm2692_vm8, %v16021_v19, 0.0 }
 0x5b1   : > { %14423 = vpow2.f32 %v2904_v33  ;;  %3838 = vadd.xlane.f32.xlu2 %v3837_v58  ;;  %v3622_v24 = vpop.xlane.xlu2 %3621 }
 0x5b4   : > { %v3215_v36 = vpop.xlane.xlu0 %3214 }
 0x5b5   : > { %14425 = vrcp.f32 %v3215_v36 }
 0x5b6   : > { %14427 = vpow2.f32 %v3524_v9 }
 0x5b7   : > { %v16027_v41 = vpop.eup %14423  ;;  %14429 = vpow2.f32 %v3724_v26 }
 0x5b8   : > { %v2909_v32 = vsel %vm2692_vm8, %v16027_v41, 0.0 }
 0x5b9   : > { %2910 = vadd.xlane.f32.xlu1 %v2909_v32  ;;  %v14362_v26 = vpop.permute.xlu2 %14361 }
 0x5bb   : > { %v14426_v38 = vpop.eup %14425 }
 0x5bc   : > { %v16033_v52 = vpop.xlane.xlu0 %3319  ;;  %v3219_v28 = vmul.f32 %v14426_v38, %v15940_v54  ;;  %v16036_v22 = vpop.eup %14427  ;;  %v3723_v54 = vsub.f32 %v15899_v55, %v16005_v30 }
 0x5bd   : > { %v3528_v47 = vsel %vm2692_vm8, %v16036_v22, 0.0  ;;  %v16045_v57 = vpop.eup %14429 }
 0x5be   : > { %10745 = vmatmul.msk.f32.gmra.mxu1 %vm2692_vm8, %v3219_v28  ;;  %v3728_v39 = vsel %vm2692_vm8, %v16045_v57, 0.0  ;;  %v3726_v14 = vmul.f32 1.442695, %v3723_v54 }
 0x5bf   : > { %v2838_v25 = vpop.f32.mrf.mxu1 }
 0x5c0   : > { %2846 = vrot.lane.b32.xlu0 %v2838_v25, %s14705_s3 }
 0x5c1   : > { %3529 = vadd.xlane.f32.xlu1 %v3528_v47 }
 0x5c4   : > { %v3426_v46 = vpop.xlane.xlu0 %3425 }
 0x5c5   : > { %14431 = vrcp.f32 %v3426_v46 }
 0x5c6   : > { %14433 = vpow2.f32 %v3830_v31 }
 0x5c7   : > { %v2841_v42 = vpop.f32.mrf.mxu1 }
 0x5c8   : > { %v2908_v2 = vpop.xlane.xlu1 %2907 }
 0x5c9   : > { %14435 = vrcp.f32 %v2908_v2  ;;  %3729 = vadd.xlane.f32.xlu1 %v3728_v39 }
 0x5ca   : > { %14437 = vpow2.f32 %v3726_v14 }
 0x5cb   : > { %v14432_v56 = vpop.eup %14431 }
 0x5cc   : > { %v3432_v48 = vmul.f32 %v14432_v56, %v15965_v34  ;;  %v16052_v45 = vpop.xlane.xlu0 %3322  ;;  %v16054_v27 = vpop.eup %14433  ;;  %v14349_v34 = vunpack.i.h.bf16 %v14347_v50 }
 0x5cd   : > { %v3834_v23 = vsel %vm2692_vm8, %v16054_v27, 0.0 }
 0x5ce   : > { %10756 = vmatmul.msk.f32.vlgmr.msra.gmra.mxu1 %vm2692_vm8, %v3432_v48 }
 0x5cf   : > { %v14436_v44 = vpop.eup %14435  ;;  %v3052_v55 = vpop.f32.mrf.mxu1 }
 0x5d0   : > { %v2914_v30 = vmul.f32 %v14436_v44, %v15979_v29  ;;  %3060 = vrot.lane.b32.xlu0 %v3052_v55, %s14704_s26  ;;  %v16062_v59 = vpop.eup %14437 }
 0x5d1   : > { %3835 = vadd.xlane.f32.xlu1 %v3834_v23  ;;  %v3731_v1 = vsel %vm2692_vm8, %v16062_v59, 0.0 }
 0x5d2   : > { %10726 = vmatmul.msk.f32.vlgmr.msrb.gmra.mxu3 %vm2692_vm8, %v2914_v30 }
 0x5d3   : > { %3354 = vmatpush.msrb.mxu3 %v14348_v60 }
 0x5d4   : > { %v3429_v53 = vpop.xlane.xlu0 %3428 }
 0x5d5   : > { %3355 = vmatpush.msrb.mxu3 %v14349_v34  ;;  %14439 = vrcp.f32 %v3429_v53 }
 0x5d6   : > { %14441 = vrcp.f32 %v3622_v24  ;;  %v10868_v24 = vld [vmem:[%s14933_s15 + $0xa8] sm:$0xf] }
 0x5d9   : > { %3732 = vadd.xlane.f32.xlu1 %v3731_v1 }
 0x5db   : > { %v14440_v29 = vpop.eup %14439 }
 0x5dc   : > { %v3433_v37 = vmul.f32 %v14440_v29, %v15997_v15  ;;  %v3533_v35 = vpop.xlane.xlu0 %3532  ;;  %v14442_v7 = vpop.eup %14441 }
 0x5dd   : > { %v3628_v0 = vmul.f32 %v14442_v7, %v15938_v51  ;;  %v3055_v15 = vpop.f32.mrf.mxu1 }
 0x5de   : > { %10757 = vmatmul.msk.f32.gmra.mxu1 %vm2692_vm8, %v3433_v37 }
 0x5ef   : > { %v14357_v5 = vpop.permute.xlu0 %14356 }
 0x5f0   : > { %v14358_v8 = vunpack.i.l.bf16 %v14357_v5  ;;  %v14359_v13 = vunpack.i.h.bf16 %v14357_v5  ;;  %v13613_v5 = vld [vmem:[%s14933_s15 + $0xac] sm:$0xf] }
 0x5f2   : > { %14366 = vrot.lane.b32.xlu1 %v15985_v61, %s14705_s3  ;;  %3658 = vmatpush.msrb.mxu1 %v14358_v8  ;;  %v10870_v8 = vld [vmem:[%s14933_s15 + $0xb4] sm:$0xf0] }
 0x5f4   : > { %3659 = vmatpush.msrb.mxu1 %v14359_v13  ;;  %v10856_v13 = vld [vmem:[%s14933_s15 + $0x90] sm:$0xf] }
 0x5f5   : > { %10768 = vmatmul.msk.f32.vlgmr.msrb.gmra.mxu1 %vm2692_vm8, %v3628_v0  ;;  %v13611_v0 = vld [vmem:[%s14933_s15 + $0x98] sm:$0xf0] }
 0x5fa   : > { %2848 = vrot.lane.b32.xlu1 %v2841_v42, %s14705_s3 }
 0x602   : > { %3062 = vrot.lane.b32.xlu1 %v3055_v15, %s14704_s26  ;;  %v10873_v15 = vor.u32 %v13613_v5, %v10870_v8  ;;  %v13635_v5 = vld [vmem:[%s14933_s15 + $0x158] sm:$0xf0] }
 0x61a   : > { %v3625_v17 = vpop.xlane.xlu0 %3624 }
 0x61b   : > { %14443 = vrcp.f32 %v3625_v17  ;;  %v13610_v17 = vld [vmem:[%s14933_s15 + $0x94] sm:$0xf] }
 0x621   : > { %v14444_v12 = vpop.eup %14443 }
 0x622   : > { %v3629_v49 = vmul.f32 %v14444_v12, %v16013_v4  ;;  %v10858_v12 = vld [vmem:[%s14933_s15 + $0x9c] sm:$0xf0] }
 0x623   : > { %v3251_v20 = vpop.f32.mrf.mxu1 }
 0x624   : > { %10769 = vmatmul.msk.f32.gmra.mxu1 %vm2692_vm8, %v3629_v49  ;;  %3259 = vrot.lane.b32.xlu2 %v3251_v20, %s14705_s3  ;;  %v3839_v54 = vpop.xlane.xlu2 %3838  ;;  %v10857_v49 = vor.u32 %v13611_v0, %v10856_v13  ;;  %v10954_v13 = vld [vmem:[%s14933_s15 + $0x15c] sm:$0xf0]  ;;  %v10960_v0 = vld [vmem:[%s14933_s15 + $0x158] sm:$0xf] }
 0x62c   : > { %v2911_v61 = vpop.xlane.xlu1 %2910 }
 0x62d   : > { %14445 = vrcp.f32 %v2911_v61  ;;  %v10861_v61 = vor.u32 %v13610_v17, %v10858_v12 }
 0x62e   : > { %14447 = vrcp.f32 %v16043_v43 }
 0x62f   : > { %14449 = vrcp.f32 %v16007_v63 }
 0x630   : > { %14451 = vrcp.f32 %v16033_v52 }
 0x631   : > { %14453 = vrcp.f32 %v16052_v45 }
 0x632   : > { %v2847_v51 = vpop.permute.xlu0 %2846 }
 0x633   : > { %v14446_v33 = vpop.eup %14445  ;;  %2853 = vst.msk [vmem:[#allocation2] sm:$0xff] %vm2852_vm9, %v2847_v51  ;;  %v10844_v51 = vld [vmem:[%s14933_s15 + $0x78] sm:$0xf] }
 0x634   : > { %v2915_v58 = vmul.f32 %v14446_v33, %v16027_v41  ;;  %v14448_v9 = vpop.eup %14447  ;;  %v3530_v6 = vpop.xlane.xlu1 %3529  ;;  %v13608_v33 = vld [vmem:[%s14933_s15 + $0x80] sm:$0xf0] }
 0x635   : > { %v3126_v36 = vmul.f32 %v14448_v9, %v15882_v18  ;;  %v14450_v32 = vpop.eup %14449  ;;  %14455 = vrcp.f32 %v3530_v6  ;;  %v10846_v9 = vld [vmem:[%s14933_s15 + $0x84] sm:$0xf0]  ;;  %v10832_v6 = vld [vmem:[%s14933_s15 + $0x60] sm:$0xf] }
 0x636   : > { %10727 = vmatmul.msk.f32.gmra.mxu3 %vm2692_vm8, %v2915_v58  ;;  %v3127_v41 = vmul.f32 %v14450_v32, %v15904_v21  ;;  %v14452_v38 = vpop.eup %14451  ;;  %14457 = vrcp.f32 %v3533_v35  ;;  %v13614_v35 = vld [vmem:[%s14933_s15 + $0xb0] sm:$0xf0]  ;;  %v13607_v58 = vld [vmem:[%s14933_s15 + $0x7c] sm:$0xf]  ;;  %v13605_v32 = vld [vmem:[%s14933_s15 + $0x68] sm:$0xf0] }
 0x637   : > { %v3326_v28 = vmul.f32 %v14452_v38, %v15952_v62  ;;  %v14454_v52 = vpop.eup %14453  ;;  %v10869_v7 = vor.u32 %v13614_v35, %v10868_v24  ;;  %v10952_v35 = vld [vmem:[%s14933_s15 + $0x150] sm:$0xf] }
 0x638   : > { %v3327_v10 = vmul.f32 %v14454_v52, %v15987_v16  ;;  %v13601_v52 = vld [vmem:[%s14933_s15 + $0x4c] sm:$0xf]  ;;  %v10953_v8 = vor.u32 %v13635_v5, %v10952_v35  ;;  %v13656_v35 = vld [vmem:[%s14933_s15 + $0x200] sm:$0xf0] }
 0x639   : > { %4386 = vmatpush.bf16.msrb.mxu2 %v10869_v7  ;;  %v13634_v7 = vld [vmem:[%s14933_s15 + $0x154] sm:$0xf] }
 0x63a   : > { %v10957_v12 = vor.u32 %v13634_v7, %v10954_v13  ;;  %v13617_v13 = vld [vmem:[%s14933_s15 + $0xc8] sm:$0xf0] }
 0x63b   : > { %v3254_v4 = vpop.f32.mrf.mxu1  ;;  %v14456_v25 = vpop.eup %14455 }
 0x63c   : > { %3261 = vrot.lane.b32.xlu0 %v3254_v4, %s14705_s3  ;;  %v3730_v63 = vpop.xlane.xlu1 %3729  ;;  %v3536_v62 = vmul.f32 %v14456_v25, %v16036_v22  ;;  %v14458_v43 = vpop.eup %14457  ;;  %v10845_v4 = vor.u32 %v13608_v33, %v10844_v51  ;;  %v13631_v51 = vld [vmem:[%s14933_s15 + $0x13c] sm:$0xf]  ;;  %v10942_v33 = vld [vmem:[%s14933_s15 + $0x144] sm:$0xf0] }
 0x63d   : > { %v3537_v16 = vmul.f32 %v14458_v43, %v16001_v40  ;;  %4387 = vmatpush.bf16.msrb.mxu2 %v10857_v49 }
 0x63e   : > { %10738 = vmatmul.msk.f32.vlgmr.msra.gmra.mxu3 %vm2692_vm8, %v3126_v36  ;;  %v10849_v36 = vor.u32 %v13607_v58, %v10846_v9  ;;  %v10948_v58 = vld [vmem:[%s14933_s15 + $0x140] sm:$0xf]  ;;  %v13633_v9 = vld [vmem:[%s14933_s15 + $0x148] sm:$0xf0] }
 0x63f   : > { %3558 = vmatpush.msra.mxu3 %v15973_v11  ;;  %v14363_v11 = vunpack.i.l.bf16 %v14362_v26 }
 0x641   : > { %3559 = vmatpush.msra.mxu3 %v15970_v3  ;;  %v14364_v3 = vunpack.i.h.bf16 %v14362_v26  ;;  %4388 = vmatpush.bf16.msrb.mxu2 %v10845_v4  ;;  %v10833_v26 = vor.u32 %v13605_v32, %v10832_v6  ;;  %v10949_v6 = vor.u32 %v13633_v9, %v10948_v58 }
 0x642   : > { %v3061_v23 = vpop.permute.xlu0 %3060 }
 0x644   : > { %v3836_v21 = vpop.xlane.xlu1 %3835 }
 0x645   : > { %14459 = vrcp.f32 %v3836_v21  ;;  %v10822_v21 = vld [vmem:[%s14933_s15 + $0x54] sm:$0xf0]  ;;  %4389 = vmatpush.bf16.msrb.mxu2 %v10833_v26 }
 0x646   : > { %10739 = vmatmul.msk.f32.gmra.mxu3 %vm2692_vm8, %v3127_v41  ;;  %14461 = vrcp.f32 %v3730_v63  ;;  %v13604_v41 = vld [vmem:[%s14933_s15 + $0x64] sm:$0xf]  ;;  %v10834_v63 = vld [vmem:[%s14933_s15 + $0x6c] sm:$0xf0]  ;;  %v10825_v25 = vor.u32 %v13601_v52, %v10822_v21  ;;  %v10916_v21 = vld [vmem:[%s14933_s15 + $0x108] sm:$0xf] }
 0x647   : > { %14463 = vrcp.f32 %v3839_v54  ;;  %v13599_v54 = vld [vmem:[%s14933_s15 + $0x38] sm:$0xf0] }
 0x64b   : > { %v3463_v18 = vpop.f32.mrf.mxu1  ;;  %v14460_v2 = vpop.eup %14459 }
 0x64c   : > { %3471 = vrot.lane.b32.xlu1 %v3463_v18, %s14704_s26  ;;  %v3733_v31 = vpop.xlane.xlu1 %3732  ;;  %v3842_v56 = vmul.f32 %v14460_v2, %v16054_v27  ;;  %v14462_v14 = vpop.eup %14461  ;;  %v10810_v2 = vld [vmem:[%s14933_s15 + $0x3c] sm:$0xf0] }
 0x64d   : > { %14465 = vrcp.f32 %v3733_v31  ;;  %v3736_v48 = vmul.f32 %v14462_v14, %v16045_v57  ;;  %v14464_v50 = vpop.eup %14463  ;;  %v13595_v14 = vld [vmem:[%s14933_s15 + $0x1c] sm:$0xf] }
 0x64e   : > { %10750 = vmatmul.msk.f32.vlgmr.msrb.gmra.mxu3 %vm2692_vm8, %v3326_v28  ;;  %v3843_v40 = vmul.f32 %v14464_v50, %v16021_v19  ;;  %v10837_v28 = vor.u32 %v13604_v41, %v10834_v63  ;;  %v10928_v41 = vld [vmem:[%s14933_s15 + $0x120] sm:$0xf]  ;;  %v13629_v63 = vld [vmem:[%s14933_s15 + $0x128] sm:$0xf0] }
 0x64f   : > { %3764 = vmatpush.msrb.mxu3 %v14363_v11  ;;  %v10820_v11 = vld [vmem:[%s14933_s15 + $0x48] sm:$0xf]  ;;  %v10929_v26 = vor.u32 %v13629_v63, %v10928_v41  ;;  %v13661_v41 = vld [vmem:[%s14933_s15 + $0x22c] sm:$0xf]  ;;  %v11062_v63 = vld [vmem:[%s14933_s15 + $0x234] sm:$0xf0] }
 0x651   : > { %3765 = vmatpush.msrb.mxu3 %v14364_v3  ;;  %v13602_v3 = vld [vmem:[%s14933_s15 + $0x50] sm:$0xf0] }
 0x653   : > { %v14466_v44 = vpop.eup %14465 }
 0x654   : > { %v3737_v27 = vmul.f32 %v14466_v44, %v16062_v59  ;;  %v13593_v44 = vld [vmem:[%s14933_s15 + $0x8] sm:$0xf0] }
 0x655   : > { %v2945_v46 = vpop.f32.mrf.mxu3 }
 0x656   : > { %10751 = vmatmul.msk.f32.gmra.mxu3 %vm2692_vm8, %v3327_v10  ;;  %v10821_v10 = vor.u32 %v13602_v3, %v10820_v11  ;;  %v13630_v11 = vld [vmem:[%s14933_s15 + $0x130] sm:$0xf0] }
 0x658   : > { %4390 = vmatpush.bf16.msrb.mxu2 %v10821_v10  ;;  %v13626_v10 = vld [vmem:[%s14933_s15 + $0x110] sm:$0xf0] }
 0x65b   : > { %v3466_v47 = vpop.f32.mrf.mxu1 }
 0x65c   : > { %3473 = vrot.lane.b32.xlu0 %v3466_v47, %s14704_s26 }
 0x65e   : > { %10762 = vmatmul.msk.f32.vlgmr.msra.gmra.mxu3 %vm2692_vm8, %v3536_v62 }
 0x664   : > { %v14367_v42 = vpop.permute.xlu1 %14366  ;;  %2953 = vrot.lane.b32.xlu0 %v2945_v46, %s14706_s4  ;;  %v10808_v46 = vld [vmem:[%s14933_s15 + $0x30] sm:$0xf] }
 0x665   : > { %v14368_v39 = vunpack.i.l.bf16 %v14367_v42  ;;  %v14369_v22 = vunpack.i.h.bf16 %v14367_v42  ;;  %v13598_v42 = vld [vmem:[%s14933_s15 + $0x34] sm:$0xf] }
 0x666   : > { %10763 = vmatmul.msk.f32.gmra.mxu3 %vm2692_vm8, %v3537_v16  ;;  %v10809_v16 = vor.u32 %v13599_v54, %v10808_v46 }
 0x667   : > { %3870 = vmatpush.msra.mxu1 %v14368_v39  ;;  %v10813_v39 = vor.u32 %v13598_v42, %v10810_v2  ;;  %v11060_v42 = vld [vmem:[%s14933_s15 + $0x228] sm:$0xf] }
 0x668   : > { %4391 = vmatpush.bf16.msrb.mxu2 %v10809_v16  ;;  %v13662_v16 = vld [vmem:[%s14933_s15 + $0x230] sm:$0xf0] }
 0x669   : > { %3871 = vmatpush.msra.mxu1 %v14369_v22  ;;  %v10796_v22 = vld [vmem:[%s14933_s15 + $0x18] sm:$0xf]  ;;  %v11061_v2 = vor.u32 %v13662_v16, %v11060_v42  ;;  %v11038_v42 = vld [vmem:[%s14933_s15 + $0x204] sm:$0xf0]  ;;  %v11044_v16 = vld [vmem:[%s14933_s15 + $0x200] sm:$0xf] }
 0x66a   : > { %10780 = vmatmul.msk.f32.vlgmr.msra.gmra.mxu1 %vm2692_vm8, %v3842_v56  ;;  %v13596_v56 = vld [vmem:[%s14933_s15 + $0x20] sm:$0xf0] }
 0x66b   : > { %4428 = vmatpush.bf16.msrb.mxu1 %v10873_v15  ;;  %v13636_v15 = vld [vmem:[%s14933_s15 + $0x160] sm:$0xf0]  ;;  %4414 = vmatpush.bf16.msrb.mxu0 %v11061_v2  ;;  %v13657_v2 = vld [vmem:[%s14933_s15 + $0x208] sm:$0xf0] }
 0x66c   : > { %v2849_v45 = vpop.permute.xlu1 %2848  ;;  %v10961_v49 = vor.u32 %v13636_v15, %v10960_v0  ;;  %v13616_v0 = vld [vmem:[%s14933_s15 + $0xc4] sm:$0xf] }
 0x66d   : > { %2854 = vst.msk [vmem:[#allocation2 + $0x18] sm:$0xff] %vm2852_vm9, %v2849_v45  ;;  %v10798_v45 = vld [vmem:[%s14933_s15 + $0x24] sm:$0xf0] }
 0x66e   : > { %10774 = vmatmul.msk.f32.vlgmr.msrb.gmra.mxu3 %vm2692_vm8, %v3736_v48  ;;  %v10797_v48 = vor.u32 %v13596_v56, %v10796_v22  ;;  %v10801_v50 = vor.u32 %v13595_v14, %v10798_v45  ;;  %v10904_v22 = vld [vmem:[%s14933_s15 + $0xf0] sm:$0xf]  ;;  %v13623_v56 = vld [vmem:[%s14933_s15 + $0xf8] sm:$0xf0]  ;;  %v10906_v45 = vld [vmem:[%s14933_s15 + $0xfc] sm:$0xf0] }
 0x66f   : > { %4429 = vmatpush.bf16.msrb.mxu1 %v10861_v61  ;;  %v13632_v61 = vld [vmem:[%s14933_s15 + $0x140] sm:$0xf0]  ;;  %v10905_v14 = vor.u32 %v13623_v56, %v10904_v22  ;;  %v10988_v56 = vld [vmem:[%s14933_s15 + $0x198] sm:$0xf] }
 0x670   : > { %4392 = vmatpush.bf16.msrb.mxu2 %v10797_v48  ;;  %v13622_v48 = vld [vmem:[%s14933_s15 + $0xf4] sm:$0xf] }
 0x672   : > { %10781 = vmatmul.msk.f32.gmra.mxu1 %vm2692_vm8, %v3843_v40  ;;  %v3661_v55 = vpop.f32.mrf.mxu1  ;;  %v10784_v40 = vld [vmem:[%s14933_s15] sm:$0xf] }
 0x673   : > { %4430 = vmatpush.bf16.msrb.mxu1 %v10849_v36  ;;  %v10945_v36 = vor.u32 %v13631_v51, %v10942_v33 }
 0x674   : > { %v3063_v17 = vpop.permute.xlu1 %3062 }
 0x676   : > { %10775 = vmatmul.msk.f32.gmra.mxu3 %vm2692_vm8, %v3737_v27  ;;  %v13592_v27 = vld [vmem:[%s14933_s15 + $0x4] sm:$0xf] }
 0x677   : > { %4431 = vmatpush.bf16.msrb.mxu1 %v10837_v28  ;;  %v10936_v28 = vld [vmem:[%s14933_s15 + $0x128] sm:$0xf] }
 0x678   : > { %v10937_v52 = vor.u32 %v13630_v11, %v10936_v28  ;;  %v11012_v28 = vld [vmem:[%s14933_s15 + $0x1c8] sm:$0xf]  ;;  %v13650_v11 = vld [vmem:[%s14933_s15 + $0x1d0] sm:$0xf0] }
 0x67b   : > { %4432 = vmatpush.bf16.msrb.mxu1 %v10825_v25  ;;  %v13625_v25 = vld [vmem:[%s14933_s15 + $0x10c] sm:$0xf] }
 0x67e   : > { %v3260_v34 = vpop.permute.xlu2 %3259 }
 0x67f   : > { %4433 = vmatpush.bf16.msrb.mxu1 %v10813_v39 }
 0x683   : > { %4434 = vmatpush.bf16.msrb.mxu1 %v10801_v50  ;;  %v10909_v50 = vor.u32 %v13622_v48, %v10906_v45  ;;  %v11045_v48 = vor.u32 %v13657_v2, %v11044_v16  ;;  %v10804_v2 = vld [vmem:[%s14933_s15 + $0x20] sm:$0xf] }
 0x6a1   : > { %v3664_v30 = vpop.f32.mrf.mxu1 }
 0x6a2   : > { %3671 = vrot.lane.b32.xlu2 %v3664_v30, %s14705_s3  ;;  %v10786_v30 = vld [vmem:[%s14933_s15 + $0xc] sm:$0xf0] }
 0x6ae   : > { %v3262_v19 = vpop.permute.xlu0 %3261 }
 0x6b9   : > { %v2948_v57 = vpop.f32.mrf.mxu3 }
 0x6ba   : > { %2955 = vrot.lane.b32.xlu1 %v2948_v57, %s14706_s4  ;;  %v10789_v57 = vor.u32 %v13592_v27, %v10786_v30  ;;  %v11048_v27 = vld [vmem:[%s14933_s15 + $0x210] sm:$0xf]  ;;  %v13659_v30 = vld [vmem:[%s14933_s15 + $0x218] sm:$0xf0] }
 0x6bc   : > { %4435 = vmatpush.bf16.msrb.mxu1 %v10789_v57  ;;  %v10892_v57 = vld [vmem:[%s14933_s15 + $0xd8] sm:$0xf] }
 0x6be   : > { %v16181_v32 = vpop.permute.xlu1 %3471 }
 0x6c1   : > { %v3151_v60 = vpop.f32.mrf.mxu3 }
 0x6c2   : > { %3157 = vst.msk [vmem:[#allocation2 + $0x8] sm:$0xff] %vm2656_vm7, %v3151_v60  ;;  %3669 = vrot.lane.b32.xlu1 %v3661_v55, %s14705_s3  ;;  %v10785_v55 = vor.u32 %v13593_v44, %v10784_v40  ;;  %v13638_v60 = vld [vmem:[%s14933_s15 + $0x170] sm:$0xf0]  ;;  %v10912_v40 = vld [vmem:[%s14933_s15 + $0xf8] sm:$0xf] }
 0x6c3   : > { %3265 = vst.msk [vmem:[#allocation2 + $0x8] sm:$0xff] %vm2852_vm9, %v3260_v34  ;;  %v13637_v34 = vld [vmem:[%s14933_s15 + $0x16c] sm:$0xf]  ;;  %v13624_v44 = vld [vmem:[%s14933_s15 + $0x100] sm:$0xf0] }
 0x6c4   : > { %4393 = vmatpush.bf16.msrb.mxu2 %v10785_v55  ;;  %v10913_v55 = vor.u32 %v13624_v44, %v10912_v40  ;;  %v13652_v40 = vld [vmem:[%s14933_s15 + $0x1e4] sm:$0xf]  ;;  %v11026_v44 = vld [vmem:[%s14933_s15 + $0x1ec] sm:$0xf0] }
 0x6c9   : > { %v3154_v53 = vpop.f32.mrf.mxu3 }
 0x6ca   : > { %3158 = vst.msk [vmem:[#allocation2 + $0x20] sm:$0xff] %vm2656_vm7, %v3154_v53  ;;  %v10966_v53 = vld [vmem:[%s14933_s15 + $0x174] sm:$0xf0] }
 0x6cb   : > { %3266 = vst.msk [vmem:[#allocation2 + $0x20] sm:$0xff] %vm2852_vm9, %v3262_v19 }
 0x6ce   : > { %v16118_v59 = vpop.permute.xlu0 %3473 }
 0x6d1   : > { %v3357_v1 = vpop.f32.mrf.mxu3 }
 0x6d2   : > { %3365 = vrot.lane.b32.xlu1 %v3357_v1, %s14706_s4  ;;  %v10972_v1 = vld [vmem:[%s14933_s15 + $0x170] sm:$0xf] }
 0x6d6   : > { %v2954_v29 = vpop.permute.xlu0 %2953 }
 0x6d7   : > { %2960 = vst.msk [vmem:[#allocation2] sm:$0xff] %vm2959_vm10, %v2954_v29  ;;  %v13639_v29 = vld [vmem:[%s14933_s15 + $0x178] sm:$0xf0] }
 0x6d8   : > { %3067 = vst.msk [vmem:[#allocation2] sm:$0xff] %vm3066_vm11, %v3061_v23  ;;  %v10964_v23 = vld [vmem:[%s14933_s15 + $0x168] sm:$0xf]  ;;  %v10973_v24 = vor.u32 %v13639_v29, %v10972_v1  ;;  %v10900_v1 = vld [vmem:[%s14933_s15 + $0xe0] sm:$0xf] }
 0x6d9   : > { %v3360_v37 = vpop.f32.mrf.mxu3  ;;  %v10965_v19 = vor.u32 %v13638_v60, %v10964_v23  ;;  %v13620_v23 = vld [vmem:[%s14933_s15 + $0xe0] sm:$0xf0]  ;;  %v11049_v60 = vor.u32 %v13659_v30, %v11048_v27  ;;  %v11029_v27 = vor.u32 %v13652_v40, %v11026_v44  ;;  %v13654_v30 = vld [vmem:[%s14933_s15 + $0x1f0] sm:$0xf0] }
 0x6da   : > { %3367 = vrot.lane.b32.xlu0 %v3360_v37, %s14706_s4  ;;  %v10969_v37 = vor.u32 %v13637_v34, %v10966_v53  ;;  %4484 = vmatpush.bf16.msra.mxu1 %v10973_v24  ;;  %v10893_v34 = vor.u32 %v13620_v23, %v10892_v57  ;;  %v10894_v53 = vld [vmem:[%s14933_s15 + $0xe4] sm:$0xf0]  ;;  %v11036_v24 = vld [vmem:[%s14933_s15 + $0x1f8] sm:$0xf]  ;;  %v10976_v23 = vld [vmem:[%s14933_s15 + $0x180] sm:$0xf] }
 0x6db   : > { %4400 = vmatpush.bf16.msra.mxu3 %v10965_v19  ;;  %v13619_v19 = vld [vmem:[%s14933_s15 + $0xdc] sm:$0xf]  ;;  %4415 = vmatpush.bf16.msrb.mxu0 %v11049_v60  ;;  %v11037_v7 = vor.u32 %v13656_v35, %v11036_v24  ;;  %v13641_v60 = vld [vmem:[%s14933_s15 + $0x188] sm:$0xf0]  ;;  %v11020_v24 = vld [vmem:[%s14933_s15 + $0x1d0] sm:$0xf] }
 0x6dc   : > { %4442 = vmatpush.bf16.msra.mxu2 %v10969_v37  ;;  %v10897_v29 = vor.u32 %v13619_v19, %v10894_v53  ;;  %v13621_v37 = vld [vmem:[%s14933_s15 + $0xe8] sm:$0xf0]  ;;  %v10977_v19 = vor.u32 %v13641_v60, %v10976_v23  ;;  %v11014_v53 = vld [vmem:[%s14933_s15 + $0x1d4] sm:$0xf0]  ;;  %v13651_v35 = vld [vmem:[%s14933_s15 + $0x1d8] sm:$0xf0] }
 0x6dd   : > { %v10901_v5 = vor.u32 %v13621_v37, %v10900_v1  ;;  %v10876_v1 = vld [vmem:[%s14933_s15 + $0xb0] sm:$0xf] }
 0x6de   : > { %4485 = vmatpush.bf16.msra.mxu1 %v10961_v49  ;;  %v13618_v49 = vld [vmem:[%s14933_s15 + $0xd0] sm:$0xf0] }
 0x6df   : > { %4401 = vmatpush.bf16.msra.mxu3 %v10953_v8  ;;  %v10880_v8 = vld [vmem:[%s14933_s15 + $0xc0] sm:$0xf]  ;;  %4416 = vmatpush.bf16.msrb.mxu0 %v11037_v7 }
 0x6e0   : > { %4443 = vmatpush.bf16.msra.mxu2 %v10957_v12  ;;  %v10888_v12 = vld [vmem:[%s14933_s15 + $0xc8] sm:$0xf]  ;;  %v10881_v51 = vor.u32 %v13617_v13, %v10880_v8  ;;  %v13646_v8 = vld [vmem:[%s14933_s15 + $0x1b4] sm:$0xf]  ;;  %v11002_v13 = vld [vmem:[%s14933_s15 + $0x1bc] sm:$0xf0] }
 0x6e1   : > { %v3561_v20 = vpop.f32.mrf.mxu3  ;;  %v10889_v9 = vor.u32 %v13618_v49, %v10888_v12  ;;  %v11008_v49 = vld [vmem:[%s14933_s15 + $0x1b8] sm:$0xf] }
 0x6e2   : > { %3567 = vst.msk [vmem:[#allocation2 + $0x10] sm:$0xff] %vm2656_vm7, %v3561_v20  ;;  %v10940_v20 = vld [vmem:[%s14933_s15 + $0x138] sm:$0xf]  ;;  %4486 = vmatpush.bf16.msra.mxu1 %v10949_v6 }
 0x6e3   : > { %v10941_v4 = vor.u32 %v13632_v61, %v10940_v20  ;;  %v3889_v20 = vld [vmem:[#allocation2] sm:$0xff] }
 0x6e4   : > { %4444 = vmatpush.bf16.msra.mxu2 %v10945_v36  ;;  %v13653_v36 = vld [vmem:[%s14933_s15 + $0x1e8] sm:$0xf0] }
 0x6e5   : > { %4402 = vmatpush.bf16.msra.mxu3 %v10941_v4  ;;  %v11024_v4 = vld [vmem:[%s14933_s15 + $0x1e0] sm:$0xf] }
 0x6e6   : > { %4487 = vmatpush.bf16.msra.mxu1 %v10937_v52  ;;  %v11025_v6 = vor.u32 %v13653_v36, %v11024_v4  ;;  %v11013_v52 = vor.u32 %v13650_v11, %v11012_v28  ;;  %v13606_v28 = vld [vmem:[%s14933_s15 + $0x70] sm:$0xf0]  ;;  %v10984_v11 = vld [vmem:[%s14933_s15 + $0x188] sm:$0xf] }
 0x6e7   : > { %v3873_v38 = vpop.f32.mrf.mxu1 }
 0x6e8   : > { %3881 = vrot.lane.b32.xlu2 %v3873_v38, %s14704_s26  ;;  %v13628_v38 = vld [vmem:[%s14933_s15 + $0x124] sm:$0xf]  ;;  %4417 = vmatpush.bf16.msrb.mxu0 %v11025_v6  ;;  %v10996_v6 = vld [vmem:[%s14933_s15 + $0x1a0] sm:$0xf] }
 0x6e9   : > { %v3564_v18 = vpop.f32.mrf.mxu3  ;;  %4403 = vmatpush.bf16.msra.mxu3 %v10929_v26  ;;  %v11065_v26 = vor.u32 %v13661_v41, %v11062_v63  ;;  %v13645_v41 = vld [vmem:[%s14933_s15 + $0x1a8] sm:$0xf0] }
 0x6ea   : > { %3568 = vst.msk [vmem:[#allocation2 + $0x28] sm:$0xff] %vm2656_vm7, %v3564_v18  ;;  %v10930_v18 = vld [vmem:[%s14933_s15 + $0x12c] sm:$0xf0]  ;;  %v10997_v63 = vor.u32 %v13645_v41, %v10996_v6 }
 0x6eb   : > { %v10933_v3 = vor.u32 %v13628_v38, %v10930_v18  ;;  %v11068_v38 = vld [vmem:[%s14933_s15 + $0x230] sm:$0xf]  ;;  %v13663_v18 = vld [vmem:[%s14933_s15 + $0x238] sm:$0xf0] }
 0x6ec   : > { %4418 = vmatpush.bf16.msrb.mxu0 %v11013_v52 }
 0x6ed   : > { %4445 = vmatpush.bf16.msra.mxu2 %v10933_v3  ;;  %v11069_v3 = vor.u32 %v13663_v18, %v11068_v38  ;;  %v13640_v38 = vld [vmem:[%s14933_s15 + $0x184] sm:$0xf]  ;;  %v10840_v18 = vld [vmem:[%s14933_s15 + $0x68] sm:$0xf] }
 0x6ef   : > { %v3876_v62 = vpop.f32.mrf.mxu1 }
 0x6f1   : > { %v3767_v47 = vpop.f32.mrf.mxu3 }
 0x6f2   : > { %3775 = vrot.lane.b32.xlu0 %v3767_v47, %s14706_s4  ;;  %v10917_v47 = vor.u32 %v13626_v10, %v10916_v21  ;;  %v13658_v21 = vld [vmem:[%s14933_s15 + $0x214] sm:$0xf]  ;;  %v11050_v10 = vld [vmem:[%s14933_s15 + $0x21c] sm:$0xf0] }
 0x6f4   : > { %4404 = vmatpush.bf16.msra.mxu3 %v10917_v47  ;;  %v11053_v47 = vor.u32 %v13658_v21, %v11050_v10 }
 0x6f8   : > { %4405 = vmatpush.bf16.msra.mxu3 %v10905_v14  ;;  %v13644_v14 = vld [vmem:[%s14933_s15 + $0x1a0] sm:$0xf0] }
 0x6f9   : > { %v3770_v31 = vpop.f32.mrf.mxu3  ;;  %v10989_v45 = vor.u32 %v13644_v14, %v10988_v56  ;;  %v10792_v56 = vld [vmem:[%s14933_s15 + $0x8] sm:$0xf]  ;;  %v13594_v14 = vld [vmem:[%s14933_s15 + $0x10] sm:$0xf0] }
 0x6fa   : > { %3777 = vrot.lane.b32.xlu1 %v3770_v31, %s14706_s4  ;;  %3883 = vrot.lane.b32.xlu0 %v3876_v62, %s14704_s26  ;;  %v10918_v62 = vld [vmem:[%s14933_s15 + $0x114] sm:$0xf0]  ;;  %v10924_v31 = vld [vmem:[%s14933_s15 + $0x110] sm:$0xf] }
 0x6fb   : > { %v10921_v46 = vor.u32 %v13625_v25, %v10918_v62  ;;  %v11056_v25 = vld [vmem:[%s14933_s15 + $0x218] sm:$0xf]  ;;  %v13660_v62 = vld [vmem:[%s14933_s15 + $0x220] sm:$0xf0] }
 0x6fc   : > { %v3672_v43 = vpop.permute.xlu2 %3671  ;;  %4406 = vmatpush.bf16.msra.mxu3 %v10893_v34  ;;  %v13649_v34 = vld [vmem:[%s14933_s15 + $0x1cc] sm:$0xf] }
 0x6fd   : > { %3676 = vst.msk [vmem:[#allocation2 + $0x28] sm:$0xff] %vm2852_vm9, %v3672_v43  ;;  %v13627_v43 = vld [vmem:[%s14933_s15 + $0x118] sm:$0xf0]  ;;  %4446 = vmatpush.bf16.msra.mxu2 %v10921_v46  ;;  %v11057_v46 = vor.u32 %v13660_v62, %v11056_v25 }
 0x6fe   : > { %v10925_v54 = vor.u32 %v13627_v43, %v10924_v31  ;;  %v11000_v31 = vld [vmem:[%s14933_s15 + $0x1b0] sm:$0xf]  ;;  %v13647_v43 = vld [vmem:[%s14933_s15 + $0x1b8] sm:$0xf0] }
 0x700   : > { %4488 = vmatpush.bf16.msra.mxu1 %v10925_v54  ;;  %4407 = vmatpush.bf16.msra.mxu3 %v10881_v51  ;;  %v13655_v54 = vld [vmem:[%s14933_s15 + $0x1fc] sm:$0xf] }
 0x701   : > { %4447 = vmatpush.bf16.msra.mxu2 %v10909_v50  ;;  %v11041_v22 = vor.u32 %v13655_v54, %v11038_v42  ;;  %v10816_v54 = vld [vmem:[%s14933_s15 + $0x38] sm:$0xf]  ;;  %v13600_v42 = vld [vmem:[%s14933_s15 + $0x40] sm:$0xf0] }
 0x702   : > { %v10817_v16 = vor.u32 %v13600_v42, %v10816_v54  ;;  %v14529_v42 = vld [vmem:[%s18159_s1 + $0x18] sm:$0xff] }
 0x704   : > { %4489 = vmatpush.bf16.msra.mxu1 %v10913_v55  ;;  %4456 = vmatpush.bf16.msrb.mxu3 %v11065_v26  ;;  %v11032_v55 = vld [vmem:[%s14933_s15 + $0x1e8] sm:$0xf]  ;;  %v10978_v26 = vld [vmem:[%s14933_s15 + $0x18c] sm:$0xf0] }
 0x705   : > { %4448 = vmatpush.bf16.msra.mxu2 %v10897_v29  ;;  %v11033_v57 = vor.u32 %v13654_v30, %v11032_v55  ;;  %v13615_v29 = vld [vmem:[%s14933_s15 + $0xb8] sm:$0xf0]  ;;  %v10981_v10 = vor.u32 %v13640_v38, %v10978_v26 }
 0x706   : > { %v10877_v37 = vor.u32 %v13615_v29, %v10876_v1  ;;  %v3994_v29 = vld [vmem:[%s18161_s29] sm:$0x7]  ;;  %s18162_s29 = scalar_lea.vmem %s18108_s8, %s14949_s23 }
 0x708   : > { %4490 = vmatpush.bf16.msra.mxu1 %v10901_v5  ;;  %4457 = vmatpush.bf16.msrb.mxu3 %v11053_v47  ;;  %v11021_v5 = vor.u32 %v13651_v35, %v11020_v24  ;;  %v10841_v47 = vor.u32 %v13606_v28, %v10840_v18  ;;  %v3996_v35 = vperm.slane %v3994_v29, 0 }
 0x70c   : > { %4491 = vmatpush.bf16.msra.mxu1 %v10889_v9  ;;  %4458 = vmatpush.bf16.msrb.mxu3 %v11041_v22  ;;  %v10852_v9 = vld [vmem:[%s14933_s15 + $0x80] sm:$0xf] }
 0x710   : > { %4459 = vmatpush.bf16.msrb.mxu3 %v11029_v27 }
 0x72c   : > { %v2956_v39 = vpop.permute.xlu1 %2955 }
 0x72d   : > { %2961 = vst.msk [vmem:[#allocation2 + $0x18] sm:$0xff] %vm2959_vm10, %v2956_v39  ;;  %v11001_v39 = vor.u32 %v13647_v43, %v11000_v31  ;;  %v10828_v31 = vld [vmem:[%s14933_s15 + $0x50] sm:$0xf]  ;;  %v13603_v43 = vld [vmem:[%s14933_s15 + $0x58] sm:$0xf0] }
 0x72e   : > { %3068 = vst.msk [vmem:[#allocation2 + $0x18] sm:$0xff] %vm3066_vm11, %v3063_v17  ;;  %v10882_v17 = vld [vmem:[%s14933_s15 + $0xcc] sm:$0xf0] }
 0x72f   : > { %v10885_v33 = vor.u32 %v13616_v0, %v10882_v17  ;;  %4419 = vmatpush.bf16.msrb.mxu0 %v11001_v39  ;;  %v11005_v0 = vor.u32 %v13646_v8, %v11002_v13  ;;  %v13612_v17 = vld [vmem:[%s14933_s15 + $0xa0] sm:$0xf0]  ;;  %v13597_v39 = vld [vmem:[%s14933_s15 + $0x28] sm:$0xf0] }
 0x730   : > { %v10805_v22 = vor.u32 %v13597_v39, %v10804_v2  ;;  %v14530_v39 = vld [vmem:[%s18159_s1 + $0x28] sm:$0xff] }
 0x731   : > { %4449 = vmatpush.bf16.msra.mxu2 %v10885_v33  ;;  %v10990_v33 = vld [vmem:[%s14933_s15 + $0x1a4] sm:$0xf0] }
 0x733   : > { %4420 = vmatpush.bf16.msrb.mxu0 %v10989_v45 }
 0x734   : > { %v3670_v15 = vpop.permute.xlu1 %3669 }
 0x735   : > { %3675 = vst.msk [vmem:[#allocation2 + $0x10] sm:$0xff] %vm2852_vm9, %v3670_v15  ;;  %v3892_v61 = vld [vmem:[#allocation2 + $0x18] sm:$0xff]  ;;  %v10864_v15 = vld [vmem:[%s14933_s15 + $0x98] sm:$0xf] }
 0x736   : > { %v16222_v58 = vpack.c.bf16 %v3892_v61, %v3889_v20  ;;  %v10865_v12 = vor.u32 %v13612_v17, %v10864_v15  ;;  %v13648_v20 = vld [vmem:[%s14933_s15 + $0x1c0] sm:$0xf0]  ;;  %v13643_v61 = vld [vmem:[%s14933_s15 + $0x19c] sm:$0xf] }
 0x737   : > { %4421 = vmatpush.bf16.msrb.mxu0 %v10977_v19  ;;  %v11009_v51 = vor.u32 %v13648_v20, %v11008_v49  ;;  %v10993_v4 = vor.u32 %v13643_v61, %v10990_v33 }
 0x738   : > { %4394 = vmatmul.bf16.vlgmr.msrb.gmra.mxu2 %v16222_v58  ;;  %4436 = vmatmul.bf16.vlgmr.msrb.gmra.mxu1 %v16222_v58 }
 0x739   : > { %4498 = vmatpush.bf16.msrb.mxu2 %v11069_v3  ;;  %v13642_v3 = vld [vmem:[%s14933_s15 + $0x190] sm:$0xf0] }
 0x73a   : > { %v10985_v62 = vor.u32 %v13642_v3, %v10984_v11  ;;  %v14527_v11 = vld [vmem:[%s18159_s1 + $0x10] sm:$0xff] }
 0x73b   : > { %4470 = vmatpush.bf16.msra.mxu0 %v10877_v37 }
 0x73d   : > { %4499 = vmatpush.bf16.msrb.mxu2 %v11057_v46  ;;  %v10829_v46 = vor.u32 %v13603_v43, %v10828_v31  ;;  %v14528_v31 = vld [vmem:[%s18159_s1 + $0x20] sm:$0xff] }
 0x73f   : > { %4471 = vmatpush.bf16.msra.mxu0 %v10865_v12 }
 0x741   : > { %4500 = vmatpush.bf16.msrb.mxu2 %v11045_v48 }
 0x742   : > { %v3882_v45 = vpop.permute.xlu2 %3881 }
 0x744   : > { %v3366_v50 = vpop.permute.xlu1 %3365 }
 0x745   : > { %3371 = vst.msk [vmem:[#allocation2 + $0x8] sm:$0xff] %vm2959_vm10, %v3366_v50  ;;  %4501 = vmatpush.bf16.msrb.mxu2 %v11033_v57  ;;  %v10793_v50 = vor.u32 %v13594_v14, %v10792_v56 }
 0x746   : > { %3477 = vst.msk [vmem:[#allocation2 + $0x8] sm:$0xff] %vm3066_vm11, %v16181_v32  ;;  %v11017_v32 = vor.u32 %v13649_v34, %v11014_v53 }
 0x748   : > { %4460 = vmatpush.bf16.msrb.mxu3 %v11017_v32  ;;  %v3997_v32 = vperm.slane %v3994_v29, 1 }
 0x749   : > { %4502 = vmatpush.bf16.msrb.mxu2 %v11021_v5 }
 0x74c   : > { %v3368_v7 = vpop.permute.xlu0 %3367  ;;  %4461 = vmatpush.bf16.msrb.mxu3 %v11005_v0  ;;  %v3998_v0 = vperm.slane %v3994_v29, 2  ;;  %v11360_v29 = vld [vmem:[%s14939_s20 + $0x240] sm:$0xf] }
 0x74d   : > { %3372 = vst.msk [vmem:[#allocation2 + $0x20] sm:$0xff] %vm2959_vm10, %v3368_v7  ;;  %4503 = vmatpush.bf16.msrb.mxu2 %v11009_v51  ;;  %v3890_v52 = vld [vmem:[#allocation2 + $0x8] sm:$0xff] }
 0x74e   : > { %3478 = vst.msk [vmem:[#allocation2 + $0x20] sm:$0xff] %vm3066_vm11, %v16118_v59  ;;  %v13609_v59 = vld [vmem:[%s14933_s15 + $0x88] sm:$0xf0] }
 0x74f   : > { %v10853_v36 = vor.u32 %v13609_v59, %v10852_v9  ;;  %v14525_v9 = vld [vmem:[%s18159_s1 + $0x8] sm:$0xff] }
 0x750   : > { %4462 = vmatpush.bf16.msrb.mxu3 %v10993_v4 }
 0x751   : > { %4472 = vmatpush.bf16.msra.mxu0 %v10853_v36  ;;  %4504 = vmatpush.bf16.msrb.mxu2 %v10997_v63  ;;  %v14526_v63 = vld [vmem:[%s18159_s1] sm:$0xff] }
 0x754   : > { %4463 = vmatpush.bf16.msrb.mxu3 %v10981_v10 }
 0x755   : > { %v3893_v21 = vld [vmem:[#allocation2 + $0x20] sm:$0xff]  ;;  %4473 = vmatpush.bf16.msra.mxu0 %v10841_v47  ;;  %4505 = vmatpush.bf16.msrb.mxu2 %v10985_v62 }
 0x756   : > { %v3896_v25 = vpack.c.bf16 %v3893_v21, %v3890_v52 }
 0x758   : > { %4408 = vmatmul.bf16.vlgmr.msra.gmra.mxu3 %v3896_v25  ;;  %4450 = vmatmul.bf16.vlgmr.msra.gmra.mxu2 %v3896_v25 }
 0x759   : > { %4492 = vmatmul.bf16.vlgmr.msra.gmra.mxu1 %v3896_v25  ;;  %4474 = vmatpush.bf16.msra.mxu0 %v10829_v46 }
 0x75d   : > { %4475 = vmatpush.bf16.msra.mxu0 %v10817_v16 }
 0x761   : > { %4476 = vmatpush.bf16.msra.mxu0 %v10805_v22 }
 0x764   : > { %v3776_v48 = vpop.permute.xlu0 %3775 }
 0x765   : > { %3781 = vst.msk [vmem:[#allocation2 + $0x10] sm:$0xff] %vm2959_vm10, %v3776_v48  ;;  %4477 = vmatpush.bf16.msra.mxu0 %v10793_v50  ;;  %v14707_v48 = vmov 384.0  }
 0x766   : > { %3887 = vst.msk [vmem:[#allocation2 + $0x10] sm:$0xff] %vm3066_vm11, %v3882_v45  ;;  %14467 = vrcp.f32 %v14707_v48  ;;  %v11984_v48 = vld [vmem:[%s14939_s20 + $0x720] sm:$0xf] }
 0x76c   : > { %v3778_v40 = vpop.permute.xlu1 %3777  ;;  %v3884_v44 = vpop.permute.xlu0 %3883 }
 0x76d   : > { %3782 = vst.msk [vmem:[#allocation2 + $0x28] sm:$0xff] %vm2959_vm10, %v3778_v40  ;;  %v3891_v27 = vld [vmem:[#allocation2 + $0x10] sm:$0xff]  ;;  %v14468_v45 = vpop.eup %14467 }
 0x76e   : > { %3888 = vst.msk [vmem:[#allocation2 + $0x28] sm:$0xff] %vm3066_vm11, %v3884_v44  ;;  %v4529_v50 = vmul.f32 384.0, %v14468_v45  ;;  %v11408_v44 = vld [vmem:[%s14939_s20 + $0x2a0] sm:$0xf]  ;;  %vm4533_vm12 = vweird.f32 %v14468_v45 }
 0x770   : > { %v4530_v40 = vsub.f32 1.0, %v4529_v50  ;;  %v13898_v50 = vld [vmem:[%s14939_s20 + $0x74c] sm:$0xf0] }
 0x775   : > { %v3894_v55 = vld [vmem:[#allocation2 + $0x28] sm:$0xff] }
 0x776   : > { %v3897_v30 = vpack.c.bf16 %v3894_v55, %v3891_v27  ;;  %v13754_v27 = vld [vmem:[%s14939_s20 + $0x2cc] sm:$0xf0]  ;;  %v11792_v55 = vld [vmem:[%s14939_s20 + $0x5a0] sm:$0xf] }
 0x778   : > { %4422 = vmatmul.bf16.vlgmr.msrb.gmra.mxu0 %v3897_v30  ;;  %4464 = vmatmul.bf16.vlgmr.msrb.gmra.mxu3 %v3897_v30 }
 0x779   : > { %4506 = vmatmul.bf16.vlgmr.msrb.gmra.mxu2 %v3897_v30  ;;  %v11409_v30 = vor.u32 %v13754_v27, %v11408_v44  ;;  %v13700_v27 = vld [vmem:[%s14939_s20 + $0x124] sm:$0xf] }
 0x77b   : > { %6372 = vmatpush.bf16.msra.mxu3 %v11409_v30 }
 0x788   : > { %4478 = vmatmul.bf16.vlgmr.msra.gmra.mxu0 %v16222_v58 }
 0x7b5   : > { %v4437_v34 = vpop.f32.mrf.mxu1 }
 0x7b6   : > { %v4438_v8 = vadd.f32 %v4437_v34, %v3997_v32 }
 0x7bb   : > { %v4395_v57 = vpop.f32.mrf.mxu2 }
 0x7bc   : > { %v4396_v58 = vadd.f32 %v4395_v57, %v3996_v35  ;;  %v13850_v57 = vld [vmem:[%s14939_s20 + $0x5cc] sm:$0xf0] }
 0x7bd   : > { %v4439_v37 = vpop.f32.mrf.mxu1  ;;  %v11793_v34 = vor.u32 %v13850_v57, %v11792_v55  ;;  %v11218_v55 = vld [vmem:[%s14939_s20 + $0x150] sm:$0xf0] }
 0x7be   : > { %v4440_v33 = vadd.f32 %v4439_v37, %v3997_v32  ;;  %v4531_v32 = vmul.f32 %v14468_v45, %v4530_v40 }
 0x7bf   : > { %6386 = vmatpush.bf16.msrb.mxu0 %v11793_v34 }
 0x7c3   : > { %v4397_v23 = vpop.f32.mrf.mxu2 }
 0x7c4   : > { %v4398_v6 = vadd.f32 %v4397_v23, %v3996_v35  ;;  %v12176_v23 = vld [vmem:[%s14939_s20 + $0x8a0] sm:$0xf] }
 0x7c5   : > { %v11744_v35 = vld [vmem:[%s14939_s20 + $0x540] sm:$0xf] }
 0x7d6   : > { %v4493_v12 = vpop.f32.mrf.mxu1 }
 0x7db   : > { %v4409_v60 = vpop.f32.mrf.mxu3  ;;  %v4451_v19 = vpop.f32.mrf.mxu2 }
 0x7dc   : > { %v4452_v13 = vadd.f32 %v4451_v19, %v4438_v8  ;;  %v4410_v15 = vadd.f32 %v4409_v60, %v4396_v58  ;;  %v13946_v60 = vld [vmem:[%s14939_s20 + $0x8cc] sm:$0xf0]  ;;  %v12128_v58 = vld [vmem:[%s14939_s20 + $0x840] sm:$0xf] }
 0x7dd   : > { %v12177_v19 = vor.u32 %v13946_v60, %v12176_v23  ;;  %v11985_v23 = vor.u32 %v13898_v50, %v11984_v48  ;;  %v11074_v48 = vld [vmem:[%s14939_s20 + $0x30] sm:$0xf0]  ;;  %v13844_v50 = vld [vmem:[%s14939_s20 + $0x5a4] sm:$0xf] }
 0x7de   : > { %v4495_v62 = vpop.f32.mrf.mxu1 }
 0x7df   : > { %6400 = vmatpush.bf16.msrb.mxu1 %v12177_v19 }
 0x7e3   : > { %v4411_v1 = vpop.f32.mrf.mxu3  ;;  %v4453_v5 = vpop.f32.mrf.mxu2 }
 0x7e4   : > { %v4454_v41 = vadd.f32 %v4453_v5, %v4440_v33  ;;  %v4412_v18 = vadd.f32 %v4411_v1, %v4398_v6  ;;  %v11410_v1 = vld [vmem:[%s14939_s20 + $0x2d0] sm:$0xf0]  ;;  %v13838_v5 = vld [vmem:[%s14939_s20 + $0x56c] sm:$0xf0]  ;;  %v12080_v33 = vld [vmem:[%s14939_s20 + $0x7e0] sm:$0xf] }
 0x7e5   : > { %v11745_v8 = vor.u32 %v13838_v5, %v11744_v35  ;;  %v13724_v6 = vld [vmem:[%s14939_s20 + $0x1e4] sm:$0xf] }
 0x7e7   : > { %6387 = vmatpush.bf16.msrb.mxu0 %v11745_v8 }
 0x7f5   : > { %v4423_v53 = vpop.f32.mrf.mxu0 }
 0x7f6   : > { %v4424_v20 = vadd.f32 %v4423_v53, %v4410_v15  ;;  %v13748_v53 = vld [vmem:[%s14939_s20 + $0x2a4] sm:$0xf] }
 0x7f7   : > { %v11413_v37 = vor.u32 %v13748_v53, %v11410_v1  ;;  %v11221_v53 = vor.u32 %v13700_v27, %v11218_v55  ;;  %v12178_v27 = vld [vmem:[%s14939_s20 + $0x8d0] sm:$0xf0] }
 0x7f8   : > { %v16308_v38 = vadd.f32 %v14526_v63, %v4424_v20 }
 0x7f9   : > { %6414 = vmatpush.bf16.msra.mxu2 %v11413_v37 }
 0x7fb   : > { %v4465_v7 = vpop.f32.mrf.mxu3 }
 0x7fc   : > { %v4466_v17 = vadd.f32 %v4465_v7, %v4452_v13  ;;  %v4507_v51 = vpop.f32.mrf.mxu2  ;;  %v13934_v13 = vld [vmem:[%s14939_s20 + $0x86c] sm:$0xf0] }
 0x7fd   : > { %v4425_v24 = vpop.f32.mrf.mxu0  ;;  %v12129_v15 = vor.u32 %v13934_v13, %v12128_v58 }
 0x7fe   : > { %v16303_v59 = vadd.f32 %v14525_v9, %v4466_v17  ;;  %v4426_v10 = vadd.f32 %v4425_v24, %v4412_v18  ;;  %v13742_v24 = vld [vmem:[%s14939_s20 + $0x26c] sm:$0xf0]  ;;  %v11362_v17 = vld [vmem:[%s14939_s20 + $0x270] sm:$0xf0]  ;;  %v4532_v9 = vadd.f32 %v14468_v45, %v4531_v32  ;;  %v11264_v18 = vld [vmem:[%s14939_s20 + $0x180] sm:$0xf] }
 0x7ff   : > { %v11361_v7 = vor.u32 %v13742_v24, %v11360_v29  ;;  %6401 = vmatpush.bf16.msrb.mxu1 %v12129_v15 }
 0x800   : > { %v4520_v52 = vadd.f32 %v16303_v59, %v16308_v38  ;;  %v16326_v16 = vadd.f32 %v14529_v42, %v4426_v10  ;;  %v12032_v10 = vld [vmem:[%s14939_s20 + $0x780] sm:$0xf]  ;;  %v13706_v42 = vld [vmem:[%s14939_s20 + $0x14c] sm:$0xf0] }
 0x801   : > { %6373 = vmatpush.bf16.msra.mxu3 %v11361_v7 }
 0x803   : > { %v4467_v36 = vpop.f32.mrf.mxu3 }
 0x804   : > { %v4468_v28 = vadd.f32 %v4467_v36, %v4454_v41  ;;  %v4509_v54 = vpop.f32.mrf.mxu2  ;;  %v13922_v36 = vld [vmem:[%s14939_s20 + $0x80c] sm:$0xf0]  ;;  %v11314_v41 = vld [vmem:[%s14939_s20 + $0x210] sm:$0xf0] }
 0x805   : > { %v4479_v49 = vpop.f32.mrf.mxu0 }
 0x806   : > { %v4480_v61 = vadd.f32 %v4479_v49, %v3998_v0  ;;  %v16321_v43 = vadd.f32 %v14528_v31, %v4468_v28  ;;  %v13730_v49 = vld [vmem:[%s14939_s20 + $0x20c] sm:$0xf0]  ;;  %v16368_v31 = vsel %vm4533_vm12, %v14468_v45, %v4532_v9 }
 0x807   : > { %v13718_v28 = vld [vmem:[%s14939_s20 + $0x1ac] sm:$0xf0] }
 0x808   : > { %v4494_v4 = vadd.f32 %v4493_v12, %v4480_v61  ;;  %v4524_v56 = vadd.f32 %v16321_v43, %v16326_v16  ;;  %v11312_v12 = vld [vmem:[%s14939_s20 + $0x1e0] sm:$0xf] }
 0x809   : > { %v11696_v61 = vld [vmem:[%s14939_s20 + $0x4e0] sm:$0xf] }
 0x80a   : > { %v4508_v26 = vadd.f32 %v4507_v51, %v4494_v4  ;;  %v13826_v51 = vld [vmem:[%s14939_s20 + $0x50c] sm:$0xf0]  ;;  %v11313_v4 = vor.u32 %v13730_v49, %v11312_v12  ;;  %v11936_v12 = vld [vmem:[%s14939_s20 + $0x6c0] sm:$0xf] }
 0x80b   : > { %v11697_v63 = vor.u32 %v13826_v51, %v11696_v61  ;;  %v13886_v49 = vld [vmem:[%s14939_s20 + $0x6ec] sm:$0xf0]  ;;  %v13688_v51 = vld [vmem:[%s14939_s20 + $0xc4] sm:$0xf] }
 0x80c   : > { %v16313_v3 = vadd.f32 %v14527_v11, %v4508_v26  ;;  %v12081_v26 = vor.u32 %v13922_v36, %v12080_v33  ;;  %v11648_v11 = vld [vmem:[%s14939_s20 + $0x480] sm:$0xf]  ;;  %6374 = vmatpush.bf16.msra.mxu3 %v11313_v4  ;;  %v11937_v61 = vor.u32 %v13886_v49, %v11936_v12  ;;  %v11170_v33 = vld [vmem:[%s14939_s20 + $0xf0] sm:$0xf0]  ;;  %v13682_v36 = vld [vmem:[%s14939_s20 + $0x8c] sm:$0xf0] }
 0x80d   : > { %v4481_v21 = vpop.f32.mrf.mxu0  ;;  %6388 = vmatpush.bf16.msrb.mxu0 %v11697_v63  ;;  %v11173_v9 = vor.u32 %v13688_v51, %v11170_v33  ;;  %v11120_v4 = vld [vmem:[%s14939_s20 + $0x60] sm:$0xf]  ;;  %v13778_v63 = vld [vmem:[%s14939_s20 + $0x38c] sm:$0xf0]  ;;  %v13916_v12 = vld [vmem:[%s14939_s20 + $0x7e4] sm:$0xf] }
 0x80e   : > { %v4482_v25 = vadd.f32 %v4481_v21, %v3998_v0  ;;  %v4521_v47 = vadd.f32 %v4520_v52, %v16313_v3  ;;  %v13736_v0 = vld [vmem:[%s14939_s20 + $0x244] sm:$0xf]  ;;  %v11317_v52 = vor.u32 %v13724_v6, %v11314_v41  ;;  %v13814_v21 = vld [vmem:[%s14939_s20 + $0x4ac] sm:$0xf0]  ;;  %6402 = vmatpush.bf16.msrb.mxu1 %v12081_v26  ;;  %v11504_v6 = vld [vmem:[%s14939_s20 + $0x360] sm:$0xf]  ;;  %v11121_v41 = vor.u32 %v13682_v36, %v11120_v4 }
 0x80f   : > { %v11365_v20 = vor.u32 %v13736_v0, %v11362_v17  ;;  %v11552_v0 = vld [vmem:[%s14939_s20 + $0x3c0] sm:$0xf]  ;;  %v13790_v17 = vld [vmem:[%s14939_s20 + $0x3ec] sm:$0xf0]  ;;  %v13731_v51 = vld [vmem:[%s14939_s20 + $0x214] sm:$0xf0] }
 0x810   : > { %v4496_v46 = vadd.f32 %v4495_v62, %v4482_v25  ;;  %4522 = vadd.xlane.f32.xlu1 %v4521_v47  ;;  %v13910_v25 = vld [vmem:[%s14939_s20 + $0x7ac] sm:$0xf0]  ;;  %v13712_v47 = vld [vmem:[%s14939_s20 + $0x184] sm:$0xf]  ;;  %v11266_v62 = vld [vmem:[%s14939_s20 + $0x1b0] sm:$0xf0] }
 0x811   : > { %6415 = vmatpush.bf16.msra.mxu2 %v11365_v20  ;;  %v11269_v44 = vor.u32 %v13712_v47, %v11266_v62  ;;  %v11553_v20 = vor.u32 %v13790_v17, %v11552_v0  ;;  %v11888_v26 = vld [vmem:[%s14939_s20 + $0x660] sm:$0xf]  ;;  %v13670_v47 = vld [vmem:[%s14939_s20 + $0x2c] sm:$0xf0]  ;;  %v11698_v17 = vld [vmem:[%s14939_s20 + $0x510] sm:$0xf0] }
 0x812   : > { %v4510_v2 = vadd.f32 %v4509_v54, %v4496_v46  ;;  %v11265_v46 = vor.u32 %v13718_v28, %v11264_v18  ;;  %v11216_v54 = vld [vmem:[%s14939_s20 + $0x120] sm:$0xf]  ;;  %v13874_v18 = vld [vmem:[%s14939_s20 + $0x68c] sm:$0xf0]  ;;  %v11505_v28 = vor.u32 %v13778_v63, %v11504_v6  ;;  %v11704_v4 = vld [vmem:[%s14939_s20 + $0x4e8] sm:$0xf] }
 0x813   : > { %v11217_v30 = vor.u32 %v13706_v42, %v11216_v54  ;;  %v11456_v62 = vld [vmem:[%s14939_s20 + $0x300] sm:$0xf]  ;;  %v13766_v54 = vld [vmem:[%s14939_s20 + $0x32c] sm:$0xf0]  ;;  %v13827_v36 = vld [vmem:[%s14939_s20 + $0x514] sm:$0xf0] }
 0x814   : > { %v16331_v22 = vadd.f32 %v14530_v39, %v4510_v2  ;;  %v11600_v2 = vld [vmem:[%s14939_s20 + $0x420] sm:$0xf]  ;;  %v11649_v39 = vor.u32 %v13814_v21, %v11648_v11  ;;  %6375 = vmatpush.bf16.msra.mxu3 %v11265_v46  ;;  %v11889_v11 = vor.u32 %v13874_v18, %v11888_v26  ;;  %v11122_v21 = vld [vmem:[%s14939_s20 + $0x90] sm:$0xf0]  ;;  %v11705_v6 = vor.u32 %v13827_v36, %v11704_v4  ;;  %v13904_v26 = vld [vmem:[%s14939_s20 + $0x784] sm:$0xf] }
 0x815   : > { %6416 = vmatpush.bf16.msra.mxu2 %v11317_v52  ;;  %v13676_v52 = vld [vmem:[%s14939_s20 + $0x64] sm:$0xf]  ;;  %v11840_v42 = vld [vmem:[%s14939_s20 + $0x600] sm:$0xf]  ;;  %v11650_v63 = vld [vmem:[%s14939_s20 + $0x4b0] sm:$0xf0] }
 0x816   : > { %v4525_v14 = vadd.f32 %v4524_v56, %v16331_v22  ;;  %v12033_v56 = vor.u32 %v13910_v25, %v12032_v10  ;;  %6389 = vmatpush.bf16.msrb.mxu0 %v11649_v39  ;;  %v11125_v10 = vor.u32 %v13676_v52, %v11122_v21  ;;  %v11072_v25 = vld [vmem:[%s14939_s20] sm:$0xf]  ;;  %v11457_v39 = vor.u32 %v13766_v54, %v11456_v62  ;;  %v13719_v52 = vld [vmem:[%s14939_s20 + $0x1b4] sm:$0xf0]  ;;  %v11602_v54 = vld [vmem:[%s14939_s20 + $0x450] sm:$0xf0] }
 0x817   : > { %v11073_v46 = vor.u32 %v13670_v47, %v11072_v25  ;;  %v11656_v25 = vld [vmem:[%s14939_s20 + $0x488] sm:$0xf]  ;;  %v13815_v47 = vld [vmem:[%s14939_s20 + $0x4b4] sm:$0xf0]  ;;  %v11842_v4 = vld [vmem:[%s14939_s20 + $0x630] sm:$0xf0] }
 0x818   : > { %4526 = vadd.xlane.f32.xlu2 %v4525_v14  ;;  %v13802_v14 = vld [vmem:[%s14939_s20 + $0x44c] sm:$0xf0]  ;;  %6403 = vmatpush.bf16.msrb.mxu1 %v12033_v56  ;;  %v11657_v62 = vor.u32 %v13815_v47, %v11656_v25  ;;  %v11080_v36 = vld [vmem:[%s14939_s20 + $0x8] sm:$0xf] }
 0x819   : > { %v11601_v57 = vor.u32 %v13802_v14, %v11600_v2  ;;  %6417 = vmatpush.bf16.msra.mxu2 %v11269_v44  ;;  %6376 = vmatpush.bf16.msra.mxu3 %v11217_v30  ;;  %v13862_v2 = vld [vmem:[%s14939_s20 + $0x62c] sm:$0xf0]  ;;  %v13664_v14 = vld [vmem:[%s14939_s20 + $0x4] sm:$0xf]  ;;  %v11794_v44 = vld [vmem:[%s14939_s20 + $0x5d0] sm:$0xf0] }
 0x81a   : > { %v11841_v56 = vor.u32 %v13862_v2, %v11840_v42  ;;  %v11797_v55 = vor.u32 %v13844_v50, %v11794_v44  ;;  %v13892_v42 = vld [vmem:[%s14939_s20 + $0x724] sm:$0xf]  ;;  %v13803_v44 = vld [vmem:[%s14939_s20 + $0x454] sm:$0xf0] }
 0x81b   : > { %6390 = vmatpush.bf16.msrb.mxu0 %v11601_v57  ;;  %v11416_v57 = vld [vmem:[%s14939_s20 + $0x2a8] sm:$0xf] }
 0x81c   : > { %6404 = vmatpush.bf16.msrb.mxu1 %v11985_v23  ;;  %v13755_v23 = vld [vmem:[%s14939_s20 + $0x2d4] sm:$0xf0] }
 0x81d   : > { %6418 = vmatpush.bf16.msra.mxu2 %v11221_v53  ;;  %v11800_v53 = vld [vmem:[%s14939_s20 + $0x5a8] sm:$0xf] }
 0x81f   : > { %6391 = vmatpush.bf16.msrb.mxu0 %v11553_v20  ;;  %v12082_v20 = vld [vmem:[%s14939_s20 + $0x810] sm:$0xf0] }
 0x820   : > { %6405 = vmatpush.bf16.msrb.mxu1 %v11937_v61  ;;  %v11320_v61 = vld [vmem:[%s14939_s20 + $0x1e8] sm:$0xf]  ;;  %v12085_v33 = vor.u32 %v13916_v12, %v12082_v20 }
 0x821   : > { %6419 = vmatpush.bf16.msra.mxu2 %v11173_v9  ;;  %v11321_v9 = vor.u32 %v13731_v51, %v11320_v61  ;;  %v11512_v12 = vld [vmem:[%s14939_s20 + $0x368] sm:$0xf]  ;;  %v13760_v51 = vld [vmem:[%s14939_s20 + $0x304] sm:$0xf] }
 0x823   : > { %6392 = vmatpush.bf16.msrb.mxu0 %v11505_v28  ;;  %v12034_v28 = vld [vmem:[%s14939_s20 + $0x7b0] sm:$0xf0] }
 0x824   : > { %6406 = vmatpush.bf16.msrb.mxu1 %v11889_v11  ;;  %v11272_v11 = vld [vmem:[%s14939_s20 + $0x188] sm:$0xf]  ;;  %v12037_v21 = vor.u32 %v13904_v26, %v12034_v28 }
 0x825   : > { %6420 = vmatpush.bf16.msra.mxu2 %v11125_v10  ;;  %v11273_v10 = vor.u32 %v13719_v52, %v11272_v11  ;;  %v11464_v26 = vld [vmem:[%s14939_s20 + $0x308] sm:$0xf] }
 0x827   : > { %6393 = vmatpush.bf16.msrb.mxu0 %v11457_v39  ;;  %v11986_v39 = vld [vmem:[%s14939_s20 + $0x750] sm:$0xf0] }
 0x828   : > { %6407 = vmatpush.bf16.msrb.mxu1 %v11841_v56  ;;  %v11224_v56 = vld [vmem:[%s14939_s20 + $0x128] sm:$0xf] }
 0x883   : > { %v4523_v40 = vpop.xlane.xlu1 %4522 }
 0x884   : > { %v4535_v45 = vmul.f32 %v16368_v31, %v4523_v40  ;;  %v11077_v40 = vor.u32 %v13664_v14, %v11074_v48  ;;  %v13707_v14 = vld [vmem:[%s14939_s20 + $0x154] sm:$0xf0]  ;;  %v11989_v48 = vor.u32 %v13892_v42, %v11986_v39 }
 0x885   : > { %v11225_v50 = vor.u32 %v13707_v14, %v11224_v56  ;;  %v4518_v56 = vld [vmem:[%s18162_s29] sm:$0x7] }
 0x886   : > { %v16380_v60 = vsub.f32 %v16308_v38, %v4535_v45  ;;  %v16383_v34 = vsub.f32 %v16303_v59, %v4535_v45  ;;  %v16386_v19 = vsub.f32 %v16313_v3, %v4535_v45  ;;  %v13940_v45 = vld [vmem:[%s14939_s20 + $0x8a4] sm:$0xf]  ;;  %6421 = vmatpush.bf16.msra.mxu2 %v11077_v40  ;;  %v11608_v40 = vld [vmem:[%s14939_s20 + $0x428] sm:$0xf] }
 0x887   : > { %v12181_v30 = vor.u32 %v13940_v45, %v12178_v27  ;;  %v11609_v45 = vor.u32 %v13803_v44, %v11608_v40  ;;  %v13784_v27 = vld [vmem:[%s14939_s20 + $0x3c4] sm:$0xf]  ;;  %v4588_v40 = vperm.slane %v4518_v56, 0  ;;  %v4589_v44 = vperm.slane %v4518_v56, 1 }
 0x888   : > { %v4543_v1 = vmul.f32 %v16380_v60, %v16380_v60  ;;  %v4544_v29 = vmul.f32 %v16383_v34, %v16383_v34  ;;  %v4545_v38 = vmul.f32 %v16386_v19, %v16386_v19 }
 0x889   : > { %6442 = vmatpush.bf16.msra.mxu0 %v12181_v30  ;;  %v13880_v30 = vld [vmem:[%s14939_s20 + $0x6c4] sm:$0xf] }
 0x88a   : > { %v4549_v32 = vadd.f32 %v4544_v29, %v4543_v1  ;;  %v11417_v1 = vor.u32 %v13755_v23, %v11416_v57  ;;  %v13851_v29 = vld [vmem:[%s14939_s20 + $0x5d4] sm:$0xf0]  ;;  %v11938_v23 = vld [vmem:[%s14939_s20 + $0x6f0] sm:$0xf0] }
 0x88b   : > { %v4527_v59 = vpop.xlane.xlu2 %4526 }
 0x88c   : > { %v4536_v3 = vmul.f32 %v16368_v31, %v4527_v59  ;;  %v4550_v37 = vadd.f32 %v4549_v32, %v4545_v38  ;;  %v13832_v38 = vld [vmem:[%s14939_s20 + $0x544] sm:$0xf]  ;;  %v11746_v32 = vld [vmem:[%s14939_s20 + $0x570] sm:$0xf0]  ;;  %v11801_v59 = vor.u32 %v13851_v29, %v11800_v53  ;;  %6456 = vmatpush.bf16.msra.mxu1 %v11417_v1  ;;  %v11176_v53 = vld [vmem:[%s14939_s20 + $0xc8] sm:$0xf] }
 0x88d   : > { %v13695_v1 = vld [vmem:[%s14939_s20 + $0xf4] sm:$0xf0] }
 0x88e   : > { %v16396_v24 = vsub.f32 %v16326_v16, %v4536_v3  ;;  %v16399_v35 = vsub.f32 %v16321_v43, %v4536_v3  ;;  %v16402_v5 = vsub.f32 %v16331_v22, %v4536_v3  ;;  %4551 = vadd.xlane.f32.xlu0 %v4550_v37  ;;  %v11168_v43 = vld [vmem:[%s14939_s20 + $0xc0] sm:$0xf]  ;;  %v13694_v22 = vld [vmem:[%s14939_s20 + $0xec] sm:$0xf0]  ;;  %v11749_v3 = vor.u32 %v13832_v38, %v11746_v32  ;;  %v13928_v37 = vld [vmem:[%s14939_s20 + $0x844] sm:$0xf] }
 0x88f   : > { %v11169_v15 = vor.u32 %v13694_v22, %v11168_v43  ;;  %v13839_v43 = vld [vmem:[%s14939_s20 + $0x574] sm:$0xf0]  ;;  %6470 = vmatpush.bf16.msrb.mxu2 %v11801_v59  ;;  %v11941_v38 = vor.u32 %v13880_v30, %v11938_v23  ;;  %v11177_v32 = vor.u32 %v13695_v1, %v11176_v53  ;;  %v11560_v59 = vld [vmem:[%s14939_s20 + $0x3c8] sm:$0xf] }
 0x890   : > { %v4546_v7 = vmul.f32 %v16396_v24, %v16396_v24  ;;  %v4547_v8 = vmul.f32 %v16399_v35, %v16399_v35  ;;  %v4548_v16 = vmul.f32 %v16402_v5, %v16402_v5 }
 0x891   : > { %6377 = vmatpush.bf16.msra.mxu3 %v11169_v15  ;;  %v13820_v15 = vld [vmem:[%s14939_s20 + $0x4e4] sm:$0xf] }
 0x892   : > { %v4553_v58 = vadd.f32 %v4547_v8, %v4546_v7  ;;  %v12130_v7 = vld [vmem:[%s14939_s20 + $0x870] sm:$0xf0]  ;;  %v11368_v8 = vld [vmem:[%s14939_s20 + $0x248] sm:$0xf]  ;;  %v11701_v49 = vor.u32 %v13820_v15, %v11698_v17  ;;  %v13683_v17 = vld [vmem:[%s14939_s20 + $0x94] sm:$0xf0] }
 0x894   : > { %v4554_v13 = vadd.f32 %v4553_v58, %v4548_v16  ;;  %v12133_v16 = vor.u32 %v13928_v37, %v12130_v7  ;;  %v13743_v58 = vld [vmem:[%s14939_s20 + $0x274] sm:$0xf0] }
 0x895   : > { %6378 = vmatpush.bf16.msra.mxu3 %v11121_v41  ;;  %v11369_v22 = vor.u32 %v13743_v58, %v11368_v8  ;;  %v13808_v41 = vld [vmem:[%s14939_s20 + $0x484] sm:$0xf] }
 0x896   : > { %4555 = vadd.xlane.f32.xlu1 %v4554_v13  ;;  %v11752_v13 = vld [vmem:[%s14939_s20 + $0x548] sm:$0xf]  ;;  %6443 = vmatpush.bf16.msra.mxu0 %v12133_v16  ;;  %v11653_v18 = vor.u32 %v13808_v41, %v11650_v63  ;;  %v13772_v8 = vld [vmem:[%s14939_s20 + $0x364] sm:$0xf]  ;;  %v11506_v16 = vld [vmem:[%s14939_s20 + $0x390] sm:$0xf0] }
 0x897   : > { %v11753_v0 = vor.u32 %v13839_v43, %v11752_v13  ;;  %6457 = vmatpush.bf16.msra.mxu1 %v11369_v22  ;;  %v13868_v58 = vld [vmem:[%s14939_s20 + $0x664] sm:$0xf]  ;;  %v11509_v43 = vor.u32 %v13772_v8, %v11506_v16  ;;  %v11890_v22 = vld [vmem:[%s14939_s20 + $0x690] sm:$0xf0] }
 0x898   : > { %v11893_v15 = vor.u32 %v13868_v58, %v11890_v22  ;;  %v12184_v58 = vld [vmem:[%s14939_s20 + $0x8a8] sm:$0xf] }
 0x899   : > { %6379 = vmatpush.bf16.msra.mxu3 %v11073_v46  ;;  %6471 = vmatpush.bf16.msrb.mxu2 %v11753_v0  ;;  %v13796_v46 = vld [vmem:[%s14939_s20 + $0x424] sm:$0xf]  ;;  %v11128_v0 = vld [vmem:[%s14939_s20 + $0x68] sm:$0xf] }
 0x89a   : > { %6444 = vmatpush.bf16.msra.mxu0 %v12085_v33  ;;  %v11605_v2 = vor.u32 %v13796_v46, %v11602_v54  ;;  %v11129_v20 = vor.u32 %v13683_v17, %v11128_v0  ;;  %v11458_v33 = vld [vmem:[%s14939_s20 + $0x330] sm:$0xf0]  ;;  %v13749_v0 = vld [vmem:[%s14939_s20 + $0x2ac] sm:$0xf] }
 0x89b   : > { %6458 = vmatpush.bf16.msra.mxu1 %v11321_v9  ;;  %v13856_v9 = vld [vmem:[%s14939_s20 + $0x604] sm:$0xf]  ;;  %v11461_v41 = vor.u32 %v13760_v51, %v11458_v33 }
 0x89c   : > { %v11845_v63 = vor.u32 %v13856_v9, %v11842_v4 }
 0x89d   : > { %6428 = vmatpush.bf16.msrb.mxu3 %v11797_v55  ;;  %6472 = vmatpush.bf16.msrb.mxu2 %v11705_v6  ;;  %v11554_v55 = vld [vmem:[%s14939_s20 + $0x3f0] sm:$0xf0]  ;;  %v13671_v6 = vld [vmem:[%s14939_s20 + $0x34] sm:$0xf0] }
 0x89e   : > { %6445 = vmatpush.bf16.msra.mxu0 %v12037_v21  ;;  %v11557_v57 = vor.u32 %v13784_v27, %v11554_v55  ;;  %v11081_v11 = vor.u32 %v13671_v6, %v11080_v36  ;;  %v12136_v6 = vld [vmem:[%s14939_s20 + $0x848] sm:$0xf] }
 0x89f   : > { %6459 = vmatpush.bf16.msra.mxu1 %v11273_v10 }
 0x8a1   : > { %6429 = vmatpush.bf16.msrb.mxu3 %v11749_v3  ;;  %6473 = vmatpush.bf16.msrb.mxu2 %v11657_v62  ;;  %v13791_v3 = vld [vmem:[%s14939_s20 + $0x3f4] sm:$0xf0] }
 0x8a2   : > { %6446 = vmatpush.bf16.msra.mxu0 %v11989_v48  ;;  %v11561_v7 = vor.u32 %v13791_v3, %v11560_v59 }
 0x8a3   : > { %6460 = vmatpush.bf16.msra.mxu1 %v11225_v50 }
 0x8a5   : > { %6430 = vmatpush.bf16.msrb.mxu3 %v11701_v49  ;;  %6474 = vmatpush.bf16.msrb.mxu2 %v11609_v45  ;;  %v13779_v49 = vld [vmem:[%s14939_s20 + $0x394] sm:$0xf0]  ;;  %v4519_v45 = vld [vmem:[%s771_s2] sm:$0x7] }
 0x8a6   : > { %6447 = vmatpush.bf16.msra.mxu0 %v11941_v38  ;;  %v11513_v61 = vor.u32 %v13779_v49, %v11512_v12  ;;  %v4601_v1 = vperm.slane %v4519_v45, 0  ;;  %v4603_v38 = vperm.slane %v4519_v45, 2  ;;  %v11802_v49 = vld [vmem:[%s14939_s20 + $0x5d8] sm:$0xf0] }
 0x8a7   : > { %6461 = vmatpush.bf16.msra.mxu1 %v11177_v32 }
 0x8a9   : > { %6431 = vmatpush.bf16.msrb.mxu3 %v11653_v18  ;;  %6475 = vmatpush.bf16.msrb.mxu2 %v11561_v7  ;;  %v13767_v18 = vld [vmem:[%s14939_s20 + $0x334] sm:$0xf0] }
 0x8aa   : > { %6448 = vmatpush.bf16.msra.mxu0 %v11893_v15  ;;  %v11465_v21 = vor.u32 %v13767_v18, %v11464_v26  ;;  %v13845_v15 = vld [vmem:[%s14939_s20 + $0x5ac] sm:$0xf] }
 0x8ab   : > { %6462 = vmatpush.bf16.msra.mxu1 %v11129_v20  ;;  %v13941_v20 = vld [vmem:[%s14939_s20 + $0x8ac] sm:$0xf] }
 0x8ac   : > { %v13737_v18 = vld [vmem:[%s14939_s20 + $0x24c] sm:$0xf] }
 0x8ad   : > { %6432 = vmatpush.bf16.msrb.mxu3 %v11605_v2  ;;  %6476 = vmatpush.bf16.msrb.mxu2 %v11513_v61  ;;  %v12186_v61 = vld [vmem:[%s14939_s20 + $0x8d8] sm:$0xf0] }
 0x8ae   : > { %6449 = vmatpush.bf16.msra.mxu0 %v11845_v63  ;;  %v11805_v63 = vor.u32 %v13845_v15, %v11802_v49  ;;  %v12189_v26 = vor.u32 %v13941_v20, %v12186_v61  ;;  %v11944_v15 = vld [vmem:[%s14939_s20 + $0x6c8] sm:$0xf]  ;;  %v13887_v49 = vld [vmem:[%s14939_s20 + $0x6f4] sm:$0xf0] }
 0x8af   : > { %6463 = vmatpush.bf16.msra.mxu1 %v11081_v11  ;;  %v13833_v11 = vld [vmem:[%s14939_s20 + $0x54c] sm:$0xf] }
 0x8b1   : > { %6433 = vmatpush.bf16.msrb.mxu3 %v11557_v57  ;;  %6477 = vmatpush.bf16.msrb.mxu2 %v11465_v21  ;;  %v4590_v57 = vperm.slane %v4518_v56, 2  ;;  %v13929_v21 = vld [vmem:[%s14939_s20 + $0x84c] sm:$0xf] }
 0x8b2   : > { %v13821_v56 = vld [vmem:[%s14939_s20 + $0x4ec] sm:$0xf] }
 0x8b5   : > { %6434 = vmatpush.bf16.msrb.mxu3 %v11509_v43 }
 0x8b9   : > { %6435 = vmatpush.bf16.msrb.mxu3 %v11461_v41  ;;  %v13935_v41 = vld [vmem:[%s14939_s20 + $0x874] sm:$0xf0] }
 0x901   : > { %v4552_v29 = vpop.xlane.xlu0 %4551 }
 0x902   : > { %v4557_v37 = vmul.f32 %v4552_v29, %v16368_v31  ;;  %v4602_v29 = vperm.slane %v4519_v45, 1  ;;  %v12040_v45 = vld [vmem:[%s14939_s20 + $0x788] sm:$0xf] }
 0x904   : > { %v4559_v13 = vadd.f32 1e-12, %v4557_v37 }
 0x906   : > { %14469 = vrsqrt.f32 %v4559_v13  ;;  %vm4567_vm14 = vweird.f32 %v4559_v13 }
 0x909   : > { %v4556_v28 = vpop.xlane.xlu1 %4555 }
 0x90a   : > { %v4558_v52 = vmul.f32 %v4556_v28, %v16368_v31  ;;  %v11370_v28 = vld [vmem:[%s14939_s20 + $0x278] sm:$0xf0] }
 0x90c   : > { %v14470_v10 = vpop.eup %14469  ;;  %v4560_v25 = vadd.f32 1e-12, %v4558_v52  ;;  %v11754_v52 = vld [vmem:[%s14939_s20 + $0x578] sm:$0xf0] }
 0x90d   : > { %v4562_v47 = vmul.f32 %v14470_v10, %v4559_v13  ;;  %vm4568_vm13 = vweird.f32 %v14470_v10  ;;  %v13947_v13 = vld [vmem:[%s14939_s20 + $0x8d4] sm:$0xf0] }
 0x90e   : > { %14471 = vrsqrt.f32 %v4560_v25  ;;  %vm4569_vm15 = vmor %vm4567_vm14, %vm4568_vm13  ;;  %vm4577_vm1 = vweird.f32 %v4560_v25  ;;  %v12185_v51 = vor.u32 %v13947_v13, %v12184_v58  ;;  %v13893_v58 = vld [vmem:[%s14939_s20 + $0x72c] sm:$0xf]  ;;  %v11994_v13 = vld [vmem:[%s14939_s20 + $0x758] sm:$0xf0] }
 0x90f   : > { %v4563_v62 = vmul.f32 %v14470_v10, %v4562_v47  ;;  %v11373_v47 = vor.u32 %v13737_v18, %v11370_v28  ;;  %v11997_v61 = vor.u32 %v13893_v58, %v11994_v13  ;;  %v11945_v18 = vor.u32 %v13887_v49, %v11944_v15  ;;  %v12144_v15 = vld [vmem:[%s14939_s20 + $0x850] sm:$0xf]  ;;  %v13936_v49 = vld [vmem:[%s14939_s20 + $0x87c] sm:$0xf0] }
 0x911   : > { %v4564_v46 = vmul.f32 0.5, %v4563_v62  ;;  %v12088_v62 = vld [vmem:[%s14939_s20 + $0x7e8] sm:$0xf] }
 0x913   : > { %v4565_v54 = vsub.f32 1.5, %v4564_v46  ;;  %v13923_v46 = vld [vmem:[%s14939_s20 + $0x814] sm:$0xf0] }
 0x914   : > { %v14472_v42 = vpop.eup %14471 }
 0x915   : > { %v4566_v2 = vmul.f32 %v14470_v10, %v4565_v54  ;;  %v4572_v39 = vmul.f32 %v14472_v42, %v4560_v25  ;;  %vm4578_vm0 = vweird.f32 %v14472_v42  ;;  %v12137_v25 = vor.u32 %v13935_v41, %v12136_v6  ;;  %v13785_v6 = vld [vmem:[%s14939_s20 + $0x3cc] sm:$0xf]  ;;  %v11562_v41 = vld [vmem:[%s14939_s20 + $0x3f8] sm:$0xf0] }
 0x916   : > { %vm4579_vm2 = vmor %vm4577_vm1, %vm4578_vm0  ;;  %v11757_v54 = vor.u32 %v13833_v11, %v11754_v52  ;;  %v11896_v11 = vld [vmem:[%s14939_s20 + $0x668] sm:$0xf]  ;;  %v13875_v52 = vld [vmem:[%s14939_s20 + $0x694] sm:$0xf0] }
 0x917   : > { %v4573_v14 = vmul.f32 %v14472_v42, %v4572_v39  ;;  %v4570_v48 = vsel %vm4569_vm15, %v14470_v10, %v4566_v2  ;;  %v12138_v10 = vld [vmem:[%s14939_s20 + $0x878] sm:$0xf0]  ;;  %v13725_v2 = vld [vmem:[%s14939_s20 + $0x1ec] sm:$0xf] }
 0x918   : > { %v4581_v27 = vmul.f32 %v4570_v48, %v16380_v60  ;;  %v4582_v55 = vmul.f32 %v4570_v48, %v16383_v34  ;;  %v4583_v23 = vmul.f32 %v4570_v48, %v16386_v19  ;;  %v11322_v39 = vld [vmem:[%s14939_s20 + $0x218] sm:$0xf0]  ;;  %v13917_v48 = vld [vmem:[%s14939_s20 + $0x7ec] sm:$0xf] }
 0x919   : > { %v4574_v50 = vmul.f32 0.5, %v4573_v14  ;;  %v11706_v14 = vld [vmem:[%s14939_s20 + $0x518] sm:$0xf0] }
 0x91a   : > { %v4594_v32 = vmul.f32 %v4588_v40, %v4581_v27  ;;  %v4595_v60 = vmul.f32 %v4589_v44, %v4582_v55  ;;  %v4596_v34 = vmul.f32 %v4590_v57, %v4583_v23  ;;  %v13911_v27 = vld [vmem:[%s14939_s20 + $0x7b4] sm:$0xf0]  ;;  %v11709_v55 = vor.u32 %v13821_v56, %v11706_v14  ;;  %v11274_v23 = vld [vmem:[%s14939_s20 + $0x1b8] sm:$0xf0] }
 0x91b   : > { %v4575_v30 = vsub.f32 1.5, %v4574_v50  ;;  %v12090_v50 = vld [vmem:[%s14939_s20 + $0x818] sm:$0xf0]  ;;  %v13863_v14 = vld [vmem:[%s14939_s20 + $0x634] sm:$0xf0] }
 0x91c   : > { %v16518_v43 = vadd.f32 %v4601_v1, %v4594_v32  ;;  %v16520_v22 = vadd.f32 %v4602_v29, %v4595_v60  ;;  %v12041_v32 = vor.u32 %v13911_v27, %v12040_v45  ;;  %v13761_v45 = vld [vmem:[%s14939_s20 + $0x30c] sm:$0xf]  ;;  %v11466_v27 = vld [vmem:[%s14939_s20 + $0x338] sm:$0xf0] }
 0x91d   : > { %v4576_v53 = vmul.f32 %v14472_v42, %v4575_v30  ;;  %v12093_v30 = vor.u32 %v13917_v48, %v12090_v50  ;;  %v13665_v48 = vld [vmem:[%s14939_s20 + $0xc] sm:$0xf]  ;;  %v11082_v50 = vld [vmem:[%s14939_s20 + $0x38] sm:$0xf0] }
 0x91f   : > { %v4580_v59 = vsel %vm4579_vm2, %v14472_v42, %v4576_v53  ;;  %v12141_v42 = vor.u32 %v13929_v21, %v12138_v10  ;;  %v13809_v53 = vld [vmem:[%s14939_s20 + $0x48c] sm:$0xf]  ;;  %v11565_v21 = vor.u32 %v13785_v6, %v11562_v41  ;;  %v11328_v6 = vld [vmem:[%s14939_s20 + $0x1f0] sm:$0xf]  ;;  %v13732_v41 = vld [vmem:[%s14939_s20 + $0x21c] sm:$0xf0] }
 0x920   : > { %v4584_v3 = vmul.f32 %v4580_v59, %v16396_v24  ;;  %v4585_v37 = vmul.f32 %v4580_v59, %v16399_v35  ;;  %v4586_v19 = vmul.f32 %v4580_v59, %v16402_v5  ;;  %v11418_v24 = vld [vmem:[%s14939_s20 + $0x2d8] sm:$0xf0]  ;;  %v16525_v35 = vadd.f32 %v4603_v38, %v4596_v34  ;;  %v11992_v59 = vld [vmem:[%s14939_s20 + $0x728] sm:$0xf]  ;;  %v13899_v34 = vld [vmem:[%s14939_s20 + $0x754] sm:$0xf0] }
 0x921   : > { %v11421_v36 = vor.u32 %v13749_v0, %v11418_v24  ;;  %v11993_v0 = vor.u32 %v13899_v34, %v11992_v59  ;;  %v13750_v59 = vld [vmem:[%s14939_s20 + $0x2b4] sm:$0xf]  ;;  %v11426_v34 = vld [vmem:[%s14939_s20 + $0x2e0] sm:$0xf0] }
 0x922   : > { %v4597_v7 = vmul.f32 %v4588_v40, %v4584_v3  ;;  %v4598_v8 = vmul.f32 %v4589_v44, %v4585_v37  ;;  %v4599_v16 = vmul.f32 %v4590_v57, %v4586_v19  ;;  %v12089_v40 = vor.u32 %v13923_v46, %v12088_v62  ;;  %v13713_v57 = vld [vmem:[%s14939_s20 + $0x18c] sm:$0xf]  ;;  %v11514_v46 = vld [vmem:[%s14939_s20 + $0x398] sm:$0xf0] }
 0x923   : > { %v11325_v44 = vor.u32 %v13725_v2, %v11322_v39  ;;  %v11277_v60 = vor.u32 %v13713_v57, %v11274_v23  ;;  %v13701_v19 = vld [vmem:[%s14939_s20 + $0x12c] sm:$0xf]  ;;  %v11848_v2 = vld [vmem:[%s14939_s20 + $0x608] sm:$0xf]  ;;  %v11897_v39 = vor.u32 %v13875_v52, %v11896_v11  ;;  %v11424_v57 = vld [vmem:[%s14939_s20 + $0x2b0] sm:$0xf]  ;;  %v11429_v13 = vor.u32 %v13750_v59, %v11426_v34 }
 0x924   : > { %v16527_v5 = vadd.f32 %v4601_v1, %v4597_v7  ;;  %v16529_v17 = vadd.f32 %v4602_v29, %v4598_v8  ;;  %v16531_v12 = vadd.f32 %v4603_v38, %v4599_v16  ;;  %v11658_v1 = vld [vmem:[%s14939_s20 + $0x4b8] sm:$0xf0]  ;;  %v13905_v29 = vld [vmem:[%s14939_s20 + $0x78c] sm:$0xf]  ;;  %v13756_v23 = vld [vmem:[%s14939_s20 + $0x2dc] sm:$0xf0] }
 0x925   : > { %v12042_v38 = vld [vmem:[%s14939_s20 + $0x7b8] sm:$0xf0]  ;;  %v11661_v3 = vor.u32 %v13809_v53, %v11658_v1  ;;  %v13797_v8 = vld [vmem:[%s14939_s20 + $0x42c] sm:$0xf]  ;;  %v11808_v53 = vld [vmem:[%s14939_s20 + $0x5b0] sm:$0xf] }
 0x926   : > { %v16538_v33 = vpack.c.bf16 %v16527_v5, %v16518_v43  ;;  %v16542_v9 = vpack.c.bf16 %v16529_v17, %v16520_v22  ;;  %v16546_v4 = vpack.c.bf16 %v16531_v12, %v16525_v35  ;;  %v12045_v37 = vor.u32 %v13905_v29, %v12042_v38  ;;  %v11226_v7 = vld [vmem:[%s14939_s20 + $0x158] sm:$0xf0]  ;;  %v13773_v62 = vld [vmem:[%s14939_s20 + $0x36c] sm:$0xf]  ;;  %v13852_v1 = vld [vmem:[%s14939_s20 + $0x5dc] sm:$0xf0] }
 0x927   : > { %v11610_v16 = vld [vmem:[%s14939_s20 + $0x458] sm:$0xf0]  ;;  %v11229_v24 = vor.u32 %v13701_v19, %v11226_v7  ;;  %v12192_v29 = vld [vmem:[%s14939_s20 + $0x8b0] sm:$0xf]  ;;  %v11849_v38 = vor.u32 %v13863_v14, %v11848_v2  ;;  %v11425_v19 = vor.u32 %v13756_v23, %v11424_v57  ;;  %v11809_v7 = vor.u32 %v13852_v1, %v11808_v53  ;;  %v13924_v52 = vld [vmem:[%s14939_s20 + $0x81c] sm:$0xf0] }
 0x928   : > { %6380 = vmatmul.bf16.vlgmr.msra.gmra.mxu3 %v16538_v33  ;;  %6394 = vmatmul.bf16.vlgmr.msrb.gmra.mxu0 %v16542_v9  ;;  %v11613_v20 = vor.u32 %v13797_v8, %v11610_v16  ;;  %v11376_v8 = vld [vmem:[%s14939_s20 + $0x250] sm:$0xf]  ;;  %v13744_v16 = vld [vmem:[%s14939_s20 + $0x27c] sm:$0xf0] }
 0x929   : > { %6408 = vmatmul.bf16.vlgmr.msrb.gmra.mxu1 %v16546_v4  ;;  %6422 = vmatmul.bf16.vlgmr.msra.gmra.mxu2 %v16538_v33  ;;  %v12096_v11 = vld [vmem:[%s14939_s20 + $0x7f0] sm:$0xf]  ;;  %v13912_v14 = vld [vmem:[%s14939_s20 + $0x7bc] sm:$0xf0] }
 0x92a   : > { %6484 = vmatpush.bf16.msra.mxu3 %v12185_v51  ;;  %6498 = vmatpush.bf16.msrb.mxu0 %v11421_v36  ;;  %v13689_v51 = vld [vmem:[%s14939_s20 + $0xcc] sm:$0xf]  ;;  %v11178_v36 = vld [vmem:[%s14939_s20 + $0xf8] sm:$0xf0]  ;;  %v11664_v2 = vld [vmem:[%s14939_s20 + $0x490] sm:$0xf] }
 0x92b   : > { %6512 = vmatpush.bf16.msrb.mxu1 %v11805_v63  ;;  %6526 = vmatpush.bf16.msra.mxu2 %v12189_v26  ;;  %v13881_v63 = vld [vmem:[%s14939_s20 + $0x6cc] sm:$0xf]  ;;  %v11946_v26 = vld [vmem:[%s14939_s20 + $0x6f8] sm:$0xf0]  ;;  %v11181_v28 = vor.u32 %v13689_v51, %v11178_v36  ;;  %v11377_v51 = vor.u32 %v13744_v16, %v11376_v8  ;;  %v11616_v57 = vld [vmem:[%s14939_s20 + $0x430] sm:$0xf] }
 0x92c   : > { %v11949_v10 = vor.u32 %v13881_v63, %v11946_v26  ;;  %v12145_v63 = vor.u32 %v13936_v49, %v12144_v15  ;;  %v13804_v23 = vld [vmem:[%s14939_s20 + $0x45c] sm:$0xf0]  ;;  %v12000_v53 = vld [vmem:[%s14939_s20 + $0x730] sm:$0xf] }
 0x92d   : > { %v13900_v1 = vld [vmem:[%s14939_s20 + $0x75c] sm:$0xf0]  ;;  %v11184_v59 = vld [vmem:[%s14939_s20 + $0xd0] sm:$0xf] }
 0x92e   : > { %6485 = vmatpush.bf16.msra.mxu3 %v12137_v25  ;;  %6499 = vmatpush.bf16.msrb.mxu0 %v11373_v47  ;;  %v13677_v25 = vld [vmem:[%s14939_s20 + $0x6c] sm:$0xf]  ;;  %v11130_v47 = vld [vmem:[%s14939_s20 + $0x98] sm:$0xf0]  ;;  %v13696_v34 = vld [vmem:[%s14939_s20 + $0xfc] sm:$0xf0] }
 0x92f   : > { %6513 = vmatpush.bf16.msrb.mxu1 %v11757_v54  ;;  %6527 = vmatpush.bf16.msra.mxu2 %v12141_v42  ;;  %v13869_v54 = vld [vmem:[%s14939_s20 + $0x66c] sm:$0xf]  ;;  %v11898_v42 = vld [vmem:[%s14939_s20 + $0x698] sm:$0xf0]  ;;  %v11133_v56 = vor.u32 %v13677_v25, %v11130_v47  ;;  %v11329_v25 = vor.u32 %v13732_v41, %v11328_v6  ;;  %v11952_v8 = vld [vmem:[%s14939_s20 + $0x6d0] sm:$0xf] }
 0x930   : > { %v13888_v16 = vld [vmem:[%s14939_s20 + $0x6fc] sm:$0xf0]  ;;  %v11136_v15 = vld [vmem:[%s14939_s20 + $0x70] sm:$0xf] }
 0x931   : > { %v13684_v49 = vld [vmem:[%s14939_s20 + $0x9c] sm:$0xf0]  ;;  %v11904_v6 = vld [vmem:[%s14939_s20 + $0x670] sm:$0xf] }
 0x932   : > { %6486 = vmatpush.bf16.msra.mxu3 %v12089_v40  ;;  %6500 = vmatpush.bf16.msrb.mxu0 %v11325_v44  ;;  %v11517_v40 = vor.u32 %v13773_v62, %v11514_v46  ;;  %v11901_v44 = vor.u32 %v13869_v54, %v11898_v42  ;;  %v11280_v62 = vld [vmem:[%s14939_s20 + $0x190] sm:$0xf]  ;;  %v13720_v46 = vld [vmem:[%s14939_s20 + $0x1bc] sm:$0xf0]  ;;  %v12097_v54 = vor.u32 %v13924_v52, %v12096_v11 }
 0x933   : > { %6514 = vmatpush.bf16.msrb.mxu1 %v11709_v55  ;;  %6528 = vmatpush.bf16.msra.mxu2 %v12093_v30  ;;  %v13857_v55 = vld [vmem:[%s14939_s20 + $0x60c] sm:$0xf]  ;;  %v11850_v30 = vld [vmem:[%s14939_s20 + $0x638] sm:$0xf0]  ;;  %v13876_v41 = vld [vmem:[%s14939_s20 + $0x69c] sm:$0xf0] }
 0x934   : > { %v13672_v52 = vld [vmem:[%s14939_s20 + $0x3c] sm:$0xf0] }
 0x936   : > { %6487 = vmatpush.bf16.msra.mxu3 %v12041_v32  ;;  %6501 = vmatpush.bf16.msrb.mxu0 %v11277_v60  ;;  %v11085_v32 = vor.u32 %v13665_v48, %v11082_v50  ;;  %v13948_v60 = vld [vmem:[%s14939_s20 + $0x8dc] sm:$0xf0]  ;;  %v13714_v48 = vld [vmem:[%s14939_s20 + $0x194] sm:$0xf]  ;;  %v11282_v50 = vld [vmem:[%s14939_s20 + $0x1c0] sm:$0xf0] }
 0x937   : > { %6515 = vmatpush.bf16.msrb.mxu1 %v11661_v3  ;;  %6529 = vmatpush.bf16.msra.mxu2 %v12045_v37  ;;  %v11469_v3 = vor.u32 %v13761_v45, %v11466_v27  ;;  %v11853_v37 = vor.u32 %v13857_v55, %v11850_v30  ;;  %v12193_v58 = vor.u32 %v13948_v60, %v12192_v29  ;;  %v11232_v45 = vld [vmem:[%s14939_s20 + $0x130] sm:$0xf]  ;;  %v13708_v27 = vld [vmem:[%s14939_s20 + $0x15c] sm:$0xf0]  ;;  %v13702_v29 = vld [vmem:[%s14939_s20 + $0x134] sm:$0xf] }
 0x938   : > { %6436 = vmatmul.bf16.vlgmr.msrb.gmra.mxu3 %v16542_v9  ;;  %6450 = vmatmul.bf16.vlgmr.msra.gmra.mxu0 %v16546_v4  ;;  %v11285_v30 = vor.u32 %v13714_v48, %v11282_v50  ;;  %v11617_v60 = vor.u32 %v13804_v23, %v11616_v57  ;;  %v11432_v48 = vld [vmem:[%s14939_s20 + $0x2b8] sm:$0xf] }
 0x939   : > { %6464 = vmatmul.bf16.vlgmr.msra.gmra.mxu1 %v16538_v33  ;;  %6478 = vmatmul.bf16.vlgmr.msrb.gmra.mxu2 %v16542_v9 }
 0x93a   : > { %6488 = vmatpush.bf16.msra.mxu3 %v11993_v0  ;;  %6502 = vmatpush.bf16.msrb.mxu0 %v11229_v24  ;;  %v11760_v0 = vld [vmem:[%s14939_s20 + $0x550] sm:$0xf]  ;;  %v13840_v24 = vld [vmem:[%s14939_s20 + $0x57c] sm:$0xf0] }
 0x93b   : > { %6516 = vmatpush.bf16.msrb.mxu1 %v11613_v20  ;;  %6530 = vmatpush.bf16.msra.mxu2 %v11997_v61  ;;  %v13738_v20 = vld [vmem:[%s14939_s20 + $0x254] sm:$0xf]  ;;  %v11378_v61 = vld [vmem:[%s14939_s20 + $0x280] sm:$0xf0]  ;;  %v11761_v36 = vor.u32 %v13840_v24, %v11760_v0  ;;  %v11185_v0 = vor.u32 %v13696_v34, %v11184_v59  ;;  %v11384_v59 = vld [vmem:[%s14939_s20 + $0x258] sm:$0xf] }
 0x93c   : > { %v11381_v26 = vor.u32 %v13738_v20, %v11378_v61  ;;  %v11953_v20 = vor.u32 %v13888_v16, %v11952_v8  ;;  %v13745_v34 = vld [vmem:[%s14939_s20 + $0x284] sm:$0xf0]  ;;  %v13822_v8 = vld [vmem:[%s14939_s20 + $0x4f4] sm:$0xf]  ;;  %v11714_v16 = vld [vmem:[%s14939_s20 + $0x520] sm:$0xf0] }
 0x93e   : > { %6489 = vmatpush.bf16.msra.mxu3 %v11945_v18  ;;  %6503 = vmatpush.bf16.msrb.mxu0 %v11181_v28  ;;  %v11712_v18 = vld [vmem:[%s14939_s20 + $0x4f0] sm:$0xf]  ;;  %v13828_v28 = vld [vmem:[%s14939_s20 + $0x51c] sm:$0xf0] }
 0x93f   : > { %6517 = vmatpush.bf16.msrb.mxu1 %v11565_v21  ;;  %6531 = vmatpush.bf16.msra.mxu2 %v11949_v10  ;;  %v13726_v21 = vld [vmem:[%s14939_s20 + $0x1f4] sm:$0xf]  ;;  %v11330_v10 = vld [vmem:[%s14939_s20 + $0x220] sm:$0xf0]  ;;  %v11713_v47 = vor.u32 %v13828_v28, %v11712_v18  ;;  %v11088_v18 = vld [vmem:[%s14939_s20 + $0x10] sm:$0xf]  ;;  %v11137_v28 = vor.u32 %v13684_v49, %v11136_v15 }
 0x940   : > { %v11333_v42 = vor.u32 %v13726_v21, %v11330_v10  ;;  %v11472_v21 = vld [vmem:[%s14939_s20 + $0x310] sm:$0xf]  ;;  %v13768_v10 = vld [vmem:[%s14939_s20 + $0x33c] sm:$0xf0]  ;;  %v11089_v50 = vor.u32 %v13672_v52, %v11088_v18  ;;  %v11336_v15 = vld [vmem:[%s14939_s20 + $0x1f8] sm:$0xf] }
 0x941   : > { %v13733_v49 = vld [vmem:[%s14939_s20 + $0x224] sm:$0xf0]  ;;  %v13906_v18 = vld [vmem:[%s14939_s20 + $0x794] sm:$0xf] }
 0x942   : > { %6490 = vmatpush.bf16.msra.mxu3 %v11897_v39  ;;  %6504 = vmatpush.bf16.msrb.mxu0 %v11133_v56  ;;  %v13816_v39 = vld [vmem:[%s14939_s20 + $0x4bc] sm:$0xf0]  ;;  %v12048_v56 = vld [vmem:[%s14939_s20 + $0x790] sm:$0xf]  ;;  %v13721_v52 = vld [vmem:[%s14939_s20 + $0x1c4] sm:$0xf0] }
 0x943   : > { %6518 = vmatpush.bf16.msrb.mxu1 %v11517_v40  ;;  %6532 = vmatpush.bf16.msra.mxu2 %v11901_v44  ;;  %v11281_v40 = vor.u32 %v13720_v46, %v11280_v62  ;;  %v11665_v44 = vor.u32 %v13816_v39, %v11664_v2  ;;  %v12049_v55 = vor.u32 %v13912_v14, %v12048_v56  ;;  %v11856_v62 = vld [vmem:[%s14939_s20 + $0x610] sm:$0xf]  ;;  %v13864_v46 = vld [vmem:[%s14939_s20 + $0x63c] sm:$0xf0]  ;;  %v13846_v2 = vld [vmem:[%s14939_s20 + $0x5b4] sm:$0xf] }
 0x944   : > { %v11810_v39 = vld [vmem:[%s14939_s20 + $0x5e0] sm:$0xf0]  ;;  %v13942_v56 = vld [vmem:[%s14939_s20 + $0x8b4] sm:$0xf] }
 0x945   : > { %v12194_v14 = vld [vmem:[%s14939_s20 + $0x8e0] sm:$0xf0]  ;;  %v11813_v57 = vor.u32 %v13846_v2, %v11810_v39  ;;  %v13894_v2 = vld [vmem:[%s14939_s20 + $0x734] sm:$0xf] }
 0x946   : > { %6491 = vmatpush.bf16.msra.mxu3 %v11849_v38  ;;  %6505 = vmatpush.bf16.msrb.mxu0 %v11085_v32  ;;  %v11234_v38 = vld [vmem:[%s14939_s20 + $0x160] sm:$0xf0]  ;;  %v11233_v32 = vor.u32 %v13708_v27, %v11232_v45  ;;  %v11816_v45 = vld [vmem:[%s14939_s20 + $0x5b8] sm:$0xf]  ;;  %v13853_v27 = vld [vmem:[%s14939_s20 + $0x5e4] sm:$0xf0]  ;;  %v12197_v23 = vor.u32 %v13942_v56, %v12194_v14 }
 0x947   : > { %6519 = vmatpush.bf16.msrb.mxu1 %v11469_v3  ;;  %6533 = vmatpush.bf16.msra.mxu2 %v11853_v37  ;;  %v12001_v3 = vor.u32 %v13900_v1, %v12000_v53  ;;  %v11237_v37 = vor.u32 %v13702_v29, %v11234_v38  ;;  %v13834_v53 = vld [vmem:[%s14939_s20 + $0x554] sm:$0xf]  ;;  %v11762_v1 = vld [vmem:[%s14939_s20 + $0x580] sm:$0xf0]  ;;  %v11817_v38 = vor.u32 %v13853_v27, %v11816_v45  ;;  %v11240_v56 = vld [vmem:[%s14939_s20 + $0x138] sm:$0xf] }
 0x948   : > { %v12002_v39 = vld [vmem:[%s14939_s20 + $0x760] sm:$0xf0]  ;;  %v13709_v14 = vld [vmem:[%s14939_s20 + $0x164] sm:$0xf0]  ;;  %v13786_v45 = vld [vmem:[%s14939_s20 + $0x3d4] sm:$0xf] }
 0x949   : > { %6492 = vmatmul.bf16.vlgmr.msra.gmra.mxu3 %v16546_v4  ;;  %6506 = vmatmul.bf16.vlgmr.msrb.gmra.mxu0 %v16538_v33  ;;  %v11570_v27 = vld [vmem:[%s14939_s20 + $0x400] sm:$0xf0] }
 0x94a   : > { %6540 = vmatpush.bf16.msrb.mxu3 %v11425_v19  ;;  %6554 = vmatpush.bf16.msra.mxu0 %v11809_v7  ;;  %v11568_v19 = vld [vmem:[%s14939_s20 + $0x3d0] sm:$0xf]  ;;  %v13792_v7 = vld [vmem:[%s14939_s20 + $0x3fc] sm:$0xf0] }
 0x94b   : > { %6568 = vmatpush.bf16.msra.mxu1 %v12193_v58  ;;  %6582 = vmatpush.bf16.msrb.mxu2 %v11429_v13  ;;  %v13690_v58 = vld [vmem:[%s14939_s20 + $0xd4] sm:$0xf]  ;;  %v11186_v13 = vld [vmem:[%s14939_s20 + $0x100] sm:$0xf0]  ;;  %v11569_v24 = vor.u32 %v13792_v7, %v11568_v19  ;;  %v11765_v19 = vor.u32 %v13834_v53, %v11762_v1  ;;  %v11192_v53 = vld [vmem:[%s14939_s20 + $0xd8] sm:$0xf] }
 0x94c   : > { %6520 = vmatmul.bf16.vlgmr.msrb.gmra.mxu1 %v16542_v9  ;;  %6534 = vmatmul.bf16.vlgmr.msra.gmra.mxu2 %v16546_v4  ;;  %v11189_v61 = vor.u32 %v13690_v58, %v11186_v13  ;;  %v11385_v58 = vor.u32 %v13745_v34, %v11384_v59  ;;  %v13697_v1 = vld [vmem:[%s14939_s20 + $0x104] sm:$0xf0]  ;;  %v13774_v59 = vld [vmem:[%s14939_s20 + $0x374] sm:$0xf]  ;;  %v11522_v34 = vld [vmem:[%s14939_s20 + $0x3a0] sm:$0xf0] }
 0x94e   : > { %6541 = vmatpush.bf16.msrb.mxu3 %v11377_v51  ;;  %6555 = vmatpush.bf16.msra.mxu0 %v11761_v36  ;;  %v11520_v51 = vld [vmem:[%s14939_s20 + $0x370] sm:$0xf]  ;;  %v13780_v36 = vld [vmem:[%s14939_s20 + $0x39c] sm:$0xf0] }
 0x94f   : > { %6569 = vmatpush.bf16.msra.mxu1 %v12145_v63  ;;  %6583 = vmatpush.bf16.msrb.mxu2 %v11381_v26  ;;  %v13678_v63 = vld [vmem:[%s14939_s20 + $0x74] sm:$0xf]  ;;  %v11138_v26 = vld [vmem:[%s14939_s20 + $0xa0] sm:$0xf0]  ;;  %v11521_v11 = vor.u32 %v13780_v36, %v11520_v51  ;;  %v11717_v51 = vor.u32 %v13822_v8, %v11714_v16  ;;  %v11144_v8 = vld [vmem:[%s14939_s20 + $0x78] sm:$0xf] }
 0x950   : > { %v13685_v16 = vld [vmem:[%s14939_s20 + $0xa4] sm:$0xf0] }
 0x952   : > { %6542 = vmatpush.bf16.msrb.mxu3 %v11329_v25  ;;  %6556 = vmatpush.bf16.msra.mxu0 %v11713_v47  ;;  %v11905_v25 = vor.u32 %v13876_v41, %v11904_v6  ;;  %v11141_v47 = vor.u32 %v13678_v63, %v11138_v26  ;;  %v13810_v6 = vld [vmem:[%s14939_s20 + $0x494] sm:$0xf]  ;;  %v11666_v41 = vld [vmem:[%s14939_s20 + $0x4c0] sm:$0xf0]  ;;  %v11337_v63 = vor.u32 %v13733_v49, %v11336_v15 }
 0x953   : > { %6570 = vmatpush.bf16.msra.mxu1 %v12097_v54  ;;  %6584 = vmatpush.bf16.msrb.mxu2 %v11333_v42  ;;  %v13666_v54 = vld [vmem:[%s14939_s20 + $0x14] sm:$0xf]  ;;  %v11090_v42 = vld [vmem:[%s14939_s20 + $0x40] sm:$0xf0] }
 0x954   : > { %v11474_v49 = vld [vmem:[%s14939_s20 + $0x340] sm:$0xf0] }
 0x956   : > { %6543 = vmatpush.bf16.msrb.mxu3 %v11281_v40  ;;  %6557 = vmatpush.bf16.msra.mxu0 %v11665_v44  ;;  %v11473_v40 = vor.u32 %v13768_v10, %v11472_v21  ;;  %v13757_v44 = vld [vmem:[%s14939_s20 + $0x2e4] sm:$0xf0]  ;;  %v11672_v21 = vld [vmem:[%s14939_s20 + $0x498] sm:$0xf] }
 0x957   : > { %6571 = vmatpush.bf16.msra.mxu1 %v12049_v55  ;;  %6585 = vmatpush.bf16.msrb.mxu2 %v11285_v30  ;;  %v11857_v55 = vor.u32 %v13864_v46, %v11856_v62  ;;  %v11093_v30 = vor.u32 %v13666_v54, %v11090_v42  ;;  %v11433_v29 = vor.u32 %v13757_v44, %v11432_v48  ;;  %v13817_v10 = vld [vmem:[%s14939_s20 + $0x4c4] sm:$0xf0]  ;;  %v13798_v62 = vld [vmem:[%s14939_s20 + $0x434] sm:$0xf]  ;;  %v11618_v46 = vld [vmem:[%s14939_s20 + $0x460] sm:$0xf0] }
 0x958   : > { %v11673_v42 = vor.u32 %v13817_v10, %v11672_v21  ;;  %v11624_v48 = vld [vmem:[%s14939_s20 + $0x438] sm:$0xf]  ;;  %v12005_v44 = vor.u32 %v13894_v2, %v12002_v39  ;;  %v13847_v21 = vld [vmem:[%s14939_s20 + $0x5bc] sm:$0xf] }
 0x95a   : > { %6544 = vmatpush.bf16.msrb.mxu3 %v11233_v32  ;;  %6558 = vmatpush.bf16.msra.mxu0 %v11617_v60  ;;  %v13930_v32 = vld [vmem:[%s14939_s20 + $0x854] sm:$0xf]  ;;  %v12146_v60 = vld [vmem:[%s14939_s20 + $0x880] sm:$0xf0] }
 0x95b   : > { %6572 = vmatpush.bf16.msra.mxu1 %v12001_v3  ;;  %6586 = vmatpush.bf16.msrb.mxu2 %v11237_v37  ;;  %v11768_v3 = vld [vmem:[%s14939_s20 + $0x558] sm:$0xf]  ;;  %v13841_v37 = vld [vmem:[%s14939_s20 + $0x584] sm:$0xf0]  ;;  %v12149_v7 = vor.u32 %v13930_v32, %v12146_v60  ;;  %v11573_v32 = vor.u32 %v13786_v45, %v11570_v27  ;;  %v13835_v45 = vld [vmem:[%s14939_s20 + $0x55c] sm:$0xf] }
 0x95c   : > { %v11769_v13 = vor.u32 %v13841_v37, %v11768_v3  ;;  %v11193_v3 = vor.u32 %v13697_v1, %v11192_v53  ;;  %v11770_v27 = vld [vmem:[%s14939_s20 + $0x588] sm:$0xf0]  ;;  %v12104_v53 = vld [vmem:[%s14939_s20 + $0x7f8] sm:$0xf]  ;;  %v13925_v1 = vld [vmem:[%s14939_s20 + $0x824] sm:$0xf0] }
 0x95e   : > { %6545 = vmatpush.bf16.msrb.mxu3 %v11185_v0  ;;  %6559 = vmatpush.bf16.msra.mxu0 %v11569_v24  ;;  %v13918_v0 = vld [vmem:[%s14939_s20 + $0x7f4] sm:$0xf]  ;;  %v12098_v24 = vld [vmem:[%s14939_s20 + $0x820] sm:$0xf0] }
 0x95f   : > { %6573 = vmatpush.bf16.msra.mxu1 %v11953_v20  ;;  %6587 = vmatpush.bf16.msrb.mxu2 %v11189_v61  ;;  %v11720_v20 = vld [vmem:[%s14939_s20 + $0x4f8] sm:$0xf]  ;;  %v13829_v61 = vld [vmem:[%s14939_s20 + $0x524] sm:$0xf0]  ;;  %v12101_v36 = vor.u32 %v13918_v0, %v12098_v24  ;;  %v13762_v0 = vld [vmem:[%s14939_s20 + $0x314] sm:$0xf]  ;;  %v11525_v24 = vor.u32 %v13774_v59, %v11522_v34 }
 0x960   : > { %v11721_v26 = vor.u32 %v13829_v61, %v11720_v20  ;;  %v13858_v20 = vld [vmem:[%s14939_s20 + $0x614] sm:$0xf]  ;;  %v11858_v61 = vld [vmem:[%s14939_s20 + $0x640] sm:$0xf0]  ;;  %v11477_v10 = vor.u32 %v13762_v0, %v11474_v49  ;;  %v13823_v59 = vld [vmem:[%s14939_s20 + $0x4fc] sm:$0xf] }
 0x961   : > { %v11722_v34 = vld [vmem:[%s14939_s20 + $0x528] sm:$0xf0]  ;;  %v13715_v0 = vld [vmem:[%s14939_s20 + $0x19c] sm:$0xf] }
 0x962   : > { %6546 = vmatpush.bf16.msrb.mxu3 %v11137_v28  ;;  %6560 = vmatpush.bf16.msra.mxu0 %v11521_v11  ;;  %v12050_v28 = vld [vmem:[%s14939_s20 + $0x7c0] sm:$0xf0]  ;;  %v11288_v11 = vld [vmem:[%s14939_s20 + $0x198] sm:$0xf]  ;;  %v11674_v49 = vld [vmem:[%s14939_s20 + $0x4c8] sm:$0xf0] }
 0x963   : > { %6574 = vmatpush.bf16.msra.mxu1 %v11905_v25  ;;  %6588 = vmatpush.bf16.msrb.mxu2 %v11141_v47  ;;  %v11669_v25 = vor.u32 %v13810_v6, %v11666_v41  ;;  %v12053_v47 = vor.u32 %v13906_v18, %v12050_v28  ;;  %v11289_v54 = vor.u32 %v13721_v52, %v11288_v11  ;;  %v11096_v6 = vld [vmem:[%s14939_s20 + $0x18] sm:$0xf]  ;;  %v13673_v41 = vld [vmem:[%s14939_s20 + $0x44] sm:$0xf0]  ;;  %v13751_v11 = vld [vmem:[%s14939_s20 + $0x2bc] sm:$0xf] }
 0x964   : > { %v12200_v18 = vld [vmem:[%s14939_s20 + $0x8b8] sm:$0xf]  ;;  %v13949_v28 = vld [vmem:[%s14939_s20 + $0x8e4] sm:$0xf0]  ;;  %v11434_v52 = vld [vmem:[%s14939_s20 + $0x2e8] sm:$0xf0] }
 0x965   : > { %v12201_v2 = vor.u32 %v13949_v28, %v12200_v18  ;;  %v11437_v39 = vor.u32 %v13751_v11, %v11434_v52  ;;  %v13703_v18 = vld [vmem:[%s14939_s20 + $0x13c] sm:$0xf]  ;;  %v11242_v28 = vld [vmem:[%s14939_s20 + $0x168] sm:$0xf0] }
 0x966   : > { %6547 = vmatpush.bf16.msrb.mxu3 %v11089_v50  ;;  %6561 = vmatpush.bf16.msra.mxu0 %v11473_v40  ;;  %v13805_v50 = vld [vmem:[%s14939_s20 + $0x464] sm:$0xf0]  ;;  %v11621_v40 = vor.u32 %v13798_v62, %v11618_v46  ;;  %v13943_v62 = vld [vmem:[%s14939_s20 + $0x8bc] sm:$0xf]  ;;  %v12202_v46 = vld [vmem:[%s14939_s20 + $0x8e8] sm:$0xf0] }
 0x967   : > { %6575 = vmatpush.bf16.msra.mxu1 %v11857_v55  ;;  %6589 = vmatpush.bf16.msrb.mxu2 %v11093_v30  ;;  %v11241_v55 = vor.u32 %v13709_v14, %v11240_v56  ;;  %v11625_v30 = vor.u32 %v13805_v50, %v11624_v48  ;;  %v12152_v56 = vld [vmem:[%s14939_s20 + $0x858] sm:$0xf]  ;;  %v13937_v14 = vld [vmem:[%s14939_s20 + $0x884] sm:$0xf0]  ;;  %v12205_v50 = vor.u32 %v13943_v62, %v12202_v46  ;;  %v13799_v11 = vld [vmem:[%s14939_s20 + $0x43c] sm:$0xf] }
 0x968   : > { %v11626_v52 = vld [vmem:[%s14939_s20 + $0x468] sm:$0xf0]  ;;  %v11960_v62 = vld [vmem:[%s14939_s20 + $0x6d8] sm:$0xf]  ;;  %v13889_v46 = vld [vmem:[%s14939_s20 + $0x704] sm:$0xf0] }
 0x969   : > { %6548 = vmatmul.bf16.vlgmr.msrb.gmra.mxu3 %v16538_v33  ;;  %6562 = vmatmul.bf16.vlgmr.msra.gmra.mxu0 %v16542_v9 }
 0x96a   : > { %6596 = vmatpush.bf16.msra.mxu3 %v11813_v57  ;;  %6610 = vmatpush.bf16.msrb.mxu0 %v12197_v23  ;;  %v13882_v57 = vld [vmem:[%s14939_s20 + $0x6d4] sm:$0xf]  ;;  %v11954_v23 = vld [vmem:[%s14939_s20 + $0x700] sm:$0xf0] }
 0x96b   : > { %6624 = vmatpush.bf16.msrb.mxu1 %v11433_v29  ;;  %6638 = vmatpush.bf16.msra.mxu2 %v11817_v38  ;;  %v11576_v29 = vld [vmem:[%s14939_s20 + $0x3d8] sm:$0xf]  ;;  %v13793_v38 = vld [vmem:[%s14939_s20 + $0x404] sm:$0xf0]  ;;  %v11957_v60 = vor.u32 %v13882_v57, %v11954_v23  ;;  %v12153_v57 = vor.u32 %v13937_v14, %v12152_v56  ;;  %v13787_v56 = vld [vmem:[%s14939_s20 + $0x3dc] sm:$0xf] }
 0x96c   : > { %6576 = vmatmul.bf16.vlgmr.msra.gmra.mxu1 %v16546_v4  ;;  %6590 = vmatmul.bf16.vlgmr.msrb.gmra.mxu2 %v16538_v33  ;;  %v11577_v37 = vor.u32 %v13793_v38, %v11576_v29  ;;  %v11773_v29 = vor.u32 %v13835_v45, %v11770_v27  ;;  %v11578_v14 = vld [vmem:[%s14939_s20 + $0x408] sm:$0xf0]  ;;  %v11912_v45 = vld [vmem:[%s14939_s20 + $0x678] sm:$0xf]  ;;  %v13877_v27 = vld [vmem:[%s14939_s20 + $0x6a4] sm:$0xf0] }
 0x96e   : > { %6597 = vmatpush.bf16.msra.mxu3 %v11765_v19  ;;  %6611 = vmatpush.bf16.msrb.mxu0 %v12149_v7  ;;  %v13870_v19 = vld [vmem:[%s14939_s20 + $0x674] sm:$0xf]  ;;  %v11906_v7 = vld [vmem:[%s14939_s20 + $0x6a0] sm:$0xf0] }
 0x96f   : > { %6625 = vmatpush.bf16.msrb.mxu1 %v11385_v58  ;;  %6639 = vmatpush.bf16.msra.mxu2 %v11769_v13  ;;  %v11528_v58 = vld [vmem:[%s14939_s20 + $0x378] sm:$0xf]  ;;  %v13781_v13 = vld [vmem:[%s14939_s20 + $0x3a4] sm:$0xf0]  ;;  %v11909_v15 = vor.u32 %v13870_v19, %v11906_v7  ;;  %v12105_v19 = vor.u32 %v13925_v1, %v12104_v53  ;;  %v13775_v53 = vld [vmem:[%s14939_s20 + $0x37c] sm:$0xf] }
 0x970   : > { %v11530_v1 = vld [vmem:[%s14939_s20 + $0x3a8] sm:$0xf0] }
 0x972   : > { %6598 = vmatpush.bf16.msra.mxu3 %v11717_v51  ;;  %6612 = vmatpush.bf16.msrb.mxu0 %v12101_v36  ;;  %v11145_v51 = vor.u32 %v13685_v16, %v11144_v8  ;;  %v11529_v36 = vor.u32 %v13781_v13, %v11528_v58  ;;  %v12056_v8 = vld [vmem:[%s14939_s20 + $0x798] sm:$0xf]  ;;  %v13913_v16 = vld [vmem:[%s14939_s20 + $0x7c4] sm:$0xf0]  ;;  %v11725_v58 = vor.u32 %v13823_v59, %v11722_v34 }
 0x973   : > { %6626 = vmatpush.bf16.msrb.mxu1 %v11337_v63  ;;  %6640 = vmatpush.bf16.msra.mxu2 %v11721_v26  ;;  %v11480_v63 = vld [vmem:[%s14939_s20 + $0x318] sm:$0xf]  ;;  %v13769_v26 = vld [vmem:[%s14939_s20 + $0x344] sm:$0xf0] }
 0x974   : > { %v13865_v34 = vld [vmem:[%s14939_s20 + $0x644] sm:$0xf0] }
 0x976   : > { %6599 = vmatpush.bf16.msra.mxu3 %v11669_v25  ;;  %6613 = vmatpush.bf16.msrb.mxu0 %v12053_v47  ;;  %v11861_v25 = vor.u32 %v13858_v20, %v11858_v61  ;;  %v11818_v47 = vld [vmem:[%s14939_s20 + $0x5e8] sm:$0xf0]  ;;  %v13907_v20 = vld [vmem:[%s14939_s20 + $0x79c] sm:$0xf] }
 0x977   : > { %6627 = vmatpush.bf16.msrb.mxu1 %v11289_v54  ;;  %6641 = vmatpush.bf16.msra.mxu2 %v11673_v42  ;;  %v11097_v54 = vor.u32 %v13673_v41, %v11096_v6  ;;  %v11481_v42 = vor.u32 %v13769_v26, %v11480_v63  ;;  %v11821_v48 = vor.u32 %v13847_v21, %v11818_v47  ;;  %v12058_v61 = vld [vmem:[%s14939_s20 + $0x7c8] sm:$0xf0]  ;;  %v12008_v6 = vld [vmem:[%s14939_s20 + $0x738] sm:$0xf]  ;;  %v13901_v41 = vld [vmem:[%s14939_s20 + $0x764] sm:$0xf0] }
 0x978   : > { %v12061_v26 = vor.u32 %v13907_v20, %v12058_v61  ;;  %v13895_v21 = vld [vmem:[%s14939_s20 + $0x73c] sm:$0xf]  ;;  %v11245_v47 = vor.u32 %v13703_v18, %v11242_v28  ;;  %v12208_v20 = vld [vmem:[%s14939_s20 + $0x8c0] sm:$0xf] }
 0x97a   : > { %6600 = vmatpush.bf16.msra.mxu3 %v11621_v40  ;;  %6614 = vmatpush.bf16.msrb.mxu0 %v12005_v44  ;;  %v13739_v40 = vld [vmem:[%s14939_s20 + $0x25c] sm:$0xf]  ;;  %v11386_v44 = vld [vmem:[%s14939_s20 + $0x288] sm:$0xf0] }
 0x97b   : > { %6628 = vmatpush.bf16.msrb.mxu1 %v11241_v55  ;;  %6642 = vmatpush.bf16.msra.mxu2 %v11625_v30  ;;  %v13931_v55 = vld [vmem:[%s14939_s20 + $0x85c] sm:$0xf]  ;;  %v12154_v30 = vld [vmem:[%s14939_s20 + $0x888] sm:$0xf0]  ;;  %v11389_v23 = vor.u32 %v13739_v40, %v11386_v44  ;;  %v11961_v40 = vor.u32 %v13889_v46, %v11960_v62  ;;  %v12160_v62 = vld [vmem:[%s14939_s20 + $0x860] sm:$0xf] }
 0x97c   : > { %v12157_v38 = vor.u32 %v13931_v55, %v12154_v30  ;;  %v11581_v55 = vor.u32 %v13787_v56, %v11578_v14  ;;  %v13938_v46 = vld [vmem:[%s14939_s20 + $0x88c] sm:$0xf0]  ;;  %v11344_v56 = vld [vmem:[%s14939_s20 + $0x200] sm:$0xf] }
 0x97d   : > { %v13734_v14 = vld [vmem:[%s14939_s20 + $0x22c] sm:$0xf0] }
 0x97e   : > { %6601 = vmatpush.bf16.msra.mxu3 %v11573_v32  ;;  %6615 = vmatpush.bf16.msrb.mxu0 %v11957_v60  ;;  %v13727_v32 = vld [vmem:[%s14939_s20 + $0x1fc] sm:$0xf]  ;;  %v11338_v60 = vld [vmem:[%s14939_s20 + $0x228] sm:$0xf0] }
 0x97f   : > { %6629 = vmatpush.bf16.msrb.mxu1 %v11193_v3  ;;  %6643 = vmatpush.bf16.msra.mxu2 %v11577_v37  ;;  %v13919_v3 = vld [vmem:[%s14939_s20 + $0x7fc] sm:$0xf]  ;;  %v12106_v37 = vld [vmem:[%s14939_s20 + $0x828] sm:$0xf0]  ;;  %v11341_v7 = vor.u32 %v13727_v32, %v11338_v60  ;;  %v11864_v32 = vld [vmem:[%s14939_s20 + $0x618] sm:$0xf]  ;;  %v11913_v60 = vor.u32 %v13877_v27, %v11912_v45 }
 0x980   : > { %v12109_v13 = vor.u32 %v13919_v3, %v12106_v37  ;;  %v13667_v3 = vld [vmem:[%s14939_s20 + $0x1c] sm:$0xf]  ;;  %v11098_v37 = vld [vmem:[%s14939_s20 + $0x48] sm:$0xf0]  ;;  %v11865_v61 = vor.u32 %v13865_v34, %v11864_v32  ;;  %v12112_v45 = vld [vmem:[%s14939_s20 + $0x800] sm:$0xf] }
 0x981   : > { %v13926_v27 = vld [vmem:[%s14939_s20 + $0x82c] sm:$0xf0]  ;;  %v11680_v32 = vld [vmem:[%s14939_s20 + $0x4a0] sm:$0xf] }
 0x982   : > { %6602 = vmatpush.bf16.msra.mxu3 %v11525_v24  ;;  %6616 = vmatpush.bf16.msrb.mxu0 %v11909_v15  ;;  %v11290_v24 = vld [vmem:[%s14939_s20 + $0x1c8] sm:$0xf0]  ;;  %v13811_v15 = vld [vmem:[%s14939_s20 + $0x49c] sm:$0xf]  ;;  %v13914_v34 = vld [vmem:[%s14939_s20 + $0x7cc] sm:$0xf0] }
 0x983   : > { %6630 = vmatpush.bf16.msrb.mxu1 %v11145_v51  ;;  %6644 = vmatpush.bf16.msra.mxu2 %v11529_v36  ;;  %v12057_v51 = vor.u32 %v13913_v16, %v12056_v8  ;;  %v11293_v36 = vor.u32 %v13715_v0, %v11290_v24  ;;  %v11677_v63 = vor.u32 %v13811_v15, %v11674_v49  ;;  %v13763_v8 = vld [vmem:[%s14939_s20 + $0x31c] sm:$0xf]  ;;  %v11482_v16 = vld [vmem:[%s14939_s20 + $0x348] sm:$0xf0]  ;;  %v11440_v0 = vld [vmem:[%s14939_s20 + $0x2c0] sm:$0xf] }
 0x984   : > { %v13758_v24 = vld [vmem:[%s14939_s20 + $0x2ec] sm:$0xf0]  ;;  %v11824_v15 = vld [vmem:[%s14939_s20 + $0x5c0] sm:$0xf] }
 0x985   : > { %v13854_v49 = vld [vmem:[%s14939_s20 + $0x5ec] sm:$0xf0]  ;;  %v11441_v18 = vor.u32 %v13758_v24, %v11440_v0  ;;  %v11632_v0 = vld [vmem:[%s14939_s20 + $0x440] sm:$0xf] }
 0x986   : > { %6603 = vmatpush.bf16.msra.mxu3 %v11477_v10  ;;  %6617 = vmatpush.bf16.msrb.mxu0 %v11861_v25  ;;  %v12010_v10 = vld [vmem:[%s14939_s20 + $0x768] sm:$0xf0]  ;;  %v12009_v25 = vor.u32 %v13901_v41, %v12008_v6  ;;  %v13752_v6 = vld [vmem:[%s14939_s20 + $0x2c4] sm:$0xf]  ;;  %v11442_v41 = vld [vmem:[%s14939_s20 + $0x2f0] sm:$0xf0]  ;;  %v11825_v28 = vor.u32 %v13854_v49, %v11824_v15 }
 0x987   : > { %6631 = vmatpush.bf16.msrb.mxu1 %v11097_v54  ;;  %6645 = vmatpush.bf16.msra.mxu2 %v11481_v42  ;;  %v11629_v54 = vor.u32 %v13799_v11, %v11626_v52  ;;  %v12013_v42 = vor.u32 %v13895_v21, %v12010_v10  ;;  %v11392_v11 = vld [vmem:[%s14939_s20 + $0x260] sm:$0xf]  ;;  %v13746_v52 = vld [vmem:[%s14939_s20 + $0x28c] sm:$0xf0]  ;;  %v11445_v10 = vor.u32 %v13752_v6, %v11442_v41 }
 0x988   : > { %v13806_v24 = vld [vmem:[%s14939_s20 + $0x46c] sm:$0xf0]  ;;  %v12016_v15 = vld [vmem:[%s14939_s20 + $0x740] sm:$0xf] }
 0x989   : > { %6604 = vmatmul.bf16.vlgmr.msra.gmra.mxu3 %v16542_v9  ;;  %6618 = vmatmul.bf16.vlgmr.msrb.gmra.mxu0 %v16546_v4  ;;  %v13902_v49 = vld [vmem:[%s14939_s20 + $0x76c] sm:$0xf0]  ;;  %v11633_v6 = vor.u32 %v13806_v24, %v11632_v0  ;;  %v11200_v41 = vld [vmem:[%s14939_s20 + $0xe0] sm:$0xf]  ;;  %v13759_v0 = vld [vmem:[%s14939_s20 + $0x2f4] sm:$0xf0] }
 0x98a   : > { %6652 = vmatpush.bf16.msrb.mxu3 %v12201_v2  ;;  %6666 = vmatpush.bf16.msra.mxu0 %v11437_v39  ;;  %v13691_v2 = vld [vmem:[%s14939_s20 + $0xdc] sm:$0xf]  ;;  %v11194_v39 = vld [vmem:[%s14939_s20 + $0x108] sm:$0xf0]  ;;  %v11832_v24 = vld [vmem:[%s14939_s20 + $0x5c8] sm:$0xf] }
 0x98b   : > { %6680 = vmatpush.bf16.msra.mxu1 %v11821_v48  ;;  %6694 = vmatpush.bf16.msrb.mxu2 %v12205_v50  ;;  %v13883_v48 = vld [vmem:[%s14939_s20 + $0x6dc] sm:$0xf]  ;;  %v11962_v50 = vld [vmem:[%s14939_s20 + $0x708] sm:$0xf0]  ;;  %v11197_v44 = vor.u32 %v13691_v2, %v11194_v39  ;;  %v11393_v2 = vor.u32 %v13746_v52, %v11392_v11  ;;  %v13794_v11 = vld [vmem:[%s14939_s20 + $0x40c] sm:$0xf0] }
 0x98c   : > { %6632 = vmatmul.bf16.vlgmr.msrb.gmra.mxu1 %v16538_v33  ;;  %6646 = vmatmul.bf16.vlgmr.msra.gmra.mxu2 %v16542_v9  ;;  %v11965_v30 = vor.u32 %v13883_v48, %v11962_v50  ;;  %v12161_v48 = vor.u32 %v13938_v46, %v12160_v62  ;;  %v11968_v52 = vld [vmem:[%s14939_s20 + $0x6e0] sm:$0xf] }
 0x98e   : > { %6653 = vmatpush.bf16.msrb.mxu3 %v12153_v57  ;;  %6667 = vmatpush.bf16.msra.mxu0 %v11389_v23  ;;  %v13679_v57 = vld [vmem:[%s14939_s20 + $0x7c] sm:$0xf]  ;;  %v11146_v23 = vld [vmem:[%s14939_s20 + $0xa8] sm:$0xf0] }
 0x98f   : > { %6681 = vmatpush.bf16.msra.mxu1 %v11773_v29  ;;  %6695 = vmatpush.bf16.msrb.mxu2 %v12157_v38  ;;  %v13871_v29 = vld [vmem:[%s14939_s20 + $0x67c] sm:$0xf]  ;;  %v11914_v38 = vld [vmem:[%s14939_s20 + $0x6a8] sm:$0xf0]  ;;  %v11149_v59 = vor.u32 %v13679_v57, %v11146_v23  ;;  %v11345_v57 = vor.u32 %v13734_v14, %v11344_v56 }
 0x992   : > { %6654 = vmatpush.bf16.msrb.mxu3 %v12105_v19  ;;  %6668 = vmatpush.bf16.msra.mxu0 %v11341_v7  ;;  %v11533_v19 = vor.u32 %v13775_v53, %v11530_v1  ;;  %v11917_v7 = vor.u32 %v13871_v29, %v11914_v38  ;;  %v11296_v53 = vld [vmem:[%s14939_s20 + $0x1a0] sm:$0xf]  ;;  %v13722_v1 = vld [vmem:[%s14939_s20 + $0x1cc] sm:$0xf0]  ;;  %v12113_v29 = vor.u32 %v13926_v27, %v12112_v45  ;;  %v13680_v45 = vld [vmem:[%s14939_s20 + $0x84] sm:$0xf] }
 0x993   : > { %6682 = vmatpush.bf16.msra.mxu1 %v11725_v58  ;;  %6696 = vmatpush.bf16.msrb.mxu2 %v12109_v13  ;;  %v13859_v58 = vld [vmem:[%s14939_s20 + $0x61c] sm:$0xf]  ;;  %v11866_v13 = vld [vmem:[%s14939_s20 + $0x648] sm:$0xf0]  ;;  %v11154_v27 = vld [vmem:[%s14939_s20 + $0xb0] sm:$0xf0] }
 0x996   : > { %6655 = vmatpush.bf16.msrb.mxu3 %v12057_v51  ;;  %6669 = vmatpush.bf16.msra.mxu0 %v11293_v36  ;;  %v11101_v51 = vor.u32 %v13667_v3, %v11098_v37  ;;  %v13950_v36 = vld [vmem:[%s14939_s20 + $0x8ec] sm:$0xf0]  ;;  %v13716_v3 = vld [vmem:[%s14939_s20 + $0x1a4] sm:$0xf]  ;;  %v11298_v37 = vld [vmem:[%s14939_s20 + $0x1d0] sm:$0xf0] }
 0x997   : > { %6683 = vmatpush.bf16.msra.mxu1 %v11677_v63  ;;  %6697 = vmatpush.bf16.msrb.mxu2 %v12061_v26  ;;  %v11485_v63 = vor.u32 %v13763_v8, %v11482_v16  ;;  %v11869_v26 = vor.u32 %v13859_v58, %v11866_v13  ;;  %v12209_v21 = vor.u32 %v13950_v36, %v12208_v20  ;;  %v11248_v8 = vld [vmem:[%s14939_s20 + $0x140] sm:$0xf]  ;;  %v13710_v16 = vld [vmem:[%s14939_s20 + $0x16c] sm:$0xf0]  ;;  %v13704_v20 = vld [vmem:[%s14939_s20 + $0x144] sm:$0xf] }
 0x998   : > { %v11301_v13 = vor.u32 %v13716_v3, %v11298_v37  ;;  %v11249_v36 = vor.u32 %v13710_v16, %v11248_v8  ;;  %v11106_v3 = vld [vmem:[%s14939_s20 + $0x50] sm:$0xf0]  ;;  %v13848_v37 = vld [vmem:[%s14939_s20 + $0x5c4] sm:$0xf]  ;;  %v11448_v16 = vld [vmem:[%s14939_s20 + $0x2c8] sm:$0xf] }
 0x999   : > { %v12210_v8 = vld [vmem:[%s14939_s20 + $0x8f0] sm:$0xf0] }
 0x99a   : > { %6656 = vmatpush.bf16.msrb.mxu3 %v12009_v25  ;;  %6670 = vmatpush.bf16.msra.mxu0 %v11245_v47  ;;  %v11776_v25 = vld [vmem:[%s14939_s20 + $0x560] sm:$0xf]  ;;  %v13842_v47 = vld [vmem:[%s14939_s20 + $0x58c] sm:$0xf0] }
 0x99b   : > { %6684 = vmatpush.bf16.msra.mxu1 %v11629_v54  ;;  %6698 = vmatpush.bf16.msrb.mxu2 %v12013_v42  ;;  %v13740_v54 = vld [vmem:[%s14939_s20 + $0x264] sm:$0xf]  ;;  %v11394_v42 = vld [vmem:[%s14939_s20 + $0x290] sm:$0xf0]  ;;  %v11777_v39 = vor.u32 %v13842_v47, %v11776_v25 }
 0x99c   : > { %v11397_v50 = vor.u32 %v13740_v54, %v11394_v42  ;;  %v11202_v25 = vld [vmem:[%s14939_s20 + $0x110] sm:$0xf0]  ;;  %v11152_v54 = vld [vmem:[%s14939_s20 + $0x80] sm:$0xf]  ;;  %v13686_v42 = vld [vmem:[%s14939_s20 + $0xac] sm:$0xf0] }
 0x99e   : > { %6657 = vmatpush.bf16.msrb.mxu3 %v11961_v40  ;;  %6671 = vmatpush.bf16.msra.mxu0 %v11197_v44  ;;  %v11728_v40 = vld [vmem:[%s14939_s20 + $0x500] sm:$0xf]  ;;  %v13830_v44 = vld [vmem:[%s14939_s20 + $0x52c] sm:$0xf0] }
 0x99f   : > { %6685 = vmatpush.bf16.msra.mxu1 %v11581_v55  ;;  %6699 = vmatpush.bf16.msrb.mxu2 %v11965_v30  ;;  %v13728_v55 = vld [vmem:[%s14939_s20 + $0x204] sm:$0xf]  ;;  %v11346_v30 = vld [vmem:[%s14939_s20 + $0x230] sm:$0xf0]  ;;  %v11729_v23 = vor.u32 %v13830_v44, %v11728_v40  ;;  %v11920_v40 = vld [vmem:[%s14939_s20 + $0x680] sm:$0xf] }
 0x9a0   : > { %v11349_v38 = vor.u32 %v13728_v55, %v11346_v30  ;;  %v13878_v44 = vld [vmem:[%s14939_s20 + $0x6ac] sm:$0xf0]  ;;  %v11104_v55 = vld [vmem:[%s14939_s20 + $0x20] sm:$0xf]  ;;  %v11153_v30 = vor.u32 %v13686_v42, %v11152_v54 }
 0x9a1   : > { %v16917_v54 = vld [vmem:[%s14971_s14] sm:$0xff] }
 0x9a2   : > { %6658 = vmatpush.bf16.msrb.mxu3 %v11913_v60  ;;  %6672 = vmatpush.bf16.msra.mxu0 %v11149_v59  ;;  %v13818_v60 = vld [vmem:[%s14939_s20 + $0x4cc] sm:$0xf0]  ;;  %v12064_v59 = vld [vmem:[%s14939_s20 + $0x7a0] sm:$0xf] }
 0x9a3   : > { %6686 = vmatpush.bf16.msra.mxu1 %v11533_v19  ;;  %6700 = vmatpush.bf16.msrb.mxu2 %v11917_v7  ;;  %v11297_v19 = vor.u32 %v13722_v1, %v11296_v53  ;;  %v11681_v7 = vor.u32 %v13818_v60, %v11680_v32  ;;  %v12065_v58 = vor.u32 %v13914_v34, %v12064_v59  ;;  %v11488_v53 = vld [vmem:[%s14939_s20 + $0x320] sm:$0xf]  ;;  %v13770_v1 = vld [vmem:[%s14939_s20 + $0x34c] sm:$0xf0]  ;;  %v13668_v34 = vld [vmem:[%s14939_s20 + $0x24] sm:$0xf] }
 0x9a4   : > { %v11157_v32 = vor.u32 %v13680_v45, %v11154_v27  ;;  %v11872_v60 = vld [vmem:[%s14939_s20 + $0x620] sm:$0xf]  ;;  %v13866_v59 = vld [vmem:[%s14939_s20 + $0x64c] sm:$0xf0]  ;;  %v13920_v45 = vld [vmem:[%s14939_s20 + $0x804] sm:$0xf] }
 0x9a5   : > { %v12114_v27 = vld [vmem:[%s14939_s20 + $0x830] sm:$0xf0] }
 0x9a6   : > { %6659 = vmatpush.bf16.msrb.mxu3 %v11865_v61  ;;  %6673 = vmatpush.bf16.msra.mxu0 %v11101_v51  ;;  %v11250_v61 = vld [vmem:[%s14939_s20 + $0x170] sm:$0xf0]  ;;  %v16860_v51 = vpop.f32.mrf.mxu0 }
 0x9a7   : > { %6687 = vmatpush.bf16.msra.mxu1 %v11485_v63  ;;  %6701 = vmatpush.bf16.msrb.mxu2 %v11869_v26  ;;  %v13698_v63 = vld [vmem:[%s14939_s20 + $0x10c] sm:$0xf0]  ;;  %v12017_v26 = vor.u32 %v13902_v49, %v12016_v15  ;;  %v13855_v15 = vld [vmem:[%s14939_s20 + $0x5f4] sm:$0xf0]  ;;  %v11873_v49 = vor.u32 %v13866_v59, %v11872_v60  ;;  %v11682_v60 = vld [vmem:[%s14939_s20 + $0x4d0] sm:$0xf0] }
 0x9a8   : > { %v11201_v62 = vor.u32 %v13698_v63, %v11200_v41  ;;  %v13836_v41 = vld [vmem:[%s14939_s20 + $0x564] sm:$0xf]  ;;  %v11778_v63 = vld [vmem:[%s14939_s20 + $0x590] sm:$0xf0] }
 0x9a9   : > { %6660 = vmatmul.bf16.vlgmr.msrb.gmra.mxu3 %v16546_v4  ;;  %6674 = vmatmul.bf16.vlgmr.msra.gmra.mxu0 %v16538_v33  ;;  %v11781_v42 = vor.u32 %v13836_v41, %v11778_v63  ;;  %v12018_v63 = vld [vmem:[%s14939_s20 + $0x770] sm:$0xf0] }
 0x9aa   : > { %6708 = vmatpush.bf16.msra.mxu3 %v11441_v18  ;;  %6722 = vmatpush.bf16.msrb.mxu0 %v11825_v28  ;;  %v11253_v18 = vor.u32 %v13704_v20, %v11250_v61  ;;  %v11584_v28 = vld [vmem:[%s14939_s20 + $0x3e0] sm:$0xf]  ;;  %v11109_v20 = vor.u32 %v13668_v34, %v11106_v3  ;;  %v13908_v3 = vld [vmem:[%s14939_s20 + $0x7a4] sm:$0xf] }
 0x9ab   : > { %6736 = vmatpush.bf16.msrb.mxu1 %v12209_v21  ;;  %6750 = vmatpush.bf16.msra.mxu2 %v11445_v10  ;;  %v13890_v21 = vld [vmem:[%s14939_s20 + $0x70c] sm:$0xf0]  ;;  %v13692_v10 = vld [vmem:[%s14939_s20 + $0xe4] sm:$0xf]  ;;  %v16870_v47 = vpop.f32.mrf.mxu3  ;;  %v11585_v46 = vor.u32 %v13794_v11, %v11584_v28  ;;  %v11449_v28 = vor.u32 %v13759_v0, %v11448_v16  ;;  %v11833_v11 = vor.u32 %v13855_v15, %v11832_v24  ;;  %v11688_v16 = vld [vmem:[%s14939_s20 + $0x4a8] sm:$0xf] }
 0x9ac   : > { %6688 = vmatmul.bf16.vlgmr.msra.gmra.mxu1 %v16542_v9  ;;  %6702 = vmatmul.bf16.vlgmr.msrb.gmra.mxu2 %v16546_v4  ;;  %v11969_v56 = vor.u32 %v13890_v21, %v11968_v52  ;;  %v11205_v14 = vor.u32 %v13692_v10, %v11202_v25  ;;  %v13932_v52 = vld [vmem:[%s14939_s20 + $0x864] sm:$0xf]  ;;  %v12162_v21 = vld [vmem:[%s14939_s20 + $0x890] sm:$0xf0]  ;;  %v11400_v10 = vld [vmem:[%s14939_s20 + $0x268] sm:$0xf] }
 0x9ad   : > { %v13747_v25 = vld [vmem:[%s14939_s20 + $0x294] sm:$0xf0] }
 0x9ae   : > { %6709 = vmatpush.bf16.msra.mxu3 %v11393_v2  ;;  %6723 = vmatpush.bf16.msrb.mxu0 %v11777_v39  ;;  %v16874_v2 = vpop.f32.mrf.mxu1  ;;  %v16876_v39 = vpop.f32.mrf.mxu2 }
 0x9af   : > { %6737 = vmatpush.bf16.msrb.mxu1 %v12161_v48  ;;  %6751 = vmatpush.bf16.msra.mxu2 %v11397_v50  ;;  %v11536_v48 = vld [vmem:[%s14939_s20 + $0x380] sm:$0xf]  ;;  %v13782_v50 = vld [vmem:[%s14939_s20 + $0x3ac] sm:$0xf0] }
 0x9b2   : > { %6710 = vmatpush.bf16.msra.mxu3 %v11345_v57  ;;  %6724 = vmatpush.bf16.msrb.mxu0 %v11729_v23  ;;  %v11537_v57 = vor.u32 %v13782_v50, %v11536_v48  ;;  %v13674_v23 = vld [vmem:[%s14939_s20 + $0x4c] sm:$0xf0]  ;;  %v11730_v48 = vld [vmem:[%s14939_s20 + $0x530] sm:$0xf0] }
 0x9b3   : > { %6738 = vmatpush.bf16.msrb.mxu1 %v12113_v29  ;;  %6752 = vmatpush.bf16.msra.mxu2 %v11349_v38  ;;  %v16888_v29 = vpop.f32.mrf.mxu0  ;;  %v11921_v38 = vor.u32 %v13878_v44, %v11920_v40  ;;  %v16902_v61 = vpop.f32.mrf.mxu3  ;;  %v11401_v40 = vor.u32 %v13747_v25, %v11400_v10  ;;  %v13807_v10 = vld [vmem:[%s14939_s20 + $0x474] sm:$0xf0] }
 0x9b6   : > { %6711 = vmatpush.bf16.msra.mxu3 %v11297_v19  ;;  %6725 = vmatpush.bf16.msrb.mxu0 %v11681_v7  ;;  %v11826_v19 = vld [vmem:[%s14939_s20 + $0x5f0] sm:$0xf0]  ;;  %v13944_v7 = vld [vmem:[%s14939_s20 + $0x8c4] sm:$0xf] }
 0x9b7   : > { %6739 = vmatpush.bf16.msrb.mxu1 %v12065_v58  ;;  %6753 = vmatpush.bf16.msra.mxu2 %v11301_v13  ;;  %v11105_v58 = vor.u32 %v13674_v23, %v11104_v55  ;;  %v11489_v13 = vor.u32 %v13770_v1, %v11488_v53  ;;  %v11352_v55 = vld [vmem:[%s14939_s20 + $0x208] sm:$0xf]  ;;  %v13831_v23 = vld [vmem:[%s14939_s20 + $0x534] sm:$0xf0]  ;;  %v4908_v53 = vperm.slane %v16917_v54, 0 }
 0x9ba   : > { %6712 = vmatpush.bf16.msra.mxu3 %v11249_v36  ;;  %6726 = vmatpush.bf16.msrb.mxu0 %v11633_v6  ;;  %v11829_v36 = vor.u32 %v13848_v37, %v11826_v19  ;;  %v12213_v6 = vor.u32 %v13944_v7, %v12210_v8  ;;  %v12066_v37 = vld [vmem:[%s14939_s20 + $0x7d0] sm:$0xf0]  ;;  %v11304_v19 = vld [vmem:[%s14939_s20 + $0x1a8] sm:$0xf]  ;;  %v13723_v8 = vld [vmem:[%s14939_s20 + $0x1d4] sm:$0xf0] }
 0x9bb   : > { %6740 = vmatpush.bf16.msrb.mxu1 %v12017_v26  ;;  %6754 = vmatpush.bf16.msra.mxu2 %v11253_v18  ;;  %v16906_v26 = vpop.f32.mrf.mxu1  ;;  %v16908_v18 = vpop.f32.mrf.mxu2 }
 0x9bc   : > { %v16921_v50 = vpop.f32.mrf.mxu0  ;;  %v6437_v7 = vpop.f32.mrf.mxu3 }
 0x9be   : > { %6713 = vmatpush.bf16.msra.mxu3 %v11201_v62  ;;  %6727 = vmatpush.bf16.msrb.mxu0 %v11585_v46  ;;  %v11784_v62 = vld [vmem:[%s14939_s20 + $0x568] sm:$0xf]  ;;  %v13843_v46 = vld [vmem:[%s14939_s20 + $0x594] sm:$0xf0] }
 0x9bf   : > { %6741 = vmatpush.bf16.msrb.mxu1 %v11969_v56  ;;  %6755 = vmatpush.bf16.msra.mxu2 %v11205_v14  ;;  %v12165_v56 = vor.u32 %v13932_v52, %v12162_v21  ;;  %v13824_v14 = vld [vmem:[%s14939_s20 + $0x504] sm:$0xf]  ;;  %v11785_v44 = vor.u32 %v13843_v46, %v11784_v62  ;;  %v13711_v52 = vld [vmem:[%s14939_s20 + $0x174] sm:$0xf0]  ;;  %v11640_v21 = vld [vmem:[%s14939_s20 + $0x448] sm:$0xf] }
 0x9c0   : > { %v11733_v1 = vor.u32 %v13824_v14, %v11730_v48  ;;  %v4909_v62 = vperm.slane %v16917_v54, 1  ;;  %v11586_v14 = vld [vmem:[%s14939_s20 + $0x410] sm:$0xf0] }
 0x9c2   : > { %6714 = vmatpush.bf16.msra.mxu3 %v11153_v30  ;;  %6728 = vmatpush.bf16.msrb.mxu0 %v11537_v57  ;;  %v13735_v30 = vld [vmem:[%s14939_s20 + $0x234] sm:$0xf0]  ;;  %v11736_v57 = vld [vmem:[%s14939_s20 + $0x508] sm:$0xf] }
 0x9c3   : > { %6742 = vmatpush.bf16.msrb.mxu1 %v11921_v38  ;;  %6756 = vmatpush.bf16.msra.mxu2 %v11157_v32  ;;  %v12117_v38 = vor.u32 %v13920_v45, %v12114_v27  ;;  %v13812_v32 = vld [vmem:[%s14939_s20 + $0x4a4] sm:$0xf]  ;;  %v11353_v59 = vor.u32 %v13735_v30, %v11352_v55  ;;  %v11737_v34 = vor.u32 %v13831_v23, %v11736_v57  ;;  %v16943_v0 = vpop.f32.mrf.mxu1  ;;  %v16945_v24 = vpop.f32.mrf.mxu2  ;;  %v11208_v45 = vld [vmem:[%s14939_s20 + $0xe8] sm:$0xf]  ;;  %v13699_v55 = vld [vmem:[%s14939_s20 + $0x114] sm:$0xf0] }
 0x9c4   : > { %v11685_v15 = vor.u32 %v13812_v32, %v11682_v60  ;;  %v16958_v46 = vpop.f32.mrf.mxu0  ;;  %v11592_v30 = vld [vmem:[%s14939_s20 + $0x3e8] sm:$0xf]  ;;  %v13795_v57 = vld [vmem:[%s14939_s20 + $0x414] sm:$0xf0]  ;;  %v13776_v60 = vld [vmem:[%s14939_s20 + $0x384] sm:$0xf] }
 0x9c6   : > { %6715 = vmatpush.bf16.msra.mxu3 %v11105_v58  ;;  %6729 = vmatpush.bf16.msrb.mxu0 %v11489_v13  ;;  %v13819_v58 = vld [vmem:[%s14939_s20 + $0x4d4] sm:$0xf0]  ;;  %v6382_v13 = vadd.f32 %v16870_v47, %v4908_v53  ;;  %v13896_v47 = vld [vmem:[%s14939_s20 + $0x744] sm:$0xf] }
 0x9c7   : > { %6743 = vmatpush.bf16.msrb.mxu1 %v11873_v49  ;;  %6757 = vmatpush.bf16.msra.mxu2 %v11109_v20  ;;  %v12069_v49 = vor.u32 %v13908_v3, %v12066_v37  ;;  %v13800_v20 = vld [vmem:[%s14939_s20 + $0x444] sm:$0xf]  ;;  %v11689_v41 = vor.u32 %v13819_v58, %v11688_v16  ;;  %v11593_v37 = vor.u32 %v13795_v57, %v11592_v30  ;;  %v13687_v16 = vld [vmem:[%s14939_s20 + $0xb4] sm:$0xf0]  ;;  %v13945_v30 = vld [vmem:[%s14939_s20 + $0x8cc] sm:$0xf] }
 0x9c8   : > { %v6396_v25 = vadd.f32 %v16860_v51, %v6382_v13  ;;  %v13884_v51 = vld [vmem:[%s14939_s20 + $0x6e4] sm:$0xf]  ;;  %v11544_v13 = vld [vmem:[%s14939_s20 + $0x388] sm:$0xf]  ;;  %v12218_v57 = vld [vmem:[%s14939_s20 + $0x8f8] sm:$0xf0] }
 0x9c9   : > { %6716 = vmatmul.bf16.vlgmr.msra.gmra.mxu3 %v16538_v33  ;;  %6730 = vmatmul.bf16.vlgmr.msrb.gmra.mxu0 %v16542_v9 }
 0x9ca   : > { %6764 = vmatpush.bf16.msrb.mxu3 %v11829_v36  ;;  %6778 = vmatpush.bf16.msra.mxu0 %v12213_v6  ;;  %v11634_v36 = vld [vmem:[%s14939_s20 + $0x470] sm:$0xf0]  ;;  %v11305_v6 = vor.u32 %v13723_v8, %v11304_v19  ;;  %v16970_v23 = vadd.f32 %v16874_v2, %v6396_v25  ;;  %v11160_v8 = vld [vmem:[%s14939_s20 + $0x88] sm:$0xf]  ;;  %v13675_v25 = vld [vmem:[%s14939_s20 + $0x54] sm:$0xf0] }
 0x9cb   : > { %6792 = vmatpush.bf16.msra.mxu1 %v11449_v28  ;;  %6806 = vmatpush.bf16.msrb.mxu2 %v11833_v11  ;;  %v11256_v28 = vld [vmem:[%s14939_s20 + $0x148] sm:$0xf]  ;;  %v6384_v11 = vadd.f32 %v16902_v61, %v4908_v53  ;;  %v13788_v61 = vld [vmem:[%s14939_s20 + $0x3e4] sm:$0xf]  ;;  %v6424_v53 = vadd.f32 %v16876_v39, %v4909_v62  ;;  %v16976_v3 = vpop.f32.mrf.mxu1  ;;  %v16978_v2 = vpop.f32.mrf.mxu2  ;;  %v11209_v39 = vor.u32 %v13699_v55, %v11208_v45  ;;  %v11922_v19 = vld [vmem:[%s14939_s20 + $0x6b0] sm:$0xf0] }
 0x9cc   : > { %6744 = vmatmul.bf16.vlgmr.msrb.gmra.mxu1 %v16546_v4  ;;  %6758 = vmatmul.bf16.vlgmr.msra.gmra.mxu2 %v16538_v33  ;;  %v11257_v48 = vor.u32 %v13711_v52, %v11256_v28  ;;  %v11874_v28 = vld [vmem:[%s14939_s20 + $0x650] sm:$0xf0]  ;;  %v6507_v52 = vpop.f32.mrf.mxu0  ;;  %v11834_v55 = vld [vmem:[%s14939_s20 + $0x5f8] sm:$0xf0] }
 0x9cd   : > { %v6398_v27 = vadd.f32 %v16888_v29, %v6384_v11  ;;  %v11538_v29 = vld [vmem:[%s14939_s20 + $0x3b0] sm:$0xf0] }
 0x9ce   : > { %6765 = vmatpush.bf16.msrb.mxu3 %v11781_v42  ;;  %6779 = vmatpush.bf16.msra.mxu0 %v12165_v56  ;;  %v11637_v42 = vor.u32 %v13800_v20, %v11634_v36  ;;  %v12021_v56 = vor.u32 %v13896_v47, %v12018_v63  ;;  %v4911_v20 = vperm.slane %v16917_v54, 3  ;;  %v13764_v36 = vld [vmem:[%s14939_s20 + $0x324] sm:$0xf]  ;;  %v11490_v47 = vld [vmem:[%s14939_s20 + $0x350] sm:$0xf0] }
 0x9cf   : > { %6793 = vmatpush.bf16.msra.mxu1 %v11401_v40  ;;  %6807 = vmatpush.bf16.msrb.mxu2 %v11785_v44  ;;  %v11641_v40 = vor.u32 %v13807_v10, %v11640_v21  ;;  %v11970_v44 = vld [vmem:[%s14939_s20 + $0x710] sm:$0xf0]  ;;  %v16984_v58 = vadd.f32 %v16906_v26, %v6398_v27  ;;  %v11161_v26 = vor.u32 %v13687_v16, %v11160_v8  ;;  %v13860_v63 = vld [vmem:[%s14939_s20 + $0x624] sm:$0xf]  ;;  %v11112_v10 = vld [vmem:[%s14939_s20 + $0x28] sm:$0xf] }
 0x9d0   : > { %v11973_v32 = vor.u32 %v13884_v51, %v11970_v44  ;;  %v13849_v51 = vld [vmem:[%s14939_s20 + $0x5cc] sm:$0xf]  ;;  %v11493_v44 = vor.u32 %v13764_v36, %v11490_v47  ;;  %v11877_v45 = vor.u32 %v13860_v63, %v11874_v28  ;;  %v11113_v27 = vor.u32 %v13675_v25, %v11112_v10  ;;  %v11786_v36 = vld [vmem:[%s14939_s20 + $0x598] sm:$0xf0]  ;;  %v12120_v10 = vld [vmem:[%s14939_s20 + $0x808] sm:$0xf] }
 0x9d1   : > { %v11837_v16 = vor.u32 %v13849_v51, %v11834_v55  ;;  %v13927_v25 = vld [vmem:[%s14939_s20 + $0x834] sm:$0xf0]  ;;  %v11738_v51 = vld [vmem:[%s14939_s20 + $0x538] sm:$0xf0] }
 0x9d2   : > { %6766 = vmatpush.bf16.msrb.mxu3 %v11733_v1  ;;  %6780 = vmatpush.bf16.msra.mxu0 %v12117_v38  ;;  %v6439_v1 = vpop.f32.mrf.mxu3  ;;  %v11589_v38 = vor.u32 %v13788_v61, %v11586_v14  ;;  %v12216_v61 = vld [vmem:[%s14939_s20 + $0x8c8] sm:$0xf]  ;;  %v13951_v14 = vld [vmem:[%s14939_s20 + $0x8f4] sm:$0xf0] }
 0x9d3   : > { %6794 = vmatpush.bf16.msra.mxu1 %v11353_v59  ;;  %6808 = vmatpush.bf16.msrb.mxu2 %v11737_v34  ;;  %v13872_v59 = vld [vmem:[%s14939_s20 + $0x684] sm:$0xf]  ;;  %v6438_v34 = vadd.f32 %v6437_v7, %v6424_v53  ;;  %v13783_v7 = vld [vmem:[%s14939_s20 + $0x3b4] sm:$0xf0]  ;;  %v4910_v53 = vperm.slane %v16917_v54, 2  ;;  %v6535_v8 = vpop.f32.mrf.mxu2 }
 0x9d4   : > { %v11545_v21 = vor.u32 %v13783_v7, %v11544_v13  ;;  %v12221_v13 = vor.u32 %v13945_v30, %v12218_v57  ;;  %v11402_v7 = vld [vmem:[%s14939_s20 + $0x298] sm:$0xf0] }
 0x9d5   : > { %v6466_v47 = vadd.f32 %v16943_v0, %v4910_v53 }
 0x9d6   : > { %6767 = vmatpush.bf16.msrb.mxu3 %v11685_v15  ;;  %6781 = vmatpush.bf16.msra.mxu0 %v12069_v49  ;;  %v6876_v15 = vmul.f32 %v16970_v23, %v16970_v23  ;;  %v6426_v49 = vadd.f32 %v16908_v18, %v4909_v62  ;;  %v16997_v18 = vadd.f32 %v16921_v50, %v6438_v34  ;;  %v11496_v62 = vld [vmem:[%s14939_s20 + $0x328] sm:$0xf] }
 0x9d7   : > { %6795 = vmatpush.bf16.msra.mxu1 %v11305_v6  ;;  %6809 = vmatpush.bf16.msrb.mxu2 %v11689_v41  ;;  %v11541_v6 = vor.u32 %v13776_v60, %v11538_v29  ;;  %v11925_v41 = vor.u32 %v13872_v59, %v11922_v19  ;;  %v12217_v59 = vor.u32 %v13951_v14, %v12216_v61  ;;  %v6521_v19 = vpop.f32.mrf.mxu1  ;;  %v13729_v61 = vld [vmem:[%s14939_s20 + $0x20c] sm:$0xf]  ;;  %v11354_v14 = vld [vmem:[%s14939_s20 + $0x238] sm:$0xf0] }
 0x9d8   : > { %v6440_v11 = vadd.f32 %v6439_v1, %v6426_v49  ;;  %v6900_v50 = vmul.f32 %v6876_v15, %v16970_v23  ;;  %v6877_v1 = vmul.f32 %v16997_v18, %v16997_v18  ;;  %v13837_v15 = vld [vmem:[%s14939_s20 + $0x56c] sm:$0xf]  ;;  %v6508_v49 = vadd.f32 %v6507_v52, %v4911_v20 }
 0x9d9   : > { %v6480_v0 = vadd.f32 %v16945_v24, %v6466_v47  ;;  %v12122_v24 = vld [vmem:[%s14939_s20 + $0x838] sm:$0xf0] }
 0x9da   : > { %6768 = vmatpush.bf16.msrb.mxu3 %v11637_v42  ;;  %6782 = vmatpush.bf16.msra.mxu0 %v12021_v56  ;;  %v6888_v42 = vmul.f32 %v16984_v58, %v16984_v58  ;;  %v13771_v56 = vld [vmem:[%s14939_s20 + $0x354] sm:$0xf0]  ;;  %v6493_v29 = vpop.f32.mrf.mxu3  ;;  %v6901_v63 = vmul.f32 %v6877_v1, %v16997_v18  ;;  %v12072_v1 = vld [vmem:[%s14939_s20 + $0x7a8] sm:$0xf] }
 0x9db   : > { %6796 = vmatpush.bf16.msra.mxu1 %v11257_v48  ;;  %6810 = vmatpush.bf16.msrb.mxu2 %v11641_v40  ;;  %v13753_v48 = vld [vmem:[%s14939_s20 + $0x2cc] sm:$0xf]  ;;  %v11450_v40 = vld [vmem:[%s14939_s20 + $0x2f8] sm:$0xf0]  ;;  %v17048_v55 = vadd.f32 %v6493_v29, %v6480_v0 }
 0x9dc   : > { %v6912_v60 = vmul.f32 %v6888_v42, %v16984_v58  ;;  %v11453_v34 = vor.u32 %v13753_v48, %v11450_v40  ;;  %v11789_v42 = vor.u32 %v13837_v15, %v11786_v36  ;;  %v6468_v48 = vadd.f32 %v16976_v3, %v4910_v53  ;;  %v13801_v0 = vld [vmem:[%s14939_s20 + $0x44c] sm:$0xf] }
 0x9dd   : > { %v6522_v40 = vadd.f32 %v6521_v19, %v6508_v49  ;;  %v12121_v3 = vor.u32 %v13927_v25, %v12120_v10  ;;  %v11357_v53 = vor.u32 %v13729_v61, %v11354_v14  ;;  %v6878_v49 = vmul.f32 %v17048_v55, %v17048_v55  ;;  %v13705_v10 = vld [vmem:[%s14939_s20 + $0x14c] sm:$0xf]  ;;  %v11258_v25 = vld [vmem:[%s14939_s20 + $0x178] sm:$0xf0] }
 0x9de   : > { %6769 = vmatpush.bf16.msrb.mxu3 %v11589_v38  ;;  %6783 = vmatpush.bf16.msra.mxu0 %v11973_v32  ;;  %v17018_v38 = vadd.f32 %v16958_v46, %v6440_v11  ;;  %v11497_v32 = vor.u32 %v13771_v56, %v11496_v62  ;;  %v13741_v46 = vld [vmem:[%s14939_s20 + $0x26c] sm:$0xf]  ;;  %v6936_v11 = vmul.f32 0.044715, %v6912_v60  ;;  %v6509_v62 = vpop.f32.mrf.mxu0  ;;  %v12026_v61 = vld [vmem:[%s14939_s20 + $0x778] sm:$0xf0] }
 0x9df   : > { %6797 = vmatpush.bf16.msra.mxu1 %v11209_v39  ;;  %6811 = vmatpush.bf16.msrb.mxu2 %v11593_v37  ;;  %v12168_v39 = vld [vmem:[%s14939_s20 + $0x868] sm:$0xf]  ;;  %v13939_v37 = vld [vmem:[%s14939_s20 + $0x894] sm:$0xf0]  ;;  %v17052_v30 = vadd.f32 %v6535_v8, %v6522_v40  ;;  %v6510_v57 = vadd.f32 %v6509_v62, %v4911_v20  ;;  %v6482_v20 = vadd.f32 %v16978_v2, %v6468_v48  ;;  %v6523_v36 = vpop.f32.mrf.mxu1 }
 0x9e0   : > { %v6889_v28 = vmul.f32 %v17018_v38, %v17018_v38  ;;  %v12169_v52 = vor.u32 %v13939_v37, %v12168_v39  ;;  %v13813_v39 = vld [vmem:[%s14939_s20 + $0x4ac] sm:$0xf]  ;;  %v6960_v19 = vadd.f32 %v6936_v11, %v16984_v58  ;;  %v6902_v40 = vmul.f32 %v6878_v49, %v17048_v55 }
 0x9e1   : > { %v6879_v2 = vmul.f32 %v17052_v30, %v17052_v30 }
 0x9e2   : > { %6770 = vmatpush.bf16.msrb.mxu3 %v11541_v6  ;;  %6784 = vmatpush.bf16.msra.mxu0 %v11925_v41  ;;  %v13933_v6 = vld [vmem:[%s14939_s20 + $0x86c] sm:$0xf]  ;;  %v12170_v41 = vld [vmem:[%s14939_s20 + $0x898] sm:$0xf0]  ;;  %v6495_v8 = vpop.f32.mrf.mxu3 }
 0x9e3   : > { %6798 = vmatpush.bf16.msra.mxu1 %v11161_v26  ;;  %6812 = vmatpush.bf16.msrb.mxu2 %v11545_v21  ;;  %v6924_v26 = vmul.f32 0.044715, %v6900_v50  ;;  %v11405_v21 = vor.u32 %v13741_v46, %v11402_v7  ;;  %v12173_v56 = vor.u32 %v13933_v6, %v12170_v41  ;;  %v13825_v50 = vld [vmem:[%s14939_s20 + $0x50c] sm:$0xf]  ;;  %v12074_v46 = vld [vmem:[%s14939_s20 + $0x7d8] sm:$0xf0]  ;;  %v6537_v6 = vpop.f32.mrf.mxu2  ;;  %v17074_v11 = vadd.f32 %v6495_v8, %v6482_v20 }
 0x9e4   : > { %v11741_v60 = vor.u32 %v13825_v50, %v11738_v51  ;;  %v17086_v50 = vmul.f32 0.7978846, %v6960_v19  ;;  %v6926_v20 = vmul.f32 0.044715, %v6902_v40  ;;  %v4912_v8 = vperm.slane %v16917_v54, 4 }
 0x9e5   : > { %v6948_v37 = vadd.f32 %v6924_v26, %v16970_v23  ;;  %v6524_v26 = vadd.f32 %v6523_v36, %v6510_v57  ;;  %v6890_v57 = vmul.f32 %v17074_v11, %v17074_v11  ;;  %v11498_v40 = vld [vmem:[%s14939_s20 + $0x358] sm:$0xf0] }
 0x9e6   : > { %6771 = vmatpush.bf16.msrb.mxu3 %v11493_v44  ;;  %6785 = vmatpush.bf16.msra.mxu0 %v11877_v45  ;;  %v13921_v44 = vld [vmem:[%s14939_s20 + $0x80c] sm:$0xf]  ;;  %v6925_v45 = vmul.f32 0.044715, %v6901_v63  ;;  %v12024_v63 = vld [vmem:[%s14939_s20 + $0x748] sm:$0xf] }
 0x9e7   : > { %6799 = vmatpush.bf16.msra.mxu1 %v11113_v27  ;;  %6813 = vmatpush.bf16.msrb.mxu2 %v11497_v32  ;;  %v6913_v27 = vmul.f32 %v6889_v28, %v17018_v38  ;;  %v13915_v32 = vld [vmem:[%s14939_s20 + $0x7d4] sm:$0xf0]  ;;  %v12125_v29 = vor.u32 %v13921_v44, %v12122_v24  ;;  %v17079_v62 = vadd.f32 %v6537_v6, %v6524_v26  ;;  %v17084_v14 = vmul.f32 0.7978846, %v6948_v37  ;;  %v11978_v37 = vld [vmem:[%s14939_s20 + $0x718] sm:$0xf0] }
 0x9e8   : > { %v6949_v7 = vadd.f32 %v6925_v45, %v16997_v18  ;;  %v12073_v41 = vor.u32 %v13915_v32, %v12072_v1  ;;  %v13903_v28 = vld [vmem:[%s14939_s20 + $0x774] sm:$0xf0]  ;;  %v6903_v44 = vmul.f32 %v6879_v2, %v17052_v30  ;;  %v11261_v45 = vor.u32 %v13705_v10, %v11258_v25  ;;  %v13693_v32 = vld [vmem:[%s14939_s20 + $0xec] sm:$0xf]  ;;  %v11162_v26 = vld [vmem:[%s14939_s20 + $0xb8] sm:$0xf0] }
 0x9e9   : > { %6772 = vmatmul.bf16.vlgmr.msrb.gmra.mxu3 %v16542_v9  ;;  %6786 = vmatmul.bf16.vlgmr.msra.gmra.mxu0 %v16546_v4  ;;  %v6937_v15 = vmul.f32 0.044715, %v6913_v27  ;;  %v12025_v24 = vor.u32 %v13903_v28, %v12024_v63  ;;  %v11976_v27 = vld [vmem:[%s14939_s20 + $0x6e8] sm:$0xf]  ;;  %v6914_v49 = vmul.f32 %v6890_v57, %v17074_v11  ;;  %v13681_v2 = vld [vmem:[%s14939_s20 + $0x8c] sm:$0xf]  ;;  %14473 = vtanh.f32 %v17084_v14 }
 0x9ea   : > { %6820 = vmatpush.bf16.msra.mxu3 %v12217_v59  ;;  %6834 = vmatpush.bf16.msrb.mxu0 %v11453_v34  ;;  %v13717_v59 = vld [vmem:[%s14939_s20 + $0x1ac] sm:$0xf]  ;;  %v11306_v34 = vld [vmem:[%s14939_s20 + $0x1d8] sm:$0xf0]  ;;  %v17090_v51 = vmul.f32 0.7978846, %v6949_v7  ;;  %14475 = vtanh.f32 %v17086_v50 }
 0x9eb   : > { %6848 = vmatpush.bf16.msrb.mxu1 %v11837_v16  ;;  %6862 = vmatpush.bf16.msra.mxu2 %v12221_v13  ;;  %v11690_v16 = vld [vmem:[%s14939_s20 + $0x4d8] sm:$0xf0]  ;;  %v13909_v13 = vld [vmem:[%s14939_s20 + $0x7ac] sm:$0xf]  ;;  %v11309_v47 = vor.u32 %v13717_v59, %v11306_v34  ;;  %v6961_v48 = vadd.f32 %v6937_v15, %v17018_v38  ;;  %v6891_v59 = vmul.f32 %v17079_v62, %v17079_v62  ;;  %v11928_v7 = vld [vmem:[%s14939_s20 + $0x688] sm:$0xf] }
 0x9ec   : > { %6800 = vmatmul.bf16.vlgmr.msra.gmra.mxu1 %v16538_v33  ;;  %6814 = vmatmul.bf16.vlgmr.msrb.gmra.mxu2 %v16542_v9  ;;  %v11594_v34 = vld [vmem:[%s14939_s20 + $0x418] sm:$0xf0]  ;;  %v13879_v15 = vld [vmem:[%s14939_s20 + $0x6b4] sm:$0xf0]  ;;  %v6549_v36 = vpop.f32.mrf.mxu3  ;;  %v11880_v10 = vld [vmem:[%s14939_s20 + $0x628] sm:$0xf]  ;;  %14477 = vtanh.f32 %v17090_v51 }
 0x9ed   : > { %v17105_v19 = vmul.f32 0.7978846, %v6961_v48  ;;  %v6915_v63 = vmul.f32 %v6891_v59, %v17079_v62  ;;  %v11546_v28 = vld [vmem:[%s14939_s20 + $0x3b8] sm:$0xf0]  ;;  %v13867_v25 = vld [vmem:[%s14939_s20 + $0x654] sm:$0xf0] }
 0x9ee   : > { %6821 = vmatpush.bf16.msra.mxu3 %v12169_v52  ;;  %6835 = vmatpush.bf16.msrb.mxu0 %v11405_v21  ;;  %v11693_v52 = vor.u32 %v13813_v39, %v11690_v16  ;;  %v12077_v21 = vor.u32 %v13909_v13, %v12074_v46  ;;  %v13885_v39 = vld [vmem:[%s14939_s20 + $0x6ec] sm:$0xf]  ;;  %v6927_v16 = vmul.f32 0.044715, %v6903_v44  ;;  %v6938_v44 = vmul.f32 0.044715, %v6914_v49 }
 0x9ef   : > { %6849 = vmatpush.bf16.msrb.mxu1 %v11789_v42  ;;  %6863 = vmatpush.bf16.msra.mxu2 %v12173_v56  ;;  %v11642_v42 = vld [vmem:[%s14939_s20 + $0x478] sm:$0xf0]  ;;  %v13897_v56 = vld [vmem:[%s14939_s20 + $0x74c] sm:$0xf]  ;;  %v6939_v57 = vmul.f32 0.044715, %v6915_v63  ;;  %v6550_v63 = vadd.f32 %v6549_v36, %v4912_v8  ;;  %14479 = vtanh.f32 %v17105_v19  ;;  %v14474_v36 = vpop.eup %14473 }
 0x9f0   : > { %v12029_v1 = vor.u32 %v13897_v56, %v12026_v61  ;;  %v11165_v56 = vor.u32 %v13681_v2, %v11162_v26  ;;  %v11114_v61 = vld [vmem:[%s14939_s20 + $0x58] sm:$0xf0]  ;;  %v13765_v48 = vld [vmem:[%s14939_s20 + $0x32c] sm:$0xf]  ;;  %v13998_v59 = vld [vmem:[%s14941_s16 + $0x170] sm:$0xf0]  ;;  %v6962_v49 = vadd.f32 %v6938_v44, %v17074_v11 }
 0x9f1   : > { %v12296_v2 = vld [vmem:[%s14941_s16 + $0x90] sm:$0xf]  ;;  %v13971_v26 = vld [vmem:[%s14941_s16 + $0x98] sm:$0xf0] }
 0x9f2   : > { %6822 = vmatpush.bf16.msra.mxu3 %v12121_v3  ;;  %6836 = vmatpush.bf16.msrb.mxu0 %v11357_v53  ;;  %v13891_v3 = vld [vmem:[%s14939_s20 + $0x714] sm:$0xf0]  ;;  %v11645_v53 = vor.u32 %v13801_v0, %v11642_v42  ;;  %v13669_v0 = vld [vmem:[%s14939_s20 + $0x2c] sm:$0xf]  ;;  %v11929_v42 = vor.u32 %v13879_v15, %v11928_v7  ;;  %v12596_v7 = vld [vmem:[%s14941_s16 + $0x2e8] sm:$0xf]  ;;  %v12297_v44 = vor.u32 %v13971_v26, %v12296_v2 }
 0x9f3   : > { %6850 = vmatpush.bf16.msrb.mxu1 %v11741_v60  ;;  %6864 = vmatpush.bf16.msra.mxu2 %v12125_v29  ;;  %v11210_v60 = vld [vmem:[%s14939_s20 + $0x118] sm:$0xf0]  ;;  %v13789_v29 = vld [vmem:[%s14939_s20 + $0x3ec] sm:$0xf]  ;;  %v11977_v13 = vor.u32 %v13891_v3, %v11976_v27  ;;  %v14046_v15 = vld [vmem:[%s14941_s16 + $0x2f0] sm:$0xf0] }
 0x9f4   : > { %v11213_v46 = vor.u32 %v13693_v32, %v11210_v60  ;;  %v11597_v6 = vor.u32 %v13789_v29, %v11594_v34  ;;  %v13861_v27 = vld [vmem:[%s14939_s20 + $0x62c] sm:$0xf]  ;;  %v11882_v3 = vld [vmem:[%s14939_s20 + $0x658] sm:$0xf0]  ;;  %v6950_v32 = vadd.f32 %v6926_v20, %v17048_v55  ;;  %v6563_v60 = vpop.f32.mrf.mxu0  ;;  %v12404_v29 = vld [vmem:[%s14941_s16 + $0x168] sm:$0xf]  ;;  %v11501_v20 = vor.u32 %v13765_v48, %v11498_v40 }
 0x9f5   : > { %v12500_v34 = vld [vmem:[%s14941_s16 + $0x228] sm:$0xf]  ;;  %v11885_v14 = vor.u32 %v13861_v27, %v11882_v3  ;;  %v13995_v50 = vld [vmem:[%s14941_s16 + $0x158] sm:$0xf0]  ;;  %v6986_v48 = vmul.f32 0.7978846, %v6962_v49  ;;  %v6564_v3 = vadd.f32 %v6563_v60, %v6550_v63 }
 0x9f6   : > { %6823 = vmatpush.bf16.msra.mxu3 %v12073_v41  ;;  %6837 = vmatpush.bf16.msrb.mxu0 %v11309_v47  ;;  %v11981_v41 = vor.u32 %v13885_v39, %v11978_v37  ;;  %v13777_v47 = vld [vmem:[%s14939_s20 + $0x38c] sm:$0xf]  ;;  %v6951_v39 = vadd.f32 %v6927_v16, %v17052_v30  ;;  %v11881_v37 = vor.u32 %v13867_v25, %v11880_v10  ;;  %v12392_v10 = vld [vmem:[%s14941_s16 + $0x150] sm:$0xf]  ;;  %v6974_v51 = vmul.f32 0.7978846, %v6950_v32 }
 0x9f7   : > { %6851 = vmatpush.bf16.msrb.mxu1 %v11693_v52  ;;  %6865 = vmatpush.bf16.msra.mxu2 %v12077_v21  ;;  %v13873_v52 = vld [vmem:[%s14939_s20 + $0x68c] sm:$0xf]  ;;  %v11930_v21 = vld [vmem:[%s14939_s20 + $0x6b8] sm:$0xf0]  ;;  %v6963_v16 = vadd.f32 %v6939_v57, %v17079_v62  ;;  %v12488_v25 = vld [vmem:[%s14941_s16 + $0x210] sm:$0xf] }
 0x9f8   : > { %v13968_v27 = vld [vmem:[%s14941_s16 + $0x80] sm:$0xf0]  ;;  %14481 = vtanh.f32 %v6974_v51  ;;  %v12272_v49 = vld [vmem:[%s14941_s16 + $0x60] sm:$0xf]  ;;  %v14013_v2 = vld [vmem:[%s14941_s16 + $0x1e8] sm:$0xf0] }
 0x9f9   : > { %v6987_v40 = vmul.f32 0.7978846, %v6963_v16  ;;  %v13992_v32 = vld [vmem:[%s14941_s16 + $0x140] sm:$0xf0]  ;;  %v12368_v16 = vld [vmem:[%s14941_s16 + $0x120] sm:$0xf] }
 0x9fa   : > { %6824 = vmatpush.bf16.msra.mxu3 %v12025_v24  ;;  %6838 = vmatpush.bf16.msrb.mxu0 %v11261_v45  ;;  %v11549_v24 = vor.u32 %v13777_v47, %v11546_v28  ;;  %v11933_v45 = vor.u32 %v13873_v52, %v11930_v21  ;;  %v6577_v47 = vpop.f32.mrf.mxu1  ;;  %v6551_v28 = vpop.f32.mrf.mxu3  ;;  %v12597_v21 = vor.u32 %v14046_v15, %v12596_v7  ;;  %v12560_v26 = vld [vmem:[%s14941_s16 + $0x2a0] sm:$0xf]  ;;  %v14037_v63 = vld [vmem:[%s14941_s16 + $0x2a8] sm:$0xf0]  ;;  %v12260_v51 = vld [vmem:[%s14941_s16 + $0x48] sm:$0xf] }
 0x9fb   : > { %6852 = vmatpush.bf16.msrb.mxu1 %v11645_v53  ;;  %6866 = vmatpush.bf16.msra.mxu2 %v12029_v1  ;;  %v12308_v53 = vld [vmem:[%s14941_s16 + $0xa8] sm:$0xf]  ;;  %v13974_v1 = vld [vmem:[%s14941_s16 + $0xb0] sm:$0xf0]  ;;  %v6552_v19 = vadd.f32 %v6551_v28, %v4912_v8  ;;  %v14016_v8 = vld [vmem:[%s14941_s16 + $0x200] sm:$0xf0] }
 0x9fc   : > { %v6565_v60 = vpop.f32.mrf.mxu0 }
 0x9fd   : > { %v6566_v7 = vadd.f32 %v6565_v60, %v6552_v19  ;;  %v12561_v19 = vor.u32 %v14037_v63, %v12560_v26  ;;  %v12536_v26 = vld [vmem:[%s14941_s16 + $0x270] sm:$0xf]  ;;  %v14031_v63 = vld [vmem:[%s14941_s16 + $0x278] sm:$0xf0] }
 0x9fe   : > { %6825 = vmatpush.bf16.msra.mxu3 %v11977_v13  ;;  %6839 = vmatpush.bf16.msrb.mxu0 %v11213_v46  ;;  %v11117_v13 = vor.u32 %v13669_v0, %v11114_v61  ;;  %v14022_v46 = vld [vmem:[%s14941_s16 + $0x230] sm:$0xf0]  ;;  %v14019_v0 = vld [vmem:[%s14941_s16 + $0x218] sm:$0xf0]  ;;  %v6975_v61 = vmul.f32 0.7978846, %v6951_v39 }
 0x9ff   : > { %6853 = vmatpush.bf16.msrb.mxu1 %v11597_v6  ;;  %6867 = vmatpush.bf16.msra.mxu2 %v11981_v41  ;;  %v12309_v6 = vor.u32 %v13974_v1, %v12308_v53  ;;  %v12405_v41 = vor.u32 %v13998_v59, %v12404_v29  ;;  %v12501_v52 = vor.u32 %v14022_v46, %v12500_v34  ;;  %v12380_v1 = vld [vmem:[%s14941_s16 + $0x138] sm:$0xf]  ;;  %v14476_v59 = vpop.eup %14475  ;;  %v14040_v39 = vld [vmem:[%s14941_s16 + $0x2c0] sm:$0xf0] }
 0xa00   : > { %v12489_v57 = vor.u32 %v14019_v0, %v12488_v25  ;;  %v12476_v29 = vld [vmem:[%s14941_s16 + $0x1f8] sm:$0xf]  ;;  %14483 = vtanh.f32 %v6975_v61  ;;  %v12381_v15 = vor.u32 %v13992_v32, %v12380_v1  ;;  %v4913_v25 = vperm.slane %v16917_v54, 5  ;;  %v13962_v61 = vld [vmem:[%s14941_s16 + $0x50] sm:$0xf0] }
 0xa01   : > { %v12572_v34 = vld [vmem:[%s14941_s16 + $0x2b8] sm:$0xf]  ;;  %14485 = vtanh.f32 %v6986_v48 }
 0xa02   : > { %6826 = vmatpush.bf16.msra.mxu3 %v11929_v42  ;;  %6840 = vmatpush.bf16.msrb.mxu0 %v11165_v56  ;;  %v12584_v42 = vld [vmem:[%s14941_s16 + $0x2d0] sm:$0xf]  ;;  %v14043_v56 = vld [vmem:[%s14941_s16 + $0x2d8] sm:$0xf0]  ;;  %14487 = vtanh.f32 %v6987_v40 }
 0xa03   : > { %6854 = vmatpush.bf16.msrb.mxu1 %v11549_v24  ;;  %6868 = vmatpush.bf16.msra.mxu2 %v11933_v45  ;;  %v12393_v24 = vor.u32 %v13995_v50, %v12392_v10  ;;  %v12284_v45 = vld [vmem:[%s14941_s16 + $0x78] sm:$0xf]  ;;  %v12585_v53 = vor.u32 %v14043_v56, %v12584_v42  ;;  %v6579_v50 = vpop.f32.mrf.mxu1 }
 0xa04   : > { %v17179_v0 = vadd.f32 %v6579_v50, %v6566_v7  ;;  %v13959_v7 = vld [vmem:[%s14941_s16 + $0x38] sm:$0xf0] }
 0xa06   : > { %6827 = vmatpush.bf16.msra.mxu3 %v11881_v37  ;;  %6841 = vmatpush.bf16.msrb.mxu0 %v11117_v13  ;;  %v14478_v37 = vpop.eup %14477  ;;  %v7020_v13 = vadd.f32 1.0, %v14474_v36 }
 0xa07   : > { %6855 = vmatpush.bf16.msrb.mxu1 %v11501_v20  ;;  %6869 = vmatpush.bf16.msra.mxu2 %v11885_v14  ;;  %v14480_v46 = vpop.eup %14479  ;;  %v13965_v20 = vld [vmem:[%s14941_s16 + $0x68] sm:$0xf0]  ;;  %v17168_v14 = vadd.f32 %v6577_v47, %v6564_v3  ;;  %v6591_v47 = vpop.f32.mrf.mxu2  ;;  %v14010_v3 = vld [vmem:[%s14941_s16 + $0x1d0] sm:$0xf0] }
 0xa08   : > { %v17176_v28 = vmul.f32 0.5, %v7020_v13  ;;  %v7033_v10 = vadd.f32 1.0, %v14480_v46  ;;  %v12273_v42 = vor.u32 %v13965_v20, %v12272_v49  ;;  %v14482_v48 = vpop.eup %14481  ;;  %v6892_v13 = vmul.f32 %v17179_v0, %v17179_v0  ;;  %v12248_v46 = vld [vmem:[%s14941_s16 + $0x30] sm:$0xf] }
 0xa09   : > { %6828 = vmatmul.bf16.vlgmr.msra.gmra.mxu3 %v16546_v4  ;;  %6842 = vmatmul.bf16.vlgmr.msrb.gmra.mxu0 %v16538_v33  ;;  %v12285_v33 = vor.u32 %v13968_v27, %v12284_v45  ;;  %v6880_v36 = vmul.f32 %v17168_v14, %v17168_v14  ;;  %v12452_v45 = vld [vmem:[%s14941_s16 + $0x1c8] sm:$0xf]  ;;  %v14484_v27 = vpop.eup %14483 }
 0xa0a   : > { %9032 = vmatpush.bf16.msrb.mxu3 %v12309_v6  ;;  %9046 = vmatpush.bf16.msra.mxu0 %v12405_v41  ;;  %v13989_v6 = vld [vmem:[%s14941_s16 + $0x128] sm:$0xf0]  ;;  %v12464_v41 = vld [vmem:[%s14941_s16 + $0x1e0] sm:$0xf]  ;;  %v14486_v1 = vpop.eup %14485  ;;  %v12453_v49 = vor.u32 %v14010_v3, %v12452_v45  ;;  %v6916_v50 = vmul.f32 %v6892_v13, %v17179_v0  ;;  %v12428_v45 = vld [vmem:[%s14941_s16 + $0x198] sm:$0xf] }
 0xa0b   : > { %9060 = vmatpush.bf16.msra.mxu1 %v12501_v52  ;;  %9074 = vmatpush.bf16.msrb.mxu2 %v12597_v21  ;;  %v7032_v52 = vadd.f32 1.0, %v14476_v59  ;;  %v7021_v21 = vadd.f32 1.0, %v14478_v37  ;;  %v12369_v56 = vor.u32 %v13989_v6, %v12368_v16  ;;  %v12465_v40 = vor.u32 %v14013_v2, %v12464_v41  ;;  %v13983_v16 = vld [vmem:[%s14941_s16 + $0xf8] sm:$0xf0]  ;;  %v12440_v6 = vld [vmem:[%s14941_s16 + $0x1b0] sm:$0xf] }
 0xa0c   : > { %6856 = vmatmul.bf16.vlgmr.msrb.gmra.mxu1 %v16542_v9  ;;  %6870 = vmatmul.bf16.vlgmr.msra.gmra.mxu2 %v16546_v4  ;;  %v12477_v9 = vor.u32 %v14016_v8, %v12476_v29  ;;  %v12573_v4 = vor.u32 %v14040_v39, %v12572_v34  ;;  %v17195_v59 = vmul.f32 0.5, %v7033_v10  ;;  %v12261_v8 = vor.u32 %v13962_v61, %v12260_v51  ;;  %v14488_v34 = vpop.eup %14487  ;;  %v14007_v2 = vld [vmem:[%s14941_s16 + $0x1b8] sm:$0xf0]  ;;  %v12236_v51 = vld [vmem:[%s14941_s16 + $0x18] sm:$0xf] }
 0xa0d   : > { %v17191_v32 = vmul.f32 0.5, %v7032_v52  ;;  %v17193_v29 = vmul.f32 0.5, %v7021_v21  ;;  %v7022_v39 = vadd.f32 1.0, %v14482_v48  ;;  %v6592_v37 = vadd.f32 %v6591_v47, %v4913_v25  ;;  %v13956_v61 = vld [vmem:[%s14941_s16 + $0x20] sm:$0xf0] }
 0xa0e   : > { %9033 = vmatpush.bf16.msrb.mxu3 %v12297_v44  ;;  %9047 = vmatpush.bf16.msra.mxu0 %v12393_v24  ;;  %v12356_v44 = vld [vmem:[%s14941_s16 + $0x108] sm:$0xf]  ;;  %v13986_v24 = vld [vmem:[%s14941_s16 + $0x110] sm:$0xf0]  ;;  %v7023_v52 = vadd.f32 1.0, %v14484_v27  ;;  %v7034_v21 = vadd.f32 1.0, %v14486_v1  ;;  %v12249_v47 = vor.u32 %v13959_v7, %v12248_v46 }
 0xa0f   : > { %9061 = vmatpush.bf16.msra.mxu1 %v12489_v57  ;;  %9075 = vmatpush.bf16.msrb.mxu2 %v12585_v53  ;;  %v12548_v57 = vld [vmem:[%s14941_s16 + $0x288] sm:$0xf]  ;;  %v14034_v53 = vld [vmem:[%s14941_s16 + $0x290] sm:$0xf0]  ;;  %v12357_v60 = vor.u32 %v13986_v24, %v12356_v44  ;;  %v7035_v10 = vadd.f32 1.0, %v14488_v34  ;;  %v12537_v44 = vor.u32 %v14031_v63, %v12536_v26 }
 0xa10   : > { %v12549_v20 = vor.u32 %v14034_v53, %v12548_v57  ;;  %v12332_v48 = vld [vmem:[%s14941_s16 + $0xd8] sm:$0xf]  ;;  %v13980_v24 = vld [vmem:[%s14941_s16 + $0xe0] sm:$0xf0]  ;;  %v7046_v53 = vmul.f32 0.5, %v7022_v39  ;;  %v7058_v1 = vmul.f32 0.5, %v7034_v21 }
 0xa11   : > { %v14004_v27 = vld [vmem:[%s14941_s16 + $0x1a0] sm:$0xf0]  ;;  %v12524_v3 = vld [vmem:[%s14941_s16 + $0x258] sm:$0xf]  ;;  %v17222_v34 = vld [vmem:[%s14941_s16] sm:$0xf]  ;;  %v12333_v7 = vor.u32 %v13980_v24, %v12332_v48 }
 0xa12   : > { %9034 = vmatpush.bf16.msrb.mxu3 %v12285_v33  ;;  %9048 = vmatpush.bf16.msra.mxu0 %v12381_v15  ;;  %v6904_v33 = vmul.f32 %v6880_v36, %v17168_v14  ;;  %v6619_v15 = vpop.f32.mrf.mxu0  ;;  %v14028_v57 = vld [vmem:[%s14941_s16 + $0x260] sm:$0xf0]  ;;  %v6940_v13 = vmul.f32 0.044715, %v6916_v50  ;;  %v12320_v39 = vld [vmem:[%s14941_s16 + $0xc0] sm:$0xf] }
 0xa13   : > { %9062 = vmatpush.bf16.msra.mxu1 %v12477_v9  ;;  %9076 = vmatpush.bf16.msrb.mxu2 %v12573_v4  ;;  %v6605_v9 = vpop.f32.mrf.mxu3  ;;  %v12344_v4 = vld [vmem:[%s14941_s16 + $0xf0] sm:$0xf]  ;;  %v12525_v54 = vor.u32 %v14028_v57, %v12524_v3  ;;  %v12512_v26 = vld [vmem:[%s14941_s16 + $0x240] sm:$0xf]  ;;  %v14025_v63 = vld [vmem:[%s14941_s16 + $0x248] sm:$0xf0] }
 0xa14   : > { %v6606_v41 = vadd.f32 %v6605_v9, %v6592_v37  ;;  %v6928_v36 = vmul.f32 0.044715, %v6904_v33  ;;  %v17225_v37 = vld [vmem:[%s14941_s16 + $0x8] sm:$0xf0]  ;;  %v12416_v9 = vld [vmem:[%s14941_s16 + $0x180] sm:$0xf] }
 0xa15   : > { %v13977_v33 = vld [vmem:[%s14941_s16 + $0xc8] sm:$0xf0]  ;;  %v12692_v21 = vld [vmem:[%s14941_s16 + $0x3a8] sm:$0xf]  ;;  %v14142_v57 = vld [vmem:[%s14941_s16 + $0x5f0] sm:$0xf0] }
 0xa16   : > { %9035 = vmatpush.bf16.msrb.mxu3 %v12273_v42  ;;  %9049 = vmatpush.bf16.msra.mxu0 %v12369_v56  ;;  %v17211_v42 = vadd.f32 %v6619_v15, %v6606_v41  ;;  %v12345_v56 = vor.u32 %v13983_v16, %v12344_v4  ;;  %v7059_v15 = vmul.f32 0.5, %v7035_v10  ;;  %v14001_v4 = vld [vmem:[%s14941_s16 + $0x188] sm:$0xf0]  ;;  %v7068_v16 = vmul.f32 %v17176_v28, %v16970_v23  ;;  %v17240_v41 = vpop.f32.mrf.mxu1  ;;  %v14070_v28 = vld [vmem:[%s14941_s16 + $0x3b0] sm:$0xf0] }
 0xa17   : > { %9063 = vmatpush.bf16.msra.mxu1 %v12465_v40  ;;  %9077 = vmatpush.bf16.msrb.mxu2 %v12561_v19  ;;  %v6593_v40 = vpop.f32.mrf.mxu2  ;;  %v12441_v19 = vor.u32 %v14007_v2, %v12440_v6  ;;  %v7080_v6 = vmul.f32 %v17191_v32, %v16984_v58  ;;  %v7069_v10 = vmul.f32 %v17193_v29, %v16997_v18  ;;  %v12788_v58 = vld [vmem:[%s14941_s16 + $0x468] sm:$0xf]  ;;  %v14094_v32 = vld [vmem:[%s14941_s16 + $0x470] sm:$0xf0] }
 0xa18   : > { %v6881_v46 = vmul.f32 %v17211_v42, %v17211_v42  ;;  %v12321_v23 = vor.u32 %v13977_v33, %v12320_v39  ;;  %v12980_v3 = vld [vmem:[%s14941_s16 + $0x5e8] sm:$0xf] }
 0xa1a   : > { %9036 = vmatpush.bf16.msrb.mxu3 %v12261_v8  ;;  %9050 = vmatpush.bf16.msra.mxu0 %v12357_v60  ;;  %v12237_v8 = vor.u32 %v13956_v61, %v12236_v51  ;;  %v6594_v60 = vadd.f32 %v6593_v40, %v4913_v25  ;;  %v6621_v50 = vpop.f32.mrf.mxu0  ;;  %v7047_v51 = vmul.f32 0.5, %v7023_v52  ;;  %v6964_v61 = vadd.f32 %v6940_v13, %v17179_v0  ;;  %v12884_v40 = vld [vmem:[%s14941_s16 + $0x528] sm:$0xf]  ;;  %v14091_v13 = vld [vmem:[%s14941_s16 + $0x458] sm:$0xf0] }
 0xa1b   : > { %9064 = vmatpush.bf16.msra.mxu1 %v12453_v49  ;;  %9078 = vmatpush.bf16.msrb.mxu2 %v12549_v20  ;;  %v6952_v49 = vadd.f32 %v6928_v36, %v17168_v14  ;;  %v12429_v20 = vor.u32 %v14004_v27, %v12428_v45  ;;  %v6607_v25 = vpop.f32.mrf.mxu3  ;;  %v6905_v48 = vmul.f32 %v6881_v46, %v17211_v42  ;;  %v12680_v36 = vld [vmem:[%s14941_s16 + $0x390] sm:$0xf] }
 0xa1c   : > { %v6608_v2 = vadd.f32 %v6607_v25, %v6594_v60  ;;  %v12513_v52 = vor.u32 %v14025_v63, %v12512_v26  ;;  %v12693_v45 = vor.u32 %v14070_v28, %v12692_v21  ;;  %v12789_v27 = vor.u32 %v14094_v32, %v12788_v58  ;;  %v14088_v26 = vld [vmem:[%s14941_s16 + $0x440] sm:$0xf0]  ;;  %v12860_v28 = vld [vmem:[%s14941_s16 + $0x4f8] sm:$0xf] }
 0xa1d   : > { %v6976_v29 = vmul.f32 0.7978846, %v6952_v49  ;;  %v7071_v60 = vmul.f32 %v7047_v51, %v17052_v30  ;;  %v6988_v46 = vmul.f32 0.7978846, %v6964_v61  ;;  %v12872_v49 = vld [vmem:[%s14941_s16 + $0x510] sm:$0xf] }
 0xa1e   : > { %9037 = vmatpush.bf16.msrb.mxu3 %v12249_v47  ;;  %9051 = vmatpush.bf16.msra.mxu0 %v12345_v56  ;;  %v7081_v47 = vmul.f32 %v17195_v59, %v17018_v38  ;;  %v12225_v56 = vor.u32 %v17225_v37, %v17222_v34  ;;  %v17256_v18 = vadd.f32 %v6621_v50, %v6608_v2  ;;  %v14067_v37 = vld [vmem:[%s14941_s16 + $0x398] sm:$0xf0]  ;;  %v12764_v2 = vld [vmem:[%s14941_s16 + $0x438] sm:$0xf]  ;;  %v17294_v21 = vpop.f32.mrf.mxu1  ;;  %v14061_v50 = vld [vmem:[%s14941_s16 + $0x368] sm:$0xf0] }
 0xa1f   : > { %9065 = vmatpush.bf16.msra.mxu1 %v12441_v19  ;;  %9079 = vmatpush.bf16.msrb.mxu2 %v12537_v44  ;;  %v7082_v38 = vmul.f32 %v7058_v1, %v17074_v11  ;;  %v12417_v59 = vor.u32 %v14001_v4, %v12416_v9  ;;  %v7083_v19 = vmul.f32 %v7059_v15, %v17079_v62  ;;  %v17262_v44 = vpop.f32.mrf.mxu2  ;;  %v14118_v11 = vld [vmem:[%s14941_s16 + $0x530] sm:$0xf0]  ;;  %v12776_v62 = vld [vmem:[%s14941_s16 + $0x450] sm:$0xf]  ;;  %v14115_v30 = vld [vmem:[%s14941_s16 + $0x518] sm:$0xf0]  ;;  %14489 = vtanh.f32 %v6976_v29 }
 0xa20   : > { %v6893_v24 = vmul.f32 %v17256_v18, %v17256_v18  ;;  %v7070_v1 = vmul.f32 %v7046_v53, %v17048_v55  ;;  %v17272_v34 = vpack.c.bf16 %v7081_v47, %v7069_v10  ;;  %v12668_v53 = vld [vmem:[%s14941_s16 + $0x378] sm:$0xf]  ;;  %v12885_v33 = vor.u32 %v14118_v11, %v12884_v40  ;;  %v12968_v4 = vld [vmem:[%s14941_s16 + $0x5d0] sm:$0xf]  ;;  %v12656_v47 = vld [vmem:[%s14941_s16 + $0x360] sm:$0xf] }
 0xa21   : > { %v12981_v15 = vor.u32 %v14142_v57, %v12980_v3  ;;  %v12681_v25 = vor.u32 %v14067_v37, %v12680_v36  ;;  %v12777_v9 = vor.u32 %v14091_v13, %v12776_v62  ;;  %14491 = vtanh.f32 %v6988_v46  ;;  %v14112_v58 = vld [vmem:[%s14941_s16 + $0x500] sm:$0xf0]  ;;  %v17306_v29 = vld [vmem:[%s14971_s14] sm:$0xff]  ;;  %v14085_v36 = vld [vmem:[%s14941_s16 + $0x428] sm:$0xf0] }
 0xa22   : > { %9038 = vmatpush.bf16.msrb.mxu3 %v12237_v8  ;;  %9052 = vmatpush.bf16.msra.mxu0 %v12333_v7  ;;  %v17270_v8 = vpack.c.bf16 %v7080_v6, %v7068_v16  ;;  %v6929_v7 = vmul.f32 0.044715, %v6905_v48  ;;  %v6917_v39 = vmul.f32 %v6893_v24, %v17256_v18  ;;  %v17279_v55 = vpack.c.bf16 %v7082_v38, %v7070_v1  ;;  %v14139_v16 = vld [vmem:[%s14941_s16 + $0x5d8] sm:$0xf0]  ;;  %v14064_v6 = vld [vmem:[%s14941_s16 + $0x380] sm:$0xf0] }
 0xa23   : > { %9066 = vmatpush.bf16.msra.mxu1 %v12429_v20  ;;  %9080 = vmatpush.bf16.msrb.mxu2 %v12525_v54  ;;  %v17284_v20 = vpack.c.bf16 %v7083_v19, %v7071_v60  ;;  %v12669_v51 = vor.u32 %v14064_v6, %v12668_v53  ;;  %v12765_v61 = vor.u32 %v14088_v26, %v12764_v2  ;;  %v12956_v48 = vld [vmem:[%s14941_s16 + $0x5b8] sm:$0xf]  ;;  %v14136_v38 = vld [vmem:[%s14941_s16 + $0x5c0] sm:$0xf0]  ;;  %v4914_v40 = vperm.slane %v17306_v29, 6 }
 0xa24   : > { %v6941_v54 = vmul.f32 0.044715, %v6917_v39  ;;  %v6953_v63 = vadd.f32 %v6929_v7, %v17211_v42  ;;  %v12644_v11 = vld [vmem:[%s14941_s16 + $0x348] sm:$0xf]  ;;  %v12861_v3 = vor.u32 %v14112_v58, %v12860_v28  ;;  %v12957_v57 = vor.u32 %v14136_v38, %v12956_v48  ;;  %v12848_v1 = vld [vmem:[%s14941_s16 + $0x4e0] sm:$0xf] }
 0xa25   : > { %v12657_v62 = vor.u32 %v14061_v50, %v12656_v47  ;;  %v14109_v60 = vld [vmem:[%s14941_s16 + $0x4e8] sm:$0xf0]  ;;  %v12944_v46 = vld [vmem:[%s14941_s16 + $0x5a0] sm:$0xf]  ;;  %v14058_v53 = vld [vmem:[%s14941_s16 + $0x350] sm:$0xf0] }
 0xa26   : > { %9039 = vmatpush.bf16.msrb.mxu3 %v12225_v56  ;;  %9053 = vmatpush.bf16.msra.mxu0 %v12321_v23  ;;  %v6965_v10 = vadd.f32 %v6941_v54, %v17256_v18  ;;  %v12873_v56 = vor.u32 %v14115_v30, %v12872_v49  ;;  %v12969_v23 = vor.u32 %v14139_v16, %v12968_v4  ;;  %v6977_v19 = vmul.f32 0.7978846, %v6953_v63  ;;  %v14133_v7 = vld [vmem:[%s14941_s16 + $0x5a8] sm:$0xf0]  ;;  %v12836_v6 = vld [vmem:[%s14941_s16 + $0x4c8] sm:$0xf] }
 0xa27   : > { %9067 = vmatpush.bf16.msra.mxu1 %v12417_v59  ;;  %9081 = vmatpush.bf16.msrb.mxu2 %v12513_v52  ;;  %v4915_v59 = vperm.slane %v17306_v29, 7  ;;  %v12752_v52 = vld [vmem:[%s14941_s16 + $0x420] sm:$0xf]  ;;  %v17312_v24 = vpop.f32.mrf.mxu2  ;;  %v6634_v30 = vadd.f32 %v17240_v41, %v4914_v40  ;;  %v12849_v4 = vor.u32 %v14109_v60, %v12848_v1  ;;  %v12945_v16 = vor.u32 %v14133_v7, %v12944_v46  ;;  %v14106_v63 = vld [vmem:[%s14941_s16 + $0x4d0] sm:$0xf0] }
 0xa28   : > { %v6989_v32 = vmul.f32 0.7978846, %v6965_v10  ;;  %v12753_v13 = vor.u32 %v14085_v36, %v12752_v52  ;;  %v12645_v41 = vor.u32 %v14058_v53, %v12644_v11  ;;  %v12932_v10 = vld [vmem:[%s14941_s16 + $0x588] sm:$0xf]  ;;  %v14130_v47 = vld [vmem:[%s14941_s16 + $0x590] sm:$0xf0] }
 0xa29   : > { %9040 = vmatmul.bf16.vlgmr.msrb.gmra.mxu3 %v17270_v8  ;;  %9054 = vmatmul.bf16.vlgmr.msra.gmra.mxu0 %v17272_v34  ;;  %v6689_v54 = vpop.f32.mrf.mxu1  ;;  %v6648_v2 = vadd.f32 %v17262_v44, %v6634_v30  ;;  %v12728_v28 = vld [vmem:[%s14941_s16 + $0x3f0] sm:$0xf]  ;;  %v14079_v58 = vld [vmem:[%s14941_s16 + $0x3f8] sm:$0xf0]  ;;  %v17343_v52 = vld [vmem:[%s14941_s16 + $0x318] sm:$0xf] }
 0xa2a   : > { %9088 = vmatpush.bf16.msra.mxu3 %v12693_v45  ;;  %9102 = vmatpush.bf16.msrb.mxu0 %v12789_v27  ;;  %v14490_v45 = vpop.eup %14489  ;;  %v6675_v27 = vpop.f32.mrf.mxu0  ;;  %14493 = vtanh.f32 %v6989_v32  ;;  %v17346_v36 = vld [vmem:[%s14941_s16 + $0x320] sm:$0xf0]  ;;  %v12729_v1 = vor.u32 %v14079_v58, %v12728_v28  ;;  %v12716_v53 = vld [vmem:[%s14941_s16 + $0x3d8] sm:$0xf] }
 0xa2b   : > { %9068 = vmatmul.bf16.vlgmr.msra.gmra.mxu1 %v17279_v55  ;;  %9082 = vmatmul.bf16.vlgmr.msrb.gmra.mxu2 %v17284_v20  ;;  %v14492_v37 = vpop.eup %14491  ;;  %v6676_v39 = vadd.f32 %v6675_v27, %v4915_v59  ;;  %v7024_v49 = vadd.f32 1.0, %v14490_v45  ;;  %14495 = vtanh.f32 %v6977_v19  ;;  %v12837_v19 = vor.u32 %v14106_v63, %v12836_v6  ;;  %v12824_v27 = vld [vmem:[%s14941_s16 + $0x4b0] sm:$0xf]  ;;  %v14100_v6 = vld [vmem:[%s14941_s16 + $0x4a0] sm:$0xf0] }
 0xa2c   : > { %9116 = vmatpush.bf16.msrb.mxu1 %v12885_v33  ;;  %9130 = vmatpush.bf16.msra.mxu2 %v12981_v15  ;;  %v12740_v33 = vld [vmem:[%s14941_s16 + $0x408] sm:$0xf]  ;;  %v14082_v15 = vld [vmem:[%s14941_s16 + $0x410] sm:$0xf0]  ;;  %v12933_v45 = vor.u32 %v14130_v47, %v12932_v10  ;;  %v12621_v63 = vor.u32 %v17346_v36, %v17343_v52  ;;  %v12908_v47 = vld [vmem:[%s14941_s16 + $0x558] sm:$0xf] }
 0xa2d   : > { %v12741_v26 = vor.u32 %v14082_v15, %v12740_v33  ;;  %v6690_v50 = vadd.f32 %v6689_v54, %v6676_v39  ;;  %v14076_v33 = vld [vmem:[%s14941_s16 + $0x3e0] sm:$0xf0]  ;;  %v17367_v54 = vld [vmem:[%s14941_s16 + $0x300] sm:$0xf] }
 0xa2e   : > { %9089 = vmatpush.bf16.msra.mxu3 %v12681_v25  ;;  %9103 = vmatpush.bf16.msrb.mxu0 %v12777_v9  ;;  %v7036_v25 = vadd.f32 1.0, %v14492_v37  ;;  %v17328_v9 = vld [vmem:[%s14941_s16 + $0x330] sm:$0xf]  ;;  %v14103_v37 = vld [vmem:[%s14941_s16 + $0x4b8] sm:$0xf0]  ;;  %v12717_v10 = vor.u32 %v14076_v33, %v12716_v53 }
 0xa2f   : > { %v6703_v44 = vpop.f32.mrf.mxu2 }
 0xa30   : > { %9117 = vmatpush.bf16.msrb.mxu1 %v12873_v56  ;;  %9131 = vmatpush.bf16.msra.mxu2 %v12969_v23  ;;  %v6661_v56 = vpop.f32.mrf.mxu3  ;;  %v14055_v23 = vld [vmem:[%s14941_s16 + $0x338] sm:$0xf0]  ;;  %v14494_v32 = vpop.eup %14493  ;;  %v17340_v48 = vadd.f32 %v6703_v44, %v6690_v50  ;;  %v7060_v60 = vmul.f32 0.5, %v7036_v25  ;;  %v17370_v25 = vld [vmem:[%s14941_s16 + $0x308] sm:$0xf0] }
 0xa31   : > { %v14496_v11 = vpop.eup %14495  ;;  %v7037_v46 = vadd.f32 1.0, %v14494_v32  ;;  %v14124_v50 = vld [vmem:[%s14941_s16 + $0x560] sm:$0xf0]  ;;  %v14166_v32 = vld [vmem:[%s14941_s16 + $0x6b0] sm:$0xf0]  ;;  %v12609_v52 = vor.u32 %v17370_v25, %v17367_v54 }
 0xa32   : > { %9090 = vmatpush.bf16.msra.mxu3 %v12669_v51  ;;  %9104 = vmatpush.bf16.msrb.mxu0 %v12765_v61  ;;  %v7048_v51 = vmul.f32 0.5, %v7024_v49  ;;  %v17338_v61 = vadd.f32 %v6661_v56, %v6648_v2  ;;  %v6677_v38 = vpop.f32.mrf.mxu0  ;;  %v6883_v7 = vmul.f32 %v17340_v48, %v17340_v48  ;;  %v6636_v49 = vadd.f32 %v17294_v21, %v4914_v40  ;;  %v12812_v40 = vld [vmem:[%s14941_s16 + $0x498] sm:$0xf] }
 0xa33   : > { %v6678_v39 = vadd.f32 %v6677_v38, %v4915_v59  ;;  %v17374_v59 = vld [vmem:[%s14941_s16 + $0x3c0] sm:$0xf]  ;;  %v12825_v21 = vor.u32 %v14103_v37, %v12824_v27  ;;  %v7084_v56 = vmul.f32 %v7060_v60, %v17179_v0  ;;  %v12813_v36 = vor.u32 %v14100_v6, %v12812_v40 }
 0xa34   : > { %9118 = vmatpush.bf16.msrb.mxu1 %v12861_v3  ;;  %9132 = vmatpush.bf16.msra.mxu2 %v12957_v57  ;;  %v6882_v3 = vmul.f32 %v17338_v61, %v17338_v61  ;;  %v12633_v57 = vor.u32 %v14055_v23, %v17328_v9  ;;  %v7072_v15 = vmul.f32 %v7048_v51, %v17168_v14  ;;  %v7025_v9 = vadd.f32 1.0, %v14496_v11  ;;  %v17380_v14 = vld [vmem:[%s14941_s16 + $0x6a8] sm:$0xf] }
 0xa35   : > { %v6650_v2 = vadd.f32 %v17312_v24, %v6636_v49  ;;  %v7061_v23 = vmul.f32 0.5, %v7037_v46  ;;  %v13077_v60 = vor.u32 %v14166_v32, %v17380_v14  ;;  %v12800_v46 = vld [vmem:[%s14941_s16 + $0x480] sm:$0xf]  ;;  %v14157_v32 = vld [vmem:[%s14941_s16 + $0x668] sm:$0xf0] }
 0xa36   : > { %9091 = vmatpush.bf16.msra.mxu3 %v12657_v62  ;;  %9105 = vmatpush.bf16.msrb.mxu0 %v12753_v13  ;;  %v12920_v62 = vld [vmem:[%s14941_s16 + $0x570] sm:$0xf]  ;;  %v14127_v13 = vld [vmem:[%s14941_s16 + $0x578] sm:$0xf0]  ;;  %v6906_v30 = vmul.f32 %v6882_v3, %v17338_v61  ;;  %v7049_v0 = vmul.f32 0.5, %v7025_v9  ;;  %v17416_v9 = vpack.c.bf16 %v7084_v56, %v7072_v15 }
 0xa37   : > { %v12921_v29 = vor.u32 %v14127_v13, %v12920_v62  ;;  %v6705_v38 = vpop.f32.mrf.mxu2  ;;  %v13064_v3 = vld [vmem:[%s14941_s16 + $0x690] sm:$0xf]  ;;  %v12896_v49 = vld [vmem:[%s14941_s16 + $0x540] sm:$0xf] }
 0xa38   : > { %9119 = vmatpush.bf16.msrb.mxu1 %v12849_v4  ;;  %9133 = vmatpush.bf16.msra.mxu2 %v12945_v16  ;;  %v6907_v4 = vmul.f32 %v6883_v7, %v17340_v48  ;;  %v17377_v16 = vld [vmem:[%s14941_s16 + $0x3c8] sm:$0xf0]  ;;  %v6663_v24 = vpop.f32.mrf.mxu3 }
 0xa39   : > { %v17392_v44 = vadd.f32 %v6663_v24, %v6650_v2  ;;  %v12705_v13 = vor.u32 %v17377_v16, %v17374_v59  ;;  %v14097_v7 = vld [vmem:[%s14941_s16 + $0x488] sm:$0xf0]  ;;  %v7073_v59 = vmul.f32 %v7049_v0, %v17211_v42  ;;  %v13052_v42 = vld [vmem:[%s14941_s16 + $0x678] sm:$0xf]  ;;  %v14154_v0 = vld [vmem:[%s14941_s16 + $0x650] sm:$0xf0] }
 0xa3a   : > { %9092 = vmatpush.bf16.msra.mxu3 %v12645_v41  ;;  %9106 = vmatpush.bf16.msrb.mxu0 %v12741_v26  ;;  %v6930_v41 = vmul.f32 0.044715, %v6906_v30  ;;  %v6691_v26 = vpop.f32.mrf.mxu1  ;;  %v6931_v28 = vmul.f32 0.044715, %v6907_v4  ;;  %v14121_v30 = vld [vmem:[%s14941_s16 + $0x548] sm:$0xf0] }
 0xa3b   : > { %v6692_v58 = vadd.f32 %v6691_v26, %v6678_v39  ;;  %v6894_v62 = vmul.f32 %v17392_v44, %v17392_v44  ;;  %v7085_v39 = vmul.f32 %v7061_v23, %v17256_v18  ;;  %v13160_v4 = vld [vmem:[%s14941_s16 + $0x750] sm:$0xf]  ;;  %v12897_v15 = vor.u32 %v14121_v30, %v12896_v49  ;;  %v14160_v26 = vld [vmem:[%s14941_s16 + $0x680] sm:$0xf0] }
 0xa3c   : > { %9120 = vmatpush.bf16.msrb.mxu1 %v12837_v19  ;;  %9134 = vmatpush.bf16.msra.mxu2 %v12933_v45  ;;  %v6954_v51 = vadd.f32 %v6930_v41, %v17338_v61  ;;  %v13172_v19 = vld [vmem:[%s14941_s16 + $0x768] sm:$0xf]  ;;  %v14190_v45 = vld [vmem:[%s14941_s16 + $0x770] sm:$0xf0]  ;;  %v6955_v27 = vadd.f32 %v6931_v28, %v17340_v48  ;;  %v13053_v23 = vor.u32 %v14160_v26, %v13052_v42  ;;  %v13040_v28 = vld [vmem:[%s14941_s16 + $0x660] sm:$0xf] }
 0xa3d   : > { %v17399_v11 = vadd.f32 %v6705_v38, %v6692_v58  ;;  %v13173_v54 = vor.u32 %v14190_v45, %v13172_v19  ;;  %v6918_v25 = vmul.f32 %v6894_v62, %v17392_v44  ;;  %v17422_v6 = vpack.c.bf16 %v7085_v39, %v7073_v59  ;;  %v14181_v38 = vld [vmem:[%s14941_s16 + $0x728] sm:$0xf0]  ;;  %v13016_v30 = vld [vmem:[%s14941_s16 + $0x630] sm:$0xf] }
 0xa3e   : > { %9093 = vmatpush.bf16.msra.mxu3 %v12633_v57  ;;  %9107 = vmatpush.bf16.msrb.mxu0 %v12729_v1  ;;  %v14163_v57 = vld [vmem:[%s14941_s16 + $0x698] sm:$0xf0]  ;;  %v12909_v1 = vor.u32 %v14124_v50, %v12908_v47  ;;  %v6978_v37 = vmul.f32 0.7978846, %v6954_v51  ;;  %v6979_v53 = vmul.f32 0.7978846, %v6955_v27  ;;  %v13041_v45 = vor.u32 %v14157_v32, %v13040_v28 }
 0xa3f   : > { %v6895_v33 = vmul.f32 %v17399_v11, %v17399_v11  ;;  %v13065_v14 = vor.u32 %v14163_v57, %v13064_v3  ;;  %v6942_v18 = vmul.f32 0.044715, %v6918_v25  ;;  %v13136_v51 = vld [vmem:[%s14941_s16 + $0x720] sm:$0xf]  ;;  %v17439_v27 = vld [vmem:[%s14971_s14 + $0x8] sm:$0xf] }
 0xa40   : > { %9121 = vmatpush.bf16.msrb.mxu1 %v12825_v21  ;;  %9135 = vmatpush.bf16.msra.mxu2 %v12921_v29  ;;  %v14187_v21 = vld [vmem:[%s14941_s16 + $0x758] sm:$0xf0]  ;;  %14497 = vtanh.f32 %v6978_v37  ;;  %v12801_v29 = vor.u32 %v14097_v7, %v12800_v46  ;;  %v13137_v3 = vor.u32 %v14181_v38, %v13136_v51  ;;  %v14178_v37 = vld [vmem:[%s14941_s16 + $0x710] sm:$0xf0]  ;;  %v13112_v59 = vld [vmem:[%s14941_s16 + $0x6f0] sm:$0xf] }
 0xa41   : > { %v6919_v16 = vmul.f32 %v6895_v33, %v17399_v11  ;;  %14499 = vtanh.f32 %v6979_v53  ;;  %v13161_v2 = vor.u32 %v14187_v21, %v13160_v4  ;;  %v6966_v41 = vadd.f32 %v6942_v18, %v17392_v44  ;;  %v13364_v28 = vld [vmem:[%s14941_s16 + $0x8e8] sm:$0xf]  ;;  %v12992_v51 = vld [vmem:[%s14941_s16 + $0x600] sm:$0xf]  ;;  %v14145_v38 = vld [vmem:[%s14941_s16 + $0x608] sm:$0xf0] }
 0xa42   : > { %9094 = vmatpush.bf16.msra.mxu3 %v12621_v63  ;;  %9108 = vmatpush.bf16.msrb.mxu0 %v12717_v10  ;;  %v13148_v63 = vld [vmem:[%s14941_s16 + $0x738] sm:$0xf]  ;;  %v14184_v10 = vld [vmem:[%s14941_s16 + $0x740] sm:$0xf0] }
 0xa43   : > { %v6943_v40 = vmul.f32 0.044715, %v6919_v16  ;;  %v6990_v50 = vmul.f32 0.7978846, %v6966_v41  ;;  %v13149_v58 = vor.u32 %v14184_v10, %v13148_v63  ;;  %v14175_v16 = vld [vmem:[%s14941_s16 + $0x6f8] sm:$0xf0] }
 0xa44   : > { %9122 = vmatpush.bf16.msrb.mxu1 %v12813_v36  ;;  %9136 = vmatpush.bf16.msra.mxu2 %v12909_v1  ;;  %v13028_v36 = vld [vmem:[%s14941_s16 + $0x648] sm:$0xf]  ;;  %v14148_v10 = vld [vmem:[%s14941_s16 + $0x620] sm:$0xf0] }
 0xa45   : > { %v6967_v47 = vadd.f32 %v6943_v40, %v17399_v11  ;;  %14501 = vtanh.f32 %v6990_v50  ;;  %v13124_v1 = vld [vmem:[%s14941_s16 + $0x708] sm:$0xf]  ;;  %v13029_v39 = vor.u32 %v14154_v0, %v13028_v36  ;;  %v14172_v50 = vld [vmem:[%s14941_s16 + $0x6e0] sm:$0xf0] }
 0xa46   : > { %9095 = vmatpush.bf16.msra.mxu3 %v12609_v52  ;;  %9109 = vmatpush.bf16.msrb.mxu0 %v12705_v13  ;;  %v14498_v24 = vpop.eup %14497  ;;  %v4916_v13 = vperm.slane %v17439_v27, 0  ;;  %v13125_v53 = vor.u32 %v14178_v37, %v13124_v1  ;;  %v6731_v4 = vpop.f32.mrf.mxu0  ;;  %v13256_v37 = vld [vmem:[%s14941_s16 + $0x810] sm:$0xf] }
 0xa47   : > { %v6991_v56 = vmul.f32 0.7978846, %v6967_v47  ;;  %v14500_v52 = vpop.eup %14499  ;;  %v7026_v19 = vadd.f32 1.0, %v14498_v24  ;;  %v13113_v47 = vor.u32 %v14175_v16, %v13112_v59  ;;  %v14238_v24 = vld [vmem:[%s14941_s16 + $0x8f0] sm:$0xf0] }
 0xa48   : > { %9123 = vmatpush.bf16.msrb.mxu1 %v12801_v29  ;;  %9137 = vmatpush.bf16.msra.mxu2 %v12897_v15  ;;  %v7027_v57 = vadd.f32 1.0, %v14500_v52  ;;  %v13973_v52 = vld [vmem:[%s14941_s16 + $0xac] sm:$0xf]  ;;  %v13365_v36 = vor.u32 %v14238_v24, %v13364_v28  ;;  %v13970_v16 = vld [vmem:[%s14941_s16 + $0x94] sm:$0xf] }
 0xa49   : > { %9096 = vmatmul.bf16.vlgmr.msra.gmra.mxu3 %v17416_v9  ;;  %9110 = vmatmul.bf16.vlgmr.msrb.gmra.mxu0 %v17422_v6  ;;  %14503 = vtanh.f32 %v6991_v56  ;;  %v7050_v46 = vmul.f32 0.5, %v7026_v19  ;;  %v6745_v40 = vpop.f32.mrf.mxu1  ;;  %v13268_v56 = vld [vmem:[%s14941_s16 + $0x828] sm:$0xf]  ;;  %v13967_v28 = vld [vmem:[%s14941_s16 + $0x7c] sm:$0xf] }
 0xa4a   : > { %9144 = vmatpush.bf16.msrb.mxu3 %v13077_v60  ;;  %9158 = vmatpush.bf16.msra.mxu0 %v13173_v54  ;;  %v7051_v33 = vmul.f32 0.5, %v7027_v57  ;;  %v14151_v54 = vld [vmem:[%s14941_s16 + $0x638] sm:$0xf0]  ;;  %v14169_v57 = vld [vmem:[%s14941_s16 + $0x6c8] sm:$0xf0] }
 0xa4b   : > { %v14502_v62 = vpop.eup %14501  ;;  %v7074_v29 = vmul.f32 %v7050_v46, %v17338_v61  ;;  %v13017_v42 = vor.u32 %v14151_v54, %v13016_v30  ;;  %v13100_v61 = vld [vmem:[%s14941_s16 + $0x6d8] sm:$0xf]  ;;  %v12993_v54 = vor.u32 %v14145_v38, %v12992_v51  ;;  %v14205_v51 = vld [vmem:[%s14941_s16 + $0x7e8] sm:$0xf0]  ;;  %v13328_v38 = vld [vmem:[%s14941_s16 + $0x8a0] sm:$0xf] }
 0xa4c   : > { %v7038_v7 = vadd.f32 1.0, %v14502_v62  ;;  %v6717_v21 = vpop.f32.mrf.mxu3  ;;  %v7075_v41 = vmul.f32 %v7051_v33, %v17340_v48  ;;  %v13101_v0 = vor.u32 %v14172_v50, %v13100_v61  ;;  %9186 = vmatpush.bf16.msrb.mxu2 %v13365_v36  ;;  %v14211_v62 = vld [vmem:[%s14941_s16 + $0x818] sm:$0xf0] }
 0xa4d   : > { %v6718_v18 = vadd.f32 %v6717_v21, %v4916_v13  ;;  %v13257_v33 = vor.u32 %v14211_v62, %v13256_v37  ;;  %v13991_v36 = vld [vmem:[%s14941_s16 + $0x13c] sm:$0xf]  ;;  %v13964_v37 = vld [vmem:[%s14941_s16 + $0x64] sm:$0xf]  ;;  %v12274_v62 = vld [vmem:[%s14941_s16 + $0x6c] sm:$0xf0] }
 0xa4e   : > { %9145 = vmatpush.bf16.msrb.mxu3 %v13065_v14  ;;  %9159 = vmatpush.bf16.msra.mxu0 %v13161_v2  ;;  %v7062_v25 = vmul.f32 0.5, %v7038_v7  ;;  %v13004_v2 = vld [vmem:[%s14941_s16 + $0x618] sm:$0xf]  ;;  %v6733_v30 = vpop.f32.mrf.mxu0 }
 0xa4f   : > { %v14504_v60 = vpop.eup %14503  ;;  %v6732_v63 = vadd.f32 %v6731_v4, %v6718_v18  ;;  %v13005_v32 = vor.u32 %v14148_v10, %v13004_v2 }
 0xa50   : > { %v7039_v49 = vadd.f32 1.0, %v14504_v60  ;;  %v7086_v15 = vmul.f32 %v7062_v25, %v17392_v44  ;;  %v13352_v60 = vld [vmem:[%s14941_s16 + $0x8d0] sm:$0xf] }
 0xa51   : > { %v17463_v48 = vadd.f32 %v6745_v40, %v6732_v63  ;;  %v6747_v18 = vpop.f32.mrf.mxu1  ;;  %v14208_v40 = vld [vmem:[%s14941_s16 + $0x800] sm:$0xf0]  ;;  %v12394_v63 = vld [vmem:[%s14941_s16 + $0x15c] sm:$0xf0] }
 0xa52   : > { %9146 = vmatpush.bf16.msrb.mxu3 %v13053_v23  ;;  %9160 = vmatpush.bf16.msra.mxu0 %v13149_v58  ;;  %v7063_v14 = vmul.f32 0.5, %v7039_v49  ;;  %v17456_v44 = vpack.c.bf16 %v7086_v15, %v7074_v29  ;;  %v14214_v23 = vld [vmem:[%s14941_s16 + $0x830] sm:$0xf0]  ;;  %v14235_v49 = vld [vmem:[%s14941_s16 + $0x8d8] sm:$0xf0] }
 0xa53   : > { %v6884_v19 = vmul.f32 %v17463_v48, %v17463_v48  ;;  %v13353_v25 = vor.u32 %v14235_v49, %v13352_v60  ;;  %v13244_v15 = vld [vmem:[%s14941_s16 + $0x7f8] sm:$0xf]  ;;  %v12370_v49 = vld [vmem:[%s14941_s16 + $0x12c] sm:$0xf0] }
 0xa54   : > { %v7087_v26 = vmul.f32 %v7063_v14, %v17399_v11  ;;  %v13269_v11 = vor.u32 %v14214_v23, %v13268_v56  ;;  %9124 = vmatmul.bf16.vlgmr.msrb.gmra.mxu1 %v17456_v44  ;;  %v6719_v1 = vpop.f32.mrf.mxu3  ;;  %v12298_v14 = vld [vmem:[%s14941_s16 + $0x9c] sm:$0xf0]  ;;  %v13245_v10 = vor.u32 %v14208_v40, %v13244_v15  ;;  %v13985_v15 = vld [vmem:[%s14941_s16 + $0x10c] sm:$0xf]  ;;  %v13208_v40 = vld [vmem:[%s14941_s16 + $0x7b0] sm:$0xf] }
 0xa55   : > { %v6908_v46 = vmul.f32 %v6884_v19, %v17463_v48  ;;  %v6720_v7 = vadd.f32 %v6719_v1, %v4916_v13  ;;  %9187 = vmatpush.bf16.msrb.mxu2 %v13353_v25  ;;  %v12301_v23 = vor.u32 %v13970_v16, %v12298_v14  ;;  %v12382_v19 = vld [vmem:[%s14941_s16 + $0x144] sm:$0xf0]  ;;  %v4917_v25 = vperm.slane %v17439_v27, 1  ;;  %v13961_v16 = vld [vmem:[%s14941_s16 + $0x4c] sm:$0xf] }
 0xa56   : > { %9147 = vmatpush.bf16.msrb.mxu3 %v13041_v45  ;;  %9161 = vmatpush.bf16.msra.mxu0 %v13137_v3  ;;  %v17461_v58 = vpack.c.bf16 %v7087_v26, %v7075_v41  ;;  %v12310_v45 = vld [vmem:[%s14941_s16 + $0xb4] sm:$0xf0]  ;;  %v13088_v3 = vld [vmem:[%s14941_s16 + $0x6c0] sm:$0xf]  ;;  %v13994_v26 = vld [vmem:[%s14941_s16 + $0x154] sm:$0xf]  ;;  %v12385_v60 = vor.u32 %v13991_v36, %v12382_v19 }
 0xa57   : > { %9172 = vmatpush.bf16.msra.mxu1 %v13269_v11  ;;  %v6932_v4 = vmul.f32 0.044715, %v6908_v46  ;;  %v6734_v21 = vadd.f32 %v6733_v30, %v6720_v7  ;;  %v12313_v59 = vor.u32 %v13973_v52, %v12310_v45  ;;  %v13089_v13 = vor.u32 %v14169_v57, %v13088_v3  ;;  %v12286_v11 = vld [vmem:[%s14941_s16 + $0x84] sm:$0xf0]  ;;  %v14202_v7 = vld [vmem:[%s14941_s16 + $0x7d0] sm:$0xf0] }
 0xa58   : > { %9138 = vmatmul.bf16.vlgmr.msra.gmra.mxu2 %v17461_v58  ;;  %v12397_v24 = vor.u32 %v13994_v26, %v12394_v63  ;;  %v12289_v1 = vor.u32 %v13967_v28, %v12286_v11  ;;  %v13220_v46 = vld [vmem:[%s14941_s16 + $0x7c8] sm:$0xf]  ;;  %v12262_v14 = vld [vmem:[%s14941_s16 + $0x54] sm:$0xf0]  ;;  %v13304_v63 = vld [vmem:[%s14941_s16 + $0x870] sm:$0xf] }
 0xa59   : > { %v6956_v2 = vadd.f32 %v6932_v4, %v17463_v48  ;;  %v17489_v41 = vadd.f32 %v6747_v18, %v6734_v21  ;;  %v13221_v30 = vor.u32 %v14202_v7, %v13220_v46  ;;  %v6759_v18 = vpop.f32.mrf.mxu2  ;;  %v13196_v11 = vld [vmem:[%s14941_s16 + $0x798] sm:$0xf]  ;;  %v14220_v19 = vld [vmem:[%s14941_s16 + $0x860] sm:$0xf0]  ;;  %v13979_v7 = vld [vmem:[%s14941_s16 + $0xdc] sm:$0xf] }
 0xa5a   : > { %9148 = vmatpush.bf16.msrb.mxu3 %v13029_v39  ;;  %9162 = vmatpush.bf16.msra.mxu0 %v13125_v53  ;;  %v13997_v39 = vld [vmem:[%s14941_s16 + $0x16c] sm:$0xf]  ;;  %v12406_v53 = vld [vmem:[%s14941_s16 + $0x174] sm:$0xf0] }
 0xa5b   : > { %v12409_v29 = vor.u32 %v13997_v39, %v12406_v53  ;;  %9173 = vmatpush.bf16.msra.mxu1 %v13257_v33  ;;  %v6980_v50 = vmul.f32 0.7978846, %v6956_v2  ;;  %v6896_v56 = vmul.f32 %v17489_v41, %v17489_v41  ;;  %v13316_v39 = vld [vmem:[%s14941_s16 + $0x888] sm:$0xf]  ;;  %v13988_v33 = vld [vmem:[%s14941_s16 + $0x124] sm:$0xf] }
 0xa5c   : > { %v12358_v2 = vld [vmem:[%s14941_s16 + $0x114] sm:$0xf0] }
 0xa5d   : > { %v6920_v52 = vmul.f32 %v6896_v56, %v17489_v41  ;;  %14505 = vtanh.f32 %v6980_v50  ;;  %v12265_v50 = vor.u32 %v13961_v16, %v12262_v14  ;;  %v13958_v56 = vld [vmem:[%s14941_s16 + $0x34] sm:$0xf]  ;;  %v12361_v28 = vor.u32 %v13985_v15, %v12358_v2  ;;  %v14021_v16 = vld [vmem:[%s14941_s16 + $0x22c] sm:$0xf] }
 0xa5e   : > { %9149 = vmatpush.bf16.msrb.mxu3 %v13017_v42  ;;  %9163 = vmatpush.bf16.msra.mxu0 %v13113_v47  ;;  %v13340_v42 = vld [vmem:[%s14941_s16 + $0x8b8] sm:$0xf]  ;;  %v14232_v47 = vld [vmem:[%s14941_s16 + $0x8c0] sm:$0xf0]  ;;  %v14045_v15 = vld [vmem:[%s14941_s16 + $0x2ec] sm:$0xf] }
 0xa5f   : > { %v13341_v61 = vor.u32 %v14232_v47, %v13340_v42  ;;  %9174 = vmatpush.bf16.msra.mxu1 %v13245_v10  ;;  %v6944_v57 = vmul.f32 0.044715, %v6920_v52  ;;  %v14199_v42 = vld [vmem:[%s14941_s16 + $0x7b8] sm:$0xf0]  ;;  %v12346_v52 = vld [vmem:[%s14941_s16 + $0xfc] sm:$0xf0] }
 0xa60   : > { %v13209_v26 = vor.u32 %v14199_v42, %v13208_v40  ;;  %v14223_v10 = vld [vmem:[%s14941_s16 + $0x878] sm:$0xf0] }
 0xa61   : > { %9188 = vmatpush.bf16.msrb.mxu2 %v13341_v61  ;;  %v6968_v53 = vadd.f32 %v6944_v57, %v17489_v41  ;;  %v13305_v47 = vor.u32 %v14223_v10, %v13304_v63  ;;  %v12238_v57 = vld [vmem:[%s14941_s16 + $0x24] sm:$0xf0]  ;;  %v12226_v63 = vld [vmem:[%s14941_s16 + $0xc] sm:$0xf0] }
 0xa62   : > { %9150 = vmatpush.bf16.msrb.mxu3 %v13005_v32  ;;  %9164 = vmatpush.bf16.msra.mxu0 %v13101_v0  ;;  %v13232_v32 = vld [vmem:[%s14941_s16 + $0x7e0] sm:$0xf]  ;;  %v14229_v0 = vld [vmem:[%s14941_s16 + $0x8a8] sm:$0xf0] }
 0xa63   : > { %v13233_v45 = vor.u32 %v14205_v51, %v13232_v32  ;;  %v13329_v3 = vor.u32 %v14229_v0, %v13328_v38  ;;  %v6992_v21 = vmul.f32 0.7978846, %v6968_v53  ;;  %v13292_v32 = vld [vmem:[%s14941_s16 + $0x858] sm:$0xf]  ;;  %v6760_v51 = vadd.f32 %v6759_v18, %v4917_v25  ;;  %v13982_v38 = vld [vmem:[%s14941_s16 + $0xf4] sm:$0xf] }
 0xa65   : > { %9175 = vmatpush.bf16.msra.mxu1 %v13233_v45  ;;  %9189 = vmatpush.bf16.msrb.mxu2 %v13329_v3  ;;  %14507 = vtanh.f32 %v6992_v21  ;;  %v13955_v3 = vld [vmem:[%s14941_s16 + $0x1c] sm:$0xf]  ;;  %v13280_v21 = vld [vmem:[%s14941_s16 + $0x840] sm:$0xf] }
 0xa66   : > { %9151 = vmatpush.bf16.msrb.mxu3 %v12993_v54  ;;  %9165 = vmatpush.bf16.msra.mxu0 %v13089_v13  ;;  %v14226_v54 = vld [vmem:[%s14941_s16 + $0x890] sm:$0xf0]  ;;  %v14506_v13 = vpop.eup %14505  ;;  %v6787_v45 = vpop.f32.mrf.mxu0  ;;  %v12241_v2 = vor.u32 %v13955_v3, %v12238_v57 }
 0xa67   : > { %v13317_v4 = vor.u32 %v14226_v54, %v13316_v39  ;;  %v7028_v61 = vadd.f32 1.0, %v14506_v13  ;;  %v12334_v39 = vld [vmem:[%s14941_s16 + $0xe4] sm:$0xf0]  ;;  %v6761_v13 = vpop.f32.mrf.mxu2 }
 0xa69   : > { %9176 = vmatpush.bf16.msra.mxu1 %v13221_v30  ;;  %9190 = vmatpush.bf16.msrb.mxu2 %v13317_v4  ;;  %v14193_v30 = vld [vmem:[%s14941_s16 + $0x788] sm:$0xf0] }
 0xa6a   : > { %9200 = vmatpush.bf16.msra.mxu3 %v12313_v59  ;;  %9214 = vmatpush.bf16.msrb.mxu0 %v12409_v29  ;;  %v12277_v59 = vor.u32 %v13964_v37, %v12274_v62  ;;  %v12373_v29 = vor.u32 %v13988_v33, %v12370_v49  ;;  %v7052_v62 = vmul.f32 0.5, %v7028_v61  ;;  %v12349_v33 = vor.u32 %v13982_v38, %v12346_v52  ;;  %v13184_v49 = vld [vmem:[%s14941_s16 + $0x780] sm:$0xf] }
 0xa6b   : > { %v14508_v37 = vpop.eup %14507  ;;  %v13185_v4 = vor.u32 %v14193_v30, %v13184_v49  ;;  %v12490_v38 = vld [vmem:[%s14941_s16 + $0x21c] sm:$0xf0]  ;;  %v12478_v49 = vld [vmem:[%s14941_s16 + $0x204] sm:$0xf0]  ;;  %v14039_v30 = vld [vmem:[%s14941_s16 + $0x2bc] sm:$0xf] }
 0xa6c   : > { %v6773_v0 = vpop.f32.mrf.mxu3  ;;  %v7040_v53 = vadd.f32 1.0, %v14508_v37  ;;  %v7076_v40 = vmul.f32 %v7052_v62, %v17463_v48 }
 0xa6d   : > { %9177 = vmatpush.bf16.msra.mxu1 %v13209_v26  ;;  %9191 = vmatpush.bf16.msrb.mxu2 %v13305_v47  ;;  %v13952_v26 = vld [vmem:[%s14941_s16 + $0x4] sm:$0xf]  ;;  %v12598_v47 = vld [vmem:[%s14941_s16 + $0x2f4] sm:$0xf0] }
 0xa6e   : > { %9201 = vmatpush.bf16.msra.mxu3 %v12301_v23  ;;  %9215 = vmatpush.bf16.msrb.mxu0 %v12397_v24  ;;  %v12250_v23 = vld [vmem:[%s14941_s16 + $0x3c] sm:$0xf0]  ;;  %v14196_v24 = vld [vmem:[%s14941_s16 + $0x7a0] sm:$0xf0]  ;;  %v7064_v14 = vmul.f32 0.5, %v7040_v53  ;;  %v12601_v48 = vor.u32 %v14045_v15, %v12598_v47  ;;  %v12229_v57 = vor.u32 %v13952_v26, %v12226_v63  ;;  %v6789_v37 = vpop.f32.mrf.mxu0 }
 0xa6f   : > { %v13197_v36 = vor.u32 %v14196_v24, %v13196_v11  ;;  %v12253_v46 = vor.u32 %v13958_v56, %v12250_v23  ;;  %v12694_v56 = vld [vmem:[%s14941_s16 + $0x3b4] sm:$0xf0]  ;;  %v12337_v23 = vor.u32 %v13979_v7, %v12334_v39  ;;  %v6762_v11 = vadd.f32 %v6761_v13, %v4917_v25  ;;  %v12670_v15 = vld [vmem:[%s14941_s16 + $0x384] sm:$0xf0]  ;;  %v14036_v26 = vld [vmem:[%s14941_s16 + $0x2a4] sm:$0xf] }
 0xa70   : > { %v7088_v61 = vmul.f32 %v7064_v14, %v17489_v41 }
 0xa71   : > { %9178 = vmatpush.bf16.msra.mxu1 %v13197_v36 }
 0xa72   : > { %9202 = vmatpush.bf16.msra.mxu3 %v12289_v1  ;;  %9216 = vmatpush.bf16.msrb.mxu0 %v12385_v60  ;;  %v13293_v1 = vor.u32 %v14220_v19, %v13292_v32  ;;  %v6774_v60 = vadd.f32 %v6773_v0, %v6760_v51  ;;  %v12322_v32 = vld [vmem:[%s14941_s16 + $0xcc] sm:$0xf0]  ;;  %v14018_v51 = vld [vmem:[%s14941_s16 + $0x214] sm:$0xf]  ;;  %v17562_v52 = vpack.c.bf16 %v7088_v61, %v7076_v40  ;;  %v17566_v0 = vpop.f32.mrf.mxu1 }
 0xa73   : > { %v12493_v36 = vor.u32 %v14018_v51, %v12490_v38  ;;  %v14042_v19 = vld [vmem:[%s14941_s16 + $0x2d4] sm:$0xf]  ;;  %v12550_v38 = vld [vmem:[%s14941_s16 + $0x294] sm:$0xf0] }
 0xa74   : > { %v17539_v54 = vadd.f32 %v6787_v45, %v6774_v60  ;;  %9192 = vmatpush.bf16.msrb.mxu2 %v13293_v1  ;;  %v6775_v41 = vpop.f32.mrf.mxu3  ;;  %v12586_v45 = vld [vmem:[%s14941_s16 + $0x2dc] sm:$0xf0]  ;;  %9152 = vmatmul.bf16.vlgmr.msrb.gmra.mxu3 %v17562_v52  ;;  %v14066_v60 = vld [vmem:[%s14941_s16 + $0x394] sm:$0xf] }
 0xa75   : > { %9179 = vmatpush.bf16.msra.mxu1 %v13185_v4  ;;  %v6776_v3 = vadd.f32 %v6775_v41, %v6762_v11  ;;  %v12589_v1 = vor.u32 %v14042_v19, %v12586_v45  ;;  %v14009_v11 = vld [vmem:[%s14941_s16 + $0x1cc] sm:$0xf]  ;;  %v4918_v19 = vperm.slane %v17439_v27, 2  ;;  %v4919_v45 = vperm.slane %v17439_v27, 3 }
 0xa76   : > { %9203 = vmatpush.bf16.msra.mxu3 %v12277_v59  ;;  %9217 = vmatpush.bf16.msrb.mxu0 %v12373_v29  ;;  %v14217_v59 = vld [vmem:[%s14941_s16 + $0x848] sm:$0xf0]  ;;  %v12502_v29 = vld [vmem:[%s14941_s16 + $0x234] sm:$0xf0]  ;;  %v6885_v42 = vmul.f32 %v17539_v54, %v17539_v54 }
 0xa77   : > { %v13281_v18 = vor.u32 %v14217_v59, %v13280_v21  ;;  %v12505_v10 = vor.u32 %v14021_v16, %v12502_v29  ;;  %v17572_v53 = vadd.f32 %v6789_v37, %v6776_v3  ;;  %v12574_v21 = vld [vmem:[%s14941_s16 + $0x2c4] sm:$0xf0]  ;;  %v17578_v16 = vpop.f32.mrf.mxu2  ;;  %v14063_v29 = vld [vmem:[%s14941_s16 + $0x37c] sm:$0xf]  ;;  %v14057_v3 = vld [vmem:[%s14941_s16 + $0x34c] sm:$0xf] }
 0xa78   : > { %v6909_v24 = vmul.f32 %v6885_v42, %v17539_v54  ;;  %v12577_v13 = vor.u32 %v14039_v30, %v12574_v21  ;;  %v14012_v42 = vld [vmem:[%s14941_s16 + $0x1e4] sm:$0xf] }
 0xa79   : > { %9193 = vmatpush.bf16.msrb.mxu2 %v13281_v18  ;;  %9228 = vmatpush.bf16.msrb.mxu1 %v12505_v10  ;;  %v6897_v14 = vmul.f32 %v17572_v53, %v17572_v53  ;;  %v12562_v10 = vld [vmem:[%s14941_s16 + $0x2ac] sm:$0xf0] }
 0xa7a   : > { %9204 = vmatpush.bf16.msra.mxu3 %v12265_v50  ;;  %9218 = vmatpush.bf16.msrb.mxu0 %v12361_v28  ;;  %v14069_v50 = vld [vmem:[%s14941_s16 + $0x3ac] sm:$0xf]  ;;  %v13976_v28 = vld [vmem:[%s14941_s16 + $0xc4] sm:$0xf]  ;;  %v6933_v25 = vmul.f32 0.044715, %v6909_v24  ;;  %v12565_v61 = vor.u32 %v14036_v26, %v12562_v10 }
 0xa7b   : > { %v12697_v62 = vor.u32 %v14069_v50, %v12694_v56  ;;  %v12325_v7 = vor.u32 %v13976_v28, %v12322_v32  ;;  %v6921_v40 = vmul.f32 %v6897_v14, %v17572_v53  ;;  %v12673_v50 = vor.u32 %v14063_v29, %v12670_v15  ;;  %v14060_v56 = vld [vmem:[%s14941_s16 + $0x364] sm:$0xf]  ;;  %v12454_v24 = vld [vmem:[%s14941_s16 + $0x1d4] sm:$0xf0]  ;;  %v14033_v32 = vld [vmem:[%s14941_s16 + $0x28c] sm:$0xf] }
 0xa7c   : > { %v6957_v39 = vadd.f32 %v6933_v25, %v17539_v54  ;;  %v12457_v51 = vor.u32 %v14009_v11, %v12454_v24  ;;  %v6802_v14 = vadd.f32 %v17566_v0, %v4918_v19  ;;  %v14003_v29 = vld [vmem:[%s14941_s16 + $0x19c] sm:$0xf]  ;;  %v12430_v15 = vld [vmem:[%s14941_s16 + $0x1a4] sm:$0xf0]  ;;  %v14093_v11 = vld [vmem:[%s14941_s16 + $0x46c] sm:$0xf] }
 0xa7d   : > { %9242 = vmatpush.bf16.msra.mxu2 %v12601_v48  ;;  %9229 = vmatpush.bf16.msrb.mxu1 %v12493_v36  ;;  %v6945_v47 = vmul.f32 0.044715, %v6921_v40  ;;  %v17591_v48 = vpop.f32.mrf.mxu1  ;;  %v12553_v36 = vor.u32 %v14033_v32, %v12550_v38  ;;  %v12433_v40 = vor.u32 %v14003_v29, %v12430_v15  ;;  %v14051_v0 = vld [vmem:[%s14941_s16 + $0x31c] sm:$0xf]  ;;  %v12418_v38 = vld [vmem:[%s14941_s16 + $0x18c] sm:$0xf0] }
 0xa7e   : > { %9205 = vmatpush.bf16.msra.mxu3 %v12253_v46  ;;  %9219 = vmatpush.bf16.msrb.mxu0 %v12349_v33  ;;  %v12682_v46 = vld [vmem:[%s14941_s16 + $0x39c] sm:$0xf0]  ;;  %v14015_v33 = vld [vmem:[%s14941_s16 + $0x1fc] sm:$0xf]  ;;  %v6981_v59 = vmul.f32 0.7978846, %v6957_v39 }
 0xa7f   : > { %v12481_v4 = vor.u32 %v14015_v33, %v12478_v49  ;;  %v12685_v18 = vor.u32 %v14066_v60, %v12682_v46  ;;  %v6969_v28 = vadd.f32 %v6945_v47, %v17572_v53  ;;  %v17602_v37 = vpop.f32.mrf.mxu2  ;;  %v12442_v60 = vld [vmem:[%s14941_s16 + $0x1bc] sm:$0xf0]  ;;  %v14030_v46 = vld [vmem:[%s14941_s16 + $0x274] sm:$0xf] }
 0xa80   : > { %14509 = vtanh.f32 %v6981_v59  ;;  %v12538_v33 = vld [vmem:[%s14941_s16 + $0x27c] sm:$0xf0]  ;;  %v14054_v59 = vld [vmem:[%s14941_s16 + $0x334] sm:$0xf] }
 0xa81   : > { %9243 = vmatpush.bf16.msra.mxu2 %v12589_v1  ;;  %9230 = vmatpush.bf16.msrb.mxu1 %v12481_v4  ;;  %v6993_v41 = vmul.f32 0.7978846, %v6969_v28  ;;  %v12541_v49 = vor.u32 %v14030_v46, %v12538_v33  ;;  %v12622_v28 = vld [vmem:[%s14941_s16 + $0x324] sm:$0xf0]  ;;  %v14090_v29 = vld [vmem:[%s14941_s16 + $0x454] sm:$0xf] }
 0xa82   : > { %9206 = vmatpush.bf16.msra.mxu3 %v12241_v2  ;;  %9220 = vmatpush.bf16.msrb.mxu0 %v12337_v23  ;;  %v12466_v2 = vld [vmem:[%s14941_s16 + $0x1ec] sm:$0xf0]  ;;  %v12778_v15 = vld [vmem:[%s14941_s16 + $0x45c] sm:$0xf0] }
 0xa83   : > { %v12469_v63 = vor.u32 %v14012_v42, %v12466_v2  ;;  %v12658_v23 = vld [vmem:[%s14941_s16 + $0x36c] sm:$0xf0]  ;;  %14511 = vtanh.f32 %v6993_v41  ;;  %v14027_v42 = vld [vmem:[%s14941_s16 + $0x25c] sm:$0xf]  ;;  %v12526_v2 = vld [vmem:[%s14941_s16 + $0x264] sm:$0xf0] }
 0xa84   : > { %v12661_v25 = vor.u32 %v14060_v56, %v12658_v23  ;;  %v12529_v10 = vor.u32 %v14027_v42, %v12526_v2 }
 0xa85   : > { %9244 = vmatpush.bf16.msra.mxu2 %v12577_v13  ;;  %9231 = vmatpush.bf16.msrb.mxu1 %v12469_v63  ;;  %v6816_v63 = vadd.f32 %v17578_v16, %v6802_v14  ;;  %v14024_v16 = vld [vmem:[%s14941_s16 + $0x244] sm:$0xf]  ;;  %v12610_v14 = vld [vmem:[%s14941_s16 + $0x30c] sm:$0xf0] }
 0xa86   : > { %9207 = vmatpush.bf16.msra.mxu3 %v12229_v57  ;;  %9221 = vmatpush.bf16.msrb.mxu0 %v12325_v7  ;;  %v12646_v57 = vld [vmem:[%s14941_s16 + $0x354] sm:$0xf0]  ;;  %v14510_v1 = vpop.eup %14509  ;;  %v6843_v7 = vpop.f32.mrf.mxu0 }
 0xa87   : > { %v7029_v30 = vadd.f32 1.0, %v14510_v1  ;;  %v6844_v4 = vadd.f32 %v6843_v7, %v4919_v45  ;;  %v12649_v21 = vor.u32 %v14057_v3, %v12646_v57  ;;  %v12790_v3 = vld [vmem:[%s14941_s16 + $0x474] sm:$0xf0]  ;;  %v12514_v1 = vld [vmem:[%s14941_s16 + $0x24c] sm:$0xf0] }
 0xa88   : > { %v12517_v46 = vor.u32 %v14024_v16, %v12514_v1  ;;  %v13054_v1 = vld [vmem:[%s14941_s16 + $0x684] sm:$0xf0] }
 0xa89   : > { %9245 = vmatpush.bf16.msra.mxu2 %v12565_v61  ;;  %9232 = vmatpush.bf16.msrb.mxu1 %v12457_v51  ;;  %v6857_v13 = vpop.f32.mrf.mxu1  ;;  %v14512_v26 = vpop.eup %14511  ;;  %v7053_v47 = vmul.f32 0.5, %v7029_v30  ;;  %v14000_v51 = vld [vmem:[%s14941_s16 + $0x184] sm:$0xf]  ;;  %v6804_v30 = vadd.f32 %v17591_v48, %v4918_v19 }
 0xa8a   : > { %9256 = vmatpush.bf16.msrb.mxu3 %v12697_v62  ;;  %v14006_v62 = vld [vmem:[%s14941_s16 + $0x1b4] sm:$0xf]  ;;  %v7041_v61 = vadd.f32 1.0, %v14512_v26  ;;  %v12421_v57 = vor.u32 %v14000_v51, %v12418_v38 }
 0xa8b   : > { %v12445_v39 = vor.u32 %v14006_v62, %v12442_v60  ;;  %9208 = vmatmul.bf16.vlgmr.msra.gmra.mxu3 %v17270_v8  ;;  %v12625_v60 = vor.u32 %v14051_v0, %v12622_v28  ;;  %v7077_v7 = vmul.f32 %v7053_v47, %v17539_v54  ;;  %v14165_v54 = vld [vmem:[%s14941_s16 + $0x6ac] sm:$0xf]  ;;  %v6818_v27 = vadd.f32 %v17602_v37, %v6804_v30  ;;  %v14162_v47 = vld [vmem:[%s14941_s16 + $0x694] sm:$0xf]  ;;  %v12766_v28 = vld [vmem:[%s14941_s16 + $0x444] sm:$0xf0] }
 0xa8c   : > { %v6829_v56 = vpop.f32.mrf.mxu3  ;;  %v7065_v41 = vmul.f32 0.5, %v7041_v61  ;;  %v12781_v37 = vor.u32 %v14090_v29, %v12778_v15  ;;  %v14156_v30 = vld [vmem:[%s14941_s16 + $0x664] sm:$0xf] }
 0xa8d   : > { %9246 = vmatpush.bf16.msra.mxu2 %v12553_v36  ;;  %9233 = vmatpush.bf16.msrb.mxu1 %v12445_v39  ;;  %v17624_v24 = vadd.f32 %v6829_v56, %v6816_v63  ;;  %v13066_v56 = vld [vmem:[%s14941_s16 + $0x69c] sm:$0xf0] }
 0xa8e   : > { %9257 = vmatpush.bf16.msrb.mxu3 %v12685_v18  ;;  %v12634_v18 = vld [vmem:[%s14941_s16 + $0x33c] sm:$0xf0]  ;;  %v7089_v39 = vmul.f32 %v7065_v41, %v17572_v53  ;;  %v13069_v41 = vor.u32 %v14162_v47, %v13066_v56  ;;  %v14150_v47 = vld [vmem:[%s14941_s16 + $0x634] sm:$0xf]  ;;  %v14075_v56 = vld [vmem:[%s14941_s16 + $0x3dc] sm:$0xf] }
 0xa8f   : > { %v12637_v23 = vor.u32 %v14054_v59, %v12634_v18  ;;  %v6871_v32 = vpop.f32.mrf.mxu2  ;;  %v6886_v62 = vmul.f32 %v17624_v24, %v17624_v24  ;;  %v14048_v59 = vld [vmem:[%s14941_s16 + $0x304] sm:$0xf]  ;;  %v13078_v18 = vld [vmem:[%s14941_s16 + $0x6b4] sm:$0xf0] }
 0xa90   : > { %v12613_v2 = vor.u32 %v14048_v59, %v12610_v14  ;;  %v14081_v59 = vld [vmem:[%s14941_s16 + $0x40c] sm:$0xf]  ;;  %v12742_v14 = vld [vmem:[%s14941_s16 + $0x414] sm:$0xf0] }
 0xa91   : > { %9247 = vmatpush.bf16.msra.mxu2 %v12541_v49  ;;  %9234 = vmatpush.bf16.msrb.mxu1 %v12433_v40  ;;  %v6859_v48 = vpop.f32.mrf.mxu1  ;;  %v12745_v15 = vor.u32 %v14081_v59, %v12742_v14 }
 0xa92   : > { %9258 = vmatpush.bf16.msrb.mxu3 %v12673_v50  ;;  %v6858_v50 = vadd.f32 %v6857_v13, %v6844_v4  ;;  %v6910_v4 = vmul.f32 %v6886_v62, %v17624_v24  ;;  %v17649_v13 = vpack.c.bf16 %v7089_v39, %v7077_v7  ;;  %v14084_v62 = vld [vmem:[%s14941_s16 + $0x424] sm:$0xf] }
 0xa94   : > { %v17629_v36 = vadd.f32 %v6871_v32, %v6858_v50  ;;  %v6831_v42 = vpop.f32.mrf.mxu3  ;;  %9166 = vmatmul.bf16.vlgmr.msra.gmra.mxu0 %v17649_v13 }
 0xa95   : > { %9248 = vmatpush.bf16.msra.mxu2 %v12529_v10  ;;  %9235 = vmatpush.bf16.msrb.mxu1 %v12421_v57  ;;  %v17657_v63 = vadd.f32 %v6831_v42, %v6818_v27  ;;  %v13081_v10 = vor.u32 %v14165_v54, %v13078_v18  ;;  %v14153_v27 = vld [vmem:[%s14941_s16 + $0x64c] sm:$0xf]  ;;  %v12730_v42 = vld [vmem:[%s14941_s16 + $0x3fc] sm:$0xf0] }
 0xa96   : > { %9259 = vmatpush.bf16.msrb.mxu3 %v12661_v25  ;;  %v6845_v25 = vpop.f32.mrf.mxu0  ;;  %v6887_v33 = vmul.f32 %v17629_v36, %v17629_v36 }
 0xa97   : > { %v6846_v49 = vadd.f32 %v6845_v25, %v4919_v45  ;;  %v6934_v45 = vmul.f32 0.044715, %v6910_v4  ;;  %v6873_v0 = vpop.f32.mrf.mxu2  ;;  %v6898_v32 = vmul.f32 %v17657_v63, %v17657_v63 }
 0xa98   : > { %v6911_v53 = vmul.f32 %v6887_v33, %v17629_v36 }
 0xa99   : > { %9249 = vmatpush.bf16.msra.mxu2 %v12517_v46  ;;  %v6860_v40 = vadd.f32 %v6859_v48, %v6846_v49  ;;  %v6958_v26 = vadd.f32 %v6934_v45, %v17624_v24  ;;  %v6922_v16 = vmul.f32 %v6898_v32, %v17657_v63  ;;  %v13030_v45 = vld [vmem:[%s14941_s16 + $0x654] sm:$0xf0] }
 0xa9a   : > { %9260 = vmatpush.bf16.msrb.mxu3 %v12649_v21  ;;  %v12793_v21 = vor.u32 %v14093_v11, %v12790_v3  ;;  %v6935_v19 = vmul.f32 0.044715, %v6911_v53  ;;  %v14159_v3 = vld [vmem:[%s14941_s16 + $0x67c] sm:$0xf] }
 0xa9b   : > { %v17661_v50 = vadd.f32 %v6873_v0, %v6860_v40  ;;  %v6982_v11 = vmul.f32 0.7978846, %v6958_v26  ;;  %v6946_v46 = vmul.f32 0.044715, %v6922_v16  ;;  %v13057_v33 = vor.u32 %v14159_v3, %v13054_v1  ;;  %v14078_v40 = vld [vmem:[%s14941_s16 + $0x3f4] sm:$0xf] }
 0xa9c   : > { %9270 = vmatpush.bf16.msra.mxu0 %v12793_v21  ;;  %v6959_v61 = vadd.f32 %v6935_v19, %v17629_v36  ;;  %v13042_v21 = vld [vmem:[%s14941_s16 + $0x66c] sm:$0xf0]  ;;  %v13033_v0 = vor.u32 %v14153_v27, %v13030_v45  ;;  %v14117_v1 = vld [vmem:[%s14941_s16 + $0x52c] sm:$0xf]  ;;  %v13174_v45 = vld [vmem:[%s14941_s16 + $0x774] sm:$0xf0] }
 0xa9d   : > { %v6899_v38 = vmul.f32 %v17661_v50, %v17661_v50  ;;  %14513 = vtanh.f32 %v6982_v11  ;;  %v6970_v39 = vadd.f32 %v6946_v46, %v17657_v63  ;;  %v13045_v29 = vor.u32 %v14156_v30, %v13042_v21  ;;  %v17686_v19 = vld [vmem:[%s14977_s5] sm:$0x7]  ;;  %v14147_v30 = vld [vmem:[%s14941_s16 + $0x61c] sm:$0xf] }
 0xa9e   : > { %9261 = vmatpush.bf16.msrb.mxu3 %v12637_v23  ;;  %v14087_v23 = vld [vmem:[%s14941_s16 + $0x43c] sm:$0xf]  ;;  %v6983_v51 = vmul.f32 0.7978846, %v6959_v61  ;;  %v13018_v61 = vld [vmem:[%s14941_s16 + $0x63c] sm:$0xf0] }
 0xa9f   : > { %v12769_v25 = vor.u32 %v14087_v23, %v12766_v28  ;;  %v6923_v57 = vmul.f32 %v6899_v38, %v17661_v50  ;;  %v6994_v54 = vmul.f32 0.7978846, %v6970_v39  ;;  %v12718_v23 = vld [vmem:[%s14941_s16 + $0x3e4] sm:$0xf0]  ;;  %v13021_v3 = vor.u32 %v14150_v47, %v13018_v61  ;;  %v12982_v39 = vld [vmem:[%s14941_s16 + $0x5f4] sm:$0xf0] }
 0xaa0   : > { %9271 = vmatpush.bf16.msra.mxu0 %v12781_v37  ;;  %14515 = vtanh.f32 %v6983_v51  ;;  %v12733_v37 = vor.u32 %v14078_v40, %v12730_v42  ;;  %v14144_v47 = vld [vmem:[%s14941_s16 + $0x604] sm:$0xf]  ;;  %v12994_v61 = vld [vmem:[%s14941_s16 + $0x60c] sm:$0xf0] }
 0xaa1   : > { %v6947_v7 = vmul.f32 0.044715, %v6923_v57  ;;  %14517 = vtanh.f32 %v6994_v54  ;;  %v12721_v57 = vor.u32 %v14075_v56, %v12718_v23  ;;  %v14072_v54 = vld [vmem:[%s14941_s16 + $0x3c4] sm:$0xf] }
 0xaa2   : > { %9262 = vmatpush.bf16.msrb.mxu3 %v12625_v60  ;;  %v12754_v60 = vld [vmem:[%s14941_s16 + $0x42c] sm:$0xf0] }
 0xaa3   : > { %v12757_v49 = vor.u32 %v14084_v62, %v12754_v60  ;;  %v6971_v4 = vadd.f32 %v6947_v7, %v17661_v50  ;;  %v14514_v18 = vpop.eup %14513  ;;  %v12886_v62 = vld [vmem:[%s14941_s16 + $0x534] sm:$0xf0]  ;;  %v14141_v7 = vld [vmem:[%s14941_s16 + $0x5ec] sm:$0xf] }
 0xaa4   : > { %9272 = vmatpush.bf16.msra.mxu0 %v12769_v25  ;;  %v12889_v27 = vor.u32 %v14117_v1, %v12886_v62  ;;  %v12985_v40 = vor.u32 %v14141_v7, %v12982_v39  ;;  %v12862_v1 = vld [vmem:[%s14941_s16 + $0x504] sm:$0xf0] }
 0xaa5   : > { %v6995_v53 = vmul.f32 0.7978846, %v6971_v4  ;;  %9222 = vmatmul.bf16.vlgmr.msrb.gmra.mxu0 %v17272_v34  ;;  %v13006_v4 = vld [vmem:[%s14941_s16 + $0x624] sm:$0xf0] }
 0xaa6   : > { %9263 = vmatpush.bf16.msrb.mxu3 %v12613_v2  ;;  %v14516_v48 = vpop.eup %14515  ;;  %v7030_v2 = vadd.f32 1.0, %v14514_v18  ;;  %v13009_v42 = vor.u32 %v14147_v30, %v13006_v4  ;;  %v12958_v7 = vld [vmem:[%s14941_s16 + $0x5c4] sm:$0xf0]  ;;  %v13972_v30 = vld [vmem:[%s14941_s16 + $0xa0] sm:$0xf0] }
 0xaa7   : > { %14519 = vtanh.f32 %v6995_v53  ;;  %v7031_v26 = vadd.f32 1.0, %v14516_v48  ;;  %v14518_v28 = vpop.eup %14517  ;;  %v12706_v53 = vld [vmem:[%s14941_s16 + $0x3cc] sm:$0xf0]  ;;  %v14183_v4 = vld [vmem:[%s14941_s16 + $0x73c] sm:$0xf] }
 0xaa8   : > { %9273 = vmatpush.bf16.msra.mxu0 %v12757_v49  ;;  %v7054_v32 = vmul.f32 0.5, %v7030_v2  ;;  %v7042_v51 = vadd.f32 1.0, %v14518_v28  ;;  %v9069_v49 = vpop.f32.mrf.mxu1  ;;  %v14114_v2 = vld [vmem:[%s14941_s16 + $0x514] sm:$0xf]  ;;  %v12316_v28 = vld [vmem:[%s14941_s16 + $0xb0] sm:$0xf] }
 0xaa9   : > { %9264 = vmatmul.bf16.vlgmr.msrb.gmra.mxu3 %v17416_v9  ;;  %v7055_v38 = vmul.f32 0.5, %v7031_v26 }
 0xaaa   : > { %9312 = vmatpush.bf16.msra.mxu3 %v13081_v10  ;;  %v7490_v10 = vperm.slane %v17686_v19, 0  ;;  %v7066_v60 = vmul.f32 0.5, %v7042_v51  ;;  %v7078_v21 = vmul.f32 %v7054_v32, %v17624_v24  ;;  %v14189_v24 = vld [vmem:[%s14941_s16 + $0x76c] sm:$0xf] }
 0xaab   : > { %v7079_v18 = vmul.f32 %v7055_v38, %v17629_v36  ;;  %v12874_v36 = vld [vmem:[%s14941_s16 + $0x51c] sm:$0xf0]  ;;  %v13177_v23 = vor.u32 %v14189_v24, %v13174_v45  ;;  %v14186_v38 = vld [vmem:[%s14941_s16 + $0x754] sm:$0xf] }
 0xaac   : > { %9274 = vmatpush.bf16.msra.mxu0 %v12745_v15  ;;  %v9041_v25 = vpop.f32.mrf.mxu3  ;;  %v7090_v59 = vmul.f32 %v7066_v60, %v17657_v63  ;;  %v12877_v51 = vor.u32 %v14114_v2, %v12874_v36  ;;  %v14180_v2 = vld [vmem:[%s14941_s16 + $0x724] sm:$0xf]  ;;  %v13138_v36 = vld [vmem:[%s14941_s16 + $0x72c] sm:$0xf0] }
 0xaad   : > { %v14520_v11 = vpop.eup %14519  ;;  %v9042_v46 = vadd.f32 %v9041_v25, %v7490_v10 }
 0xaae   : > { %9313 = vmatpush.bf16.msra.mxu3 %v13069_v41  ;;  %v7043_v16 = vadd.f32 1.0, %v14520_v11  ;;  %v9055_v41 = vpop.f32.mrf.mxu0  ;;  %v9083_v15 = vpop.f32.mrf.mxu2  ;;  %v17712_v63 = vpack.c.bf16 %v7090_v59, %v7078_v21  ;;  %v13975_v11 = vld [vmem:[%s14941_s16 + $0xb8] sm:$0xf0]  ;;  %v13150_v21 = vld [vmem:[%s14941_s16 + $0x744] sm:$0xf0] }
 0xaaf   : > { %v9056_v14 = vadd.f32 %v9055_v41, %v9042_v46  ;;  %v12317_v60 = vor.u32 %v13975_v11, %v12316_v28  ;;  %v14135_v46 = vld [vmem:[%s14941_s16 + $0x5bc] sm:$0xf]  ;;  %v13153_v45 = vor.u32 %v14183_v4, %v13150_v21  ;;  %v13141_v28 = vor.u32 %v14180_v2, %v13138_v36  ;;  %v12280_v11 = vld [vmem:[%s14941_s16 + $0x68] sm:$0xf] }
 0xab0   : > { %9275 = vmatpush.bf16.msra.mxu0 %v12733_v37  ;;  %v12970_v37 = vld [vmem:[%s14941_s16 + $0x5dc] sm:$0xf0]  ;;  %9180 = vmatmul.bf16.vlgmr.msra.gmra.mxu1 %v17712_v63  ;;  %v9071_v19 = vpop.f32.mrf.mxu1  ;;  %v14123_v21 = vld [vmem:[%s14941_s16 + $0x55c] sm:$0xf] }
 0xab1   : > { %v9070_v48 = vadd.f32 %v9069_v49, %v9056_v14  ;;  %9284 = vmatpush.bf16.msra.mxu1 %v12889_v27  ;;  %v12304_v49 = vld [vmem:[%s14941_s16 + $0x98] sm:$0xf]  ;;  %v12961_v14 = vor.u32 %v14135_v46, %v12958_v7  ;;  %v12946_v27 = vld [vmem:[%s14941_s16 + $0x5ac] sm:$0xf0]  ;;  %v13963_v7 = vld [vmem:[%s14941_s16 + $0x58] sm:$0xf0] }
 0xab2   : > { %9314 = vmatpush.bf16.msra.mxu3 %v13057_v33  ;;  %v7067_v33 = vmul.f32 0.5, %v7043_v16  ;;  %v13162_v16 = vld [vmem:[%s14941_s16 + $0x75c] sm:$0xf0]  ;;  %v12268_v46 = vld [vmem:[%s14941_s16 + $0x50] sm:$0xf] }
 0xab3   : > { %v17722_v56 = vadd.f32 %v9083_v15, %v9070_v48  ;;  %v14132_v15 = vld [vmem:[%s14941_s16 + $0x5a4] sm:$0xf]  ;;  %v12292_v48 = vld [vmem:[%s14941_s16 + $0x80] sm:$0xf]  ;;  %v12269_v4 = vor.u32 %v13963_v7, %v12268_v46 }
 0xab4   : > { %9276 = vmatpush.bf16.msra.mxu0 %v12721_v57  ;;  %v9043_v32 = vpop.f32.mrf.mxu3  ;;  %v14111_v57 = vld [vmem:[%s14941_s16 + $0x4fc] sm:$0xf]  ;;  %v13258_v46 = vld [vmem:[%s14941_s16 + $0x81c] sm:$0xf0] }
 0xab5   : > { %v9044_v41 = vadd.f32 %v9043_v32, %v7490_v10  ;;  %9285 = vmatpush.bf16.msra.mxu1 %v12877_v51  ;;  %v12865_v10 = vor.u32 %v14111_v57, %v12862_v1  ;;  %v13966_v32 = vld [vmem:[%s14941_s16 + $0x70] sm:$0xf0] }
 0xab6   : > { %9315 = vmatpush.bf16.msra.mxu3 %v13045_v29  ;;  %v7091_v29 = vmul.f32 %v7067_v33, %v17661_v50  ;;  %v14138_v50 = vld [vmem:[%s14941_s16 + $0x5d4] sm:$0xf]  ;;  %v9057_v62 = vpop.f32.mrf.mxu0  ;;  %v13165_v33 = vor.u32 %v14186_v38, %v13162_v16  ;;  %v14177_v38 = vld [vmem:[%s14941_s16 + $0x70c] sm:$0xf]  ;;  %v13126_v16 = vld [vmem:[%s14941_s16 + $0x714] sm:$0xf0]  ;;  %v12281_v57 = vor.u32 %v13966_v32, %v12280_v11 }
 0xab7   : > { %v12973_v25 = vor.u32 %v14138_v50, %v12970_v37  ;;  %v9058_v39 = vadd.f32 %v9057_v62, %v9044_v41  ;;  %v12949_v50 = vor.u32 %v14132_v15, %v12946_v27  ;;  %v12838_v37 = vld [vmem:[%s14941_s16 + $0x4d4] sm:$0xf0]  ;;  %v14126_v1 = vld [vmem:[%s14941_s16 + $0x574] sm:$0xf]  ;;  %v12922_v62 = vld [vmem:[%s14941_s16 + $0x57c] sm:$0xf0] }
 0xab8   : > { %v17717_v26 = vpack.c.bf16 %v7091_v29, %v7079_v18  ;;  %v9085_v18 = vpop.f32.mrf.mxu2  ;;  %v12305_v29 = vor.u32 %v13972_v30, %v12304_v49  ;;  %v13114_v49 = vld [vmem:[%s14941_s16 + $0x6fc] sm:$0xf0]  ;;  %v12925_v30 = vor.u32 %v14126_v1, %v12922_v62  ;;  %v13102_v15 = vld [vmem:[%s14941_s16 + $0x6e4] sm:$0xf0]  ;;  %v14096_v27 = vld [vmem:[%s14941_s16 + $0x484] sm:$0xf] }
 0xab9   : > { %v9072_v59 = vadd.f32 %v9071_v19, %v9058_v39  ;;  %9286 = vmatpush.bf16.msra.mxu1 %v12865_v10  ;;  %v14099_v19 = vld [vmem:[%s14941_s16 + $0x49c] sm:$0xf]  ;;  %v12814_v10 = vld [vmem:[%s14941_s16 + $0x4a4] sm:$0xf0]  ;;  %v12244_v11 = vld [vmem:[%s14941_s16 + $0x20] sm:$0xf] }
 0xaba   : > { %9316 = vmatpush.bf16.msra.mxu3 %v13033_v0  ;;  %v12709_v0 = vor.u32 %v14072_v54, %v12706_v53  ;;  %9194 = vmatmul.bf16.vlgmr.msrb.gmra.mxu2 %v17717_v26  ;;  %v14108_v54 = vld [vmem:[%s14941_s16 + $0x4e4] sm:$0xf]  ;;  %v12850_v53 = vld [vmem:[%s14941_s16 + $0x4ec] sm:$0xf0]  ;;  %v13957_v32 = vld [vmem:[%s14941_s16 + $0x28] sm:$0xf0] }
 0xabb   : > { %9298 = vmatpush.bf16.msrb.mxu2 %v12985_v40  ;;  %v17745_v24 = vadd.f32 %v9085_v18, %v9072_v59  ;;  %v13969_v40 = vld [vmem:[%s14941_s16 + $0x88] sm:$0xf0]  ;;  %v12910_v59 = vld [vmem:[%s14941_s16 + $0x564] sm:$0xf0]  ;;  %v12817_v18 = vor.u32 %v14099_v19, %v12814_v10  ;;  %v12245_v62 = vor.u32 %v13957_v32, %v12244_v11  ;;  %v13954_v19 = vld [vmem:[%s14941_s16 + $0x10] sm:$0xf0] }
 0xabc   : > { %9277 = vmatpush.bf16.msra.mxu0 %v12709_v0  ;;  %v14105_v0 = vld [vmem:[%s14941_s16 + $0x4cc] sm:$0xf]  ;;  %v12700_v10 = vld [vmem:[%s14941_s16 + $0x3b0] sm:$0xf] }
 0xabd   : > { %v12841_v51 = vor.u32 %v14105_v0, %v12838_v37  ;;  %v14213_v0 = vld [vmem:[%s14941_s16 + $0x82c] sm:$0xf]  ;;  %v13270_v37 = vld [vmem:[%s14941_s16 + $0x834] sm:$0xf0]  ;;  %v13234_v11 = vld [vmem:[%s14941_s16 + $0x7ec] sm:$0xf0] }
 0xabe   : > { %9317 = vmatpush.bf16.msra.mxu3 %v13021_v3  ;;  %v12997_v3 = vor.u32 %v14144_v47, %v12994_v61  ;;  %v12293_v47 = vor.u32 %v13969_v40, %v12292_v48  ;;  %v14129_v61 = vld [vmem:[%s14941_s16 + $0x58c] sm:$0xf]  ;;  %v12802_v48 = vld [vmem:[%s14941_s16 + $0x48c] sm:$0xf0]  ;;  %v14120_v40 = vld [vmem:[%s14941_s16 + $0x544] sm:$0xf] }
 0xabf   : > { %9299 = vmatpush.bf16.msrb.mxu2 %v12973_v25  ;;  %9278 = vmatmul.bf16.vlgmr.msra.gmra.mxu0 %v17422_v6  ;;  %v14102_v25 = vld [vmem:[%s14941_s16 + $0x4b4] sm:$0xf] }
 0xac0   : > { %9326 = vmatpush.bf16.msrb.mxu0 %v13177_v23  ;;  %v12934_v23 = vld [vmem:[%s14941_s16 + $0x594] sm:$0xf0]  ;;  %9236 = vmatmul.bf16.vlgmr.msrb.gmra.mxu1 %v17279_v55 }
 0xac1   : > { %v12937_v41 = vor.u32 %v14129_v61, %v12934_v23 }
 0xac2   : > { %9318 = vmatpush.bf16.msra.mxu3 %v13009_v42  ;;  %v12853_v42 = vor.u32 %v14108_v54, %v12850_v53  ;;  %v12256_v54 = vld [vmem:[%s14941_s16 + $0x38] sm:$0xf]  ;;  %v13960_v53 = vld [vmem:[%s14941_s16 + $0x40] sm:$0xf0] }
 0xac3   : > { %9300 = vmatpush.bf16.msrb.mxu2 %v12961_v14 }
 0xac4   : > { %9327 = vmatpush.bf16.msrb.mxu0 %v13165_v33  ;;  %9287 = vmatpush.bf16.msra.mxu1 %v12853_v42  ;;  %v14174_v33 = vld [vmem:[%s14941_s16 + $0x6f4] sm:$0xf]  ;;  %v12898_v42 = vld [vmem:[%s14941_s16 + $0x54c] sm:$0xf0] }
 0xac5   : > { %v13117_v14 = vor.u32 %v14174_v33, %v13114_v49  ;;  %v13354_v33 = vld [vmem:[%s14941_s16 + $0x8dc] sm:$0xf0] }
 0xac6   : > { %9319 = vmatpush.bf16.msra.mxu3 %v12997_v3  ;;  %v12826_v3 = vld [vmem:[%s14941_s16 + $0x4bc] sm:$0xf0]  ;;  %v9111_v2 = vpop.f32.mrf.mxu0 }
 0xac7   : > { %9301 = vmatpush.bf16.msrb.mxu2 %v12949_v50  ;;  %v12829_v39 = vor.u32 %v14102_v25, %v12826_v3  ;;  %v12257_v50 = vor.u32 %v13960_v53, %v12256_v54  ;;  %v13273_v25 = vor.u32 %v14213_v0, %v13270_v37  ;;  %v12412_v3 = vld [vmem:[%s14941_s16 + $0x170] sm:$0xf]  ;;  %v12388_v0 = vld [vmem:[%s14941_s16 + $0x140] sm:$0xf]  ;;  %v13993_v37 = vld [vmem:[%s14941_s16 + $0x148] sm:$0xf0] }
 0xac8   : > { %9328 = vmatpush.bf16.msrb.mxu0 %v13153_v45  ;;  %9288 = vmatpush.bf16.msra.mxu1 %v12841_v51  ;;  %v12913_v45 = vor.u32 %v14123_v21, %v12910_v59  ;;  %v12805_v51 = vor.u32 %v14096_v27, %v12802_v48  ;;  %v14071_v21 = vld [vmem:[%s14941_s16 + $0x3b8] sm:$0xf0]  ;;  %v12400_v59 = vld [vmem:[%s14941_s16 + $0x158] sm:$0xf]  ;;  %v13342_v48 = vld [vmem:[%s14941_s16 + $0x8c4] sm:$0xf0] }
 0xac9   : > { %9320 = vmatmul.bf16.vlgmr.msra.gmra.mxu3 %v17562_v52 }
 0xaca   : > { %9368 = vmatpush.bf16.msrb.mxu3 %v12317_v60  ;;  %v13129_v60 = vor.u32 %v14177_v38, %v13126_v16  ;;  %9250 = vmatmul.bf16.vlgmr.msra.gmra.mxu2 %v17284_v20  ;;  %v14168_v38 = vld [vmem:[%s14941_s16 + $0x6c4] sm:$0xf]  ;;  %v13090_v16 = vld [vmem:[%s14941_s16 + $0x6cc] sm:$0xf0] }
 0xacb   : > { %9302 = vmatpush.bf16.msrb.mxu2 %v12937_v41  ;;  %v12901_v41 = vor.u32 %v14120_v40, %v12898_v42  ;;  %v13093_v7 = vor.u32 %v14168_v38, %v13090_v16  ;;  %v12701_v42 = vor.u32 %v14071_v21, %v12700_v10  ;;  %v13330_v38 = vld [vmem:[%s14941_s16 + $0x8ac] sm:$0xf0]  ;;  %v14062_v10 = vld [vmem:[%s14941_s16 + $0x370] sm:$0xf0]  ;;  %v13987_v21 = vld [vmem:[%s14941_s16 + $0x118] sm:$0xf0] }
 0xacc   : > { %9329 = vmatpush.bf16.msrb.mxu0 %v13141_v28  ;;  %9289 = vmatpush.bf16.msra.mxu1 %v12829_v39  ;;  %v9097_v36 = vpop.f32.mrf.mxu3  ;;  %v13366_v28 = vld [vmem:[%s14941_s16 + $0x8f4] sm:$0xf0]  ;;  %v14234_v39 = vld [vmem:[%s14941_s16 + $0x8d4] sm:$0xf] }
 0xacd   : > { %v9098_v61 = vadd.f32 %v9097_v36, %v17722_v56  ;;  %v13999_v56 = vld [vmem:[%s14941_s16 + $0x178] sm:$0xf0]  ;;  %v13357_v53 = vor.u32 %v14234_v39, %v13354_v33  ;;  %v12688_v36 = vld [vmem:[%s14941_s16 + $0x398] sm:$0xf] }
 0xace   : > { %9369 = vmatpush.bf16.msrb.mxu3 %v12305_v29  ;;  %v14171_v29 = vld [vmem:[%s14941_s16 + $0x6dc] sm:$0xf]  ;;  %v12413_v49 = vor.u32 %v13999_v56, %v12412_v3  ;;  %v9113_v40 = vpop.f32.mrf.mxu0  ;;  %v14065_v56 = vld [vmem:[%s14941_s16 + $0x388] sm:$0xf0]  ;;  %v13318_v39 = vld [vmem:[%s14941_s16 + $0x894] sm:$0xf0] }
 0xacf   : > { %9303 = vmatpush.bf16.msrb.mxu2 %v12925_v30  ;;  %v13105_v23 = vor.u32 %v14171_v29, %v13102_v15  ;;  %v12232_v30 = vld [vmem:[%s14941_s16 + $0x8] sm:$0xf] }
 0xad0   : > { %9330 = vmatpush.bf16.msrb.mxu0 %v13129_v60  ;;  %9290 = vmatpush.bf16.msra.mxu1 %v12817_v18  ;;  %v14210_v60 = vld [vmem:[%s14941_s16 + $0x814] sm:$0xf]  ;;  %v14207_v18 = vld [vmem:[%s14941_s16 + $0x7fc] sm:$0xf]  ;;  %v13246_v29 = vld [vmem:[%s14941_s16 + $0x804] sm:$0xf0]  ;;  %v12233_v27 = vor.u32 %v13954_v19, %v12232_v30 }
 0xad1   : > { %v12664_v30 = vld [vmem:[%s14941_s16 + $0x368] sm:$0xf] }
 0xad2   : > { %9370 = vmatpush.bf16.msrb.mxu3 %v12293_v47  ;;  %v14237_v47 = vld [vmem:[%s14941_s16 + $0x8ec] sm:$0xf] }
 0xad3   : > { %9304 = vmatpush.bf16.msrb.mxu2 %v12913_v45  ;;  %v13369_v1 = vor.u32 %v14237_v47, %v13366_v28  ;;  %v14231_v45 = vld [vmem:[%s14941_s16 + $0x8bc] sm:$0xf]  ;;  %v14204_v28 = vld [vmem:[%s14941_s16 + $0x7e4] sm:$0xf] }
 0xad4   : > { %9331 = vmatpush.bf16.msrb.mxu0 %v13117_v14  ;;  %9291 = vmatpush.bf16.msra.mxu1 %v12805_v51  ;;  %v13996_v14 = vld [vmem:[%s14941_s16 + $0x160] sm:$0xf0]  ;;  %v9099_v54 = vpop.f32.mrf.mxu3  ;;  %v13237_v3 = vor.u32 %v14204_v28, %v13234_v11  ;;  %v12640_v28 = vld [vmem:[%s14941_s16 + $0x338] sm:$0xf] }
 0xad5   : > { %v9100_v15 = vadd.f32 %v9099_v54, %v17745_v24  ;;  %v13249_v24 = vor.u32 %v14207_v18, %v13246_v29  ;;  %v14228_v51 = vld [vmem:[%s14941_s16 + $0x8a4] sm:$0xf]  ;;  %v14198_v54 = vld [vmem:[%s14941_s16 + $0x7b4] sm:$0xf]  ;;  %v13306_v29 = vld [vmem:[%s14941_s16 + $0x87c] sm:$0xf0] }
 0xad6   : > { %9371 = vmatpush.bf16.msrb.mxu3 %v12281_v57  ;;  %v9112_v57 = vadd.f32 %v9111_v2, %v9098_v61  ;;  %v12401_v2 = vor.u32 %v13996_v14, %v12400_v59  ;;  %v13345_v61 = vor.u32 %v14231_v45, %v13342_v48  ;;  %v14222_v18 = vld [vmem:[%s14941_s16 + $0x874] sm:$0xf]  ;;  %v12652_v45 = vld [vmem:[%s14941_s16 + $0x350] sm:$0xf] }
 0xad7   : > { %9305 = vmatpush.bf16.msrb.mxu2 %v12901_v41  ;;  %9292 = vmatmul.bf16.vlgmr.msra.gmra.mxu1 %v17456_v44  ;;  %v17814_v47 = vadd.f32 %v9113_v40, %v9100_v15  ;;  %v12389_v41 = vor.u32 %v13993_v37, %v12388_v0  ;;  %v12665_v15 = vor.u32 %v14062_v10, %v12664_v30  ;;  %v14059_v40 = vld [vmem:[%s14941_s16 + $0x358] sm:$0xf0]  ;;  %v13294_v37 = vld [vmem:[%s14941_s16 + $0x864] sm:$0xf0] }
 0xad8   : > { %9332 = vmatpush.bf16.msrb.mxu0 %v13105_v23  ;;  %9340 = vmatpush.bf16.msrb.mxu1 %v13273_v25  ;;  %v9125_v23 = vpop.f32.mrf.mxu1  ;;  %v12676_v25 = vld [vmem:[%s14941_s16 + $0x380] sm:$0xf]  ;;  %v14219_v0 = vld [vmem:[%s14941_s16 + $0x85c] sm:$0xf]  ;;  %v12328_v30 = vld [vmem:[%s14941_s16 + $0xc8] sm:$0xf] }
 0xad9   : > { %v9126_v32 = vadd.f32 %v9125_v23, %v9112_v57  ;;  %v13333_v57 = vor.u32 %v14228_v51, %v13330_v38  ;;  %v12677_v33 = vor.u32 %v14065_v56, %v12676_v25  ;;  %v12340_v51 = vld [vmem:[%s14941_s16 + $0xe0] sm:$0xf]  ;;  %v13981_v38 = vld [vmem:[%s14941_s16 + $0xe8] sm:$0xf0]  ;;  %v13186_v25 = vld [vmem:[%s14941_s16 + $0x78c] sm:$0xf0] }
 0xada   : > { %9372 = vmatpush.bf16.msrb.mxu3 %v12269_v4  ;;  %v13261_v4 = vor.u32 %v14210_v60, %v13258_v46  ;;  %9306 = vmatmul.bf16.vlgmr.msrb.gmra.mxu2 %v17461_v58  ;;  %v14201_v60 = vld [vmem:[%s14941_s16 + $0x7cc] sm:$0xf]  ;;  %v13222_v46 = vld [vmem:[%s14941_s16 + $0x7d4] sm:$0xf0]  ;;  %v13282_v56 = vld [vmem:[%s14941_s16 + $0x84c] sm:$0xf0] }
 0xadb   : > { %9354 = vmatpush.bf16.msra.mxu2 %v13369_v1  ;;  %v12376_v1 = vld [vmem:[%s14941_s16 + $0x128] sm:$0xf]  ;;  %v9139_v19 = vpop.f32.mrf.mxu2 }
 0xadc   : > { %9333 = vmatpush.bf16.msrb.mxu0 %v13093_v7  ;;  %9341 = vmatpush.bf16.msrb.mxu1 %v13261_v4  ;;  %v14225_v7 = vld [vmem:[%s14941_s16 + $0x88c] sm:$0xf]  ;;  %v12364_v4 = vld [vmem:[%s14941_s16 + $0x110] sm:$0xf]  ;;  %v17834_v59 = vadd.f32 %v9139_v19, %v9126_v32  ;;  %v14056_v32 = vld [vmem:[%s14941_s16 + $0x340] sm:$0xf0] }
 0xadd   : > { %v13321_v14 = vor.u32 %v14225_v7, %v13318_v39  ;;  %v14047_v7 = vld [vmem:[%s14941_s16 + $0x2f8] sm:$0xf0]  ;;  %v12628_v39 = vld [vmem:[%s14941_s16 + $0x320] sm:$0xf]  ;;  %v13978_v19 = vld [vmem:[%s14941_s16 + $0xd0] sm:$0xf0] }
 0xade   : > { %9373 = vmatpush.bf16.msrb.mxu3 %v12257_v50  ;;  %v14068_v50 = vld [vmem:[%s14941_s16 + $0x3a0] sm:$0xf0] }
 0xadf   : > { %9334 = vmatmul.bf16.vlgmr.msrb.gmra.mxu0 %v17649_v13  ;;  %9355 = vmatpush.bf16.msra.mxu2 %v13357_v53  ;;  %v12689_v16 = vor.u32 %v14068_v50, %v12688_v36  ;;  %v13210_v53 = vld [vmem:[%s14941_s16 + $0x7bc] sm:$0xf0]  ;;  %v13309_v36 = vor.u32 %v14222_v18, %v13306_v29  ;;  %v13198_v50 = vld [vmem:[%s14941_s16 + $0x7a4] sm:$0xf0]  ;;  %v12329_v29 = vor.u32 %v13978_v19, %v12328_v30  ;;  %v14086_v19 = vld [vmem:[%s14941_s16 + $0x430] sm:$0xf0] }
 0xae0   : > { %9382 = vmatpush.bf16.msra.mxu0 %v12413_v49  ;;  %9342 = vmatpush.bf16.msrb.mxu1 %v13249_v24  ;;  %v13213_v48 = vor.u32 %v14198_v54, %v13210_v53  ;;  %v14195_v24 = vld [vmem:[%s14941_s16 + $0x79c] sm:$0xf]  ;;  %v12496_v54 = vld [vmem:[%s14941_s16 + $0x218] sm:$0xf]  ;;  %v14020_v53 = vld [vmem:[%s14941_s16 + $0x220] sm:$0xf0] }
 0xae1   : > { %v13201_v11 = vor.u32 %v14195_v24, %v13198_v50  ;;  %v12784_v24 = vld [vmem:[%s14941_s16 + $0x458] sm:$0xf] }
 0xae2   : > { %9374 = vmatpush.bf16.msrb.mxu3 %v12245_v62  ;;  %v13990_v62 = vld [vmem:[%s14941_s16 + $0x130] sm:$0xf0] }
 0xae3   : > { %9356 = vmatpush.bf16.msra.mxu2 %v13345_v61  ;;  %v12377_v49 = vor.u32 %v13990_v62, %v12376_v1  ;;  %v12653_v61 = vor.u32 %v14059_v40, %v12652_v45  ;;  %v12508_v1 = vld [vmem:[%s14941_s16 + $0x230] sm:$0xf]  ;;  %v14023_v62 = vld [vmem:[%s14941_s16 + $0x238] sm:$0xf0]  ;;  %v12616_v45 = vld [vmem:[%s14941_s16 + $0x308] sm:$0xf] }
 0xae4   : > { %9383 = vmatpush.bf16.msra.mxu0 %v12401_v2  ;;  %9343 = vmatpush.bf16.msrb.mxu1 %v13237_v3  ;;  %v13984_v2 = vld [vmem:[%s14941_s16 + $0x100] sm:$0xf0]  ;;  %v12509_v10 = vor.u32 %v14023_v62, %v12508_v1  ;;  %v12472_v1 = vld [vmem:[%s14941_s16 + $0x1e8] sm:$0xf]  ;;  %v14014_v62 = vld [vmem:[%s14941_s16 + $0x1f0] sm:$0xf0] }
 0xae5   : > { %v14216_v3 = vld [vmem:[%s14941_s16 + $0x844] sm:$0xf] }
 0xae6   : > { %9375 = vmatpush.bf16.msrb.mxu3 %v12233_v27  ;;  %v12365_v27 = vor.u32 %v13987_v21, %v12364_v4  ;;  %v12796_v4 = vld [vmem:[%s14941_s16 + $0x470] sm:$0xf] }
 0xae7   : > { %9357 = vmatpush.bf16.msra.mxu2 %v13333_v57  ;;  %v12641_v57 = vor.u32 %v14056_v32, %v12640_v28  ;;  %v12580_v28 = vld [vmem:[%s14941_s16 + $0x2c0] sm:$0xf] }
 0xae8   : > { %9384 = vmatpush.bf16.msra.mxu0 %v12389_v41  ;;  %v14192_v41 = vld [vmem:[%s14941_s16 + $0x784] sm:$0xf] }
 0xae9   : > { %9376 = vmatmul.bf16.vlgmr.msrb.gmra.mxu3 %v17270_v8  ;;  %v13225_v8 = vor.u32 %v14201_v60, %v13222_v46  ;;  %v12341_v60 = vor.u32 %v13981_v38, %v12340_v51  ;;  %v12604_v46 = vld [vmem:[%s14941_s16 + $0x2f0] sm:$0xf] }
 0xaea   : > { %9424 = vmatpush.bf16.msra.mxu3 %v12701_v42  ;;  %v12352_v42 = vld [vmem:[%s14941_s16 + $0xf8] sm:$0xf]  ;;  %v12605_v21 = vor.u32 %v14047_v7, %v12604_v46  ;;  %v12473_v7 = vor.u32 %v14014_v62, %v12472_v1  ;;  %v14152_v62 = vld [vmem:[%s14941_s16 + $0x640] sm:$0xf0] }
 0xaeb   : > { %9344 = vmatpush.bf16.msrb.mxu1 %v13225_v8  ;;  %9358 = vmatpush.bf16.msra.mxu2 %v13321_v14  ;;  %v12353_v23 = vor.u32 %v13984_v2, %v12352_v42  ;;  %v13285_v8 = vor.u32 %v14216_v3, %v13282_v56  ;;  %v14095_v14 = vld [vmem:[%s14941_s16 + $0x478] sm:$0xf0]  ;;  %v12497_v42 = vor.u32 %v14020_v53, %v12496_v54  ;;  %v13084_v2 = vld [vmem:[%s14941_s16 + $0x6b0] sm:$0xf]  ;;  %v14089_v56 = vld [vmem:[%s14941_s16 + $0x448] sm:$0xf0] }
 0xaec   : > { %9385 = vmatpush.bf16.msra.mxu0 %v12377_v49  ;;  %v14053_v49 = vld [vmem:[%s14941_s16 + $0x328] sm:$0xf0]  ;;  %v12797_v40 = vor.u32 %v14095_v14, %v12796_v4  ;;  %v12556_v4 = vld [vmem:[%s14941_s16 + $0x290] sm:$0xf] }
 0xaed   : > { %v12629_v18 = vor.u32 %v14053_v49, %v12628_v39  ;;  %v13060_v39 = vld [vmem:[%s14941_s16 + $0x680] sm:$0xf]  ;;  %v12760_v49 = vld [vmem:[%s14941_s16 + $0x428] sm:$0xf] }
 0xaee   : > { %9425 = vmatpush.bf16.msra.mxu3 %v12689_v16  ;;  %v13297_v16 = vor.u32 %v14219_v0, %v13294_v37  ;;  %v14092_v0 = vld [vmem:[%s14941_s16 + $0x460] sm:$0xf0]  ;;  %v12484_v37 = vld [vmem:[%s14941_s16 + $0x200] sm:$0xf]  ;;  %v12761_v54 = vor.u32 %v14086_v19, %v12760_v49  ;;  %v14026_v49 = vld [vmem:[%s14941_s16 + $0x250] sm:$0xf0] }
 0xaef   : > { %9345 = vmatpush.bf16.msrb.mxu1 %v13213_v48  ;;  %9359 = vmatpush.bf16.msra.mxu2 %v13309_v36  ;;  %v14050_v48 = vld [vmem:[%s14941_s16 + $0x310] sm:$0xf0]  ;;  %v14167_v36 = vld [vmem:[%s14941_s16 + $0x6b8] sm:$0xf0]  ;;  %v12785_v51 = vor.u32 %v14092_v0, %v12784_v24  ;;  %v13036_v0 = vld [vmem:[%s14941_s16 + $0x650] sm:$0xf] }
 0xaf0   : > { %9386 = vmatpush.bf16.msra.mxu0 %v12365_v27  ;;  %v14044_v27 = vld [vmem:[%s14941_s16 + $0x2e0] sm:$0xf0]  ;;  %v13085_v32 = vor.u32 %v14167_v36, %v13084_v2  ;;  %v14119_v19 = vld [vmem:[%s14941_s16 + $0x538] sm:$0xf0] }
 0xaf2   : > { %9426 = vmatpush.bf16.msra.mxu3 %v12677_v33  ;;  %v13189_v33 = vor.u32 %v14192_v41, %v13186_v25  ;;  %v14164_v41 = vld [vmem:[%s14941_s16 + $0x6a0] sm:$0xf0]  ;;  %v12772_v25 = vld [vmem:[%s14941_s16 + $0x440] sm:$0xf] }
 0xaf3   : > { %9346 = vmatpush.bf16.msrb.mxu1 %v13201_v11  ;;  %9360 = vmatpush.bf16.msra.mxu2 %v13297_v16  ;;  %v14041_v11 = vld [vmem:[%s14941_s16 + $0x2c8] sm:$0xf0]  ;;  %v13072_v16 = vld [vmem:[%s14941_s16 + $0x698] sm:$0xf] }
 0xaf4   : > { %9387 = vmatpush.bf16.msra.mxu0 %v12353_v23  ;;  %v12617_v23 = vor.u32 %v14050_v48, %v12616_v45  ;;  %v12581_v3 = vor.u32 %v14041_v11, %v12580_v28  ;;  %v13073_v46 = vor.u32 %v14164_v41, %v13072_v16  ;;  %v12448_v45 = vld [vmem:[%s14941_s16 + $0x1b8] sm:$0xf]  ;;  %v14008_v48 = vld [vmem:[%s14941_s16 + $0x1c0] sm:$0xf0]  ;;  %v12532_v16 = vld [vmem:[%s14941_s16 + $0x260] sm:$0xf] }
 0xaf5   : > { %v14080_v11 = vld [vmem:[%s14941_s16 + $0x400] sm:$0xf0]  ;;  %v14029_v41 = vld [vmem:[%s14941_s16 + $0x268] sm:$0xf0] }
 0xaf6   : > { %9427 = vmatpush.bf16.msra.mxu3 %v12665_v15  ;;  %v12592_v15 = vld [vmem:[%s14941_s16 + $0x2d8] sm:$0xf] }
 0xaf7   : > { %9347 = vmatpush.bf16.msrb.mxu1 %v13189_v33  ;;  %9361 = vmatpush.bf16.msra.mxu2 %v13285_v8  ;;  %v12593_v50 = vor.u32 %v14044_v27, %v12592_v15  ;;  %v14161_v33 = vld [vmem:[%s14941_s16 + $0x688] sm:$0xf0]  ;;  %v12460_v8 = vld [vmem:[%s14941_s16 + $0x1d0] sm:$0xf]  ;;  %v14083_v27 = vld [vmem:[%s14941_s16 + $0x418] sm:$0xf0]  ;;  %v9153_v24 = vpop.f32.mrf.mxu3 }
 0xaf8   : > { %9388 = vmatpush.bf16.msra.mxu0 %v12341_v60  ;;  %v14038_v60 = vld [vmem:[%s14941_s16 + $0x2b0] sm:$0xf0]  ;;  %v13061_v14 = vor.u32 %v14161_v33, %v13060_v39  ;;  %v12520_v33 = vld [vmem:[%s14941_s16 + $0x248] sm:$0xf] }
 0xaf9   : > { %v14002_v39 = vld [vmem:[%s14941_s16 + $0x190] sm:$0xf0] }
 0xafa   : > { %9428 = vmatpush.bf16.msra.mxu3 %v12653_v61  ;;  %v14017_v61 = vld [vmem:[%s14941_s16 + $0x208] sm:$0xf0]  ;;  %9348 = vmatmul.bf16.vlgmr.msrb.gmra.mxu1 %v17712_v63 }
 0xafb   : > { %9396 = vmatpush.bf16.msra.mxu1 %v12509_v10  ;;  %9410 = vmatpush.bf16.msrb.mxu2 %v12605_v21  ;;  %v12485_v38 = vor.u32 %v14017_v61, %v12484_v37  ;;  %v14011_v10 = vld [vmem:[%s14941_s16 + $0x1d8] sm:$0xf0]  ;;  %v12736_v61 = vld [vmem:[%s14941_s16 + $0x3f8] sm:$0xf] }
 0xafc   : > { %9389 = vmatpush.bf16.msra.mxu0 %v12329_v29  ;;  %9362 = vmatmul.bf16.vlgmr.msra.gmra.mxu2 %v17717_v26  ;;  %v14035_v21 = vld [vmem:[%s14941_s16 + $0x298] sm:$0xf0]  ;;  %v12461_v53 = vor.u32 %v14011_v10, %v12460_v8  ;;  %v12748_v29 = vld [vmem:[%s14941_s16 + $0x410] sm:$0xf] }
 0xafd   : > { %v12557_v15 = vor.u32 %v14035_v21, %v12556_v4  ;;  %v12749_v36 = vor.u32 %v14083_v27, %v12748_v29  ;;  %v14155_v37 = vld [vmem:[%s14941_s16 + $0x658] sm:$0xf0]  ;;  %v12988_v4 = vld [vmem:[%s14941_s16 + $0x5f0] sm:$0xf]  ;;  %v12521_v29 = vor.u32 %v14026_v49, %v12520_v33  ;;  %v12712_v27 = vld [vmem:[%s14941_s16 + $0x3c8] sm:$0xf] }
 0xafe   : > { %9429 = vmatpush.bf16.msra.mxu3 %v12641_v57  ;;  %v12568_v57 = vld [vmem:[%s14941_s16 + $0x2a8] sm:$0xf]  ;;  %v14143_v21 = vld [vmem:[%s14941_s16 + $0x5f8] sm:$0xf0] }
 0xaff   : > { %9397 = vmatpush.bf16.msra.mxu1 %v12497_v42  ;;  %9390 = vmatmul.bf16.vlgmr.msra.gmra.mxu0 %v17272_v34  ;;  %v12773_v34 = vor.u32 %v14089_v56, %v12772_v25  ;;  %v12569_v30 = vor.u32 %v14038_v60, %v12568_v57  ;;  %v14032_v42 = vld [vmem:[%s14941_s16 + $0x280] sm:$0xf0]  ;;  %v13037_v25 = vor.u32 %v14155_v37, %v13036_v0  ;;  %v12724_v57 = vld [vmem:[%s14941_s16 + $0x3e0] sm:$0xf]  ;;  %v14077_v60 = vld [vmem:[%s14941_s16 + $0x3e8] sm:$0xf0] }
 0xb00   : > { %9438 = vmatpush.bf16.msrb.mxu0 %v12797_v40  ;;  %9411 = vmatpush.bf16.msrb.mxu2 %v12593_v50  ;;  %v12544_v40 = vld [vmem:[%s14941_s16 + $0x278] sm:$0xf]  ;;  %v12449_v50 = vor.u32 %v14008_v48, %v12448_v45  ;;  %v12737_v56 = vor.u32 %v14080_v11, %v12736_v61  ;;  %v14074_v45 = vld [vmem:[%s14941_s16 + $0x3d0] sm:$0xf0]  ;;  %v13180_v48 = vld [vmem:[%s14941_s16 + $0x770] sm:$0xf] }
 0xb01   : > { %v12545_v28 = vor.u32 %v14032_v42, %v12544_v40  ;;  %v12989_v40 = vor.u32 %v14143_v21, %v12988_v4  ;;  %v14191_v42 = vld [vmem:[%s14941_s16 + $0x778] sm:$0xf0]  ;;  %v14140_v0 = vld [vmem:[%s14941_s16 + $0x5e0] sm:$0xf0]  ;;  %v12713_v37 = vor.u32 %v14074_v45, %v12712_v27  ;;  %v13000_v61 = vld [vmem:[%s14941_s16 + $0x608] sm:$0xf] }
 0xb02   : > { %9430 = vmatpush.bf16.msra.mxu3 %v12629_v18  ;;  %v14158_v18 = vld [vmem:[%s14941_s16 + $0x670] sm:$0xf0]  ;;  %v13181_v11 = vor.u32 %v14191_v42, %v13180_v48  ;;  %v13144_v49 = vld [vmem:[%s14941_s16 + $0x728] sm:$0xf]  ;;  %v12940_v21 = vld [vmem:[%s14941_s16 + $0x590] sm:$0xf] }
 0xb03   : > { %9398 = vmatpush.bf16.msra.mxu1 %v12485_v38  ;;  %v9127_v38 = vpop.f32.mrf.mxu1  ;;  %v14128_v27 = vld [vmem:[%s14941_s16 + $0x580] sm:$0xf0] }
 0xb04   : > { %9439 = vmatpush.bf16.msrb.mxu0 %v12785_v51  ;;  %9412 = vmatpush.bf16.msrb.mxu2 %v12581_v3  ;;  %v14005_v51 = vld [vmem:[%s14941_s16 + $0x1a8] sm:$0xf0]  ;;  %v13024_v3 = vld [vmem:[%s14941_s16 + $0x638] sm:$0xf] }
 0xb05   : > { %v13025_v10 = vor.u32 %v14152_v62, %v13024_v3 }
 0xb06   : > { %9431 = vmatpush.bf16.msra.mxu3 %v12617_v23  ;;  %v17912_v23 = vadd.f32 %v9153_v24, %v17834_v59  ;;  %v9141_v59 = vpop.f32.mrf.mxu2 }
 0xb07   : > { %9399 = vmatpush.bf16.msra.mxu1 %v12473_v7  ;;  %v12424_v7 = vld [vmem:[%s14941_s16 + $0x188] sm:$0xf] }
 0xb08   : > { %9440 = vmatpush.bf16.msrb.mxu0 %v12773_v34  ;;  %9413 = vmatpush.bf16.msrb.mxu2 %v12569_v30  ;;  %v12533_v34 = vor.u32 %v14029_v41, %v12532_v16  ;;  %v12892_v30 = vld [vmem:[%s14941_s16 + $0x530] sm:$0xf]  ;;  %v14188_v16 = vld [vmem:[%s14941_s16 + $0x760] sm:$0xf0]  ;;  %v12868_v41 = vld [vmem:[%s14941_s16 + $0x500] sm:$0xf] }
 0xb09   : > { %9432 = vmatmul.bf16.vlgmr.msra.gmra.mxu3 %v17416_v9  ;;  %v13048_v9 = vld [vmem:[%s14941_s16 + $0x668] sm:$0xf] }
 0xb0a   : > { %9480 = vmatpush.bf16.msrb.mxu3 %v13085_v32  ;;  %v13049_v2 = vor.u32 %v14158_v18, %v13048_v9  ;;  %v12436_v32 = vld [vmem:[%s14941_s16 + $0x1a0] sm:$0xf]  ;;  %v14149_v9 = vld [vmem:[%s14941_s16 + $0x628] sm:$0xf0] }
 0xb0b   : > { %9400 = vmatpush.bf16.msra.mxu1 %v12461_v53  ;;  %v12437_v1 = vor.u32 %v14005_v51, %v12436_v32  ;;  %v13012_v53 = vld [vmem:[%s14941_s16 + $0x620] sm:$0xf]  ;;  %v13168_v51 = vld [vmem:[%s14941_s16 + $0x758] sm:$0xf] }
 0xb0c   : > { %9441 = vmatpush.bf16.msrb.mxu0 %v12761_v54  ;;  %9414 = vmatpush.bf16.msrb.mxu2 %v12557_v15  ;;  %v12425_v54 = vor.u32 %v14002_v39, %v12424_v7  ;;  %v12893_v15 = vor.u32 %v14119_v19, %v12892_v30  ;;  %v13013_v24 = vor.u32 %v14149_v9, %v13012_v53  ;;  %v12952_v7 = vld [vmem:[%s14941_s16 + $0x5a8] sm:$0xf]  ;;  %v14179_v9 = vld [vmem:[%s14941_s16 + $0x718] sm:$0xf0] }
 0xb0e   : > { %9481 = vmatpush.bf16.msrb.mxu3 %v13073_v46  ;;  %v9128_v46 = vadd.f32 %v9127_v38, %v17814_v47  ;;  %v12725_v47 = vor.u32 %v14077_v60, %v12724_v57  ;;  %v13156_v57 = vld [vmem:[%s14941_s16 + $0x740] sm:$0xf] }
 0xb0f   : > { %9401 = vmatpush.bf16.msra.mxu1 %v12449_v50  ;;  %v12976_v50 = vld [vmem:[%s14941_s16 + $0x5d8] sm:$0xf] }
 0xb10   : > { %9442 = vmatpush.bf16.msrb.mxu0 %v12749_v36  ;;  %9415 = vmatpush.bf16.msrb.mxu2 %v12545_v28  ;;  %v9142_v8 = vadd.f32 %v9141_v59, %v9128_v46  ;;  %v14116_v36 = vld [vmem:[%s14941_s16 + $0x520] sm:$0xf0]  ;;  %v14146_v28 = vld [vmem:[%s14941_s16 + $0x610] sm:$0xf0]  ;;  %v12977_v38 = vor.u32 %v14140_v0, %v12976_v50  ;;  %v12964_v59 = vld [vmem:[%s14941_s16 + $0x5c0] sm:$0xf] }
 0xb11   : > { %v13001_v3 = vor.u32 %v14146_v28, %v13000_v61  ;;  %v14185_v46 = vld [vmem:[%s14941_s16 + $0x748] sm:$0xf0]  ;;  %v9167_v30 = vpop.f32.mrf.mxu0 }
 0xb12   : > { %9482 = vmatpush.bf16.msrb.mxu3 %v13061_v14  ;;  %v9155_v14 = vpop.f32.mrf.mxu3  ;;  %v13157_v39 = vor.u32 %v14185_v46, %v13156_v57  ;;  %v17967_v4 = vadd.f32 %v9167_v30, %v17912_v23  ;;  %v12928_v23 = vld [vmem:[%s14941_s16 + $0x578] sm:$0xf]  ;;  %v14101_v50 = vld [vmem:[%s14941_s16 + $0x4a8] sm:$0xf0] }
 0xb13   : > { %9402 = vmatpush.bf16.msra.mxu1 %v12437_v1  ;;  %v17934_v18 = vadd.f32 %v9155_v14, %v9142_v8  ;;  %v13169_v1 = vor.u32 %v14188_v16, %v13168_v51  ;;  %v12844_v8 = vld [vmem:[%s14941_s16 + $0x4d0] sm:$0xf]  ;;  %v14125_v61 = vld [vmem:[%s14941_s16 + $0x568] sm:$0xf0]  ;;  %v12808_v16 = vld [vmem:[%s14941_s16 + $0x488] sm:$0xf] }
 0xb14   : > { %9443 = vmatpush.bf16.msrb.mxu0 %v12737_v56  ;;  %9416 = vmatpush.bf16.msrb.mxu2 %v12533_v34  ;;  %v14137_v56 = vld [vmem:[%s14941_s16 + $0x5c8] sm:$0xf0]  ;;  %v12856_v34 = vld [vmem:[%s14941_s16 + $0x4e8] sm:$0xf] }
 0xb15   : > { %v12965_v60 = vor.u32 %v14137_v56, %v12964_v59  ;;  %v14173_v51 = vld [vmem:[%s14941_s16 + $0x6e8] sm:$0xf0]  ;;  %v14215_v59 = vld [vmem:[%s14941_s16 + $0x838] sm:$0xf0]  ;;  %v13372_v56 = vld [vmem:[%s14941_s16 + $0x8f0] sm:$0xf] }
 0xb16   : > { %9483 = vmatpush.bf16.msrb.mxu3 %v13049_v2  ;;  %v12880_v2 = vld [vmem:[%s14941_s16 + $0x518] sm:$0xf] }
 0xb17   : > { %9403 = vmatpush.bf16.msra.mxu1 %v12425_v54  ;;  %v12881_v32 = vor.u32 %v14116_v36, %v12880_v2  ;;  %v13132_v54 = vld [vmem:[%s14941_s16 + $0x710] sm:$0xf]  ;;  %v12929_v2 = vor.u32 %v14128_v27, %v12928_v23  ;;  %v14176_v36 = vld [vmem:[%s14941_s16 + $0x700] sm:$0xf0] }
 0xb18   : > { %9444 = vmatpush.bf16.msrb.mxu0 %v12725_v47  ;;  %9417 = vmatpush.bf16.msrb.mxu2 %v12521_v29  ;;  %v14131_v47 = vld [vmem:[%s14941_s16 + $0x598] sm:$0xf0]  ;;  %v12832_v29 = vld [vmem:[%s14941_s16 + $0x4b8] sm:$0xf]  ;;  %v13133_v45 = vor.u32 %v14179_v9, %v13132_v54  ;;  %v13240_v54 = vld [vmem:[%s14941_s16 + $0x7e8] sm:$0xf] }
 0xb19   : > { %v12941_v53 = vor.u32 %v14131_v47, %v12940_v21  ;;  %v9169_v42 = vpop.f32.mrf.mxu0  ;;  %v13348_v21 = vld [vmem:[%s14941_s16 + $0x8c0] sm:$0xf]  ;;  %v14233_v47 = vld [vmem:[%s14941_s16 + $0x8c8] sm:$0xf0]  ;;  %v13336_v9 = vld [vmem:[%s14941_s16 + $0x8a8] sm:$0xf] }
 0xb1a   : > { %9484 = vmatpush.bf16.msrb.mxu3 %v13037_v25  ;;  %v14113_v25 = vld [vmem:[%s14941_s16 + $0x508] sm:$0xf0]  ;;  %9404 = vmatmul.bf16.vlgmr.msra.gmra.mxu1 %v17279_v55  ;;  %v14110_v55 = vld [vmem:[%s14941_s16 + $0x4f0] sm:$0xf0]  ;;  %v17982_v0 = vadd.f32 %v9169_v42, %v17934_v18  ;;  %v13228_v27 = vld [vmem:[%s14941_s16 + $0x7d0] sm:$0xf] }
 0xb1b   : > { %9452 = vmatpush.bf16.msrb.mxu1 %v12893_v15  ;;  %9418 = vmatmul.bf16.vlgmr.msrb.gmra.mxu2 %v17284_v20  ;;  %v12869_v62 = vor.u32 %v14113_v25, %v12868_v41  ;;  %v14134_v20 = vld [vmem:[%s14941_s16 + $0x5b0] sm:$0xf0]  ;;  %v12857_v33 = vor.u32 %v14110_v55, %v12856_v34  ;;  %v14104_v15 = vld [vmem:[%s14941_s16 + $0x4c0] sm:$0xf0]  ;;  %v12904_v25 = vld [vmem:[%s14941_s16 + $0x548] sm:$0xf] }
 0xb1c   : > { %9466 = vmatpush.bf16.msra.mxu2 %v12989_v40  ;;  %9445 = vmatpush.bf16.msrb.mxu0 %v12713_v37  ;;  %v12953_v19 = vor.u32 %v14134_v20, %v12952_v7  ;;  %v12833_v48 = vor.u32 %v14104_v15, %v12832_v29  ;;  %v13120_v40 = vld [vmem:[%s14941_s16 + $0x6f8] sm:$0xf]  ;;  %v12916_v37 = vld [vmem:[%s14941_s16 + $0x560] sm:$0xf]  ;;  %v14098_v41 = vld [vmem:[%s14941_s16 + $0x490] sm:$0xf0] }
 0xb1d   : > { %v13121_v28 = vor.u32 %v14176_v36, %v13120_v40  ;;  %v14122_v18 = vld [vmem:[%s14941_s16 + $0x550] sm:$0xf0]  ;;  %v12809_v57 = vor.u32 %v14098_v41, %v12808_v16  ;;  %v13096_v34 = vld [vmem:[%s14941_s16 + $0x6c8] sm:$0xf]  ;;  %v13264_v20 = vld [vmem:[%s14941_s16 + $0x818] sm:$0xf] }
 0xb1e   : > { %9485 = vmatpush.bf16.msrb.mxu3 %v13025_v10  ;;  %v14107_v10 = vld [vmem:[%s14941_s16 + $0x4d8] sm:$0xf0]  ;;  %v14170_v55 = vld [vmem:[%s14941_s16 + $0x6d0] sm:$0xf0]  ;;  %v14200_v36 = vld [vmem:[%s14941_s16 + $0x7c0] sm:$0xf0] }
 0xb1f   : > { %9453 = vmatpush.bf16.msrb.mxu1 %v12881_v32  ;;  %9446 = vmatmul.bf16.vlgmr.msrb.gmra.mxu0 %v17422_v6  ;;  %v14182_v6 = vld [vmem:[%s14941_s16 + $0x730] sm:$0xf0]  ;;  %v12845_v14 = vor.u32 %v14107_v10, %v12844_v8  ;;  %v13108_v32 = vld [vmem:[%s14941_s16 + $0x6e0] sm:$0xf]  ;;  %v13097_v30 = vor.u32 %v14170_v55, %v13096_v34  ;;  %v14209_v10 = vld [vmem:[%s14941_s16 + $0x808] sm:$0xf0] }
 0xb20   : > { %9494 = vmatpush.bf16.msra.mxu0 %v13181_v11  ;;  %9467 = vmatpush.bf16.msra.mxu2 %v12977_v38  ;;  %v12917_v38 = vor.u32 %v14125_v61, %v12916_v37  ;;  %v13252_v8 = vld [vmem:[%s14941_s16 + $0x800] sm:$0xf]  ;;  %v14227_v40 = vld [vmem:[%s14941_s16 + $0x898] sm:$0xf0]  ;;  %v14221_v41 = vld [vmem:[%s14941_s16 + $0x868] sm:$0xf0] }
 0xb21   : > { %v13300_v16 = vld [vmem:[%s14941_s16 + $0x860] sm:$0xf] }
 0xb22   : > { %9486 = vmatpush.bf16.msrb.mxu3 %v13013_v24  ;;  %v12820_v24 = vld [vmem:[%s14941_s16 + $0x4a0] sm:$0xf]  ;;  %v9223_v34 = vpop.f32.mrf.mxu0 }
 0xb23   : > { %9454 = vmatpush.bf16.msrb.mxu1 %v12869_v62  ;;  %v12821_v11 = vor.u32 %v14101_v50, %v12820_v24  ;;  %v13109_v62 = vor.u32 %v14173_v51, %v13108_v32  ;;  %v13312_v24 = vld [vmem:[%s14941_s16 + $0x878] sm:$0xf]  ;;  %v14224_v50 = vld [vmem:[%s14941_s16 + $0x880] sm:$0xf0]  ;;  %v13204_v51 = vld [vmem:[%s14941_s16 + $0x7a0] sm:$0xf] }
 0xb24   : > { %9495 = vmatpush.bf16.msra.mxu0 %v13169_v1  ;;  %9468 = vmatpush.bf16.msra.mxu2 %v12965_v60  ;;  %v14239_v1 = vld [vmem:[%s14941_s16 + $0x8f8] sm:$0xf0]  ;;  %v12905_v60 = vor.u32 %v14122_v18, %v12904_v25  ;;  %v13313_v32 = vor.u32 %v14224_v50, %v13312_v24  ;;  %v13301_v18 = vor.u32 %v14221_v41, %v13300_v16 }
 0xb25   : > { %v13373_v7 = vor.u32 %v14239_v1, %v13372_v56  ;;  %v13288_v56 = vld [vmem:[%s14941_s16 + $0x848] sm:$0xf]  ;;  %v14218_v1 = vld [vmem:[%s14941_s16 + $0x850] sm:$0xf0] }
 0xb26   : > { %9487 = vmatpush.bf16.msrb.mxu3 %v13001_v3  ;;  %v13276_v3 = vld [vmem:[%s14941_s16 + $0x830] sm:$0xf] }
 0xb27   : > { %9455 = vmatpush.bf16.msrb.mxu1 %v12857_v33  ;;  %v13277_v46 = vor.u32 %v14215_v59, %v13276_v3  ;;  %v13360_v33 = vld [vmem:[%s14941_s16 + $0x8d8] sm:$0xf]  ;;  %v13192_v3 = vld [vmem:[%s14941_s16 + $0x788] sm:$0xf]  ;;  %v14194_v59 = vld [vmem:[%s14941_s16 + $0x790] sm:$0xf0] }
 0xb28   : > { %9496 = vmatpush.bf16.msra.mxu0 %v13157_v39  ;;  %9469 = vmatpush.bf16.msra.mxu2 %v12953_v19  ;;  %v14212_v39 = vld [vmem:[%s14941_s16 + $0x820] sm:$0xf0] }
 0xb29   : > { %9488 = vmatmul.bf16.vlgmr.msrb.gmra.mxu3 %v17562_v52  ;;  %v13145_v52 = vor.u32 %v14182_v6, %v13144_v49  ;;  %v14236_v49 = vld [vmem:[%s14941_s16 + $0x8e0] sm:$0xf0]  ;;  %v13265_v19 = vor.u32 %v14212_v39, %v13264_v20 }
 0xb2a   : > { %v13361_v6 = vor.u32 %v14236_v49, %v13360_v33  ;;  %v9225_v39 = vpop.f32.mrf.mxu0 }
 0xb2b   : > { %9456 = vmatpush.bf16.msrb.mxu1 %v12845_v14  ;;  %v13349_v14 = vor.u32 %v14233_v47, %v13348_v21 }
 0xb2c   : > { %9497 = vmatpush.bf16.msra.mxu0 %v13145_v52  ;;  %9470 = vmatpush.bf16.msra.mxu2 %v12941_v53  ;;  %v13253_v52 = vor.u32 %v14209_v10, %v13252_v8  ;;  %v14206_v53 = vld [vmem:[%s14941_s16 + $0x7f0] sm:$0xf0] }
 0xb2d   : > { %v9181_v29 = vpop.f32.mrf.mxu1 }
 0xb2e   : > { %v9182_v15 = vadd.f32 %v9181_v29, %v17967_v4 }
 0xb2f   : > { %9457 = vmatpush.bf16.msrb.mxu1 %v12833_v48  ;;  %v13324_v48 = vld [vmem:[%s14941_s16 + $0x890] sm:$0xf] }
 0xb30   : > { %9498 = vmatpush.bf16.msra.mxu0 %v13133_v45  ;;  %9471 = vmatpush.bf16.msra.mxu2 %v12929_v2  ;;  %v14203_v45 = vld [vmem:[%s14941_s16 + $0x7d8] sm:$0xf0]  ;;  %v13325_v42 = vor.u32 %v14227_v40, %v13324_v48  ;;  %v13216_v2 = vld [vmem:[%s14941_s16 + $0x7b8] sm:$0xf] }
 0xb33   : > { %9458 = vmatpush.bf16.msrb.mxu1 %v12821_v11 }
 0xb34   : > { %9499 = vmatpush.bf16.msra.mxu0 %v13121_v28  ;;  %9472 = vmatpush.bf16.msra.mxu2 %v12917_v38  ;;  %v13217_v28 = vor.u32 %v14200_v36, %v13216_v2  ;;  %v14197_v38 = vld [vmem:[%s14941_s16 + $0x7a8] sm:$0xf0] }
 0xb35   : > { %v9183_v61 = vpop.f32.mrf.mxu1  ;;  %v13205_v25 = vor.u32 %v14197_v38, %v13204_v51 }
 0xb36   : > { %v9184_v11 = vadd.f32 %v9183_v61, %v17982_v0  ;;  %v13289_v0 = vor.u32 %v14218_v1, %v13288_v56 }
 0xb37   : > { %9459 = vmatpush.bf16.msrb.mxu1 %v12809_v57  ;;  %v13193_v57 = vor.u32 %v14194_v59, %v13192_v3 }
 0xb38   : > { %9500 = vmatpush.bf16.msra.mxu0 %v13109_v62  ;;  %9473 = vmatpush.bf16.msra.mxu2 %v12905_v60 }
 0xb3a   : > { %9460 = vmatmul.bf16.vlgmr.msrb.gmra.mxu1 %v17456_v44  ;;  %v14230_v44 = vld [vmem:[%s14941_s16 + $0x8b0] sm:$0xf0] }
 0xb3b   : > { %9508 = vmatpush.bf16.msra.mxu1 %v13277_v46  ;;  %9474 = vmatmul.bf16.vlgmr.msra.gmra.mxu2 %v17461_v58  ;;  %v13241_v58 = vor.u32 %v14206_v53, %v13240_v54  ;;  %v13337_v23 = vor.u32 %v14230_v44, %v13336_v9  ;;  %v9209_v46 = vpop.f32.mrf.mxu3 }
 0xb3c   : > { %9522 = vmatpush.bf16.msrb.mxu2 %v13373_v7  ;;  %9501 = vmatpush.bf16.msra.mxu0 %v13097_v30 }
 0xb3d   : > { %v9195_v37 = vpop.f32.mrf.mxu2  ;;  %v9237_v55 = vpop.f32.mrf.mxu1 }
 0xb3e   : > { %v18022_v4 = vadd.f32 %v9195_v37, %v9182_v15 }
 0xb3f   : > { %9509 = vmatpush.bf16.msra.mxu1 %v13265_v19  ;;  %9502 = vmatmul.bf16.vlgmr.msra.gmra.mxu0 %v17649_v13  ;;  %v13229_v13 = vor.u32 %v14203_v45, %v13228_v27  ;;  %v9279_v19 = vpop.f32.mrf.mxu0  ;;  %v14532_v27 = vld [vmem:[%s14977_s5] sm:$0x7] }
 0xb40   : > { %9523 = vmatpush.bf16.msrb.mxu2 %v13361_v6  ;;  %v7491_v45 = vperm.slane %v14532_v27, 1  ;;  %v7492_v2 = vperm.slane %v14532_v27, 2 }
 0xb43   : > { %9510 = vmatpush.bf16.msra.mxu1 %v13253_v52  ;;  %v9211_v7 = vpop.f32.mrf.mxu3 }
 0xb44   : > { %9524 = vmatpush.bf16.msrb.mxu2 %v13349_v14 }
 0xb45   : > { %v9197_v62 = vpop.f32.mrf.mxu2  ;;  %v9239_v33 = vpop.f32.mrf.mxu1 }
 0xb46   : > { %v18033_v60 = vadd.f32 %v9197_v62, %v9184_v11  ;;  %v9212_v11 = vadd.f32 %v9211_v7, %v7491_v45 }
 0xb47   : > { %9511 = vmatpush.bf16.msra.mxu1 %v13241_v58  ;;  %v9281_v21 = vpop.f32.mrf.mxu0 }
 0xb48   : > { %9525 = vmatpush.bf16.msrb.mxu2 %v13337_v23  ;;  %v9226_v38 = vadd.f32 %v9225_v39, %v9212_v11 }
 0xb4a   : > { %v9240_v3 = vadd.f32 %v9239_v33, %v9226_v38 }
 0xb4b   : > { %9512 = vmatpush.bf16.msra.mxu1 %v13229_v13  ;;  %v9265_v49 = vpop.f32.mrf.mxu3  ;;  %v9210_v13 = vadd.f32 %v9209_v46, %v7491_v45 }
 0xb4c   : > { %9526 = vmatpush.bf16.msrb.mxu2 %v13325_v42 }
 0xb4d   : > { %v9251_v20 = vpop.f32.mrf.mxu2  ;;  %v9224_v42 = vadd.f32 %v9223_v34, %v9210_v13 }
 0xb4f   : > { %9513 = vmatpush.bf16.msra.mxu1 %v13217_v28  ;;  %v9238_v50 = vadd.f32 %v9237_v55, %v9224_v42 }
 0xb50   : > { %9527 = vmatpush.bf16.msrb.mxu2 %v13313_v32 }
 0xb51   : > { %v9252_v37 = vadd.f32 %v9251_v20, %v9238_v50 }
 0xb53   : > { %9514 = vmatpush.bf16.msra.mxu1 %v13205_v25  ;;  %v9267_v8 = vpop.f32.mrf.mxu3  ;;  %v9266_v16 = vadd.f32 %v9265_v49, %v9252_v37 }
 0xb54   : > { %9528 = vmatpush.bf16.msrb.mxu2 %v13301_v18  ;;  %v9293_v6 = vpop.f32.mrf.mxu1 }
 0xb55   : > { %v9253_v30 = vpop.f32.mrf.mxu2  ;;  %v9280_v1 = vadd.f32 %v9279_v19, %v9266_v16 }
 0xb56   : > { %v9254_v56 = vadd.f32 %v9253_v30, %v9240_v3 }
 0xb57   : > { %9515 = vmatpush.bf16.msra.mxu1 %v13193_v57  ;;  %v9294_v57 = vadd.f32 %v9293_v6, %v9280_v1 }
 0xb58   : > { %9529 = vmatpush.bf16.msrb.mxu2 %v13289_v0  ;;  %v9268_v20 = vadd.f32 %v9267_v8, %v9254_v56 }
 0xb5a   : > { %9516 = vmatmul.bf16.vlgmr.msra.gmra.mxu1 %v17712_v63  ;;  %v9282_v45 = vadd.f32 %v9281_v21, %v9268_v20 }
 0xb5b   : > { %9530 = vmatmul.bf16.vlgmr.msrb.gmra.mxu2 %v17717_v26  ;;  %v9321_v52 = vpop.f32.mrf.mxu3 }
 0xb5c   : > { %v9295_v47 = vpop.f32.mrf.mxu1  ;;  %v9335_v14 = vpop.f32.mrf.mxu0 }
 0xb5d   : > { %v9307_v10 = vpop.f32.mrf.mxu2  ;;  %v9296_v33 = vadd.f32 %v9295_v47, %v9282_v45 }
 0xb63   : > { %v9323_v54 = vpop.f32.mrf.mxu3 }
 0xb64   : > { %v18037_v9 = vpop.f32.mrf.mxu0 }
 0xb65   : > { %v9309_v63 = vpop.f32.mrf.mxu2 }
 0xb6c   : > { %v9377_v29 = vpop.f32.mrf.mxu3 }
 0xb6d   : > { %v9378_v61 = vadd.f32 %v9377_v29, %v7492_v2  ;;  %v9308_v29 = vadd.f32 %v9307_v10, %v9294_v57 }
 0xb74   : > { %v9379_v48 = vpop.f32.mrf.mxu3 }
 0xb75   : > { %v9380_v62 = vadd.f32 %v9379_v48, %v7492_v2  ;;  %v9310_v48 = vadd.f32 %v9309_v63, %v9296_v33  ;;  %v9536_v63 = vadd.f32 %v18022_v4, %v16518_v43  ;;  %v9539_v43 = vadd.f32 %v18033_v60, %v16527_v5 }
 0xb77   : > { %v9349_v26 = vpop.f32.mrf.mxu1 }
 0xb7c   : > { %v9391_v15 = vpop.f32.mrf.mxu0 }
 0xb7d   : > { %v9392_v32 = vadd.f32 %v9391_v15, %v9378_v61 }
 0xb7f   : > { %v9363_v53 = vpop.f32.mrf.mxu2  ;;  %v18039_v44 = vpop.f32.mrf.mxu1 }
 0xb84   : > { %v9393_v36 = vpop.f32.mrf.mxu0 }
 0xb85   : > { %v9394_v0 = vadd.f32 %v9393_v36, %v9380_v62 }
 0xb87   : > { %v18041_v58 = vpop.f32.mrf.mxu2 }
 0xb8c   : > { %v9433_v28 = vpop.f32.mrf.mxu3 }
 0xb94   : > { %v9435_v34 = vpop.f32.mrf.mxu3 }
 0xb97   : > { %v9405_v23 = vpop.f32.mrf.mxu1 }
 0xb98   : > { %v9406_v41 = vadd.f32 %v9405_v23, %v9392_v32  ;;  %v9322_v23 = vadd.f32 %v9321_v52, %v9308_v29 }
 0xb9a   : > { %v9336_v6 = vadd.f32 %v9335_v14, %v9322_v23 }
 0xb9c   : > { %v9447_v25 = vpop.f32.mrf.mxu0  ;;  %v9350_v2 = vadd.f32 %v9349_v26, %v9336_v6 }
 0xb9e   : > { %v9419_v40 = vpop.f32.mrf.mxu2  ;;  %v9364_v37 = vadd.f32 %v9363_v53, %v9350_v2 }
 0xb9f   : > { %v9407_v24 = vpop.f32.mrf.mxu1  ;;  %v9420_v59 = vadd.f32 %v9419_v40, %v9406_v41 }
 0xba0   : > { %v9408_v7 = vadd.f32 %v9407_v24, %v9394_v0  ;;  %v9324_v24 = vadd.f32 %v9323_v54, %v9310_v48  ;;  %v9537_v21 = vadd.f32 %v9364_v37, %v16520_v22 }
 0xba1   : > { %v9434_v46 = vadd.f32 %v9433_v28, %v9420_v59 }
 0xba2   : > { %v9338_v47 = vadd.f32 %v18037_v9, %v9324_v24  ;;  %v9544_v16 = vadd.f32 %v9537_v21, %v9536_v63 }
 0xba3   : > { %v9448_v27 = vadd.f32 %v9447_v25, %v9434_v46 }
 0xba4   : > { %v9449_v39 = vpop.f32.mrf.mxu0  ;;  %v9352_v14 = vadd.f32 %v18039_v44, %v9338_v47 }
 0xba6   : > { %v9421_v51 = vpop.f32.mrf.mxu2  ;;  %v9366_v54 = vadd.f32 %v18041_v58, %v9352_v14 }
 0xba7   : > { %v9422_v15 = vadd.f32 %v9421_v51, %v9408_v7 }
 0xba8   : > { %v9540_v9 = vadd.f32 %v9366_v54, %v16529_v17 }
 0xba9   : > { %v9436_v40 = vadd.f32 %v9435_v34, %v9422_v15 }
 0xbaa   : > { %v9548_v56 = vadd.f32 %v9540_v9, %v9539_v43 }
 0xbab   : > { %v9450_v50 = vadd.f32 %v9449_v39, %v9436_v40 }
 0xbac   : > { %v9489_v19 = vpop.f32.mrf.mxu3 }
 0xbb4   : > { %v9491_v32 = vpop.f32.mrf.mxu3 }
 0xbb7   : > { %v9461_v18 = vpop.f32.mrf.mxu1 }
 0xbb8   : > { %v9462_v13 = vadd.f32 %v9461_v18, %v9448_v27 }
 0xbbc   : > { %v9503_v8 = vpop.f32.mrf.mxu0 }
 0xbbe   : > { %v9475_v55 = vpop.f32.mrf.mxu2 }
 0xbbf   : > { %v9463_v49 = vpop.f32.mrf.mxu1  ;;  %v9476_v30 = vadd.f32 %v9475_v55, %v9462_v13 }
 0xbc0   : > { %v9464_v61 = vadd.f32 %v9463_v49, %v9450_v50 }
 0xbc1   : > { %v9490_v36 = vadd.f32 %v9489_v19, %v9476_v30 }
 0xbc3   : > { %v9504_v11 = vadd.f32 %v9503_v8, %v9490_v36  ;;  %v9542_v36 = vld [vmem:[%s783_s10] sm:$0x7] }
 0xbc4   : > { %v9505_v41 = vpop.f32.mrf.mxu0  ;;  %v9605_v37 = vperm.slane %v9542_v36, 0 }
 0xbc6   : > { %v9477_v42 = vpop.f32.mrf.mxu2 }
 0xbc7   : > { %v9478_v28 = vadd.f32 %v9477_v42, %v9464_v61  ;;  %v9606_v61 = vperm.slane %v9542_v36, 1 }
 0xbc9   : > { %v9492_v26 = vadd.f32 %v9491_v32, %v9478_v28  ;;  %v9607_v28 = vperm.slane %v9542_v36, 2 }
 0xbcb   : > { %v9506_v22 = vadd.f32 %v9505_v41, %v9492_v26 }
 0xbd7   : > { %v9517_v10 = vpop.f32.mrf.mxu1 }
 0xbd8   : > { %v9518_v52 = vadd.f32 %v9517_v10, %v9504_v11  ;;  %v9543_v10 = vld [vmem:[%s787_s12] sm:$0x7] }
 0xbd9   : > { %v9618_v11 = vperm.slane %v9543_v10, 0  ;;  %v9620_v32 = vperm.slane %v9543_v10, 2 }
 0xbde   : > { %v9531_v51 = vpop.f32.mrf.mxu2 }
 0xbdf   : > { %v9532_v38 = vadd.f32 %v9531_v51, %v9518_v52  ;;  %v9519_v25 = vpop.f32.mrf.mxu1 }
 0xbe0   : > { %v9520_v3 = vadd.f32 %v9519_v25, %v9506_v22 }
 0xbe1   : > { %v9538_v53 = vadd.f32 %v9532_v38, %v16525_v35 }
 0xbe3   : > { %v9545_v18 = vadd.f32 %v9544_v16, %v9538_v53 }
 0xbe5   : > { %9546 = vadd.xlane.f32.xlu2 %v9545_v18 }
 0xbe6   : > { %v9533_v59 = vpop.f32.mrf.mxu2 }
 0xbe7   : > { %v9534_v4 = vadd.f32 %v9533_v59, %v9520_v3 }
 0xbe9   : > { %v9541_v44 = vadd.f32 %v9534_v4, %v16531_v12 }
 0xbeb   : > { %v9549_v58 = vadd.f32 %v9548_v56, %v9541_v44 }
 0xbed   : > { %9550 = vadd.xlane.f32.xlu0 %v9549_v58 }
 0xc58   : > { %v9547_v35 = vpop.xlane.xlu2 %9546 }
 0xc59   : > { %v9552_v1 = vmul.f32 %v9547_v35, %v16368_v31 }
 0xc5b   : > { %v9554_v62 = vsub.f32 %v9536_v63, %v9552_v1  ;;  %v9555_v57 = vsub.f32 %v9537_v21, %v9552_v1  ;;  %v9556_v0 = vsub.f32 %v9538_v53, %v9552_v1  ;;  %v9619_v21 = vperm.slane %v9543_v10, 1 }
 0xc5d   : > { %v9560_v46 = vmul.f32 %v9554_v62, %v9554_v62  ;;  %v9561_v17 = vmul.f32 %v9555_v57, %v9555_v57  ;;  %v9562_v34 = vmul.f32 %v9556_v0, %v9556_v0 }
 0xc5f   : > { %v9566_v55 = vadd.f32 %v9561_v17, %v9560_v46 }
 0xc60   : > { %v9551_v20 = vpop.xlane.xlu0 %9550 }
 0xc61   : > { %v9553_v29 = vmul.f32 %v9551_v20, %v16368_v31  ;;  %v9567_v5 = vadd.f32 %v9566_v55, %v9562_v34 }
 0xc63   : > { %v9557_v60 = vsub.f32 %v9539_v43, %v9553_v29  ;;  %v9558_v7 = vsub.f32 %v9540_v9, %v9553_v29  ;;  %v9559_v12 = vsub.f32 %v9541_v44, %v9553_v29  ;;  %9568 = vadd.xlane.f32.xlu1 %v9567_v5 }
 0xc65   : > { %v9563_v15 = vmul.f32 %v9557_v60, %v9557_v60  ;;  %v9564_v27 = vmul.f32 %v9558_v7, %v9558_v7  ;;  %v9565_v39 = vmul.f32 %v9559_v12, %v9559_v12 }
 0xc67   : > { %v9570_v49 = vadd.f32 %v9564_v27, %v9563_v15 }
 0xc69   : > { %v9571_v23 = vadd.f32 %v9570_v49, %v9565_v39 }
 0xc6b   : > { %9572 = vadd.xlane.f32.xlu2 %v9571_v23 }
 0xcd6   : > { %v9569_v45 = vpop.xlane.xlu1 %9568 }
 0xcd7   : > { %v9574_v13 = vmul.f32 %v9569_v45, %v16368_v31 }
 0xcd9   : > { %v9576_v33 = vadd.f32 1e-12, %v9574_v13 }
 0xcdb   : > { %14521 = vrsqrt.f32 %v9576_v33  ;;  %vm9584_vm4 = vweird.f32 %v9576_v33 }
 0xcde   : > { %v9573_v40 = vpop.xlane.xlu2 %9572 }
 0xcdf   : > { %v9575_v30 = vmul.f32 %v9573_v40, %v16368_v31 }
 0xce1   : > { %v14522_v19 = vpop.eup %14521  ;;  %v9577_v48 = vadd.f32 1e-12, %v9575_v30 }
 0xce2   : > { %v9579_v6 = vmul.f32 %v14522_v19, %v9576_v33  ;;  %vm9585_vm3 = vweird.f32 %v14522_v19 }
 0xce3   : > { %14523 = vrsqrt.f32 %v9577_v48  ;;  %vm9586_vm5 = vmor %vm9584_vm4, %vm9585_vm3  ;;  %vm9594_vm7 = vweird.f32 %v9577_v48 }
 0xce4   : > { %v9580_v42 = vmul.f32 %v14522_v19, %v9579_v6 }
 0xce6   : > { %v9581_v2 = vmul.f32 0.5, %v9580_v42 }
 0xce8   : > { %v9582_v50 = vsub.f32 1.5, %v9581_v2 }
 0xce9   : > { %v14524_v8 = vpop.eup %14523 }
 0xcea   : > { %v9583_v31 = vmul.f32 %v14522_v19, %v9582_v50  ;;  %v9589_v24 = vmul.f32 %v14524_v8, %v9577_v48  ;;  %vm9595_vm6 = vweird.f32 %v14524_v8 }
 0xceb   : > { %vm9596_vm8 = vmor %vm9594_vm7, %vm9595_vm6 }
 0xcec   : > { %v9587_v47 = vsel %vm9586_vm5, %v14522_v19, %v9583_v31  ;;  %v9590_v52 = vmul.f32 %v14524_v8, %v9589_v24 }
 0xced   : > { %v9598_v51 = vmul.f32 %v9587_v47, %v9554_v62  ;;  %v9599_v63 = vmul.f32 %v9587_v47, %v9555_v57  ;;  %v9600_v14 = vmul.f32 %v9587_v47, %v9556_v0 }
 0xcee   : > { %v9591_v26 = vmul.f32 0.5, %v9590_v52 }
 0xcef   : > { %v9611_v38 = vmul.f32 %v9605_v37, %v9598_v51  ;;  %v9612_v54 = vmul.f32 %v9606_v61, %v9599_v63  ;;  %v9613_v53 = vmul.f32 %v9607_v28, %v9600_v14 }
 0xcf0   : > { %v9592_v16 = vsub.f32 1.5, %v9591_v26 }
 0xcf1   : > { %v9624_v41 = vadd.f32 %v9618_v11, %v9611_v38  ;;  %v9625_v25 = vadd.f32 %v9619_v21, %v9612_v54  ;;  %v9626_v22 = vadd.f32 %v9620_v32, %v9613_v53 }
 0xcf2   : > { %v9593_v18 = vmul.f32 %v14524_v8, %v9592_v16 }
 0xcf3   : > { %9630 = vst [vmem:[%s18159_s1] sm:$0xff] %v9624_v41 }
 0xcf4   : > { %9631 = vst [vmem:[%s18159_s1 + $0x8] sm:$0xff] %v9625_v25  ;;  %v9597_v9 = vsel %vm9596_vm8, %v14524_v8, %v9593_v18 }
 0xcf5   : > { %9632 = vst [vmem:[%s18159_s1 + $0x10] sm:$0xff] %v9626_v22  ;;  %v9601_v3 = vmul.f32 %v9597_v9, %v9557_v60  ;;  %v9602_v59 = vmul.f32 %v9597_v9, %v9558_v7  ;;  %v9603_v43 = vmul.f32 %v9597_v9, %v9559_v12 }
 0xcf7   : > { %v9614_v4 = vmul.f32 %v9605_v37, %v9601_v3  ;;  %v9615_v44 = vmul.f32 %v9606_v61, %v9602_v59  ;;  %v9616_v56 = vmul.f32 %v9607_v28, %v9603_v43 }
 0xcf9   : > { %v9627_v58 = vadd.f32 %v9618_v11, %v9614_v4  ;;  %v9628_v35 = vadd.f32 %v9619_v21, %v9615_v44  ;;  %v9629_v1 = vadd.f32 %v9620_v32, %v9616_v56 }
 0xcfb   : > { %9633 = vst [vmem:[%s18159_s1 + $0x18] sm:$0xff] %v9627_v58 }
 0xcfc   : > { %9634 = vst [vmem:[%s18159_s1 + $0x20] sm:$0xff] %v9628_v35 }
 0xcfd   : > { %9635 = vst [vmem:[%s18159_s1 + $0x28] sm:$0xff] %v9629_v1 }
 0xcfe PF: > { %s18165_s24 = sld [smem:[#allocation14_spill]]  ;;  %s18168_s21 = smov %s14687_s22 }
 0xcff   : > { %s18166_s27 = sld [smem:[#allocation13_spill]] }
 0xd00   : > { %s18167_s23 = sld [smem:[#allocation15_spill]] }
 0xd04   : > { %p32_p10 = scmp.ge.s32.totalorder %s18165_s24, 14  }
 0xd05   : > { %s18169_s22 = smov %s18166_s27 }
 0xd06   :  { %34 = sbr.rel (!%p32_p10) target bundleno = 21 (0x15), region = 185 }
 0xd0b   :  { %9647 = vsyncpa [#allocation4], 1 }
 0xd0c   :  { %9649 = vsyncpa [#allocation4 + $0x1], 1 }
 0xd0d   :  { %9650 = vsyncpa [#allocation6], 1 }
 0xd0e   :  { %9652 = vsyncpa [#allocation6 + $0x1], 1 }
 0xd0f   :  { %9653 = vsyncpa [#allocation9], 1 }
 0xd10   :  { %9655 = vsyncpa [#allocation9 + $0x1], 1 }

</bundles_post_ra>
